<compile_context>
chip_gen: v7x
topology: tpu7x:2x2x1
jax: 0.10.0
libtpu: 0.0.40
codegen_flags: <defaults>
</compile_context>

<pallas_src>
import math

import jax
import jax.numpy as jnp
from jax.experimental import pallas as pl
from jax.experimental.pallas import tpu as pltpu


# ----------------------------------------------------------------------------
# Pallas kernel
# ----------------------------------------------------------------------------
def make_jdefault_kernel(depth):
    """Kernel arg order:
       x, grad_H, W_0..W_{depth-1}, layer_vecs, Wout, bout, Rt, Ct, Cpad, negRpad, out
    """

    def kernel(*refs):
        out_ref = refs[-1]
        x_ref, g_ref = refs[0], refs[1]
        w_refs = refs[2:2 + depth]
        (vecs_ref, wout_ref, bout_ref,
         rt_ref, ct_ref, cpad_ref, nrpad_ref) = refs[2 + depth:-1]

        hp = jax.lax.Precision.HIGHEST

        h = x_ref[...]                                   # (TB, N) f32
        # Hidden MLP layers: Linear -> LayerNorm -> SiLU
        for l in range(depth):
            W = w_refs[l][...]                           # (din, H) bf16
            b = vecs_ref[3 * l + 0:3 * l + 1, :]         # (1, H) f32
            gamma = vecs_ref[3 * l + 1:3 * l + 2, :]     # (1, H) f32
            beta = vecs_ref[3 * l + 2:3 * l + 3, :]      # (1, H) f32

            h = jnp.dot(h.astype(jnp.bfloat16), W,
                        preferred_element_type=jnp.float32) + b
            # Fused LayerNorm statistics: one pass for mean and E[h^2];
            # var = E[h^2] - mu^2 (values are O(1), cancellation benign).
            mu = jnp.mean(h, axis=-1, keepdims=True)
            ex2 = jnp.mean(h * h, axis=-1, keepdims=True)
            var = ex2 - mu * mu
            # gamma folded into the rsqrt scale (one fewer full-width VPU mul)
            scale = gamma * jax.lax.rsqrt(var + 1e-5)
            h = (h - mu) * scale + beta
            h = h * jax.nn.sigmoid(h)                    # SiLU, f32 (EUP)

        # Output projection (single copy of Wout): o[b,p] = M[b,row_p,col_p]
        o = jnp.dot(h.astype(jnp.bfloat16), wout_ref[...],
                    preferred_element_type=jnp.float32) + bout_ref[...]       # (TB, P)

        # gR[b,p] = g[b,row_p], gC[b,p] = g[b,col_p]  (f32, explicit precision)
        g = g_ref[...]
        gR = jnp.dot(g, rt_ref[...], precision=hp,
                     preferred_element_type=jnp.float32)                      # (TB, P)
        gC = jnp.dot(g, ct_ref[...], precision=hp,
                     preferred_element_type=jnp.float32)                      # (TB, P)

        # y[b,i] = sum_j g[b,j] * (M[b,j,i] - M[b,i,j]), lane-padded to 128.
        y = (jnp.dot(o * gR, cpad_ref[...], precision=hp,
                     preferred_element_type=jnp.float32)
             + jnp.dot(o * gC, nrpad_ref[...], precision=hp,
                       preferred_element_type=jnp.float32))                   # (TB, Npad)

        out_ref[...] = y.astype(out_ref.dtype)

    return kernel


# ----------------------------------------------------------------------------
# Wrapper
# ----------------------------------------------------------------------------
def _tc_parallelism():
    """Best-effort number of TensorCores the 'parallel' grid axis can use."""
    try:
        kind = jax.devices()[0].device_kind.lower()
        if ("v7" in kind) or ("v5p" in kind) or ("v4" in kind):
            return 2
    except Exception:
        pass
    return 1


def _pick_tb(B, tb=None):
    """Batch tile: full batch (grid=1) on 1-TC chips, ~B/2 (grid=2) on 2-TC
    chips; capped at 128 so the f32 tail never spills vregs."""
    if tb is None:
        TB = -(-B // _tc_parallelism())
    else:
        TB = tb
    TB = min(TB, 128, B)
    if TB >= B:
        return B                              # full-batch block is always legal
    TB = max(8, ((TB + 7) // 8) * 8)          # sublane multiple when tiled
    return min(TB, B)


def _const_spec(shape, single_buffer):
    """VMEM-resident constant: constant index_map; single-buffered if supported."""
    idx = lambda *_: (0,) * len(shape)
    if single_buffer and hasattr(pl, "Buffered"):
        try:
            return pl.BlockSpec(shape, idx, pipeline_mode=pl.Buffered(1))
        except Exception:
            pass
    return pl.BlockSpec(shape, idx)


def jdefault_forward(x, grad_h, weights, layer_vecs, wout, bout,
                     rt, ct, cpad, nrpad, depth, tb=None):
    """Batched-grid Pallas call; returns (B, N) result."""
    B, N = x.shape
    n_pad = cpad.shape[1]
    P = wout.shape[1]
    H = weights[0].shape[1]

    TB = _pick_tb(B, tb)
    grid = (pl.cdiv(B, TB),)

    const_in = list(weights) + [layer_vecs, wout, bout, rt, ct, cpad, nrpad]

    # Advisory cost estimate so XLA schedules around this call sensibly.
    flops = 2 * B * (N * H + (depth - 1) * H * H + H * P
                     + 2 * N * P + 2 * P * n_pad)
    bytes_accessed = int(sum(int(a.size) * a.dtype.itemsize
                             for a in ([x, grad_h] + const_in)) + B * n_pad * 4)
    cost = pl.CostEstimate(flops=int(flops),
                           transcendentals=int(B * H * depth),
                           bytes_accessed=bytes_accessed)

    def run(single_buffer_consts):
        in_specs = (
            [pl.BlockSpec((TB, N), lambda i: (i, 0)),        # x  (batch-tiled)
             pl.BlockSpec((TB, N), lambda i: (i, 0))]        # grad_H
            + [_const_spec(a.shape, single_buffer_consts) for a in const_in])
        out_spec = pl.BlockSpec((TB, n_pad), lambda i: (i, 0))
        return pl.pallas_call(
            make_jdefault_kernel(depth),
            out_shape=jax.ShapeDtypeStruct((B, n_pad), jnp.float32),
            grid_spec=pltpu.PrefetchScalarGridSpec(
                num_scalar_prefetch=0,
                grid=grid,
                in_specs=in_specs,
                out_specs=out_spec,
            ),
            compiler_params=pltpu.CompilerParams(
                dimension_semantics=("parallel",),
                vmem_limit_bytes=32 * 1024 * 1024),
            cost_estimate=cost,
        )(x, grad_h, *const_in)

    try:
        out_padded = run(True)        # single-buffered resident constants
    except Exception:
        out_padded = run(False)       # fallback: default buffering
    return out_padded[:, :N]


# ----------------------------------------------------------------------------
# Deterministic parameter / constant construction (plain JAX glue)
# ----------------------------------------------------------------------------
def init_params(key, input_dim, hidden_dim, depth):
    """Returns (weights_bf16 list, layer_vecs f32, Wout bf16 (H,P), bout f32 (1,P))."""
    N, H = input_dim, hidden_dim
    P = (N - 1) * N // 2
    weights, vec_rows = [], []
    dims = [(N, H)] + [(H, H)] * (depth - 1)
    for (din, dout) in dims:
        key, k1, k2 = jax.random.split(key, 3)
        W = jax.random.normal(k1, (din, dout), jnp.float32) / math.sqrt(din)
        b = 0.01 * jax.random.normal(k2, (dout,), jnp.float32)
        gamma = jnp.ones((dout,), jnp.float32)   # nn.LayerNorm default weight
        beta = jnp.zeros((dout,), jnp.float32)   # nn.LayerNorm default bias
        weights.append(W.astype(jnp.bfloat16))
        vec_rows += [b, gamma, beta]
    layer_vecs = jnp.stack(vec_rows, axis=0)     # (3*depth, H) f32

    key, k1, k2 = jax.random.split(key, 3)
    Wout = jax.random.normal(k1, (H, P), jnp.float32) / math.sqrt(H)
    bout = 0.01 * jax.random.normal(k2, (P,), jnp.float32)
    return weights, layer_vecs, Wout.astype(jnp.bfloat16), bout[None, :]


def build_selectors(N, n_pad):
    """One-hot selector constants for the strict-upper-triangular VTU order:
       for j in range(N): for i in range(j+1, N) -> M[j, i] = out[p]."""
    rows, cols = [], []
    for j in range(N):
        for i in range(j + 1, N):
            rows.append(j)
            cols.append(i)
    R = jax.nn.one_hot(jnp.array(rows), N, dtype=jnp.float32)   # (P, N)
    C = jax.nn.one_hot(jnp.array(cols), N, dtype=jnp.float32)   # (P, N)
    rt = R.T                                                     # (N, P)
    ct = C.T                                                     # (N, P)
    cpad = jnp.pad(C, ((0, 0), (0, n_pad - N)))                  # (P, n_pad)
    nrpad = jnp.pad(-R, ((0, 0), (0, n_pad - N)))                # (P, n_pad)
    return rt, ct, cpad, nrpad


# ----------------------------------------------------------------------------
# Pure-JAX reference: mirrors the PyTorch forward (scatter-based VTU,
# antisymmetrize, grad_H @ J) with the same bf16 matmul-operand rounding
# and the same (mathematically equivalent) LayerNorm variance formula.
# ----------------------------------------------------------------------------
def reference_forward(x, grad_h, weights, layer_vecs, wout, bout, N, depth):
    h = x
    for l in range(depth):
        W = weights[l]                                  # bf16
        b = layer_vecs[3 * l + 0]
        gamma = layer_vecs[3 * l + 1]
        beta = layer_vecs[3 * l + 2]
        h = jnp.dot(h.astype(jnp.bfloat16), W, preferred_element_type=jnp.float32) + b
        mu = h.mean(-1, keepdims=True)
        ex2 = (h * h).mean(-1, keepdims=True)
        var = ex2 - mu * mu                             # == E[(h-mu)^2] (biased)
        h = (h - mu) * jax.lax.rsqrt(var + 1e-5) * gamma + beta
        h = h * jax.nn.sigmoid(h)
    out = jnp.dot(h.astype(jnp.bfloat16), wout,
                  preferred_element_type=jnp.float32) + bout        # (B, P)

    B = x.shape[0]
    M = jnp.zeros((B, N, N), dtype=out.dtype)
    p = 0
    for j in range(N):
        for i in range(j + 1, N):
            M = M.at[:, j, i].set(out[:, p])
            p += 1
    J = M - jnp.transpose(M, (0, 2, 1))
    return jnp.einsum('bj,bji->bi', grad_h, J)


# ----------------------------------------------------------------------------
if __name__ == "__main__":
    B, N, H, DEPTH = 128, 8, 32, 2          # batch, input_dim, hidden_dim, depth
    N_PAD = 128                             # lane-dense padded output width

    key = jax.random.PRNGKey(0)
    kx, kg, kp = jax.random.split(key, 3)
    x = jax.random.normal(kx, (B, N), jnp.float32)
    grad_h = jax.random.normal(kg, (B, N), jnp.float32)

    weights, layer_vecs, wout, bout = init_params(kp, N, H, DEPTH)
    rt, ct, cpad, nrpad = build_selectors(N, N_PAD)

    # TB is auto-selected: full batch (grid=1) on v5e/v6e, B/2 (grid=2) on 2-TC chips.
    y = jdefault_forward(x, grad_h, weights, layer_vecs, wout, bout,
                         rt, ct, cpad, nrpad, DEPTH)
    y = jax.block_until_ready(y)

    y_ref = reference_forward(x, grad_h, weights, layer_vecs, wout, bout, N, DEPTH)
    assert y.shape == (B, N)
    assert jnp.allclose(y, y_ref, atol=1e-4, rtol=1e-4), (
        f"max abs err {float(jnp.max(jnp.abs(y - y_ref)))}")

    print("KERNEL_OK")
</pallas_src>

<mosaic_0001>
module attributes {stable_mosaic.version = 11 : i64} {
  func.func @kernel(%arg0: i32, %arg1: memref<128x8xf32, #tpu.memory_space<vmem>>, %arg2: memref<128x8xf32, #tpu.memory_space<vmem>>, %arg3: memref<8x32xbf16, #tpu.memory_space<vmem>>, %arg4: memref<32x32xbf16, #tpu.memory_space<vmem>>, %arg5: memref<6x32xf32, #tpu.memory_space<vmem>>, %arg6: memref<32x28xbf16, #tpu.memory_space<vmem>>, %arg7: memref<1x28xf32, #tpu.memory_space<vmem>>, %arg8: memref<8x28xf32, #tpu.memory_space<vmem>>, %arg9: memref<8x28xf32, #tpu.memory_space<vmem>>, %arg10: memref<28x128xf32, #tpu.memory_space<vmem>>, %arg11: memref<28x128xf32, #tpu.memory_space<vmem>>, %arg12: memref<128x128xf32, #tpu.memory_space<vmem>>) attributes {dimension_semantics = [#tpu.dimension_semantics<parallel>], iteration_bounds = array<i64: 1>, scalar_prefetch = 0 : i64, scratch_operands = 0 : i64, tpu.core_type = #tpu.core_type<tc>, window_params = [{transform_indices = @transform_0, window_bounds = array<i64: 128, 8>}, {transform_indices = @transform_1, window_bounds = array<i64: 128, 8>}, {pipeline_mode = #tpu.pipeline_mode<synchronous>, transform_indices = @transform_2, window_bounds = array<i64: 8, 32>}, {pipeline_mode = #tpu.pipeline_mode<synchronous>, transform_indices = @transform_3, window_bounds = array<i64: 32, 32>}, {pipeline_mode = #tpu.pipeline_mode<synchronous>, transform_indices = @transform_4, window_bounds = array<i64: 6, 32>}, {pipeline_mode = #tpu.pipeline_mode<synchronous>, transform_indices = @transform_5, window_bounds = array<i64: 32, 28>}, {pipeline_mode = #tpu.pipeline_mode<synchronous>, transform_indices = @transform_6, window_bounds = array<i64: 1, 28>}, {pipeline_mode = #tpu.pipeline_mode<synchronous>, transform_indices = @transform_7, window_bounds = array<i64: 8, 28>}, {pipeline_mode = #tpu.pipeline_mode<synchronous>, transform_indices = @transform_8, window_bounds = array<i64: 8, 28>}, {pipeline_mode = #tpu.pipeline_mode<synchronous>, transform_indices = @transform_9, window_bounds = array<i64: 28, 128>}, {pipeline_mode = #tpu.pipeline_mode<synchronous>, transform_indices = @transform_10, window_bounds = array<i64: 28, 128>}, {transform_indices = @transform_11, window_bounds = array<i64: 128, 128>}]} {
    %c0 = arith.constant 0 : index
    %c0_0 = arith.constant 0 : index
    %0 = vector.load %arg1[%c0, %c0_0] : memref<128x8xf32, #tpu.memory_space<vmem>>, vector<128x8xf32>
    %c0_1 = arith.constant 0 : index
    %c0_2 = arith.constant 0 : index
    %1 = vector.load %arg3[%c0_1, %c0_2] : memref<8x32xbf16, #tpu.memory_space<vmem>>, vector<8x32xbf16>
    %c0_3 = arith.constant 0 : index
    %c0_4 = arith.constant 0 : index
    %2 = vector.load %arg5[%c0_3, %c0_4] : memref<6x32xf32, #tpu.memory_space<vmem>>, vector<1x32xf32>
    %c1 = arith.constant 1 : index
    %c0_5 = arith.constant 0 : index
    %3 = vector.load %arg5[%c1, %c0_5] : memref<6x32xf32, #tpu.memory_space<vmem>>, vector<1x32xf32>
    %c2 = arith.constant 2 : index
    %c0_6 = arith.constant 0 : index
    %4 = vector.load %arg5[%c2, %c0_6] : memref<6x32xf32, #tpu.memory_space<vmem>>, vector<1x32xf32>
    %5 = arith.truncf %0 : vector<128x8xf32> to vector<128x8xbf16>
    %cst = arith.constant dense<0.000000e+00> : vector<128x32xf32>
    %6 = tpu.matmul %5, %1, %cst {dimension_numbers = #tpu.dot_dimension_numbers<[1], [0], [0], [1], [0, 0, 1, 1], [], []>} : vector<128x8xbf16>, vector<8x32xbf16>, vector<128x32xf32> -> vector<128x32xf32>
    %7 = vector.broadcast %2 : vector<1x32xf32> to vector<128x32xf32>
    %8 = arith.addf %6, %7 : vector<128x32xf32>
    %cst_7 = arith.constant dense<0.000000e+00> : vector<128xf32>
    %9 = vector.multi_reduction <add>, %8, %cst_7 [1] : vector<128x32xf32> to vector<128xf32>
    %10 = vector.shape_cast %9 : vector<128xf32> to vector<128x1xf32>
    %cst_8 = arith.constant 3.200000e+01 : f32
    %11 = vector.broadcast %cst_8 : f32 to vector<128x1xf32>
    %12 = arith.divf %10, %11 : vector<128x1xf32>
    %13 = arith.mulf %8, %8 : vector<128x32xf32>
    %cst_9 = arith.constant dense<0.000000e+00> : vector<128xf32>
    %14 = vector.multi_reduction <add>, %13, %cst_9 [1] : vector<128x32xf32> to vector<128xf32>
    %15 = vector.shape_cast %14 : vector<128xf32> to vector<128x1xf32>
    %cst_10 = arith.constant 3.200000e+01 : f32
    %16 = vector.broadcast %cst_10 : f32 to vector<128x1xf32>
    %17 = arith.divf %15, %16 : vector<128x1xf32>
    %18 = arith.mulf %12, %12 : vector<128x1xf32>
    %19 = arith.subf %17, %18 : vector<128x1xf32>
    %cst_11 = arith.constant 9.99999974E-6 : f32
    %20 = vector.broadcast %cst_11 : f32 to vector<128x1xf32>
    %21 = arith.addf %19, %20 : vector<128x1xf32>
    %22 = math.rsqrt %21 : vector<128x1xf32>
    %23 = vector.broadcast %3 : vector<1x32xf32> to vector<128x32xf32>
    %24 = vector.broadcast %22 : vector<128x1xf32> to vector<128x32xf32>
    %25 = arith.mulf %23, %24 : vector<128x32xf32>
    %26 = vector.broadcast %12 : vector<128x1xf32> to vector<128x32xf32>
    %27 = arith.subf %8, %26 : vector<128x32xf32>
    %28 = arith.mulf %27, %25 : vector<128x32xf32>
    %29 = vector.broadcast %4 : vector<1x32xf32> to vector<128x32xf32>
    %30 = arith.addf %28, %29 : vector<128x32xf32>
    %31 = arith.negf %30 : vector<128x32xf32>
    %32 = math.exp %31 : vector<128x32xf32>
    %cst_12 = arith.constant 1.000000e+00 : f32
    %33 = vector.broadcast %cst_12 : f32 to vector<128x32xf32>
    %34 = arith.addf %33, %32 : vector<128x32xf32>
    %35 = arith.divf %33, %34 : vector<128x32xf32>
    %36 = arith.mulf %30, %35 : vector<128x32xf32>
    %c0_13 = arith.constant 0 : index
    %c0_14 = arith.constant 0 : index
    %37 = vector.load %arg4[%c0_13, %c0_14] : memref<32x32xbf16, #tpu.memory_space<vmem>>, vector<32x32xbf16>
    %c3 = arith.constant 3 : index
    %c0_15 = arith.constant 0 : index
    %38 = vector.load %arg5[%c3, %c0_15] : memref<6x32xf32, #tpu.memory_space<vmem>>, vector<1x32xf32>
    %c4 = arith.constant 4 : index
    %c0_16 = arith.constant 0 : index
    %39 = vector.load %arg5[%c4, %c0_16] : memref<6x32xf32, #tpu.memory_space<vmem>>, vector<1x32xf32>
    %c5 = arith.constant 5 : index
    %c0_17 = arith.constant 0 : index
    %40 = vector.load %arg5[%c5, %c0_17] : memref<6x32xf32, #tpu.memory_space<vmem>>, vector<1x32xf32>
    %41 = arith.truncf %36 : vector<128x32xf32> to vector<128x32xbf16>
    %cst_18 = arith.constant dense<0.000000e+00> : vector<128x32xf32>
    %42 = tpu.matmul %41, %37, %cst_18 {dimension_numbers = #tpu.dot_dimension_numbers<[1], [0], [0], [1], [0, 0, 1, 1], [], []>} : vector<128x32xbf16>, vector<32x32xbf16>, vector<128x32xf32> -> vector<128x32xf32>
    %43 = vector.broadcast %38 : vector<1x32xf32> to vector<128x32xf32>
    %44 = arith.addf %42, %43 : vector<128x32xf32>
    %cst_19 = arith.constant dense<0.000000e+00> : vector<128xf32>
    %45 = vector.multi_reduction <add>, %44, %cst_19 [1] : vector<128x32xf32> to vector<128xf32>
    %46 = vector.shape_cast %45 : vector<128xf32> to vector<128x1xf32>
    %cst_20 = arith.constant 3.200000e+01 : f32
    %47 = vector.broadcast %cst_20 : f32 to vector<128x1xf32>
    %48 = arith.divf %46, %47 : vector<128x1xf32>
    %49 = arith.mulf %44, %44 : vector<128x32xf32>
    %cst_21 = arith.constant dense<0.000000e+00> : vector<128xf32>
    %50 = vector.multi_reduction <add>, %49, %cst_21 [1] : vector<128x32xf32> to vector<128xf32>
    %51 = vector.shape_cast %50 : vector<128xf32> to vector<128x1xf32>
    %cst_22 = arith.constant 3.200000e+01 : f32
    %52 = vector.broadcast %cst_22 : f32 to vector<128x1xf32>
    %53 = arith.divf %51, %52 : vector<128x1xf32>
    %54 = arith.mulf %48, %48 : vector<128x1xf32>
    %55 = arith.subf %53, %54 : vector<128x1xf32>
    %cst_23 = arith.constant 9.99999974E-6 : f32
    %56 = vector.broadcast %cst_23 : f32 to vector<128x1xf32>
    %57 = arith.addf %55, %56 : vector<128x1xf32>
    %58 = math.rsqrt %57 : vector<128x1xf32>
    %59 = vector.broadcast %39 : vector<1x32xf32> to vector<128x32xf32>
    %60 = vector.broadcast %58 : vector<128x1xf32> to vector<128x32xf32>
    %61 = arith.mulf %59, %60 : vector<128x32xf32>
    %62 = vector.broadcast %48 : vector<128x1xf32> to vector<128x32xf32>
    %63 = arith.subf %44, %62 : vector<128x32xf32>
    %64 = arith.mulf %63, %61 : vector<128x32xf32>
    %65 = vector.broadcast %40 : vector<1x32xf32> to vector<128x32xf32>
    %66 = arith.addf %64, %65 : vector<128x32xf32>
    %67 = arith.negf %66 : vector<128x32xf32>
    %68 = math.exp %67 : vector<128x32xf32>
    %cst_24 = arith.constant 1.000000e+00 : f32
    %69 = vector.broadcast %cst_24 : f32 to vector<128x32xf32>
    %70 = arith.addf %69, %68 : vector<128x32xf32>
    %71 = arith.divf %69, %70 : vector<128x32xf32>
    %72 = arith.mulf %66, %71 : vector<128x32xf32>
    %73 = arith.truncf %72 : vector<128x32xf32> to vector<128x32xbf16>
    %c0_25 = arith.constant 0 : index
    %c0_26 = arith.constant 0 : index
    %74 = vector.load %arg6[%c0_25, %c0_26] : memref<32x28xbf16, #tpu.memory_space<vmem>>, vector<32x28xbf16>
    %cst_27 = arith.constant dense<0.000000e+00> : vector<128x28xf32>
    %75 = tpu.matmul %73, %74, %cst_27 {dimension_numbers = #tpu.dot_dimension_numbers<[1], [0], [0], [1], [0, 0, 1, 1], [], []>} : vector<128x32xbf16>, vector<32x28xbf16>, vector<128x28xf32> -> vector<128x28xf32>
    %c0_28 = arith.constant 0 : index
    %c0_29 = arith.constant 0 : index
    %76 = vector.load %arg7[%c0_28, %c0_29] : memref<1x28xf32, #tpu.memory_space<vmem>>, vector<1x28xf32>
    %77 = vector.broadcast %76 : vector<1x28xf32> to vector<128x28xf32>
    %78 = arith.addf %75, %77 : vector<128x28xf32>
    %c0_30 = arith.constant 0 : index
    %c0_31 = arith.constant 0 : index
    %79 = vector.load %arg2[%c0_30, %c0_31] : memref<128x8xf32, #tpu.memory_space<vmem>>, vector<128x8xf32>
    %c0_32 = arith.constant 0 : index
    %c0_33 = arith.constant 0 : index
    %80 = vector.load %arg8[%c0_32, %c0_33] : memref<8x28xf32, #tpu.memory_space<vmem>>, vector<8x28xf32>
    %cst_34 = arith.constant dense<0.000000e+00> : vector<128x28xf32>
    %81 = tpu.matmul %79, %80, %cst_34 {dimension_numbers = #tpu.dot_dimension_numbers<[1], [0], [0], [1], [0, 0, 1, 1], [], []>, precision = #tpu.contract_precision<fp32>} : vector<128x8xf32>, vector<8x28xf32>, vector<128x28xf32> -> vector<128x28xf32>
    %c0_35 = arith.constant 0 : index
    %c0_36 = arith.constant 0 : index
    %82 = vector.load %arg9[%c0_35, %c0_36] : memref<8x28xf32, #tpu.memory_space<vmem>>, vector<8x28xf32>
    %cst_37 = arith.constant dense<0.000000e+00> : vector<128x28xf32>
    %83 = tpu.matmul %79, %82, %cst_37 {dimension_numbers = #tpu.dot_dimension_numbers<[1], [0], [0], [1], [0, 0, 1, 1], [], []>, precision = #tpu.contract_precision<fp32>} : vector<128x8xf32>, vector<8x28xf32>, vector<128x28xf32> -> vector<128x28xf32>
    %84 = arith.mulf %78, %81 : vector<128x28xf32>
    %c0_38 = arith.constant 0 : index
    %c0_39 = arith.constant 0 : index
    %85 = vector.load %arg10[%c0_38, %c0_39] : memref<28x128xf32, #tpu.memory_space<vmem>>, vector<28x128xf32>
    %cst_40 = arith.constant dense<0.000000e+00> : vector<128x128xf32>
    %86 = tpu.matmul %84, %85, %cst_40 {dimension_numbers = #tpu.dot_dimension_numbers<[1], [0], [0], [1], [0, 0, 1, 1], [], []>, precision = #tpu.contract_precision<fp32>} : vector<128x28xf32>, vector<28x128xf32>, vector<128x128xf32> -> vector<128x128xf32>
    %87 = arith.mulf %78, %83 : vector<128x28xf32>
    %c0_41 = arith.constant 0 : index
    %c0_42 = arith.constant 0 : index
    %88 = vector.load %arg11[%c0_41, %c0_42] : memref<28x128xf32, #tpu.memory_space<vmem>>, vector<28x128xf32>
    %cst_43 = arith.constant dense<0.000000e+00> : vector<128x128xf32>
    %89 = tpu.matmul %87, %88, %cst_43 {dimension_numbers = #tpu.dot_dimension_numbers<[1], [0], [0], [1], [0, 0, 1, 1], [], []>, precision = #tpu.contract_precision<fp32>} : vector<128x28xf32>, vector<28x128xf32>, vector<128x128xf32> -> vector<128x128xf32>
    %90 = arith.addf %86, %89 : vector<128x128xf32>
    %c0_44 = arith.constant 0 : index
    %c0_45 = arith.constant 0 : index
    %91 = vector.load %arg12[%c0_44, %c0_45] : memref<128x128xf32, #tpu.memory_space<vmem>>, vector<128x128xf32>
    tpu.vector_store %arg12[%c0_44, %c0_45], %90 {strides = array<i32>} : memref<128x128xf32, #tpu.memory_space<vmem>>, vector<128x128xf32>,
    return
  }
  func.func @transform_0(%arg0: i32) -> (i32, i32) {
    %c0_i32 = arith.constant 0 : i32
    %c0_i32_0 = arith.constant 0 : i32
    return %arg0, %c0_i32 : i32, i32
  }
  func.func @transform_1(%arg0: i32) -> (i32, i32) {
    %c0_i32 = arith.constant 0 : i32
    %c0_i32_0 = arith.constant 0 : i32
    return %arg0, %c0_i32 : i32, i32
  }
  func.func @transform_2(%arg0: i32) -> (i32, i32) {
    %c0_i32 = arith.constant 0 : i32
    %c0_i32_0 = arith.constant 0 : i32
    %c0_i32_1 = arith.constant 0 : i32
    return %c0_i32, %c0_i32_0 : i32, i32
  }
  func.func @transform_3(%arg0: i32) -> (i32, i32) {
    %c0_i32 = arith.constant 0 : i32
    %c0_i32_0 = arith.constant 0 : i32
    %c0_i32_1 = arith.constant 0 : i32
    return %c0_i32, %c0_i32_0 : i32, i32
  }
  func.func @transform_4(%arg0: i32) -> (i32, i32) {
    %c0_i32 = arith.constant 0 : i32
    %c0_i32_0 = arith.constant 0 : i32
    %c0_i32_1 = arith.constant 0 : i32
    return %c0_i32, %c0_i32_0 : i32, i32
  }
  func.func @transform_5(%arg0: i32) -> (i32, i32) {
    %c0_i32 = arith.constant 0 : i32
    %c0_i32_0 = arith.constant 0 : i32
    %c0_i32_1 = arith.constant 0 : i32
    return %c0_i32, %c0_i32_0 : i32, i32
  }
  func.func @transform_6(%arg0: i32) -> (i32, i32) {
    %c0_i32 = arith.constant 0 : i32
    %c0_i32_0 = arith.constant 0 : i32
    %c0_i32_1 = arith.constant 0 : i32
    return %c0_i32, %c0_i32_0 : i32, i32
  }
  func.func @transform_7(%arg0: i32) -> (i32, i32) {
    %c0_i32 = arith.constant 0 : i32
    %c0_i32_0 = arith.constant 0 : i32
    %c0_i32_1 = arith.constant 0 : i32
    return %c0_i32, %c0_i32_0 : i32, i32
  }
  func.func @transform_8(%arg0: i32) -> (i32, i32) {
    %c0_i32 = arith.constant 0 : i32
    %c0_i32_0 = arith.constant 0 : i32
    %c0_i32_1 = arith.constant 0 : i32
    return %c0_i32, %c0_i32_0 : i32, i32
  }
  func.func @transform_9(%arg0: i32) -> (i32, i32) {
    %c0_i32 = arith.constant 0 : i32
    %c0_i32_0 = arith.constant 0 : i32
    %c0_i32_1 = arith.constant 0 : i32
    return %c0_i32, %c0_i32_0 : i32, i32
  }
  func.func @transform_10(%arg0: i32) -> (i32, i32) {
    %c0_i32 = arith.constant 0 : i32
    %c0_i32_0 = arith.constant 0 : i32
    %c0_i32_1 = arith.constant 0 : i32
    return %c0_i32, %c0_i32_0 : i32, i32
  }
  func.func @transform_11(%arg0: i32) -> (i32, i32) {
    %c0_i32 = arith.constant 0 : i32
    %c0_i32_0 = arith.constant 0 : i32
    return %arg0, %c0_i32 : i32, i32
  }
}

module attributes {stable_mosaic.version = 11 : i64} {
  func.func @kernel(%arg0: i32, %arg1: memref<128x8xf32, #tpu.memory_space<vmem>>, %arg2: memref<128x8xf32, #tpu.memory_space<vmem>>, %arg3: memref<8x32xbf16, #tpu.memory_space<vmem>>, %arg4: memref<32x32xbf16, #tpu.memory_space<vmem>>, %arg5: memref<6x32xf32, #tpu.memory_space<vmem>>, %arg6: memref<32x28xbf16, #tpu.memory_space<vmem>>, %arg7: memref<1x28xf32, #tpu.memory_space<vmem>>, %arg8: memref<8x28xf32, #tpu.memory_space<vmem>>, %arg9: memref<8x28xf32, #tpu.memory_space<vmem>>, %arg10: memref<28x128xf32, #tpu.memory_space<vmem>>, %arg11: memref<28x128xf32, #tpu.memory_space<vmem>>, %arg12: memref<128x128xf32, #tpu.memory_space<vmem>>) attributes {dimension_semantics = [#tpu.dimension_semantics<parallel>], iteration_bounds = array<i64: 1>, scalar_prefetch = 0 : i64, scratch_operands = 0 : i64, tpu.core_type = #tpu.core_type<tc>, window_params = [{transform_indices = @transform_0, window_bounds = array<i64: 128, 8>}, {transform_indices = @transform_1, window_bounds = array<i64: 128, 8>}, {pipeline_mode = #tpu.pipeline_mode<synchronous>, transform_indices = @transform_2, window_bounds = array<i64: 8, 32>}, {pipeline_mode = #tpu.pipeline_mode<synchronous>, transform_indices = @transform_3, window_bounds = array<i64: 32, 32>}, {pipeline_mode = #tpu.pipeline_mode<synchronous>, transform_indices = @transform_4, window_bounds = array<i64: 6, 32>}, {pipeline_mode = #tpu.pipeline_mode<synchronous>, transform_indices = @transform_5, window_bounds = array<i64: 32, 28>}, {pipeline_mode = #tpu.pipeline_mode<synchronous>, transform_indices = @transform_6, window_bounds = array<i64: 1, 28>}, {pipeline_mode = #tpu.pipeline_mode<synchronous>, transform_indices = @transform_7, window_bounds = array<i64: 8, 28>}, {pipeline_mode = #tpu.pipeline_mode<synchronous>, transform_indices = @transform_8, window_bounds = array<i64: 8, 28>}, {pipeline_mode = #tpu.pipeline_mode<synchronous>, transform_indices = @transform_9, window_bounds = array<i64: 28, 128>}, {pipeline_mode = #tpu.pipeline_mode<synchronous>, transform_indices = @transform_10, window_bounds = array<i64: 28, 128>}, {transform_indices = @transform_11, window_bounds = array<i64: 128, 128>}]} {
    %c0 = arith.constant 0 : index
    %c0_0 = arith.constant 0 : index
    %0 = vector.load %arg1[%c0, %c0_0] : memref<128x8xf32, #tpu.memory_space<vmem>>, vector<128x8xf32>
    %c0_1 = arith.constant 0 : index
    %c0_2 = arith.constant 0 : index
    %1 = vector.load %arg3[%c0_1, %c0_2] : memref<8x32xbf16, #tpu.memory_space<vmem>>, vector<8x32xbf16>
    %c0_3 = arith.constant 0 : index
    %c0_4 = arith.constant 0 : index
    %2 = vector.load %arg5[%c0_3, %c0_4] : memref<6x32xf32, #tpu.memory_space<vmem>>, vector<1x32xf32>
    %c1 = arith.constant 1 : index
    %c0_5 = arith.constant 0 : index
    %3 = vector.load %arg5[%c1, %c0_5] : memref<6x32xf32, #tpu.memory_space<vmem>>, vector<1x32xf32>
    %c2 = arith.constant 2 : index
    %c0_6 = arith.constant 0 : index
    %4 = vector.load %arg5[%c2, %c0_6] : memref<6x32xf32, #tpu.memory_space<vmem>>, vector<1x32xf32>
    %5 = arith.truncf %0 : vector<128x8xf32> to vector<128x8xbf16>
    %cst = arith.constant dense<0.000000e+00> : vector<128x32xf32>
    %6 = tpu.matmul %5, %1, %cst {dimension_numbers = #tpu.dot_dimension_numbers<[1], [0], [0], [1], [0, 0, 1, 1], [], []>} : vector<128x8xbf16>, vector<8x32xbf16>, vector<128x32xf32> -> vector<128x32xf32>
    %7 = vector.broadcast %2 : vector<1x32xf32> to vector<128x32xf32>
    %8 = arith.addf %6, %7 : vector<128x32xf32>
    %cst_7 = arith.constant dense<0.000000e+00> : vector<128xf32>
    %9 = vector.multi_reduction <add>, %8, %cst_7 [1] : vector<128x32xf32> to vector<128xf32>
    %10 = vector.shape_cast %9 : vector<128xf32> to vector<128x1xf32>
    %cst_8 = arith.constant 3.200000e+01 : f32
    %11 = vector.broadcast %cst_8 : f32 to vector<128x1xf32>
    %12 = arith.divf %10, %11 : vector<128x1xf32>
    %13 = arith.mulf %8, %8 : vector<128x32xf32>
    %cst_9 = arith.constant dense<0.000000e+00> : vector<128xf32>
    %14 = vector.multi_reduction <add>, %13, %cst_9 [1] : vector<128x32xf32> to vector<128xf32>
    %15 = vector.shape_cast %14 : vector<128xf32> to vector<128x1xf32>
    %cst_10 = arith.constant 3.200000e+01 : f32
    %16 = vector.broadcast %cst_10 : f32 to vector<128x1xf32>
    %17 = arith.divf %15, %16 : vector<128x1xf32>
    %18 = arith.mulf %12, %12 : vector<128x1xf32>
    %19 = arith.subf %17, %18 : vector<128x1xf32>
    %cst_11 = arith.constant 9.99999974E-6 : f32
    %20 = vector.broadcast %cst_11 : f32 to vector<128x1xf32>
    %21 = arith.addf %19, %20 : vector<128x1xf32>
    %22 = math.rsqrt %21 : vector<128x1xf32>
    %23 = vector.broadcast %3 : vector<1x32xf32> to vector<128x32xf32>
    %24 = vector.broadcast %22 : vector<128x1xf32> to vector<128x32xf32>
    %25 = arith.mulf %23, %24 : vector<128x32xf32>
    %26 = vector.broadcast %12 : vector<128x1xf32> to vector<128x32xf32>
    %27 = arith.subf %8, %26 : vector<128x32xf32>
    %28 = arith.mulf %27, %25 : vector<128x32xf32>
    %29 = vector.broadcast %4 : vector<1x32xf32> to vector<128x32xf32>
    %30 = arith.addf %28, %29 : vector<128x32xf32>
    %31 = arith.negf %30 : vector<128x32xf32>
    %32 = math.exp %31 : vector<128x32xf32>
    %cst_12 = arith.constant 1.000000e+00 : f32
    %33 = vector.broadcast %cst_12 : f32 to vector<128x32xf32>
    %34 = arith.addf %33, %32 : vector<128x32xf32>
    %35 = arith.divf %33, %34 : vector<128x32xf32>
    %36 = arith.mulf %30, %35 : vector<128x32xf32>
    %c0_13 = arith.constant 0 : index
    %c0_14 = arith.constant 0 : index
    %37 = vector.load %arg4[%c0_13, %c0_14] : memref<32x32xbf16, #tpu.memory_space<vmem>>, vector<32x32xbf16>
    %c3 = arith.constant 3 : index
    %c0_15 = arith.constant 0 : index
    %38 = vector.load %arg5[%c3, %c0_15] : memref<6x32xf32, #tpu.memory_space<vmem>>, vector<1x32xf32>
    %c4 = arith.constant 4 : index
    %c0_16 = arith.constant 0 : index
    %39 = vector.load %arg5[%c4, %c0_16] : memref<6x32xf32, #tpu.memory_space<vmem>>, vector<1x32xf32>
    %c5 = arith.constant 5 : index
    %c0_17 = arith.constant 0 : index
    %40 = vector.load %arg5[%c5, %c0_17] : memref<6x32xf32, #tpu.memory_space<vmem>>, vector<1x32xf32>
    %41 = arith.truncf %36 : vector<128x32xf32> to vector<128x32xbf16>
    %cst_18 = arith.constant dense<0.000000e+00> : vector<128x32xf32>
    %42 = tpu.matmul %41, %37, %cst_18 {dimension_numbers = #tpu.dot_dimension_numbers<[1], [0], [0], [1], [0, 0, 1, 1], [], []>} : vector<128x32xbf16>, vector<32x32xbf16>, vector<128x32xf32> -> vector<128x32xf32>
    %43 = vector.broadcast %38 : vector<1x32xf32> to vector<128x32xf32>
    %44 = arith.addf %42, %43 : vector<128x32xf32>
    %cst_19 = arith.constant dense<0.000000e+00> : vector<128xf32>
    %45 = vector.multi_reduction <add>, %44, %cst_19 [1] : vector<128x32xf32> to vector<128xf32>
    %46 = vector.shape_cast %45 : vector<128xf32> to vector<128x1xf32>
    %cst_20 = arith.constant 3.200000e+01 : f32
    %47 = vector.broadcast %cst_20 : f32 to vector<128x1xf32>
    %48 = arith.divf %46, %47 : vector<128x1xf32>
    %49 = arith.mulf %44, %44 : vector<128x32xf32>
    %cst_21 = arith.constant dense<0.000000e+00> : vector<128xf32>
    %50 = vector.multi_reduction <add>, %49, %cst_21 [1] : vector<128x32xf32> to vector<128xf32>
    %51 = vector.shape_cast %50 : vector<128xf32> to vector<128x1xf32>
    %cst_22 = arith.constant 3.200000e+01 : f32
    %52 = vector.broadcast %cst_22 : f32 to vector<128x1xf32>
    %53 = arith.divf %51, %52 : vector<128x1xf32>
    %54 = arith.mulf %48, %48 : vector<128x1xf32>
    %55 = arith.subf %53, %54 : vector<128x1xf32>
    %cst_23 = arith.constant 9.99999974E-6 : f32
    %56 = vector.broadcast %cst_23 : f32 to vector<128x1xf32>
    %57 = arith.addf %55, %56 : vector<128x1xf32>
    %58 = math.rsqrt %57 : vector<128x1xf32>
    %59 = vector.broadcast %39 : vector<1x32xf32> to vector<128x32xf32>
    %60 = vector.broadcast %58 : vector<128x1xf32> to vector<128x32xf32>
    %61 = arith.mulf %59, %60 : vector<128x32xf32>
    %62 = vector.broadcast %48 : vector<128x1xf32> to vector<128x32xf32>
    %63 = arith.subf %44, %62 : vector<128x32xf32>
    %64 = arith.mulf %63, %61 : vector<128x32xf32>
    %65 = vector.broadcast %40 : vector<1x32xf32> to vector<128x32xf32>
    %66 = arith.addf %64, %65 : vector<128x32xf32>
    %67 = arith.negf %66 : vector<128x32xf32>
    %68 = math.exp %67 : vector<128x32xf32>
    %cst_24 = arith.constant 1.000000e+00 : f32
    %69 = vector.broadcast %cst_24 : f32 to vector<128x32xf32>
    %70 = arith.addf %69, %68 : vector<128x32xf32>
    %71 = arith.divf %69, %70 : vector<128x32xf32>
    %72 = arith.mulf %66, %71 : vector<128x32xf32>
    %73 = arith.truncf %72 : vector<128x32xf32> to vector<128x32xbf16>
    %c0_25 = arith.constant 0 : index
    %c0_26 = arith.constant 0 : index
    %74 = vector.load %arg6[%c0_25, %c0_26] : memref<32x28xbf16, #tpu.memory_space<vmem>>, vector<32x28xbf16>
    %cst_27 = arith.constant dense<0.000000e+00> : vector<128x28xf32>
    %75 = tpu.matmul %73, %74, %cst_27 {dimension_numbers = #tpu.dot_dimension_numbers<[1], [0], [0], [1], [0, 0, 1, 1], [], []>} : vector<128x32xbf16>, vector<32x28xbf16>, vector<128x28xf32> -> vector<128x28xf32>
    %c0_28 = arith.constant 0 : index
    %c0_29 = arith.constant 0 : index
    %76 = vector.load %arg7[%c0_28, %c0_29] : memref<1x28xf32, #tpu.memory_space<vmem>>, vector<1x28xf32>
    %77 = vector.broadcast %76 : vector<1x28xf32> to vector<128x28xf32>
    %78 = arith.addf %75, %77 : vector<128x28xf32>
    %c0_30 = arith.constant 0 : index
    %c0_31 = arith.constant 0 : index
    %79 = vector.load %arg2[%c0_30, %c0_31] : memref<128x8xf32, #tpu.memory_space<vmem>>, vector<128x8xf32>
    %c0_32 = arith.constant 0 : index
    %c0_33 = arith.constant 0 : index
    %80 = vector.load %arg8[%c0_32, %c0_33] : memref<8x28xf32, #tpu.memory_space<vmem>>, vector<8x28xf32>
    %cst_34 = arith.constant dense<0.000000e+00> : vector<128x28xf32>
    %81 = tpu.matmul %79, %80, %cst_34 {dimension_numbers = #tpu.dot_dimension_numbers<[1], [0], [0], [1], [0, 0, 1, 1], [], []>, precision = #tpu.contract_precision<fp32>} : vector<128x8xf32>, vector<8x28xf32>, vector<128x28xf32> -> vector<128x28xf32>
    %c0_35 = arith.constant 0 : index
    %c0_36 = arith.constant 0 : index
    %82 = vector.load %arg9[%c0_35, %c0_36] : memref<8x28xf32, #tpu.memory_space<vmem>>, vector<8x28xf32>
    %cst_37 = arith.constant dense<0.000000e+00> : vector<128x28xf32>
    %83 = tpu.matmul %79, %82, %cst_37 {dimension_numbers = #tpu.dot_dimension_numbers<[1], [0], [0], [1], [0, 0, 1, 1], [], []>, precision = #tpu.contract_precision<fp32>} : vector<128x8xf32>, vector<8x28xf32>, vector<128x28xf32> -> vector<128x28xf32>
    %84 = arith.mulf %78, %81 : vector<128x28xf32>
    %c0_38 = arith.constant 0 : index
    %c0_39 = arith.constant 0 : index
    %85 = vector.load %arg10[%c0_38, %c0_39] : memref<28x128xf32, #tpu.memory_space<vmem>>, vector<28x128xf32>
    %cst_40 = arith.constant dense<0.000000e+00> : vector<128x128xf32>
    %86 = tpu.matmul %84, %85, %cst_40 {dimension_numbers = #tpu.dot_dimension_numbers<[1], [0], [0], [1], [0, 0, 1, 1], [], []>, precision = #tpu.contract_precision<fp32>} : vector<128x28xf32>, vector<28x128xf32>, vector<128x128xf32> -> vector<128x128xf32>
    %87 = arith.mulf %78, %83 : vector<128x28xf32>
    %c0_41 = arith.constant 0 : index
    %c0_42 = arith.constant 0 : index
    %88 = vector.load %arg11[%c0_41, %c0_42] : memref<28x128xf32, #tpu.memory_space<vmem>>, vector<28x128xf32>
    %cst_43 = arith.constant dense<0.000000e+00> : vector<128x128xf32>
    %89 = tpu.matmul %87, %88, %cst_43 {dimension_numbers = #tpu.dot_dimension_numbers<[1], [0], [0], [1], [0, 0, 1, 1], [], []>, precision = #tpu.contract_precision<fp32>} : vector<128x28xf32>, vector<28x128xf32>, vector<128x128xf32> -> vector<128x128xf32>
    %90 = arith.addf %86, %89 : vector<128x128xf32>
    %c0_44 = arith.constant 0 : index
    %c0_45 = arith.constant 0 : index
    %91 = vector.load %arg12[%c0_44, %c0_45] : memref<128x128xf32, #tpu.memory_space<vmem>>, vector<128x128xf32>
    tpu.vector_store %arg12[%c0_44, %c0_45], %90 {strides = array<i32>} : memref<128x128xf32, #tpu.memory_space<vmem>>, vector<128x128xf32>,
    return
  }
  func.func @transform_0(%arg0: i32) -> (i32, i32) {
    %c0_i32 = arith.constant 0 : i32
    %c0_i32_0 = arith.constant 0 : i32
    return %arg0, %c0_i32 : i32, i32
  }
  func.func @transform_1(%arg0: i32) -> (i32, i32) {
    %c0_i32 = arith.constant 0 : i32
    %c0_i32_0 = arith.constant 0 : i32
    return %arg0, %c0_i32 : i32, i32
  }
  func.func @transform_2(%arg0: i32) -> (i32, i32) {
    %c0_i32 = arith.constant 0 : i32
    %c0_i32_0 = arith.constant 0 : i32
    %c0_i32_1 = arith.constant 0 : i32
    return %c0_i32, %c0_i32_0 : i32, i32
  }
  func.func @transform_3(%arg0: i32) -> (i32, i32) {
    %c0_i32 = arith.constant 0 : i32
    %c0_i32_0 = arith.constant 0 : i32
    %c0_i32_1 = arith.constant 0 : i32
    return %c0_i32, %c0_i32_0 : i32, i32
  }
  func.func @transform_4(%arg0: i32) -> (i32, i32) {
    %c0_i32 = arith.constant 0 : i32
    %c0_i32_0 = arith.constant 0 : i32
    %c0_i32_1 = arith.constant 0 : i32
    return %c0_i32, %c0_i32_0 : i32, i32
  }
  func.func @transform_5(%arg0: i32) -> (i32, i32) {
    %c0_i32 = arith.constant 0 : i32
    %c0_i32_0 = arith.constant 0 : i32
    %c0_i32_1 = arith.constant 0 : i32
    return %c0_i32, %c0_i32_0 : i32, i32
  }
  func.func @transform_6(%arg0: i32) -> (i32, i32) {
    %c0_i32 = arith.constant 0 : i32
    %c0_i32_0 = arith.constant 0 : i32
    %c0_i32_1 = arith.constant 0 : i32
    return %c0_i32, %c0_i32_0 : i32, i32
  }
  func.func @transform_7(%arg0: i32) -> (i32, i32) {
    %c0_i32 = arith.constant 0 : i32
    %c0_i32_0 = arith.constant 0 : i32
    %c0_i32_1 = arith.constant 0 : i32
    return %c0_i32, %c0_i32_0 : i32, i32
  }
  func.func @transform_8(%arg0: i32) -> (i32, i32) {
    %c0_i32 = arith.constant 0 : i32
    %c0_i32_0 = arith.constant 0 : i32
    %c0_i32_1 = arith.constant 0 : i32
    return %c0_i32, %c0_i32_0 : i32, i32
  }
  func.func @transform_9(%arg0: i32) -> (i32, i32) {
    %c0_i32 = arith.constant 0 : i32
    %c0_i32_0 = arith.constant 0 : i32
    %c0_i32_1 = arith.constant 0 : i32
    return %c0_i32, %c0_i32_0 : i32, i32
  }
  func.func @transform_10(%arg0: i32) -> (i32, i32) {
    %c0_i32 = arith.constant 0 : i32
    %c0_i32_0 = arith.constant 0 : i32
    %c0_i32_1 = arith.constant 0 : i32
    return %c0_i32, %c0_i32_0 : i32, i32
  }
  func.func @transform_11(%arg0: i32) -> (i32, i32) {
    %c0_i32 = arith.constant 0 : i32
    %c0_i32_0 = arith.constant 0 : i32
    return %arg0, %c0_i32 : i32, i32
  }
}

</mosaic_0001>

<bundles_post_ra>
// kernel: tpu_custom_call.1
= control target key start
LH: loop header
LB: loop body
LE: loop exit
PB: predicated region body
PF: predicated region fallthrough
CT: control target
= control target key end

     0   :  { %vm97_vm0 = vcmask 1043456   ;;  %vm72_vm1 = vcmask 64512   ;;  %s10208_s0 = inlined_call_operand.vmem [shape: f32[128,8], index: 0, kind: input, shape index: {}]   ;;  %s10209_s1 = inlined_call_operand.vmem [shape: f32[128,8], index: 1, kind: input, shape index: {}]   ;;  %s10210_s2 = inlined_call_operand.vmem [shape: bf16[8,32], index: 2, kind: input, shape index: {}]   ;;  %s10211_s3 = inlined_call_operand.vmem [shape: bf16[32,32], index: 3, kind: input, shape index: {}]   ;;  %s10212_s4 = inlined_call_operand.vmem [shape: f32[6,32], index: 4, kind: input, shape index: {}]   ;;  %s10213_s5 = inlined_call_operand.vmem [shape: bf16[32,28], index: 5, kind: input, shape index: {}]   ;;  %s10214_s6 = inlined_call_operand.vmem [shape: f32[1,28], index: 6, kind: input, shape index: {}]   ;;  %s10215_s7 = inlined_call_operand.vmem [shape: f32[8,28], index: 7, kind: input, shape index: {}]   ;;  %s10216_s8 = inlined_call_operand.vmem [shape: f32[8,28], index: 8, kind: input, shape index: {}]   ;;  %s10217_s9 = inlined_call_operand.vmem [shape: f32[28,128], index: 9, kind: input, shape index: {}]   ;;  %s10218_s10 = inlined_call_operand.vmem [shape: f32[28,128], index: 10, kind: input, shape index: {}]   ;;  %s10219_s11 = inlined_call_operand.hbm [shape: f32[128,128], index: 11, kind: output, shape index: {}]  }
   0x1   :  { %v56_v0 = vld [vmem:[%s10210_s2] sm:$0xf]  ;;  %v3575_v1 = vld [vmem:[%s10218_s10 + $0x18] sm:$0xf]  ;;  %v41_v5 = vld [vmem:[%s10208_s0 + $0x8] sm:$0xff] }
   0x2   :  { %7699 = vmatprep.subr.msk.bf16.mxu0 %vm97_vm0, %v56_v0  ;;  %v99_v2 = vsel %vm97_vm0, %v56_v0, 0  ;;  %v7995_v3 = vsel %vm97_vm0, %v3575_v1, 0  ;;  %v40_v4 = vld [vmem:[%s10208_s0] sm:$0xff]  ;;  %v42_v8 = vld [vmem:[%s10208_s0 + $0x10] sm:$0xff]  ;;  %v43_v9 = vld [vmem:[%s10208_s0 + $0x18] sm:$0xff] }
   0x3   :  { %10283 = vst [vmem:[#allocation5_spill] sm:$0xff] %v7995_v3  ;;  %6512 = vmatpush3.bf16.msra.mxu0 %v99_v2  ;;  %v10220_v6 = vand.u32 4294901760, %v7995_v3  ;;  %v60_v7 = vpack.c.bf16 %v41_v5, %v40_v4  ;;  %v44_v10 = vld [vmem:[%s10208_s0 + $0x20] sm:$0xff]  ;;  %v61_v11 = vpack.c.bf16 %v43_v9, %v42_v8  ;;  %v45_v12 = vld [vmem:[%s10208_s0 + $0x28] sm:$0xff]  ;;  %v46_v15 = vld [vmem:[%s10208_s0 + $0x30] sm:$0xff] }
   0x4   :  { %v62_v14 = vpack.c.bf16 %v45_v12, %v44_v10  ;;  %v47_v16 = vld [vmem:[%s10208_s0 + $0x38] sm:$0xff]  ;;  %v48_v17 = vld [vmem:[%s10208_s0 + $0x40] sm:$0xff]  ;;  %v49_v18 = vld [vmem:[%s10208_s0 + $0x48] sm:$0xff] }
   0x5   :  { %v8019_v13 = vsub.f32 %v7995_v3, %v10220_v6  ;;  %6513 = vmatprep.mubr.msk.bf16.mxu0 %vm72_vm1, %v60_v7  ;;  %v63_v19 = vpack.c.bf16 %v47_v16, %v46_v15 }
   0x6   :  { %6514 = vmatmul.mubr.msk.bf16.vlgmr.msra.gmra.mrb[0].mxu0 %vm72_vm1, %v61_v11 }
   0x7   :  { %10284 = vst [vmem:[#allocation6_spill] sm:$0xff] %v8019_v13  ;;  %6517 = vmatprep.mubr.msk.bf16.mxu0 %vm72_vm1, %v62_v14 }
   0x8   :  { %16 = vsyncpa [#allocation3], 0  ;;  %v64_v20 = vpack.c.bf16 %v49_v18, %v48_v17  ;;  %v50_v21 = vld [vmem:[%s10208_s0 + $0x50] sm:$0xff]  ;;  %v51_v22 = vld [vmem:[%s10208_s0 + $0x58] sm:$0xff]  ;;  %vm198_vm2 = vcmask 261120   ;;  %vm3576_vm3 = vcmask 228352  }
   0x9   :  { %v52_v23 = vld [vmem:[%s10208_s0 + $0x60] sm:$0xff]  ;;  %v53_v24 = vld [vmem:[%s10208_s0 + $0x68] sm:$0xff]  ;;  %v65_v25 = vpack.c.bf16 %v51_v22, %v50_v21  ;;  %v54_v27 = vld [vmem:[%s10208_s0 + $0x70] sm:$0xff] }
   0xa   :  { %v66_v26 = vpack.c.bf16 %v53_v24, %v52_v23  ;;  %v55_v28 = vld [vmem:[%s10208_s0 + $0x78] sm:$0xff]  ;;  %v8062_v30 = vld [vmem:[%s10212_s4] ss:$0 sm:$0xff] }
   0xb   :  { %v67_v29 = vpack.c.bf16 %v55_v28, %v54_v27 }
   0xe   :  { %6518 = vmatmul.mubr.msk.bf16.gmra.mrb[4].mxu0 %vm72_vm1, %v63_v19 }
   0xf   :  { %6521 = vmatprep.mubr.msk.bf16.mxu0 %vm72_vm1, %v64_v20 }
  0x16   :  { %6522 = vmatmul.mubr.msk.bf16.gmra.mrb[8].mxu0 %vm72_vm1, %v65_v25 }
  0x17   :  { %6525 = vmatprep.mubr.msk.bf16.mxu0 %vm72_vm1, %v66_v26 }
  0x1e   :  { %6526 = vmatmul.mubr.msk.bf16.gmra.mrb[12].mxu0 %vm72_vm1, %v67_v29 }
  0xd9   :  { %v6515_v31 = vpop.f32.mrb[0].mxu0 }
  0xda   :  { %v8065_v32 = vadd.f32 %v6515_v31, %v8062_v30  ;;  %v135_v33 = vpop.f32.mrb[1].mxu0 }
  0xdb   :  { %v8068_v34 = vadd.f32 %v8062_v30, %v135_v33  ;;  %v6516_v35 = vpop.f32.mrb[2].mxu0 }
  0xdc   :  { %v8071_v36 = vadd.f32 %v6516_v35, %v8062_v30  ;;  %v138_v37 = vpop.f32.mrb[3].mxu0  ;;  %v205_v38 = vsel %vm198_vm2, %v8065_v32, 0.0  ;;  %v266_v40 = vmul.f32 %v8065_v32, %v8065_v32 }
  0xdd   :  { %206 = vadd.xlane.f32.xlu1 %v205_v38  ;;  %v199_v39 = vsel %vm198_vm2, %v8068_v34, 0.0  ;;  %v8080_v41 = vadd.f32 %v8062_v30, %v138_v37  ;;  %v264_v52 = vmul.f32 %v8068_v34, %v8068_v34 }
  0xde   :  { %200 = vadd.xlane.f32.xlu0 %v199_v39  ;;  %v208_v42 = vsel %vm198_vm2, %v8071_v36, 0.0  ;;  %v267_v43 = vmul.f32 %v8071_v36, %v8071_v36  ;;  %v286_v44 = vsel %vm198_vm2, %v266_v40, 0.0 }
  0xdf   :  { %v265_v50 = vmul.f32 %v8080_v41, %v8080_v41  ;;  %v202_v51 = vsel %vm198_vm2, %v8080_v41, 0.0  ;;  %v280_v56 = vsel %vm198_vm2, %v264_v52, 0.0 }
  0xe0   :  { %v289_v48 = vsel %vm198_vm2, %v267_v43, 0.0 }
  0xe1   :  { %209 = vadd.xlane.f32.xlu1 %v208_v42  ;;  %v6519_v45 = vpop.f32.mrb[4].mxu0  ;;  %v283_v54 = vsel %vm198_vm2, %v265_v50, 0.0 }
  0xe2   :  { %287 = vadd.xlane.f32.xlu0 %v286_v44  ;;  %v151_v46 = vpop.f32.mrb[5].mxu0  ;;  %v8099_v55 = vadd.f32 %v6519_v45, %v8062_v30 }
  0xe3   :  { %v6520_v47 = vpop.f32.mrb[6].mxu0  ;;  %v8108_v63 = vadd.f32 %v8062_v30, %v151_v46 }
  0xe4   :  { %v154_v49 = vpop.f32.mrb[7].mxu0  ;;  %v8095_v53 = vadd.f32 %v6520_v47, %v8062_v30  ;;  %v217_v0 = vsel %vm198_vm2, %v8099_v55, 0.0  ;;  %v270_v5 = vmul.f32 %v8099_v55, %v8099_v55 }
  0xe5   :  { %290 = vadd.xlane.f32.xlu1 %v289_v48  ;;  %v8105_v61 = vadd.f32 %v8062_v30, %v154_v49  ;;  %v211_v4 = vsel %vm198_vm2, %v8108_v63, 0.0  ;;  %v268_v15 = vmul.f32 %v8108_v63, %v8108_v63 }
  0xe6   :  { %203 = vadd.xlane.f32.xlu0 %v202_v51  ;;  %v220_v58 = vsel %vm198_vm2, %v8095_v53, 0.0  ;;  %v271_v2 = vmul.f32 %v8095_v53, %v8095_v53  ;;  %v298_v14 = vsel %vm198_vm2, %v270_v5, 0.0 }
  0xe7   :  { %v214_v1 = vsel %vm198_vm2, %v8105_v61, 0.0  ;;  %v269_v11 = vmul.f32 %v8105_v61, %v8105_v61  ;;  %v292_v19 = vsel %vm198_vm2, %v268_v15, 0.0 }
  0xe8   :  { %v301_v10 = vsel %vm198_vm2, %v271_v2, 0.0 }
  0xe9   :  { %284 = vadd.xlane.f32.xlu1 %v283_v54  ;;  %v6523_v57 = vpop.f32.mrb[8].mxu0  ;;  %v295_v17 = vsel %vm198_vm2, %v269_v11, 0.0 }
  0xea   :  { %281 = vadd.xlane.f32.xlu0 %v280_v56  ;;  %v167_v59 = vpop.f32.mrb[9].mxu0  ;;  %v8131_v18 = vadd.f32 %v6523_v57, %v8062_v30  ;;  %v7703_v56 = vld [vmem:[%s10211_s3] sm:$0xff]   ;;  %v7704_v57 = vld [vmem:[%s10211_s3 + $0x8] sm:$0xff]  }
  0xeb   :  { %v6524_v60 = vpop.f32.mrb[10].mxu0  ;;  %v8140_v22 = vadd.f32 %v8062_v30, %v167_v59  ;;  %6529 = vmatprep.subr.bf16.mxu0 %v7703_v56 }
  0xec   :  { %v170_v62 = vpop.f32.mrb[11].mxu0  ;;  %v8127_v16 = vadd.f32 %v6524_v60, %v8062_v30  ;;  %v229_v23 = vsel %vm198_vm2, %v8131_v18, 0.0  ;;  %v274_v27 = vmul.f32 %v8131_v18, %v8131_v18  ;;  %6530 = vmatpush3.bf16.msra.mxu0 %v7703_v56 }
  0xed   :  { %221 = vadd.xlane.f32.xlu1 %v220_v58  ;;  %v8137_v21 = vadd.f32 %v8062_v30, %v170_v62  ;;  %v223_v26 = vsel %vm198_vm2, %v8140_v22, 0.0  ;;  %v272_v33 = vmul.f32 %v8140_v22, %v8140_v22  ;;  %6531 = vmatprep.subr.bf16.mxu0 %v7704_v57 }
  0xee   :  { %218 = vadd.xlane.f32.xlu0 %v217_v0  ;;  %v232_v20 = vsel %vm198_vm2, %v8127_v16, 0.0  ;;  %v275_v25 = vmul.f32 %v8127_v16, %v8127_v16  ;;  %v310_v31 = vsel %vm198_vm2, %v274_v27, 0.0 }
  0xef   :  { %v226_v24 = vsel %vm198_vm2, %v8137_v21, 0.0  ;;  %v273_v29 = vmul.f32 %v8137_v21, %v8137_v21  ;;  %v304_v39 = vsel %vm198_vm2, %v272_v33, 0.0 }
  0xf0   :  { %v313_v28 = vsel %vm198_vm2, %v275_v25, 0.0  ;;  %6532 = vmatpush3.bf16.msra.mxu0 %v7704_v57 }
  0xf1   :  { %215 = vadd.xlane.f32.xlu1 %v214_v1  ;;  %v6527_v7 = vpop.f32.mrb[12].mxu0  ;;  %v307_v38 = vsel %vm198_vm2, %v273_v29, 0.0 }
  0xf2   :  { %212 = vadd.xlane.f32.xlu0 %v211_v4  ;;  %v183_v8 = vpop.f32.mrb[13].mxu0  ;;  %v8162_v37 = vadd.f32 %v6527_v7, %v8062_v30 }
  0xf3   :  { %v6528_v9 = vpop.f32.mrb[14].mxu0  ;;  %v8174_v44 = vadd.f32 %v8062_v30, %v183_v8 }
  0xf4   :  { %v186_v12 = vpop.f32.mrb[15].mxu0  ;;  %v8159_v35 = vadd.f32 %v6528_v9, %v8062_v30  ;;  %v241_v42 = vsel %vm198_vm2, %v8162_v37, 0.0  ;;  %v278_v51 = vmul.f32 %v8162_v37, %v8162_v37 }
  0xf5   :  { %302 = vadd.xlane.f32.xlu1 %v301_v10  ;;  %v8171_v43 = vadd.f32 %v8062_v30, %v186_v12  ;;  %v235_v47 = vsel %vm198_vm2, %v8174_v44, 0.0  ;;  %v276_v48 = vmul.f32 %v8174_v44, %v8174_v44 }
  0xf6   :  { %299 = vadd.xlane.f32.xlu0 %v298_v14  ;;  %v244_v40 = vsel %vm198_vm2, %v8159_v35, 0.0  ;;  %v279_v30 = vmul.f32 %v8159_v35, %v8159_v35  ;;  %v322_v54 = vsel %vm198_vm2, %v278_v51, 0.0 }
  0xf7   :  { %v238_v45 = vsel %vm198_vm2, %v8171_v43, 0.0  ;;  %v277_v46 = vmul.f32 %v8171_v43, %v8171_v43  ;;  %v316_v50 = vsel %vm198_vm2, %v276_v48, 0.0 }
  0xf8   :  { %v325_v52 = vsel %vm198_vm2, %v279_v30, 0.0  ;;  %v8220_v30 = vld [vmem:[%s10212_s4 + $0x2] ss:$0 sm:$0xff] }
  0xf9   :  { %296 = vadd.xlane.f32.xlu1 %v295_v17  ;;  %v319_v49 = vsel %vm198_vm2, %v277_v46, 0.0 }
  0xfa   :  { %293 = vadd.xlane.f32.xlu0 %v292_v19 }
  0xfd   :  { %233 = vadd.xlane.f32.xlu1 %v232_v20 }
  0xfe   :  { %230 = vadd.xlane.f32.xlu0 %v229_v23 }
 0x101   :  { %227 = vadd.xlane.f32.xlu1 %v226_v24 }
 0x102   :  { %224 = vadd.xlane.f32.xlu0 %v223_v26 }
 0x105   :  { %314 = vadd.xlane.f32.xlu1 %v313_v28 }
 0x106   :  { %311 = vadd.xlane.f32.xlu0 %v310_v31 }
 0x109   :  { %308 = vadd.xlane.f32.xlu1 %v307_v38 }
 0x10a   :  { %305 = vadd.xlane.f32.xlu0 %v304_v39  ;;  %v8209_v39 = vld [vmem:[%s10212_s4 + $0x1] ss:$0 sm:$0xff] }
 0x10d   :  { %245 = vadd.xlane.f32.xlu1 %v244_v40 }
 0x10e   :  { %242 = vadd.xlane.f32.xlu0 %v241_v42 }
 0x111   :  { %239 = vadd.xlane.f32.xlu1 %v238_v45 }
 0x112   :  { %236 = vadd.xlane.f32.xlu0 %v235_v47 }
 0x115   :  { %320 = vadd.xlane.f32.xlu1 %v319_v49 }
 0x116   :  { %317 = vadd.xlane.f32.xlu0 %v316_v50 }
 0x119   :  { %326 = vadd.xlane.f32.xlu1 %v325_v52 }
 0x11a   :  { %323 = vadd.xlane.f32.xlu0 %v322_v54 }
 0x16a   :  { %v207_v58 = vpop.xlane.xlu1 %206 }
 0x16b   :  { %v201_v59 = vpop.xlane.xlu0 %200  ;;  %v250_v60 = vmul.f32 0.03125, %v207_v58 }
 0x16c   :  { %v8198_v11 = vmul.f32 0.03125, %v201_v59 }
 0x16d   :  { %v346_v2 = vmul.f32 %v250_v60, %v250_v60  ;;  %v430_v48 = vsub.f32 %v8065_v32, %v250_v60 }
 0x16e   :  { %v210_v62 = vpop.xlane.xlu1 %209  ;;  %v344_v25 = vmul.f32 %v8198_v11, %v8198_v11 }
 0x16f   :  { %v251_v0 = vmul.f32 0.03125, %v210_v62  ;;  %v288_v1 = vpop.xlane.xlu0 %287 }
 0x170   :  { %v330_v4 = vmul.f32 0.03125, %v288_v1 }
 0x171   :  { %v347_v8 = vmul.f32 %v251_v0, %v251_v0  ;;  %v431_v32 = vsub.f32 %v8071_v36, %v251_v0 }
 0x172   :  { %v362_v5 = vsub.f32 %v330_v4, %v346_v2  ;;  %v291_v7 = vpop.xlane.xlu1 %290 }
 0x173   :  { %v331_v9 = vmul.f32 0.03125, %v291_v7  ;;  %v204_v10 = vpop.xlane.xlu0 %203 }
 0x174   :  { %v378_v12 = vadd.f32 1e-05, %v362_v5  ;;  %v8200_v14 = vmul.f32 0.03125, %v204_v10 }
 0x175   :  { %v363_v15 = vsub.f32 %v331_v9, %v347_v8 }
 0x176   :  { %7707 = vrsqrt.f32 %v378_v12  ;;  %v345_v17 = vmul.f32 %v8200_v14, %v8200_v14  ;;  %v285_v19 = vpop.xlane.xlu1 %284  ;;  %v429_v7 = vsub.f32 %v8080_v41, %v8200_v14 }
 0x177   :  { %v379_v20 = vadd.f32 1e-05, %v363_v15  ;;  %v329_v23 = vmul.f32 0.03125, %v285_v19  ;;  %v282_v24 = vpop.xlane.xlu0 %281 }
 0x178   :  { %v328_v26 = vmul.f32 0.03125, %v282_v24 }
 0x179   :  { %7709 = vrsqrt.f32 %v379_v20  ;;  %v361_v27 = vsub.f32 %v329_v23, %v345_v17 }
 0x17a   :  { %v360_v28 = vsub.f32 %v328_v26, %v344_v25  ;;  %v222_v29 = vpop.xlane.xlu1 %221  ;;  %v428_v25 = vsub.f32 %v8068_v34, %v8198_v11 }
 0x17b   :  { %v377_v31 = vadd.f32 1e-05, %v361_v27  ;;  %v219_v33 = vpop.xlane.xlu0 %218  ;;  %v8211_v42 = vmul.f32 0.03125, %v222_v29 }
 0x17c   :  { %v376_v38 = vadd.f32 1e-05, %v360_v28  ;;  %v8213_v47 = vmul.f32 0.03125, %v219_v33 }
 0x17d   :  { %7711 = vrsqrt.f32 %v377_v31  ;;  %v351_v56 = vmul.f32 %v8211_v42, %v8211_v42 }
 0x17e   :  { %7713 = vrsqrt.f32 %v376_v38  ;;  %v216_v40 = vpop.xlane.xlu1 %215  ;;  %v350_v62 = vmul.f32 %v8213_v47, %v8213_v47 }
 0x17f   :  { %v213_v45 = vpop.xlane.xlu0 %212  ;;  %v8222_v50 = vmul.f32 0.03125, %v216_v40 }
 0x180   :  { %v7708_v46 = vpop.eup %7707  ;;  %v8226_v57 = vmul.f32 0.03125, %v213_v45 }
 0x181   :  { %v414_v49 = vmul.f32 %v7708_v46, %v8209_v39  ;;  %v349_v8 = vmul.f32 %v8222_v50, %v8222_v50 }
 0x182   :  { %v303_v51 = vpop.xlane.xlu1 %302  ;;  %v348_v12 = vmul.f32 %v8226_v57, %v8226_v57 }
 0x183   :  { %v7710_v52 = vpop.eup %7709  ;;  %v446_v54 = vmul.f32 %v430_v48, %v414_v49  ;;  %v335_v58 = vmul.f32 0.03125, %v303_v51  ;;  %v300_v59 = vpop.xlane.xlu0 %299 }
 0x184   :  { %v415_v60 = vmul.f32 %v7710_v52, %v8209_v39  ;;  %v334_v1 = vmul.f32 0.03125, %v300_v59 }
 0x185   :  { %v8233_v2 = vadd.f32 %v8220_v30, %v446_v54  ;;  %v367_v4 = vsub.f32 %v335_v58, %v351_v56 }
 0x186   :  { %v447_v5 = vmul.f32 %v431_v32, %v415_v60  ;;  %v366_v9 = vsub.f32 %v334_v1, %v350_v62  ;;  %v297_v10 = vpop.xlane.xlu1 %296  ;;  %v435_v62 = vsub.f32 %v8095_v53, %v8211_v42 }
 0x187   :  { %v7712_v36 = vpop.eup %7711  ;;  %v5984_v0 = vmul.f32 -1.442695, %v8233_v2  ;;  %v383_v15 = vadd.f32 1e-05, %v367_v4  ;;  %v333_v17 = vmul.f32 0.03125, %v297_v10  ;;  %v294_v19 = vpop.xlane.xlu0 %293 }
 0x188   :  { %v7714_v20 = vpop.eup %7713  ;;  %v8243_v23 = vadd.f32 %v8220_v30, %v447_v5  ;;  %v413_v41 = vmul.f32 %v7712_v36, %v8209_v39  ;;  %v382_v14 = vadd.f32 1e-05, %v366_v9  ;;  %v332_v24 = vmul.f32 0.03125, %v294_v19 }
 0x189   :  { %7715 = vpow2.f32 %v5984_v0  ;;  %v412_v26 = vmul.f32 %v7714_v20, %v8209_v39  ;;  %v365_v27 = vsub.f32 %v333_v17, %v349_v8  ;;  %v434_v9 = vsub.f32 %v8099_v55, %v8213_v47 }
 0x18a   :  { %v5985_v28 = vmul.f32 -1.442695, %v8243_v23  ;;  %7717 = vrsqrt.f32 %v383_v15  ;;  %v364_v29 = vsub.f32 %v332_v24, %v348_v12  ;;  %v234_v31 = vpop.xlane.xlu1 %233  ;;  %v445_v33 = vmul.f32 %v429_v7, %v413_v41 }
 0x18b   :  { %7719 = vrsqrt.f32 %v382_v14  ;;  %v381_v38 = vadd.f32 1e-05, %v365_v27  ;;  %v231_v40 = vpop.xlane.xlu0 %230  ;;  %v444_v45 = vmul.f32 %v428_v25, %v412_v26  ;;  %v8257_v51 = vmul.f32 0.03125, %v234_v31 }
 0x18c   :  { %7721 = vpow2.f32 %v5985_v28  ;;  %v380_v46 = vadd.f32 1e-05, %v364_v29  ;;  %v8251_v48 = vadd.f32 %v8220_v30, %v445_v33  ;;  %v8260_v56 = vmul.f32 0.03125, %v231_v40 }
 0x18d   :  { %7723 = vrsqrt.f32 %v381_v38  ;;  %v8254_v34 = vadd.f32 %v8220_v30, %v444_v45  ;;  %v355_v1 = vmul.f32 %v8257_v51, %v8257_v51  ;;  %v433_v12 = vsub.f32 %v8105_v61, %v8222_v50 }
 0x18e   :  { %7725 = vrsqrt.f32 %v380_v46  ;;  %v228_v11 = vpop.xlane.xlu1 %227  ;;  %v5983_v49 = vmul.f32 -1.442695, %v8251_v48  ;;  %v354_v10 = vmul.f32 %v8260_v56, %v8260_v56  ;;  %v432_v45 = vsub.f32 %v8108_v63, %v8226_v57 }
 0x18f   :  { %v225_v52 = vpop.xlane.xlu0 %224  ;;  %v5982_v54 = vmul.f32 -1.442695, %v8254_v34  ;;  %v8262_v58 = vmul.f32 0.03125, %v228_v11 }
 0x190   :  { %7727 = vpow2.f32 %v5983_v49  ;;  %v8264_v59 = vmul.f32 0.03125, %v225_v52 }
 0x191   :  { %7729 = vpow2.f32 %v5982_v54  ;;  %v353_v42 = vmul.f32 %v8262_v58, %v8262_v58 }
 0x192   :  { %v315_v32 = vpop.xlane.xlu1 %314  ;;  %v352_v55 = vmul.f32 %v8264_v59, %v8264_v59 }
 0x193   :  { %v7716_v60 = vpop.eup %7715  ;;  %v339_v4 = vmul.f32 0.03125, %v315_v32  ;;  %v312_v5 = vpop.xlane.xlu0 %311 }
 0x194   :  { %v7718_v7 = vpop.eup %7717  ;;  %v530_v8 = vadd.f32 1.0, %v7716_v60  ;;  %v338_v36 = vmul.f32 0.03125, %v312_v5 }
 0x195   :  { %v7720_v0 = vpop.eup %7719  ;;  %v419_v53 = vmul.f32 %v7718_v7, %v8209_v39  ;;  %v371_v15 = vsub.f32 %v339_v4, %v355_v1 }
 0x196   :  { %v7722_v17 = vpop.eup %7721  ;;  %7731 = vrcp.f32 %v530_v8  ;;  %v418_v19 = vmul.f32 %v7720_v0, %v8209_v39  ;;  %v370_v47 = vsub.f32 %v338_v36, %v354_v10  ;;  %v309_v20 = vpop.xlane.xlu1 %308 }
 0x197   :  { %v7724_v41 = vpop.eup %7723  ;;  %v531_v14 = vadd.f32 1.0, %v7722_v17  ;;  %v387_v24 = vadd.f32 1e-05, %v371_v15  ;;  %v337_v25 = vmul.f32 0.03125, %v309_v20  ;;  %v306_v61 = vpop.xlane.xlu0 %305  ;;  %v451_v50 = vmul.f32 %v435_v62, %v419_v53 }
 0x198   :  { %v7726_v26 = vpop.eup %7725  ;;  %v417_v27 = vmul.f32 %v7724_v41, %v8209_v39  ;;  %v386_v28 = vadd.f32 1e-05, %v370_v47  ;;  %v336_v29 = vmul.f32 0.03125, %v306_v61  ;;  %v450_v31 = vmul.f32 %v434_v9, %v418_v19 }
 0x199   :  { %7733 = vrcp.f32 %v531_v14  ;;  %v416_v33 = vmul.f32 %v7726_v26, %v8209_v39  ;;  %v369_v38 = vsub.f32 %v337_v25, %v353_v42  ;;  %v8290_v62 = vadd.f32 %v8220_v30, %v451_v50 }
 0x19a   :  { %v7728_v40 = vpop.eup %7727  ;;  %7735 = vrsqrt.f32 %v387_v24  ;;  %v368_v46 = vsub.f32 %v336_v29, %v352_v55  ;;  %v246_v11 = vpop.xlane.xlu1 %245  ;;  %v449_v49 = vmul.f32 %v433_v12, %v417_v27  ;;  %v8287_v60 = vadd.f32 %v8220_v30, %v450_v31 }
 0x19b   :  { %v7730_v52 = vpop.eup %7729  ;;  %7737 = vrsqrt.f32 %v386_v28  ;;  %v385_v54 = vadd.f32 1e-05, %v369_v38  ;;  %v243_v32 = vpop.xlane.xlu0 %242  ;;  %v529_v5 = vadd.f32 1.0, %v7728_v40  ;;  %v448_v7 = vmul.f32 %v432_v45, %v416_v33 }
 0x19c   :  { %v384_v1 = vadd.f32 1e-05, %v368_v46  ;;  %v528_v4 = vadd.f32 1.0, %v7730_v52  ;;  %v8293_v63 = vadd.f32 %v8220_v30, %v449_v49  ;;  %v5988_v0 = vmul.f32 -1.442695, %v8287_v60 }
 0x19d   :  { %7739 = vrsqrt.f32 %v385_v54  ;;  %v8296_v8 = vadd.f32 %v8220_v30, %v448_v7  ;;  %v5989_v15 = vmul.f32 -1.442695, %v8290_v62  ;;  %v8306_v17 = vmul.f32 0.03125, %v246_v11 }
 0x19e   :  { %7741 = vrsqrt.f32 %v384_v1  ;;  %v240_v57 = vpop.xlane.xlu1 %239  ;;  %v5987_v36 = vmul.f32 -1.442695, %v8293_v63  ;;  %v8308_v47 = vmul.f32 0.03125, %v243_v32  ;;  %v439_v25 = vsub.f32 %v8127_v16, %v8257_v51 }
 0x19f   :  { %v8298_v9 = vmul.f32 0.03125, %v240_v57  ;;  %v237_v10 = vpop.xlane.xlu0 %236  ;;  %7743 = vrcp.f32 %v528_v4  ;;  %v5986_v42 = vmul.f32 -1.442695, %v8296_v8  ;;  %v438_v27 = vsub.f32 %v8131_v18, %v8260_v56 }
 0x1a0   :  { %v7732_v12 = vpop.eup %7731  ;;  %v8302_v53 = vmul.f32 0.03125, %v237_v10  ;;  %7745 = vrcp.f32 %v529_v5  ;;  %v437_v28 = vsub.f32 %v8137_v21, %v8262_v58  ;;  %v436_v33 = vsub.f32 %v8140_v22, %v8264_v59 }
 0x1a1   :  { %7747 = vpow2.f32 %v5987_v36  ;;  %v357_v20 = vmul.f32 %v8298_v9, %v8298_v9  ;;  %v359_v51 = vmul.f32 %v8306_v17, %v8306_v17  ;;  %v358_v18 = vmul.f32 %v8308_v47, %v8308_v47 }
 0x1a2   :  { %v321_v19 = vpop.xlane.xlu1 %320  ;;  %7749 = vpow2.f32 %v5986_v42  ;;  %v356_v61 = vmul.f32 %v8302_v53, %v8302_v53  ;;  %v578_v42 = vmul.f32 %v7732_v12, %v8233_v2 }
 0x1a3   :  { %v7734_v55 = vpop.eup %7733  ;;  %v341_v41 = vmul.f32 0.03125, %v321_v19  ;;  %v318_v14 = vpop.xlane.xlu0 %317  ;;  %7751 = vpow2.f32 %v5988_v0 }
 0x1a4   :  { %v7736_v24 = vpop.eup %7735  ;;  %v340_v50 = vmul.f32 0.03125, %v318_v14  ;;  %7753 = vpow2.f32 %v5989_v15  ;;  %v579_v58 = vmul.f32 %v7734_v55, %v8243_v23 }
 0x1a5   :  { %v7738_v26 = vpop.eup %7737  ;;  %v423_v29 = vmul.f32 %v7736_v24, %v8209_v39  ;;  %v373_v31 = vsub.f32 %v341_v41, %v357_v20 }
 0x1a6   :  { %v422_v16 = vmul.f32 %v7738_v26, %v8209_v39  ;;  %v372_v38 = vsub.f32 %v340_v50, %v356_v61  ;;  %v327_v40 = vpop.xlane.xlu1 %326  ;;  %v600_v2 = vpack.c.bf16 %v579_v58, %v578_v42  ;;  %v443_v58 = vsub.f32 %v8159_v35, %v8306_v17 }
 0x1a7   :  { %v7740_v45 = vpop.eup %7739  ;;  %v389_v56 = vadd.f32 1e-05, %v373_v31  ;;  %v343_v46 = vmul.f32 0.03125, %v327_v40  ;;  %v324_v21 = vpop.xlane.xlu0 %323  ;;  %v455_v4 = vmul.f32 %v439_v25, %v423_v29  ;;  %v440_v40 = vsub.f32 %v8174_v44, %v8302_v53 }
 0x1a8   :  { %v7742_v11 = vpop.eup %7741  ;;  %v421_v49 = vmul.f32 %v7740_v45, %v8209_v39  ;;  %v388_v22 = vadd.f32 1e-05, %v372_v38  ;;  %v342_v59 = vmul.f32 0.03125, %v324_v21  ;;  %v454_v52 = vmul.f32 %v438_v27, %v422_v16 }
 0x1a9   :  { %v7744_v54 = vpop.eup %7743  ;;  %v420_v32 = vmul.f32 %v7742_v11, %v8209_v39  ;;  %7755 = vrsqrt.f32 %v389_v56  ;;  %v375_v1 = vsub.f32 %v343_v46, %v359_v51  ;;  %v8344_v50 = vadd.f32 %v8220_v30, %v455_v4 }
 0x1aa   :  { %v7746_v5 = vpop.eup %7745  ;;  %7757 = vrsqrt.f32 %v388_v22  ;;  %v374_v7 = vsub.f32 %v342_v59, %v358_v18  ;;  %v576_v57 = vmul.f32 %v7744_v54, %v8254_v34  ;;  %v453_v10 = vmul.f32 %v437_v28, %v421_v49 }
 0x1ab   :  { %v7748_v36 = vpop.eup %7747  ;;  %v391_v23 = vadd.f32 1e-05, %v375_v1  ;;  %v577_v0 = vmul.f32 %v7746_v5, %v8251_v48  ;;  %v452_v15 = vmul.f32 %v436_v33, %v420_v32  ;;  %v8338_v14 = vadd.f32 %v8220_v30, %v454_v52 }
 0x1ac   :  { %v7750_v19 = vpop.eup %7749  ;;  %v390_v55 = vadd.f32 1e-05, %v374_v7  ;;  %v533_v20 = vadd.f32 1.0, %v7748_v36  ;;  %v8335_v41 = vadd.f32 %v8220_v30, %v453_v10  ;;  %v5993_v31 = vmul.f32 -1.442695, %v8344_v50 }
 0x1ad   :  { %v7752_v24 = vpop.eup %7751  ;;  %7759 = vrsqrt.f32 %v391_v23  ;;  %v599_v34 = vpack.c.bf16 %v577_v0, %v576_v57  ;;  %v532_v25 = vadd.f32 1.0, %v7750_v19  ;;  %v8341_v61 = vadd.f32 %v8220_v30, %v452_v15 }
 0x1ae   :  { %v7754_v48 = vpop.eup %7753  ;;  %7761 = vrsqrt.f32 %v390_v55  ;;  %v534_v12 = vadd.f32 1.0, %v7752_v24  ;;  %v5991_v28 = vmul.f32 -1.442695, %v8335_v41  ;;  %v5992_v29 = vmul.f32 -1.442695, %v8338_v14 }
 0x1af   :  { %6533 = vmatprep.mubr.msk.bf16.mxu0 %vm198_vm2, %v599_v34  ;;  %7763 = vrcp.f32 %v532_v25  ;;  %v535_v26 = vadd.f32 1.0, %v7754_v48  ;;  %v5990_v27 = vmul.f32 -1.442695, %v8341_v61  ;;  %v441_v51 = vsub.f32 %v8171_v43, %v8298_v9 }
 0x1b0   :  { %6534 = vmatmul.mubr.msk.bf16.vlgmr.msra.gmra.mrb[16].mxu0 %vm198_vm2, %v600_v2  ;;  %7765 = vrcp.f32 %v533_v20  ;;  %v442_v44 = vsub.f32 %v8162_v37, %v8308_v47 }
 0x1b1   :  { %7767 = vrcp.f32 %v534_v12 }
 0x1b2   :  { %7769 = vrcp.f32 %v535_v26 }
 0x1b3   :  { %v7756_v33 = vpop.eup %7755  ;;  %7771 = vpow2.f32 %v5990_v27 }
 0x1b4   :  { %v7758_v16 = vpop.eup %7757  ;;  %v425_v38 = vmul.f32 %v7756_v33, %v8209_v39  ;;  %7773 = vpow2.f32 %v5991_v28 }
 0x1b5   :  { %v424_v45 = vmul.f32 %v7758_v16, %v8209_v39  ;;  %7775 = vpow2.f32 %v5992_v29 }
 0x1b6   :  { %7777 = vpow2.f32 %v5993_v31  ;;  %v457_v18 = vmul.f32 %v441_v51, %v425_v38 }
 0x1b7   :  { %v7760_v56 = vpop.eup %7759  ;;  %v456_v46 = vmul.f32 %v440_v40, %v424_v45 }
 0x1b8   :  { %v7762_v21 = vpop.eup %7761  ;;  %v427_v11 = vmul.f32 %v7760_v56, %v8209_v39  ;;  %v8362_v43 = vadd.f32 %v8220_v30, %v457_v18 }
 0x1b9   :  { %v7764_v9 = vpop.eup %7763  ;;  %v426_v53 = vmul.f32 %v7762_v21, %v8209_v39  ;;  %v8368_v49 = vadd.f32 %v8220_v30, %v456_v46  ;;  %v8393_v21 = vld [vmem:[%s10212_s4 + $0x3] ss:$0 sm:$0xff] }
 0x1ba   :  { %v7766_v22 = vpop.eup %7765  ;;  %v580_v59 = vmul.f32 %v7764_v9, %v8296_v8  ;;  %v5995_v52 = vmul.f32 -1.442695, %v8362_v43  ;;  %v459_v35 = vmul.f32 %v443_v58, %v427_v11 }
 0x1bb   :  { %v7768_v17 = vpop.eup %7767  ;;  %v581_v54 = vmul.f32 %v7766_v22, %v8293_v63  ;;  %v5994_v32 = vmul.f32 -1.442695, %v8368_v49  ;;  %v458_v1 = vmul.f32 %v442_v44, %v426_v53 }
 0x1bc   :  { %v7770_v4 = vpop.eup %7769  ;;  %v582_v37 = vmul.f32 %v7768_v17, %v8287_v60  ;;  %7779 = vpow2.f32 %v5995_v52  ;;  %v479_v39 = vadd.f32 %v8220_v30, %v459_v35 }
 0x1bd   :  { %v7772_v47 = vpop.eup %7771  ;;  %v601_v5 = vpack.c.bf16 %v581_v54, %v580_v59  ;;  %v583_v7 = vmul.f32 %v7770_v4, %v8290_v62  ;;  %7781 = vpow2.f32 %v5994_v32  ;;  %v478_v8 = vadd.f32 %v8220_v30, %v458_v1 }
 0x1be   :  { %v7774_v57 = vpop.eup %7773  ;;  %v536_v10 = vadd.f32 1.0, %v7772_v47  ;;  %v5997_v19 = vmul.f32 -1.442695, %v479_v39 }
 0x1bf   :  { %v7776_v36 = vpop.eup %7775  ;;  %6537 = vmatprep.mubr.msk.bf16.mxu0 %vm198_vm2, %v601_v5  ;;  %v602_v63 = vpack.c.bf16 %v583_v7, %v582_v37  ;;  %v537_v23 = vadd.f32 1.0, %v7774_v57  ;;  %v5996_v42 = vmul.f32 -1.442695, %v478_v8 }
 0x1c0   :  { %v7778_v0 = vpop.eup %7777  ;;  %7783 = vrcp.f32 %v536_v10  ;;  %v538_v60 = vadd.f32 1.0, %v7776_v36 }
 0x1c1   :  { %6538 = vmatmul.mubr.msk.bf16.gmra.mrb[20].mxu0 %vm198_vm2, %v602_v63  ;;  %7785 = vrcp.f32 %v537_v23  ;;  %v539_v15 = vadd.f32 1.0, %v7778_v0 }
 0x1c2   :  { %7787 = vrcp.f32 %v538_v60 }
 0x1c3   :  { %7789 = vrcp.f32 %v539_v15 }
 0x1c4   :  { %7791 = vpow2.f32 %v5996_v42 }
 0x1c5   :  { %7793 = vpow2.f32 %v5997_v19 }
 0x1c6   :  { %v7780_v30 = vpop.eup %7779 }
 0x1c7   :  { %v7782_v62 = vpop.eup %7781  ;;  %v541_v55 = vadd.f32 1.0, %v7780_v30 }
 0x1c8   :  { %v540_v20 = vadd.f32 1.0, %v7782_v62 }
 0x1c9   :  { %7795 = vrcp.f32 %v541_v55 }
 0x1ca   :  { %v7784_v24 = vpop.eup %7783  ;;  %7797 = vrcp.f32 %v540_v20 }
 0x1cb   :  { %v7786_v34 = vpop.eup %7785  ;;  %v584_v25 = vmul.f32 %v7784_v24, %v8341_v61 }
 0x1cc   :  { %v7788_v48 = vpop.eup %7787  ;;  %v585_v2 = vmul.f32 %v7786_v34, %v8335_v41 }
 0x1cd   :  { %v7790_v12 = vpop.eup %7789  ;;  %v586_v26 = vmul.f32 %v7788_v48, %v8338_v14 }
 0x1ce   :  { %v7792_v27 = vpop.eup %7791  ;;  %v603_v28 = vpack.c.bf16 %v585_v2, %v584_v25  ;;  %v587_v29 = vmul.f32 %v7790_v12, %v8344_v50 }
 0x1cf   :  { %v7794_v31 = vpop.eup %7793  ;;  %v542_v33 = vadd.f32 1.0, %v7792_v27 }
 0x1d0   :  { %6541 = vmatprep.mubr.msk.bf16.mxu0 %vm198_vm2, %v603_v28  ;;  %v604_v16 = vpack.c.bf16 %v587_v29, %v586_v26  ;;  %v543_v51 = vadd.f32 1.0, %v7794_v31 }
 0x1d1   :  { %7799 = vrcp.f32 %v542_v33 }
 0x1d2   :  { %6542 = vmatmul.mubr.msk.bf16.gmra.mrb[24].mxu0 %vm198_vm2, %v604_v16  ;;  %7801 = vrcp.f32 %v543_v51 }
 0x1d3   :  { %v7796_v61 = vpop.eup %7795 }
 0x1d4   :  { %v7798_v38 = vpop.eup %7797  ;;  %v589_v41 = vmul.f32 %v7796_v61, %v8362_v43 }
 0x1d5   :  { %v588_v14 = vmul.f32 %v7798_v38, %v8368_v49 }
 0x1d7   :  { %v605_v40 = vpack.c.bf16 %v589_v41, %v588_v14 }
 0x1d9   :  { %6545 = vmatprep.mubr.msk.bf16.mxu0 %vm198_vm2, %v605_v40 }
 0x1db   :  { %v7800_v50 = vpop.eup %7799 }
 0x1dc   :  { %v7802_v45 = vpop.eup %7801  ;;  %v590_v18 = vmul.f32 %v7800_v50, %v478_v8 }
 0x1dd   :  { %v591_v56 = vmul.f32 %v7802_v45, %v479_v39 }
 0x1df   :  { %v606_v46 = vpack.c.bf16 %v591_v56, %v590_v18 }
 0x1e1   :  { %6546 = vmatmul.mubr.msk.bf16.gmra.mrb[28].mxu0 %vm198_vm2, %v606_v46 }
 0x283   :  { %v6535_v58 = vpop.f32.mrb[16].mxu0 }
 0x284   :  { %v8396_v11 = vadd.f32 %v6535_v58, %v8393_v21  ;;  %v681_v43 = vpop.f32.mrb[17].mxu0 }
 0x285   :  { %v6536_v9 = vpop.f32.mrb[18].mxu0  ;;  %v8399_v44 = vadd.f32 %v8393_v21, %v681_v43 }
 0x286   :  { %v8402_v53 = vadd.f32 %v6536_v9, %v8393_v21  ;;  %v684_v49 = vpop.f32.mrb[19].mxu0  ;;  %v750_v22 = vsel %vm198_vm2, %v8396_v11, 0.0  ;;  %v810_v17 = vmul.f32 %v8396_v11, %v8396_v11 }
 0x287   :  { %751 = vadd.xlane.f32.xlu0 %v750_v22  ;;  %v8407_v59 = vadd.f32 %v8393_v21, %v684_v49  ;;  %v744_v35 = vsel %vm198_vm2, %v8399_v44, 0.0  ;;  %v808_v4 = vmul.f32 %v8399_v44, %v8399_v44 }
 0x288   :  { %v753_v52 = vsel %vm198_vm2, %v8402_v53, 0.0  ;;  %v811_v32 = vmul.f32 %v8402_v53, %v8402_v53  ;;  %v830_v1 = vsel %vm198_vm2, %v810_v17, 0.0 }
 0x289   :  { %754 = vadd.xlane.f32.xlu1 %v753_v52  ;;  %v747_v54 = vsel %vm198_vm2, %v8407_v59, 0.0  ;;  %v809_v39 = vmul.f32 %v8407_v59, %v8407_v59  ;;  %v824_v47 = vsel %vm198_vm2, %v808_v4, 0.0 }
 0x28a   :  { %v833_v37 = vsel %vm198_vm2, %v811_v32, 0.0 }
 0x28b   :  { %745 = vadd.xlane.f32.xlu0 %v744_v35  ;;  %v827_v7 = vsel %vm198_vm2, %v809_v39, 0.0 }
 0x28d   :  { %748 = vadd.xlane.f32.xlu1 %v747_v54 }
 0x28f   :  { %831 = vadd.xlane.f32.xlu0 %v830_v1 }
 0x291   :  { %834 = vadd.xlane.f32.xlu1 %v833_v37 }
 0x293   :  { %825 = vadd.xlane.f32.xlu0 %v824_v47 }
 0x294   :  { %v6539_v5 = vpop.f32.mrb[20].mxu0 }
 0x295   :  { %v8428_v8 = vadd.f32 %v6539_v5, %v8393_v21  ;;  %v697_v57 = vpop.f32.mrb[21].mxu0  ;;  %828 = vadd.xlane.f32.xlu1 %v827_v7 }
 0x296   :  { %v6540_v10 = vpop.f32.mrb[22].mxu0  ;;  %v8431_v36 = vadd.f32 %v8393_v21, %v697_v57 }
 0x297   :  { %v8434_v63 = vadd.f32 %v6540_v10, %v8393_v21  ;;  %v700_v23 = vpop.f32.mrb[23].mxu0  ;;  %v762_v0 = vsel %vm198_vm2, %v8428_v8, 0.0  ;;  %v814_v19 = vmul.f32 %v8428_v8, %v8428_v8 }
 0x298   :  { %763 = vadd.xlane.f32.xlu0 %v762_v0  ;;  %v8439_v60 = vadd.f32 %v8393_v21, %v700_v23  ;;  %v756_v15 = vsel %vm198_vm2, %v8431_v36, 0.0  ;;  %v812_v20 = vmul.f32 %v8431_v36, %v8431_v36  ;;  %v7705_v23 = vld [vmem:[%s10213_s5] sm:$0xff]   ;;  %v7706_v0 = vld [vmem:[%s10213_s5 + $0x8] sm:$0xff]  }
 0x299   :  { %v765_v42 = vsel %vm198_vm2, %v8434_v63, 0.0  ;;  %v815_v62 = vmul.f32 %v8434_v63, %v8434_v63  ;;  %v842_v55 = vsel %vm198_vm2, %v814_v19, 0.0  ;;  %6549 = vmatprep.subr.bf16.mxu0 %v7705_v23 }
 0x29a   :  { %766 = vadd.xlane.f32.xlu1 %v765_v42  ;;  %v759_v30 = vsel %vm198_vm2, %v8439_v60, 0.0  ;;  %v813_v34 = vmul.f32 %v8439_v60, %v8439_v60  ;;  %v836_v25 = vsel %vm198_vm2, %v812_v20, 0.0  ;;  %6550 = vmatpush3.bf16.msra.mxu0 %v7705_v23  ;;  %v1304_v42 = vld [vmem:[%s10215_s7] sm:$0xff] }
 0x29b   :  { %v845_v24 = vsel %vm198_vm2, %v815_v62, 0.0  ;;  %6551 = vmatprep.subr.bf16.mxu0 %v7706_v0 }
 0x29c   :  { %757 = vadd.xlane.f32.xlu0 %v756_v15  ;;  %v839_v2 = vsel %vm198_vm2, %v813_v34, 0.0  ;;  %v8532_v15 = vand.u32 4294901760, %v1304_v42 }
 0x29e   :  { %760 = vadd.xlane.f32.xlu1 %v759_v30  ;;  %6552 = vmatpush3.bf16.msra.mxu0 %v7706_v0  ;;  %v8536_v19 = vsub.f32 %v1304_v42, %v8532_v15 }
 0x29f   :  { %6569 = vmatprep.subr.mxu0 %v8532_v15 }
 0x2a0   :  { %843 = vadd.xlane.f32.xlu0 %v842_v55  ;;  %10285 = vst [vmem:[#allocation7_spill] sm:$0xff] %v8536_v19  ;;  %v8539_v30 = vand.u32 4294901760, %v8536_v19 }
 0x2a2   :  { %846 = vadd.xlane.f32.xlu1 %v845_v24  ;;  %10286 = vst [vmem:[#allocation8_spill] sm:$0xff] %v8539_v30  ;;  %7361 = vmatprep.subr.mxu1 %v8539_v30 }
 0x2a3   :  { %7362 = vmatpush3.msra.mxu1 %v8539_v30 }
 0x2a4   :  { %837 = vadd.xlane.f32.xlu0 %v836_v25  ;;  %6699 = vmatprep.subr.mxu1 %v8532_v15 }
 0x2a5   :  { %v6543_v48 = vpop.f32.mrb[24].mxu0 }
 0x2a6   :  { %v8460_v12 = vadd.f32 %v6543_v48, %v8393_v21  ;;  %v713_v26 = vpop.f32.mrb[25].mxu0  ;;  %840 = vadd.xlane.f32.xlu1 %v839_v2  ;;  %v1294_v48 = vld [vmem:[%s10209_s1 + $0x30] sm:$0xff] }
 0x2a7   :  { %v6544_v27 = vpop.f32.mrb[26].mxu0  ;;  %v8463_v28 = vadd.f32 %v8393_v21, %v713_v26  ;;  %v8552_v26 = vsel %vm72_vm1, %v1294_v48, 0 }
 0x2a8   :  { %v8466_v29 = vadd.f32 %v6544_v27, %v8393_v21  ;;  %v716_v31 = vpop.f32.mrb[27].mxu0  ;;  %v774_v33 = vsel %vm198_vm2, %v8460_v12, 0.0  ;;  %v818_v38 = vmul.f32 %v8460_v12, %v8460_v12  ;;  %10287 = vst [vmem:[#allocation9_spill] sm:$0xff] %v8552_v26  ;;  %v1295_v27 = vld [vmem:[%s10209_s1 + $0x38] sm:$0xff] }
 0x2a9   :  { %775 = vadd.xlane.f32.xlu0 %v774_v33  ;;  %v8471_v16 = vadd.f32 %v8393_v21, %v716_v31  ;;  %v768_v61 = vsel %vm198_vm2, %v8463_v28, 0.0  ;;  %v816_v50 = vmul.f32 %v8463_v28, %v8463_v28 }
 0x2aa   :  { %v777_v51 = vsel %vm198_vm2, %v8466_v29, 0.0  ;;  %v819_v14 = vmul.f32 %v8466_v29, %v8466_v29  ;;  %v854_v40 = vsel %vm198_vm2, %v818_v38, 0.0 }
 0x2ab   :  { %778 = vadd.xlane.f32.xlu1 %v777_v51  ;;  %v771_v41 = vsel %vm198_vm2, %v8471_v16, 0.0  ;;  %v817_v18 = vmul.f32 %v8471_v16, %v8471_v16  ;;  %v848_v46 = vsel %vm198_vm2, %v816_v50, 0.0 }
 0x2ac   :  { %v857_v45 = vsel %vm198_vm2, %v819_v14, 0.0 }
 0x2ad   :  { %769 = vadd.xlane.f32.xlu0 %v768_v61  ;;  %v851_v49 = vsel %vm198_vm2, %v817_v18, 0.0  ;;  %v1296_v18 = vld [vmem:[%s10209_s1 + $0x40] sm:$0xff] }
 0x2af   :  { %772 = vadd.xlane.f32.xlu1 %v771_v41  ;;  %v8564_v41 = vand.u32 4294901760, %v8552_v26 }
 0x2b1   :  { %855 = vadd.xlane.f32.xlu0 %v854_v40  ;;  %6684 = vmatprep.mubr.f32.mxu1 %v8564_v41 }
 0x2b3   :  { %858 = vadd.xlane.f32.xlu1 %v857_v45  ;;  %v8569_v45 = vsel %vm72_vm1, %v1295_v27, 0 }
 0x2b4   :  { %v6547_v56 = vpop.f32.mrb[28].mxu0  ;;  %10288 = vst [vmem:[#allocation10_spill] sm:$0xff] %v8569_v45 }
 0x2b5   :  { %v8491_v58 = vadd.f32 %v6547_v56, %v8393_v21  ;;  %849 = vadd.xlane.f32.xlu0 %v848_v46  ;;  %v729_v43 = vpop.f32.mrb[29].mxu0  ;;  %v8575_v46 = vand.u32 4294901760, %v8569_v45 }
 0x2b6   :  { %v6548_v9 = vpop.f32.mrb[30].mxu0  ;;  %v8500_v17 = vadd.f32 %v8393_v21, %v729_v43  ;;  %v8578_v43 = vsel %vm72_vm1, %v1296_v18, 0 }
 0x2b7   :  { %v8495_v22 = vadd.f32 %v6548_v9, %v8393_v21  ;;  %852 = vadd.xlane.f32.xlu1 %v851_v49  ;;  %v732_v52 = vpop.f32.mrb[31].mxu0  ;;  %v786_v35 = vsel %vm198_vm2, %v8491_v58, 0.0  ;;  %10289 = vst [vmem:[#allocation11_spill] sm:$0xff] %v8578_v43  ;;  %6685 = vmatmul.mubr.f32.vlgmr.msra.gmra.mrb[0].mxu1 %v8575_v46 }
 0x2b8   :  { %v8505_v32 = vadd.f32 %v8393_v21, %v732_v52  ;;  %v780_v1 = vsel %vm198_vm2, %v8500_v17, 0.0  ;;  %v820_v4 = vmul.f32 %v8500_v17, %v8500_v17  ;;  %v822_v21 = vmul.f32 %v8491_v58, %v8491_v58  ;;  %6700 = vmatpush3.msra.mxu1 %v8532_v15 }
 0x2b9   :  { %787 = vadd.xlane.f32.xlu0 %v786_v35  ;;  %v789_v54 = vsel %vm198_vm2, %v8495_v22, 0.0  ;;  %v823_v7 = vmul.f32 %v8495_v22, %v8495_v22 }
 0x2ba   :  { %v783_v37 = vsel %vm198_vm2, %v8505_v32, 0.0  ;;  %v821_v39 = vmul.f32 %v8505_v32, %v8505_v32  ;;  %v860_v47 = vsel %vm198_vm2, %v820_v4, 0.0  ;;  %v866_v57 = vsel %vm198_vm2, %v822_v21, 0.0 }
 0x2bb   :  { %790 = vadd.xlane.f32.xlu1 %v789_v54  ;;  %v869_v10 = vsel %vm198_vm2, %v823_v7, 0.0  ;;  %v8586_v4 = vand.u32 4294901760, %v8578_v43 }
 0x2bc   :  { %v863_v5 = vsel %vm198_vm2, %v821_v39, 0.0 }
 0x2bd   :  { %781 = vadd.xlane.f32.xlu0 %v780_v1  ;;  %10290 = vst [vmem:[#allocation12_spill] sm:$0xff] %v8586_v4  ;;  %6687 = vmatprep.mubr.f32.mxu1 %v8586_v4 }
 0x2bf   :  { %784 = vadd.xlane.f32.xlu1 %v783_v37  ;;  %v1297_v37 = vld [vmem:[%s10209_s1 + $0x48] sm:$0xff] }
 0x2c0   :  { %v8598_v23 = vsel %vm72_vm1, %v1297_v37, 0 }
 0x2c1   :  { %861 = vadd.xlane.f32.xlu0 %v860_v47  ;;  %10291 = vst [vmem:[#allocation13_spill] sm:$0xff] %v8598_v23 }
 0x2c3   :  { %864 = vadd.xlane.f32.xlu1 %v863_v5  ;;  %v1298_v5 = vld [vmem:[%s10209_s1 + $0x50] sm:$0xff] }
 0x2c5   :  { %867 = vadd.xlane.f32.xlu0 %v866_v57 }
 0x2c7   :  { %870 = vadd.xlane.f32.xlu1 %v869_v10 }
 0x314   :  { %v752_v62 = vpop.xlane.xlu0 %751 }
 0x315   :  { %v8544_v24 = vmul.f32 0.03125, %v752_v62  ;;  %v8601_v62 = vand.u32 4294901760, %v8598_v23 }
 0x316   :  { %v755_v55 = vpop.xlane.xlu1 %754 }
 0x317   :  { %v8546_v25 = vmul.f32 0.03125, %v755_v55  ;;  %v890_v31 = vmul.f32 %v8544_v24, %v8544_v24  ;;  %v8604_v55 = vsel %vm72_vm1, %v1298_v5, 0  ;;  %6688 = vmatmul.mubr.f32.gmra.mrb[2].mxu1 %v8601_v62 }
 0x318   :  { %v746_v20 = vpop.xlane.xlu0 %745  ;;  %10292 = vst [vmem:[#allocation14_spill] sm:$0xff] %v8604_v55  ;;  %v8610_v48 = vand.u32 4294901760, %v8604_v55 }
 0x319   :  { %v8559_v33 = vmul.f32 0.03125, %v746_v20  ;;  %v891_v14 = vmul.f32 %v8546_v25, %v8546_v25  ;;  %v1299_v20 = vld [vmem:[%s10209_s1 + $0x58] sm:$0xff] }
 0x31a   :  { %v749_v34 = vpop.xlane.xlu1 %748  ;;  %6690 = vmatprep.mubr.f32.mxu1 %v8610_v48 }
 0x31b   :  { %v8561_v61 = vmul.f32 0.03125, %v749_v34  ;;  %v888_v9 = vmul.f32 %v8559_v33, %v8559_v33 }
 0x31c   :  { %v832_v2 = vpop.xlane.xlu0 %831 }
 0x31d   :  { %v874_v51 = vmul.f32 0.03125, %v832_v2  ;;  %v889_v54 = vmul.f32 %v8561_v61, %v8561_v61  ;;  %v1300_v2 = vld [vmem:[%s10209_s1 + $0x60] sm:$0xff] }
 0x31e   :  { %v835_v38 = vpop.xlane.xlu1 %834 }
 0x31f   :  { %v906_v40 = vsub.f32 %v874_v51, %v890_v31  ;;  %v875_v50 = vmul.f32 0.03125, %v835_v38  ;;  %v8619_v31 = vsel %vm72_vm1, %v1299_v20, 0  ;;  %v8624_v51 = vld [vmem:[%s10212_s4 + $0x4] ss:$0 sm:$0xff] }
 0x320   :  { %v826_v56 = vpop.xlane.xlu0 %825  ;;  %10293 = vst [vmem:[#allocation15_spill] sm:$0xff] %v8619_v31 }
 0x321   :  { %v922_v49 = vadd.f32 1e-05, %v906_v40  ;;  %v907_v52 = vsub.f32 %v875_v50, %v891_v14  ;;  %v872_v35 = vmul.f32 0.03125, %v826_v56  ;;  %v8627_v14 = vand.u32 4294901760, %v8619_v31 }
 0x322   :  { %v829_v1 = vpop.xlane.xlu1 %828  ;;  %v8631_v40 = vsel %vm72_vm1, %v1300_v2, 0 }
 0x323   :  { %7803 = vrsqrt.f32 %v922_v49  ;;  %v923_v39 = vadd.f32 1e-05, %v907_v52  ;;  %v904_v47 = vsub.f32 %v872_v35, %v888_v9  ;;  %v873_v21 = vmul.f32 0.03125, %v829_v1  ;;  %10294 = vst [vmem:[#allocation16_spill] sm:$0xff] %v8631_v40  ;;  %6691 = vmatmul.mubr.f32.gmra.mrb[4].mxu1 %v8627_v14 }
 0x324   :  { %v8638_v49 = vand.u32 4294901760, %v8631_v40  ;;  %v974_v52 = vsub.f32 %v8396_v11, %v8544_v24 }
 0x325   :  { %7805 = vrsqrt.f32 %v923_v39  ;;  %v920_v7 = vadd.f32 1e-05, %v904_v47  ;;  %v905_v57 = vsub.f32 %v873_v21, %v889_v54  ;;  %v764_v10 = vpop.xlane.xlu0 %763  ;;  %v975_v39 = vsub.f32 %v8402_v53, %v8546_v25  ;;  %v8651_v47 = vld [vmem:[%s10212_s4 + $0x5] ss:$0 sm:$0xff] }
 0x326   :  { %v8616_v27 = vmul.f32 0.03125, %v764_v10  ;;  %6693 = vmatprep.mubr.f32.mxu1 %v8638_v49  ;;  %v1301_v10 = vld [vmem:[%s10209_s1 + $0x68] sm:$0xff]  ;;  %v972_v25 = vsub.f32 %v8399_v44, %v8559_v33 }
 0x327   :  { %7807 = vrsqrt.f32 %v920_v7  ;;  %v921_v0 = vadd.f32 1e-05, %v905_v57  ;;  %v767_v42 = vpop.xlane.xlu1 %766 }
 0x328   :  { %v8633_v18 = vmul.f32 0.03125, %v767_v42  ;;  %v894_v54 = vmul.f32 %v8616_v27, %v8616_v27 }
 0x329   :  { %7809 = vrsqrt.f32 %v921_v0  ;;  %v758_v34 = vpop.xlane.xlu0 %757  ;;  %v973_v0 = vsub.f32 %v8407_v59, %v8561_v61 }
 0x32a   :  { %v8635_v56 = vmul.f32 0.03125, %v758_v34  ;;  %v895_v42 = vmul.f32 %v8633_v18, %v8633_v18 }
 0x32b   :  { %v761_v38 = vpop.xlane.xlu1 %760 }
 0x32c   :  { %v8653_v21 = vmul.f32 0.03125, %v761_v38  ;;  %v892_v20 = vmul.f32 %v8635_v56, %v8635_v56 }
 0x32d   :  { %v7804_v50 = vpop.eup %7803  ;;  %v844_v9 = vpop.xlane.xlu0 %843 }
 0x32e   :  { %v958_v35 = vmul.f32 %v7804_v50, %v8624_v51  ;;  %v878_v1 = vmul.f32 0.03125, %v844_v9  ;;  %v893_v44 = vmul.f32 %v8653_v21, %v8653_v21  ;;  %v977_v43 = vsub.f32 %v8439_v60, %v8653_v21 }
 0x32f   :  { %v7806_v37 = vpop.eup %7805  ;;  %v847_v5 = vpop.xlane.xlu1 %846 }
 0x330   :  { %v990_v11 = vmul.f32 %v974_v52, %v958_v35  ;;  %v959_v24 = vmul.f32 %v7806_v37, %v8624_v51  ;;  %v910_v7 = vsub.f32 %v878_v1, %v894_v54  ;;  %v879_v57 = vmul.f32 0.03125, %v847_v5 }
 0x331   :  { %v7808_v53 = vpop.eup %7807  ;;  %v838_v34 = vpop.xlane.xlu0 %837  ;;  %v8675_v35 = vsel %vm72_vm1, %v1301_v10, 0  ;;  %v1288_v10 = vld [vmem:[%s10209_s1] sm:$0xff] }
 0x332   :  { %v8669_v2 = vadd.f32 %v8651_v47, %v990_v11  ;;  %v991_v38 = vmul.f32 %v975_v39, %v959_v24  ;;  %v956_v50 = vmul.f32 %v7808_v53, %v8624_v51  ;;  %v926_v9 = vadd.f32 1e-05, %v910_v7  ;;  %10295 = vst [vmem:[#allocation17_spill] sm:$0xff] %v8675_v35 }
 0x333   :  { %v7810_v52 = vpop.eup %7809  ;;  %v911_v33 = vsub.f32 %v879_v57, %v895_v42  ;;  %v876_v59 = vmul.f32 0.03125, %v838_v34  ;;  %v841_v61 = vpop.xlane.xlu1 %840 }
 0x334   :  { %v6013_v54 = vmul.f32 -1.442695, %v8669_v2  ;;  %v8679_v1 = vadd.f32 %v8651_v47, %v991_v38  ;;  %v957_v37 = vmul.f32 %v7810_v52, %v8624_v51  ;;  %7811 = vrsqrt.f32 %v926_v9  ;;  %v1302_v52 = vld [vmem:[%s10209_s1 + $0x70] sm:$0xff] }
 0x335   :  { %v927_v39 = vadd.f32 1e-05, %v911_v33  ;;  %v908_v5 = vsub.f32 %v876_v59, %v892_v20  ;;  %v877_v11 = vmul.f32 0.03125, %v841_v61  ;;  %v988_v24 = vmul.f32 %v972_v25, %v956_v50  ;;  %v1289_v25 = vld [vmem:[%s10209_s1 + $0x8] sm:$0xff]  ;;  %v1291_v59 = vld [vmem:[%s10209_s1 + $0x18] sm:$0xff] }
 0x336   :  { %7813 = vpow2.f32 %v6013_v54  ;;  %v6014_v7 = vmul.f32 -1.442695, %v8679_v1  ;;  %v776_v57 = vpop.xlane.xlu0 %775  ;;  %v989_v53 = vmul.f32 %v973_v0, %v957_v37  ;;  %v1290_v0 = vld [vmem:[%s10209_s1 + $0x10] sm:$0xff]  ;;  %v8699_v50 = vand.u32 4294901760, %v8675_v35  ;;  %v1303_v61 = vld [vmem:[%s10209_s1 + $0x78] sm:$0xff] }
 0x337   :  { %7815 = vrsqrt.f32 %v927_v39  ;;  %v924_v42 = vadd.f32 1e-05, %v908_v5  ;;  %v909_v34 = vsub.f32 %v877_v11, %v893_v44  ;;  %v8687_v9 = vadd.f32 %v8651_v47, %v988_v24  ;;  %v1292_v11 = vld [vmem:[%s10209_s1 + $0x20] sm:$0xff] }
 0x338   :  { %7817 = vpow2.f32 %v6014_v7  ;;  %v779_v38 = vpop.xlane.xlu1 %778  ;;  %v8690_v20 = vadd.f32 %v8651_v47, %v989_v53  ;;  %v8705_v33 = vsel %vm72_vm1, %v1288_v10, 0  ;;  %v8713_v54 = vmul.f32 0.03125, %v776_v57  ;;  %6694 = vmatmul.mubr.f32.gmra.mrb[6].mxu1 %v8699_v50 }
 0x339   :  { %7819 = vrsqrt.f32 %v924_v42  ;;  %v925_v44 = vadd.f32 1e-05, %v909_v34  ;;  %v6011_v39 = vmul.f32 -1.442695, %v8687_v9  ;;  %v8722_v24 = vsel %vm72_vm1, %v1289_v25, 0 }
 0x33a   :  { %v770_v37 = vpop.xlane.xlu0 %769  ;;  %v6012_v5 = vmul.f32 -1.442695, %v8690_v20  ;;  %10296 = vst [vmem:[#allocation18_spill] sm:$0xff] %v8722_v24  ;;  %v8725_v7 = vsel %vm72_vm1, %v1290_v0, 0  ;;  %v8728_v57 = vsel %vm72_vm1, %v1302_v52, 0  ;;  %v8731_v10 = vand.u32 4294901760, %v8705_v33 }
 0x33b   :  { %7821 = vrsqrt.f32 %v925_v44  ;;  %10297 = vst [vmem:[#allocation19_spill] sm:$0xff] %v8725_v7  ;;  %10298 = vst [vmem:[#allocation20_spill] sm:$0xff] %v8728_v57  ;;  %v8734_v42 = vsel %vm72_vm1, %v1303_v61, 0  ;;  %v8736_v34 = vmul.f32 0.03125, %v779_v38  ;;  %v8739_v25 = vsel %vm72_vm1, %v1291_v59, 0 }
 0x33c   :  { %v773_v53 = vpop.xlane.xlu1 %772  ;;  %7823 = vpow2.f32 %v6011_v39  ;;  %10299 = vst [vmem:[#allocation21_spill] sm:$0xff] %v8734_v42  ;;  %10300 = vst [vmem:[#allocation22_spill] sm:$0xff] %v8739_v25  ;;  %v8742_v0 = vsel %vm72_vm1, %v1292_v11, 0  ;;  %v898_v52 = vmul.f32 %v8713_v54, %v8713_v54  ;;  %v8747_v6 = vand.u32 4294901760, %v8722_v24 }
 0x33d   :  { %7825 = vpow2.f32 %v6012_v5  ;;  %10301 = vst [vmem:[#allocation23_spill] sm:$0xff] %v8742_v0  ;;  %v8750_v61 = vand.u32 4294901760, %v8725_v7  ;;  %v8753_v38 = vand.u32 4294901760, %v8728_v57  ;;  %v8756_v5 = vmul.f32 0.03125, %v770_v37 }
 0x33e   :  { %v7812_v44 = vpop.eup %7811  ;;  %v856_v39 = vpop.xlane.xlu0 %855  ;;  %v8759_v13 = vand.u32 4294901760, %v8734_v42  ;;  %v978_v35 = vsub.f32 %v8428_v8, %v8616_v27  ;;  %v8763_v40 = vmul.f32 0.03125, %v773_v53  ;;  %v8766_v55 = vand.u32 4294901760, %v8739_v25 }
 0x33f   :  { %v962_v59 = vmul.f32 %v7812_v44, %v8624_v51  ;;  %v882_v11 = vmul.f32 0.03125, %v856_v39  ;;  %v8769_v57 = vand.u32 4294901760, %v8742_v0  ;;  %6696 = vmatprep.mubr.f32.mxu1 %v8753_v38  ;;  %v899_v39 = vmul.f32 %v8736_v34, %v8736_v34 }
 0x340   :  { %v7814_v3 = vpop.eup %7813  ;;  %v859_v31 = vpop.xlane.xlu1 %858  ;;  %6697 = vmatmul.mubr.f32.gmra.mrb[8].mxu1 %v8759_v13  ;;  %v979_v27 = vsub.f32 %v8434_v63, %v8633_v18  ;;  %v976_v53 = vsub.f32 %v8431_v36, %v8635_v56  ;;  %v897_v36 = vmul.f32 %v8763_v40, %v8763_v40  ;;  %v1293_v56 = vld [vmem:[%s10209_s1 + $0x28] sm:$0xff] }
 0x341   :  { %v7816_v37 = vpop.eup %7815  ;;  %v1074_v44 = vadd.f32 1.0, %v7814_v3  ;;  %v914_v42 = vsub.f32 %v882_v11, %v898_v52  ;;  %v883_v23 = vmul.f32 0.03125, %v859_v31  ;;  %6701 = vmatprep.mubr.f32.mxu1 %v8731_v10  ;;  %v896_v31 = vmul.f32 %v8756_v5, %v8756_v5 }
 0x342   :  { %v7818_v8 = vpop.eup %7817  ;;  %v963_v45 = vmul.f32 %v7816_v37, %v8624_v51  ;;  %v850_v3 = vpop.xlane.xlu0 %849  ;;  %v994_v0 = vmul.f32 %v978_v35, %v962_v59 }
 0x343   :  { %v7820_v26 = vpop.eup %7819  ;;  %v930_v52 = vadd.f32 1e-05, %v914_v42  ;;  %v915_v11 = vsub.f32 %v883_v23, %v899_v39  ;;  %7827 = vrcp.f32 %v1074_v44  ;;  %v880_v18 = vmul.f32 0.03125, %v850_v3 }
 0x344   :  { %v960_v63 = vmul.f32 %v7820_v26, %v8624_v51  ;;  %v853_v60 = vpop.xlane.xlu1 %852  ;;  %v1075_v37 = vadd.f32 1.0, %v7818_v8  ;;  %v995_v24 = vmul.f32 %v979_v27, %v963_v45  ;;  %6702 = vmatmul.mubr.f32.vlgmr.msra.gmra.mrb[10].mxu1 %v8747_v6  ;;  %v8795_v3 = vadd.f32 %v8651_v47, %v994_v0 }
 0x345   :  { %v7822_v21 = vpop.eup %7821  ;;  %v931_v25 = vadd.f32 1e-05, %v915_v11  ;;  %v881_v7 = vmul.f32 0.03125, %v853_v60  ;;  %7829 = vrsqrt.f32 %v930_v52  ;;  %v912_v26 = vsub.f32 %v880_v18, %v896_v31  ;;  %6704 = vmatprep.mubr.f32.mxu1 %v8750_v61 }
 0x346   :  { %v7824_v23 = vpop.eup %7823  ;;  %v961_v35 = vmul.f32 %v7822_v21, %v8624_v51  ;;  %v788_v42 = vpop.xlane.xlu0 %787  ;;  %v992_v59 = vmul.f32 %v976_v53, %v960_v63  ;;  %v8798_v8 = vsel %vm72_vm1, %v1293_v56, 0  ;;  %v8809_v63 = vadd.f32 %v8651_v47, %v995_v24 }
 0x347   :  { %v7826_v44 = vpop.eup %7825  ;;  %7831 = vrsqrt.f32 %v931_v25  ;;  %v913_v39 = vsub.f32 %v881_v7, %v897_v36  ;;  %v928_v45 = vadd.f32 1e-05, %v912_v26  ;;  %v1072_v11 = vadd.f32 1.0, %v7824_v23 }
 0x348   :  { %v791_v27 = vpop.xlane.xlu1 %790  ;;  %v993_v60 = vmul.f32 %v977_v43, %v961_v35  ;;  %v8801_v52 = vadd.f32 %v8651_v47, %v992_v59  ;;  %7833 = vrcp.f32 %v1075_v37  ;;  %v1073_v31 = vadd.f32 1.0, %v7826_v44  ;;  %6705 = vmatmul.mubr.f32.gmra.mrb[12].mxu1 %v8766_v55 }
 0x349   :  { %v929_v53 = vadd.f32 1e-05, %v913_v39  ;;  %7835 = vrsqrt.f32 %v928_v45  ;;  %6707 = vmatprep.mubr.f32.mxu1 %v8769_v57  ;;  %v8815_v36 = vand.u32 4294901760, %v8798_v8  ;;  %v6017_v21 = vmul.f32 -1.442695, %v8795_v3 }
 0x34a   :  { %v782_v7 = vpop.xlane.xlu0 %781  ;;  %v8805_v25 = vadd.f32 %v8651_v47, %v993_v60  ;;  %v6015_v0 = vmul.f32 -1.442695, %v8801_v52  ;;  %v6018_v24 = vmul.f32 -1.442695, %v8809_v63  ;;  %v8823_v35 = vmul.f32 0.03125, %v788_v42 }
 0x34b   :  { %7837 = vrsqrt.f32 %v929_v53  ;;  %v8812_v43 = vmul.f32 0.03125, %v782_v7  ;;  %v1583_v59 = vsub.f32 %v8536_v19, %v8539_v30 }
 0x34c   :  { %v785_v18 = vpop.xlane.xlu1 %784  ;;  %7839 = vrcp.f32 %v1072_v11  ;;  %v6016_v56 = vmul.f32 -1.442695, %v8805_v25  ;;  %6708 = vmatmul.mubr.f32.gmra.mrb[14].mxu1 %v8815_v36  ;;  %v8830_v11 = vmul.f32 0.03125, %v791_v27  ;;  %v983_v27 = vsub.f32 %v8466_v29, %v8736_v34 }
 0x34d   :  { %v8819_v37 = vmul.f32 0.03125, %v785_v18  ;;  %7841 = vrcp.f32 %v1073_v31  ;;  %v7828_v23 = vpop.eup %7827  ;;  %6710 = vmatprep.mubr.f32.mxu1 %v8564_v41  ;;  %v900_v44 = vmul.f32 %v8812_v43, %v8812_v43  ;;  %v982_v18 = vsub.f32 %v8460_v12, %v8713_v54 }
 0x34e   :  { %v862_v26 = vpop.xlane.xlu0 %861  ;;  %7843 = vpow2.f32 %v6015_v0  ;;  %v8842_v30 = vand.u32 4294901760, %v1583_v59  ;;  %v980_v12 = vsub.f32 %v8463_v28, %v8756_v5  ;;  %v981_v29 = vsub.f32 %v8471_v16, %v8763_v40 }
 0x34f   :  { %v884_v39 = vmul.f32 0.03125, %v862_v26  ;;  %7845 = vpow2.f32 %v6016_v56  ;;  %v7830_v45 = vpop.eup %7829  ;;  %v901_v60 = vmul.f32 %v8819_v37, %v8819_v37  ;;  %v902_v56 = vmul.f32 %v8823_v35, %v8823_v35 }
 0x350   :  { %v865_v42 = vpop.xlane.xlu1 %864  ;;  %7847 = vpow2.f32 %v6017_v21  ;;  %v966_v31 = vmul.f32 %v7830_v45, %v8624_v51  ;;  %6711 = vmatmul.mubr.f32.gmra.mrb[0].mxu1 %v8575_v46  ;;  %v903_v54 = vmul.f32 %v8830_v11, %v8830_v11  ;;  %v1122_v5 = vmul.f32 %v7828_v23, %v8669_v2 }
 0x351   :  { %v7832_v53 = vpop.eup %7831  ;;  %v916_v7 = vsub.f32 %v884_v39, %v900_v44  ;;  %v885_v0 = vmul.f32 0.03125, %v865_v42  ;;  %7849 = vpow2.f32 %v6018_v24  ;;  %6713 = vmatprep.mubr.f32.mxu1 %v8586_v4 }
 0x352   :  { %v868_v26 = vpop.xlane.xlu0 %867  ;;  %v7834_v21 = vpop.eup %7833  ;;  %v967_v44 = vmul.f32 %v7832_v53, %v8624_v51  ;;  %v998_v59 = vmul.f32 %v982_v18, %v966_v31 }
 0x353   :  { %v932_v24 = vadd.f32 1e-05, %v916_v7  ;;  %v917_v39 = vsub.f32 %v885_v0, %v901_v60  ;;  %v886_v45 = vmul.f32 0.03125, %v868_v26  ;;  %v7836_v42 = vpop.eup %7835  ;;  %v1123_v16 = vmul.f32 %v7834_v21, %v8679_v1 }
 0x354   :  { %v871_v34 = vpop.xlane.xlu1 %870  ;;  %v964_v4 = vmul.f32 %v7836_v42, %v8624_v51  ;;  %6714 = vmatmul.mubr.f32.gmra.mrb[2].mxu1 %v8601_v62  ;;  %v999_v26 = vmul.f32 %v983_v27, %v967_v44  ;;  %v8864_v1 = vadd.f32 %v8651_v47, %v998_v59 }
 0x355   :  { %v7838_v19 = vpop.eup %7837  ;;  %7851 = vrsqrt.f32 %v932_v24  ;;  %v933_v53 = vadd.f32 1e-05, %v917_v39  ;;  %v918_v7 = vsub.f32 %v886_v45, %v902_v56  ;;  %v887_v28 = vmul.f32 0.03125, %v871_v34  ;;  %6716 = vmatprep.mubr.f32.mxu1 %v8610_v48 }
 0x356   :  { %v7840_v60 = vpop.eup %7839  ;;  %v965_v0 = vmul.f32 %v7838_v19, %v8624_v51  ;;  %v996_v18 = vmul.f32 %v980_v12, %v964_v4  ;;  %v1137_v44 = vpack.c.bf16 %v1123_v16, %v1122_v5 }
 0x357   :  { %v7842_v40 = vpop.eup %7841  ;;  %7853 = vrsqrt.f32 %v933_v53  ;;  %v934_v31 = vadd.f32 1e-05, %v918_v7  ;;  %v919_v39 = vsub.f32 %v887_v28, %v903_v54  ;;  %v1120_v56 = vmul.f32 %v7840_v60, %v8687_v9 }
 0x358   :  { %v7844_v24 = vpop.eup %7843  ;;  %v1121_v45 = vmul.f32 %v7842_v40, %v8690_v20  ;;  %v997_v42 = vmul.f32 %v981_v29, %v965_v0  ;;  %v8861_v2 = vadd.f32 %v8651_v47, %v996_v18  ;;  %6717 = vmatmul.mubr.f32.gmra.mrb[4].mxu1 %v8627_v14  ;;  %v8872_v29 = vadd.f32 %v8651_v47, %v999_v26 }
 0x359   :  { %v7846_v19 = vpop.eup %7845  ;;  %7855 = vrsqrt.f32 %v934_v31  ;;  %v1076_v34 = vadd.f32 1.0, %v7844_v24  ;;  %v935_v23 = vadd.f32 1e-05, %v919_v39  ;;  %6719 = vmatprep.mubr.f32.mxu1 %v8638_v49  ;;  %v6021_v7 = vmul.f32 -1.442695, %v8864_v1 }
 0x35a   :  { %v7848_v4 = vpop.eup %7847  ;;  %v1136_v27 = vpack.c.bf16 %v1121_v45, %v1120_v56  ;;  %v1077_v21 = vadd.f32 1.0, %v7846_v19  ;;  %v8868_v9 = vadd.f32 %v8651_v47, %v997_v42  ;;  %v6019_v59 = vmul.f32 -1.442695, %v8861_v2 }
 0x35b   :  { %v7850_v20 = vpop.eup %7849  ;;  %7857 = vrcp.f32 %v1076_v34  ;;  %v1078_v12 = vadd.f32 1.0, %v7848_v4  ;;  %v6022_v0 = vmul.f32 -1.442695, %v8872_v29  ;;  %v984_v28 = vsub.f32 %v8500_v17, %v8812_v43 }
 0x35c   :  { %7859 = vrsqrt.f32 %v935_v23  ;;  %6553 = vmatprep.mubr.msk.bf16.mxu0 %vm198_vm2, %v1136_v27  ;;  %v1079_v54 = vadd.f32 1.0, %v7850_v20  ;;  %v6020_v53 = vmul.f32 -1.442695, %v8868_v9  ;;  %6720 = vmatmul.mubr.f32.gmra.mrb[6].mxu1 %v8699_v50  ;;  %v985_v40 = vsub.f32 %v8505_v32, %v8819_v37 }
 0x35d   :  { %6554 = vmatmul.mubr.msk.bf16.vlgmr.msra.gmra.mrb[32].mxu0 %vm198_vm2, %v1137_v44  ;;  %7861 = vrcp.f32 %v1077_v21  ;;  %6722 = vmatprep.mubr.f32.mxu1 %v8753_v38  ;;  %v986_v24 = vsub.f32 %v8491_v58, %v8823_v35  ;;  %v987_v34 = vsub.f32 %v8495_v22, %v8830_v11 }
 0x35e   :  { %7863 = vrcp.f32 %v1078_v12  ;;  %6570 = vmatpush3.msra.mxu0 %v8532_v15 }
 0x35f   :  { %v7852_v60 = vpop.eup %7851  ;;  %7865 = vrcp.f32 %v1079_v54  ;;  %6595 = vmatprep.subr.mxu0 %v8842_v30 }
 0x360   :  { %v968_v5 = vmul.f32 %v7852_v60, %v8624_v51  ;;  %7867 = vpow2.f32 %v6019_v59  ;;  %6723 = vmatmul.mubr.f32.gmra.mrb[8].mxu1 %v8759_v13 }
 0x361   :  { %v7854_v16 = vpop.eup %7853  ;;  %7869 = vpow2.f32 %v6020_v53 }
 0x362   :  { %v969_v31 = vmul.f32 %v7854_v16, %v8624_v51  ;;  %7871 = vpow2.f32 %v6021_v7  ;;  %v1000_v18 = vmul.f32 %v984_v28, %v968_v5 }
 0x363   :  { %v7856_v26 = vpop.eup %7855  ;;  %7873 = vpow2.f32 %v6022_v0 }
 0x364   :  { %v970_v17 = vmul.f32 %v7856_v26, %v8624_v51  ;;  %v1001_v43 = vmul.f32 %v985_v40, %v969_v31  ;;  %v8895_v39 = vadd.f32 %v8651_v47, %v1000_v18 }
 0x365   :  { %v7858_v56 = vpop.eup %7857 }
 0x366   :  { %v7860_v45 = vpop.eup %7859  ;;  %v8898_v42 = vadd.f32 %v8651_v47, %v1001_v43  ;;  %v6023_v32 = vmul.f32 -1.442695, %v8895_v39  ;;  %v1002_v37 = vmul.f32 %v986_v24, %v970_v17  ;;  %v1124_v35 = vmul.f32 %v7858_v56, %v8801_v52 }
 0x367   :  { %v7862_v19 = vpop.eup %7861  ;;  %v971_v58 = vmul.f32 %v7860_v45, %v8624_v51 }
 0x368   :  { %v7864_v4 = vpop.eup %7863  ;;  %v1125_v23 = vmul.f32 %v7862_v19, %v8805_v25  ;;  %7875 = vpow2.f32 %v6023_v32  ;;  %v6024_v27 = vmul.f32 -1.442695, %v8898_v42  ;;  %v8908_v21 = vadd.f32 %v8651_v47, %v1002_v37 }
 0x369   :  { %v7866_v20 = vpop.eup %7865  ;;  %v1126_v44 = vmul.f32 %v7864_v4, %v8795_v3  ;;  %v1003_v12 = vmul.f32 %v987_v34, %v971_v58  ;;  %v8923_v4 = vsub.f32 %v8705_v33, %v8731_v10 }
 0x36a   :  { %v7868_v54 = vpop.eup %7867  ;;  %v1138_v59 = vpack.c.bf16 %v1125_v23, %v1124_v35  ;;  %v1127_v22 = vmul.f32 %v7866_v20, %v8809_v63  ;;  %7877 = vpow2.f32 %v6024_v27  ;;  %v6025_v51 = vmul.f32 -1.442695, %v8908_v21  ;;  %v10302_v20 = vld [vmem:[#allocation18_spill] sm:$0xff] }
 0x36b   :  { %v7870_v52 = vpop.eup %7869  ;;  %v1080_v11 = vadd.f32 1.0, %v7868_v54  ;;  %v1023_v25 = vadd.f32 %v8651_v47, %v1003_v12  ;;  %v10303_v54 = vld [vmem:[#allocation19_spill] sm:$0xff] }
 0x36c   :  { %v7872_v53 = vpop.eup %7871  ;;  %6557 = vmatprep.mubr.msk.bf16.mxu0 %vm198_vm2, %v1138_v59  ;;  %v1139_v7 = vpack.c.bf16 %v1127_v22, %v1126_v44  ;;  %v1081_v60 = vadd.f32 1.0, %v7870_v52  ;;  %7879 = vpow2.f32 %v6025_v51  ;;  %v8933_v44 = vsub.f32 %v10302_v20, %v8747_v6  ;;  %v10304_v52 = vld [vmem:[#allocation22_spill] sm:$0xff]  ;;  %v10313_v20 = vld [vmem:[#allocation7_spill] sm:$0xff] }
 0x36d   :  { %v7874_v0 = vpop.eup %7873  ;;  %7881 = vrcp.f32 %v1080_v11  ;;  %v1082_v3 = vadd.f32 1.0, %v7872_v53  ;;  %v6026_v28 = vmul.f32 -1.442695, %v1023_v25  ;;  %v8940_v59 = vsub.f32 %v10303_v54, %v8750_v61  ;;  %v10315_v54 = vld [vmem:[#allocation15_spill] sm:$0xff] }
 0x36e   :  { %6558 = vmatmul.mubr.msk.bf16.gmra.mrb[36].mxu0 %vm198_vm2, %v1139_v7  ;;  %7883 = vrcp.f32 %v1081_v60  ;;  %v1083_v63 = vadd.f32 1.0, %v7874_v0  ;;  %v8944_v51 = vand.u32 4294901760, %v8933_v44  ;;  %v8948_v11 = vsub.f32 %v10304_v52, %v8766_v55  ;;  %v10305_v60 = vld [vmem:[#allocation23_spill] sm:$0xff] }
 0x36f   :  { %7885 = vrcp.f32 %v1082_v3  ;;  %v8953_v7 = vand.u32 4294901760, %v8940_v59  ;;  %v8957_v0 = vsub.f32 %v10305_v60, %v8769_v57  ;;  %v10317_v60 = vld [vmem:[#allocation16_spill] sm:$0xff] }
 0x370   :  { %7887 = vrcp.f32 %v1083_v63 }
 0x371   :  { %7889 = vpow2.f32 %v6026_v28  ;;  %v8967_v28 = vsub.f32 %v8798_v8, %v8815_v36  ;;  %v1442_v63 = vsub.f32 %v8940_v59, %v8953_v7 }
 0x372   :  { %v7876_v5 = vpop.eup %7875 }
 0x373   :  { %v1084_v16 = vadd.f32 1.0, %v7876_v5  ;;  %v8973_v5 = vand.u32 4294901760, %v8957_v0  ;;  %v8984_v8 = vand.u32 4294901760, %v8967_v28 }
 0x374   :  { %v7878_v47 = vpop.eup %7877 }
 0x375   :  { %v1085_v40 = vadd.f32 1.0, %v7878_v47  ;;  %7891 = vrcp.f32 %v1084_v16  ;;  %v10306_v16 = vld [vmem:[#allocation9_spill] sm:$0xff] }
 0x376   :  { %v7880_v31 = vpop.eup %7879  ;;  %v8977_v47 = vsub.f32 %v10306_v16, %v8564_v41 }
 0x377   :  { %v7882_v18 = vpop.eup %7881  ;;  %7893 = vrcp.f32 %v1085_v40  ;;  %v1086_v24 = vadd.f32 1.0, %v7880_v31 }
 0x378   :  { %v7884_v26 = vpop.eup %7883  ;;  %v1128_v43 = vmul.f32 %v7882_v18, %v8861_v2  ;;  %v10307_v18 = vld [vmem:[#allocation10_spill] sm:$0xff] }
 0x379   :  { %v7886_v17 = vpop.eup %7885  ;;  %v1129_v56 = vmul.f32 %v7884_v26, %v8868_v9  ;;  %7895 = vrcp.f32 %v1086_v24  ;;  %v8988_v26 = vsub.f32 %v10307_v18, %v8575_v46  ;;  %v8990_v24 = vand.u32 4294901760, %v1442_v63 }
 0x37a   :  { %v7888_v45 = vpop.eup %7887  ;;  %v1130_v19 = vmul.f32 %v7886_v17, %v8864_v1  ;;  %v1462_v17 = vsub.f32 %v8957_v0, %v8973_v5 }
 0x37b   :  { %v7890_v32 = vpop.eup %7889  ;;  %v1140_v37 = vpack.c.bf16 %v1129_v56, %v1128_v43  ;;  %v1131_v34 = vmul.f32 %v7888_v45, %v8872_v29  ;;  %v8929_v29 = vand.u32 4294901760, %v8923_v4  ;;  %v8995_v43 = vand.u32 4294901760, %v8977_v47  ;;  %v10308_v56 = vld [vmem:[#allocation12_spill] sm:$0xff]  ;;  %v10309_v45 = vld [vmem:[#allocation11_spill] sm:$0xff] }
 0x37c   :  { %v1087_v58 = vadd.f32 1.0, %v7890_v32  ;;  %v8999_v32 = vsub.f32 %v10309_v45, %v10308_v56 }
 0x37d   :  { %6561 = vmatprep.mubr.msk.bf16.mxu0 %vm198_vm2, %v1140_v37  ;;  %v1141_v35 = vpack.c.bf16 %v1131_v34, %v1130_v19  ;;  %v1422_v33 = vsub.f32 %v8923_v4, %v8929_v29  ;;  %v1472_v19 = vsub.f32 %v8967_v28, %v8984_v8  ;;  %v9007_v34 = vand.u32 4294901760, %v8988_v26 }
 0x37e   :  { %7897 = vrcp.f32 %v1087_v58  ;;  %v10310_v58 = vld [vmem:[#allocation13_spill] sm:$0xff] }
 0x37f   :  { %v7892_v2 = vpop.eup %7891  ;;  %6562 = vmatmul.mubr.msk.bf16.gmra.mrb[40].mxu0 %vm198_vm2, %v1141_v35  ;;  %v8950_v53 = vand.u32 4294901760, %v1422_v33  ;;  %v9011_v35 = vsub.f32 %v10310_v58, %v8601_v62  ;;  %v10322_v58 = vld [vmem:[#allocation20_spill] sm:$0xff] }
 0x380   :  { %v1132_v23 = vmul.f32 %v7892_v2, %v8895_v39  ;;  %v9015_v2 = vand.u32 4294901760, %v1462_v17 }
 0x381   :  { %v7894_v9 = vpop.eup %7893  ;;  %v9033_v33 = vand.u32 4294901760, %v9011_v35 }
 0x382   :  { %v1133_v1 = vmul.f32 %v7894_v9, %v8898_v42  ;;  %10311 = vst [vmem:[#allocation18_spill] sm:$0xff] %v9015_v2  ;;  %v1482_v9 = vsub.f32 %v8977_v47, %v8995_v43 }
 0x383   :  { %v7896_v12 = vpop.eup %7895  ;;  %v1512_v63 = vsub.f32 %v9011_v35, %v9033_v33 }
 0x384   :  { %v1142_v27 = vpack.c.bf16 %v1133_v1, %v1132_v23  ;;  %v1134_v42 = vmul.f32 %v7896_v12, %v8908_v21  ;;  %v1432_v21 = vsub.f32 %v8933_v44, %v8944_v51  ;;  %v9020_v23 = vand.u32 4294901760, %v8999_v32  ;;  %v10312_v1 = vld [vmem:[#allocation14_spill] sm:$0xff] }
 0x385   :  { %v9028_v12 = vand.u32 4294901760, %v1472_v19 }
 0x386   :  { %6565 = vmatprep.mubr.msk.bf16.mxu0 %vm198_vm2, %v1142_v27  ;;  %v8979_v40 = vand.u32 4294901760, %v1432_v21  ;;  %v9024_v27 = vsub.f32 %v10312_v1, %v8610_v48  ;;  %v9076_v1 = vand.u32 4294901760, %v1512_v63 }
 0x387   :  { %10314 = vst [vmem:[#allocation19_spill] sm:$0xff] %v9028_v12 }
 0x388   :  { %v7898_v39 = vpop.eup %7897  ;;  %v9045_v52 = vand.u32 4294901760, %v9024_v27  ;;  %10323 = vst [vmem:[#allocation12_spill] sm:$0xff] %v9076_v1 }
 0x389   :  { %v1135_v22 = vmul.f32 %v7898_v39, %v1023_v25  ;;  %v8963_v25 = vand.u32 4294901760, %v8948_v11  ;;  %v9037_v39 = vsub.f32 %v10315_v54, %v8627_v14 }
 0x38a   :  { %v1522_v45 = vsub.f32 %v9024_v27, %v9045_v52 }
 0x38b   :  { %v1143_v3 = vpack.c.bf16 %v1135_v22, %v1134_v42  ;;  %v1452_v31 = vsub.f32 %v8948_v11, %v8963_v25  ;;  %v9040_v42 = vand.u32 4294901760, %v1482_v9  ;;  %v1502_v22 = vsub.f32 %v8999_v32, %v9020_v23 }
 0x38c   :  { %v9057_v16 = vand.u32 4294901760, %v9037_v39  ;;  %v9073_v9 = vsub.f32 %v10322_v58, %v8753_v38 }
 0x38d   :  { %6566 = vmatmul.mubr.msk.bf16.gmra.mrb[44].mxu0 %vm198_vm2, %v1143_v3  ;;  %v9002_v37 = vand.u32 4294901760, %v1452_v31  ;;  %10316 = vst [vmem:[#allocation22_spill] sm:$0xff] %v9040_v42  ;;  %v9049_v3 = vsub.f32 %v10317_v60, %v8638_v49  ;;  %v10319_v31 = vld [vmem:[#allocation17_spill] sm:$0xff]  ;;  %v9064_v17 = vand.u32 4294901760, %v1502_v22 }
 0x38e   :  { %6571 = vmatprep.mubr.f32.mxu0 %v8950_v53  ;;  %v9061_v18 = vsub.f32 %v10319_v31, %v8699_v50  ;;  %v10325_v22 = vld [vmem:[#allocation21_spill] sm:$0xff]  ;;  %v9088_v31 = vand.u32 4294901760, %v1522_v45  ;;  %v9093_v63 = vand.u32 4294901760, %v9073_v9 }
 0x38f   :  { %10320 = vst [vmem:[#allocation9_spill] sm:$0xff] %v9064_v17  ;;  %v9069_v19 = vand.u32 4294901760, %v9049_v3  ;;  %v9085_v60 = vsub.f32 %v10325_v22, %v8759_v13 }
 0x390   :  { %v9081_v54 = vand.u32 4294901760, %v9061_v18  ;;  %10326 = vst [vmem:[#allocation13_spill] sm:$0xff] %v9093_v63 }
 0x391   :  { %10321 = vst [vmem:[#allocation10_spill] sm:$0xff] %v9069_v19  ;;  %v1542_v58 = vsub.f32 %v9049_v3, %v9069_v19  ;;  %v9101_v22 = vand.u32 4294901760, %v9085_v60 }
 0x392   :  { %10324 = vst [vmem:[#allocation11_spill] sm:$0xff] %v9081_v54 }
 0x393   :  { %10327 = vst [vmem:[#allocation14_spill] sm:$0xff] %v9101_v22  ;;  %v9104_v45 = vand.u32 4294901760, %v1542_v58 }
 0x395   :  { %6572 = vmatmul.mubr.f32.vlgmr.msra.gmra.mrb[48].mxu0 %v8979_v40 }
 0x396   :  { %6596 = vmatpush3.msra.mxu0 %v8842_v30  ;;  %6574 = vmatprep.mubr.f32.mxu0 %v8990_v24  ;;  %v1492_v30 = vsub.f32 %v8988_v26, %v9007_v34 }
 0x397   :  { %6621 = vmatprep.subr.mxu0 %v10313_v20 }
 0x398   :  { %v9052_v21 = vand.u32 4294901760, %v1492_v30  ;;  %v1532_v30 = vsub.f32 %v9037_v39, %v9057_v16 }
 0x399   :  { %6575 = vmatmul.mubr.f32.gmra.mrb[50].mxu0 %v9002_v37 }
 0x39a   :  { %6577 = vmatprep.mubr.f32.mxu0 %v9015_v2  ;;  %10318 = vst [vmem:[#allocation23_spill] sm:$0xff] %v9052_v21 }
 0x39d   :  { %6578 = vmatmul.mubr.f32.gmra.mrb[52].mxu0 %v9028_v12 }
 0x39e   :  { %6580 = vmatprep.mubr.f32.mxu0 %v9040_v42  ;;  %v1552_v42 = vsub.f32 %v9061_v18, %v9081_v54 }
 0x3a0   :  { %v9109_v12 = vand.u32 4294901760, %v1552_v42 }
 0x3a1   :  { %6581 = vmatmul.mubr.f32.gmra.mrb[54].mxu0 %v9052_v21  ;;  %v9096_v21 = vand.u32 4294901760, %v1532_v30  ;;  %v1572_v30 = vsub.f32 %v9085_v60, %v9101_v22 }
 0x3a2   :  { %6583 = vmatprep.mubr.f32.mxu0 %v9064_v17  ;;  %v1562_v17 = vsub.f32 %v9073_v9, %v9093_v63 }
 0x3a3   :  { %v9117_v2 = vand.u32 4294901760, %v1572_v30 }
 0x3a5   :  { %6584 = vmatmul.mubr.f32.gmra.mrb[56].mxu0 %v9076_v1  ;;  %v9114_v1 = vand.u32 4294901760, %v1562_v17 }
 0x3a6   :  { %6586 = vmatprep.mubr.f32.mxu0 %v9088_v31 }
 0x3a9   :  { %6587 = vmatmul.mubr.f32.gmra.mrb[58].mxu0 %v9096_v21 }
 0x3aa   :  { %6589 = vmatprep.mubr.f32.mxu0 %v9104_v45 }
 0x3ad   :  { %6590 = vmatmul.mubr.f32.gmra.mrb[60].mxu0 %v9109_v12 }
 0x3ae   :  { %6592 = vmatprep.mubr.f32.mxu0 %v9114_v1 }
 0x3b1   :  { %6593 = vmatmul.mubr.f32.gmra.mrb[62].mxu0 %v9117_v2 }
 0x3b2   :  { %6597 = vmatprep.mubr.f32.mxu0 %v8731_v10 }
 0x3b5   :  { %6598 = vmatmul.mubr.f32.vlgmr.msra.gmra.mrb[48].mxu0 %v8747_v6 }
 0x3b6   :  { %6622 = vmatpush3.msra.mxu0 %v10313_v20  ;;  %6600 = vmatprep.mubr.f32.mxu0 %v8750_v61  ;;  %v10328_v20 = vld [vmem:[#allocation8_spill] sm:$0xff] }
 0x3b7   :  { %6647 = vmatprep.subr.mxu0 %v8532_v15 }
 0x3b9   :  { %6601 = vmatmul.mubr.f32.gmra.mrb[50].mxu0 %v8766_v55 }
 0x3ba   :  { %6603 = vmatprep.mubr.f32.mxu0 %v8769_v57 }
 0x3bd   :  { %6604 = vmatmul.mubr.f32.gmra.mrb[52].mxu0 %v8815_v36 }
 0x3be   :  { %6606 = vmatprep.mubr.f32.mxu0 %v8564_v41 }
 0x3c1   :  { %6607 = vmatmul.mubr.f32.gmra.mrb[54].mxu0 %v8575_v46 }
 0x3c2   :  { %6609 = vmatprep.mubr.f32.mxu0 %v10308_v56 }
 0x3c5   :  { %6610 = vmatmul.mubr.f32.gmra.mrb[56].mxu0 %v8601_v62 }
 0x3c6   :  { %6612 = vmatprep.mubr.f32.mxu0 %v8610_v48 }
 0x3c9   :  { %6613 = vmatmul.mubr.f32.gmra.mrb[58].mxu0 %v8627_v14 }
 0x3ca   :  { %6615 = vmatprep.mubr.f32.mxu0 %v8638_v49 }
 0x3cd   :  { %6616 = vmatmul.mubr.f32.gmra.mrb[60].mxu0 %v8699_v50 }
 0x3ce   :  { %6618 = vmatprep.mubr.f32.mxu0 %v8753_v38 }
 0x3d1   :  { %6619 = vmatmul.mubr.f32.gmra.mrb[62].mxu0 %v8759_v13 }
 0x3d2   :  { %6623 = vmatprep.mubr.f32.mxu0 %v8923_v4 }
 0x3d5   :  { %6624 = vmatmul.mubr.f32.vlgmr.msra.gmra.mrb[48].mxu0 %v8933_v44 }
 0x3d6   :  { %6648 = vmatpush3.msra.mxu0 %v8532_v15  ;;  %6626 = vmatprep.mubr.f32.mxu0 %v8940_v59  ;;  %v2444_v15 = vld [vmem:[%s10216_s8] sm:$0xff] }
 0x3d7   :  { %6673 = vmatprep.subr.mxu0 %v10328_v20  ;;  %v9161_v42 = vand.u32 4294901760, %v2444_v15 }
 0x3d9   :  { %6627 = vmatmul.mubr.f32.gmra.mrb[50].mxu0 %v8948_v11  ;;  %v2673_v17 = vsub.f32 %v2444_v15, %v9161_v42  ;;  %v10329_v15 = vld [vmem:[#allocation18_spill] sm:$0xff] }
 0x3da   :  { %6629 = vmatprep.mubr.f32.mxu0 %v8957_v0 }
 0x3db   :  { %v9178_v58 = vand.u32 4294901760, %v2673_v17 }
 0x3dd   :  { %6630 = vmatmul.mubr.f32.gmra.mrb[52].mxu0 %v8967_v28  ;;  %v2675_v30 = vsub.f32 %v2673_v17, %v9178_v58 }
 0x3de   :  { %6632 = vmatprep.mubr.f32.mxu0 %v8977_v47 }
 0x3e1   :  { %6633 = vmatmul.mubr.f32.gmra.mrb[54].mxu0 %v8988_v26 }
 0x3e2   :  { %6635 = vmatprep.mubr.f32.mxu0 %v8999_v32 }
 0x3e5   :  { %6636 = vmatmul.mubr.f32.gmra.mrb[56].mxu0 %v9011_v35 }
 0x3e6   :  { %6638 = vmatprep.mubr.f32.mxu0 %v9024_v27 }
 0x3e9   :  { %6639 = vmatmul.mubr.f32.gmra.mrb[58].mxu0 %v9037_v39 }
 0x3ea   :  { %6641 = vmatprep.mubr.f32.mxu0 %v9049_v3 }
 0x3ed   :  { %6642 = vmatmul.mubr.f32.gmra.mrb[60].mxu0 %v9061_v18 }
 0x3ee   :  { %6644 = vmatprep.mubr.f32.mxu0 %v9073_v9 }
 0x3f1   :  { %6645 = vmatmul.mubr.f32.gmra.mrb[62].mxu0 %v9085_v60 }
 0x3f2   :  { %6649 = vmatprep.mubr.f32.mxu0 %v8929_v29 }
 0x3f5   :  { %6650 = vmatmul.mubr.f32.vlgmr.msra.gmra.mrb[48].mxu0 %v8944_v51 }
 0x3f6   :  { %6674 = vmatpush3.msra.mxu0 %v10328_v20  ;;  %6652 = vmatprep.mubr.f32.mxu0 %v8953_v7  ;;  %v2676_v20 = vand.u32 4294901760, %v2675_v30  ;;  %v10330_v30 = vld [vmem:[#allocation19_spill] sm:$0xff] }
 0x3f7   :  { %6725 = vmatprep.subr.mxu0 %v9161_v42 }
 0x3f9   :  { %6653 = vmatmul.mubr.f32.gmra.mrb[50].mxu0 %v8963_v25 }
 0x3fa   :  { %6655 = vmatprep.mubr.f32.mxu0 %v8973_v5 }
 0x3fd   :  { %6656 = vmatmul.mubr.f32.gmra.mrb[52].mxu0 %v8984_v8 }
 0x3fe   :  { %6658 = vmatprep.mubr.f32.mxu0 %v8995_v43 }
 0x401   :  { %6659 = vmatmul.mubr.f32.gmra.mrb[54].mxu0 %v9007_v34 }
 0x402   :  { %6661 = vmatprep.mubr.f32.mxu0 %v9020_v23 }
 0x405   :  { %6662 = vmatmul.mubr.f32.gmra.mrb[56].mxu0 %v9033_v33 }
 0x406   :  { %6664 = vmatprep.mubr.f32.mxu0 %v9045_v52 }
 0x409   :  { %6665 = vmatmul.mubr.f32.gmra.mrb[58].mxu0 %v9057_v16 }
 0x40a   :  { %6667 = vmatprep.mubr.f32.mxu0 %v9069_v19 }
 0x40d   :  { %6668 = vmatmul.mubr.f32.gmra.mrb[60].mxu0 %v9081_v54  ;;  %v10333_v54 = vld [vmem:[#allocation9_spill] sm:$0xff] }
 0x40e   :  { %6670 = vmatprep.mubr.f32.mxu0 %v9093_v63  ;;  %v10332_v63 = vld [vmem:[#allocation23_spill] sm:$0xff] }
 0x411   :  { %6671 = vmatmul.mubr.f32.gmra.mrb[62].mxu0 %v9101_v22  ;;  %v10331_v22 = vld [vmem:[#allocation22_spill] sm:$0xff] }
 0x412   :  { %6675 = vmatprep.mubr.f32.mxu0 %v8731_v10 }
 0x415   :  { %6676 = vmatmul.mubr.f32.vlgmr.msra.gmra.mrb[48].mxu0 %v8747_v6 }
 0x416   :  { %6726 = vmatpush3.msra.mxu0 %v9161_v42  ;;  %6678 = vmatprep.mubr.f32.mxu0 %v8750_v61 }
 0x417   :  { %6751 = vmatprep.subr.mxu0 %v2676_v20 }
 0x419   :  { %6679 = vmatmul.mubr.f32.gmra.mrb[50].mxu0 %v8766_v55 }
 0x41a   :  { %6681 = vmatprep.mubr.f32.mxu0 %v8769_v57 }
 0x41d   :  { %6682 = vmatmul.mubr.f32.gmra.mrb[52].mxu0 %v8815_v36 }
 0x41e   :  { %6727 = vmatprep.mubr.f32.mxu0 %v8950_v53  ;;  %v10335_v53 = vld [vmem:[#allocation12_spill] sm:$0xff] }
 0x421   :  { %6728 = vmatmul.mubr.f32.vlgmr.msra.gmra.mrb[64].mxu0 %v8979_v40 }
 0x422   :  { %6752 = vmatpush3.msra.mxu0 %v2676_v20  ;;  %6730 = vmatprep.mubr.f32.mxu0 %v8990_v24 }
 0x423   :  { %6777 = vmatprep.subr.mxu0 %v2673_v17 }
 0x425   :  { %6731 = vmatmul.mubr.f32.gmra.mrb[66].mxu0 %v9002_v37 }
 0x426   :  { %6733 = vmatprep.mubr.f32.mxu0 %v10329_v15 }
 0x429   :  { %6734 = vmatmul.mubr.f32.gmra.mrb[68].mxu0 %v10330_v30 }
 0x42a   :  { %6736 = vmatprep.mubr.f32.mxu0 %v10331_v22 }
 0x42d   :  { %6737 = vmatmul.mubr.f32.gmra.mrb[70].mxu0 %v10332_v63 }
 0x42e   :  { %6739 = vmatprep.mubr.f32.mxu0 %v10333_v54 }
 0x430   :  { %v9200_v19 = vpop.f32.mrb[32].mxu0 }
 0x431   :  { %10334 = vst [vmem:[#allocation7_spill] sm:$0xff] %v9200_v19  ;;  %6740 = vmatmul.mubr.f32.gmra.mrb[72].mxu0 %v10335_v53  ;;  %v9203_v40 = vpop.f32.mrb[33].mxu0 }
 0x432   :  { %v9205_v24 = vpop.f32.mrb[34].mxu0  ;;  %6742 = vmatprep.mubr.f32.mxu0 %v9088_v31 }
 0x433   :  { %v9208_v37 = vpop.f32.mrb[35].mxu0 }
 0x435   :  { %6743 = vmatmul.mubr.f32.gmra.mrb[74].mxu0 %v9096_v21 }
 0x436   :  { %6745 = vmatprep.mubr.f32.mxu0 %v9104_v45 }
 0x439   :  { %6746 = vmatmul.mubr.f32.gmra.mrb[76].mxu0 %v9109_v12 }
 0x43a   :  { %6748 = vmatprep.mubr.f32.mxu0 %v9114_v1 }
 0x43d   :  { %6749 = vmatmul.mubr.f32.gmra.mrb[78].mxu0 %v9117_v2  ;;  %v9232_v2 = vpop.f32.mrb[10].mxu1 }
 0x43e   :  { %6753 = vmatprep.mubr.f32.mxu0 %v8731_v10  ;;  %v9235_v1 = vpop.f32.mrb[11].mxu1 }
 0x43f   :  { %v9237_v63 = vpop.f32.mrb[12].mxu1 }
 0x440   :  { %v9239_v22 = vpop.f32.mrb[13].mxu1 }
 0x441   :  { %v9216_v54 = vpop.f32.mrb[36].mxu0  ;;  %6754 = vmatmul.mubr.f32.vlgmr.msra.gmra.mrb[64].mxu0 %v8747_v6  ;;  %v9242_v45 = vpop.f32.mrb[14].mxu1 }
 0x442   :  { %10336 = vst [vmem:[#allocation15_spill] sm:$0xff] %v9216_v54  ;;  %6778 = vmatpush3.msra.mxu0 %v2673_v17  ;;  %v9219_v31 = vpop.f32.mrb[37].mxu0  ;;  %6756 = vmatprep.mubr.f32.mxu0 %v8750_v61  ;;  %v9247_v20 = vpop.f32.mrb[15].mxu1 }
 0x443   :  { %10337 = vst [vmem:[#allocation16_spill] sm:$0xff] %v9219_v31  ;;  %v9222_v21 = vpop.f32.mrb[38].mxu0  ;;  %6803 = vmatprep.subr.mxu0 %v9161_v42  ;;  %v9253_v53 = vpop.f32.mrb[0].mxu1 }
 0x444   :  { %10338 = vst [vmem:[#allocation17_spill] sm:$0xff] %v9222_v21  ;;  %v9225_v12 = vpop.f32.mrb[39].mxu0 }
 0x445   :  { %10339 = vst [vmem:[#allocation20_spill] sm:$0xff] %v9225_v12  ;;  %6757 = vmatmul.mubr.f32.gmra.mrb[66].mxu0 %v8766_v55 }
 0x446   :  { %6759 = vmatprep.mubr.f32.mxu0 %v8769_v57 }
 0x449   :  { %6760 = vmatmul.mubr.f32.gmra.mrb[68].mxu0 %v8815_v36 }
 0x44a   :  { %6762 = vmatprep.mubr.f32.mxu0 %v8564_v41 }
 0x44d   :  { %6763 = vmatmul.mubr.f32.gmra.mrb[70].mxu0 %v8575_v46 }
 0x44e   :  { %6765 = vmatprep.mubr.f32.mxu0 %v10308_v56 }
 0x451   :  { %6766 = vmatmul.mubr.f32.gmra.mrb[72].mxu0 %v8601_v62 }
 0x452   :  { %v9244_v17 = vpop.f32.mrb[40].mxu0  ;;  %6768 = vmatprep.mubr.f32.mxu0 %v8610_v48 }
 0x453   :  { %10340 = vst [vmem:[#allocation21_spill] sm:$0xff] %v9244_v17  ;;  %v9249_v15 = vpop.f32.mrb[41].mxu0  ;;  %v9261_v17 = vpop.f32.mrb[1].mxu1 }
 0x454   :  { %10341 = vst [vmem:[#allocation8_spill] sm:$0xff] %v9249_v15  ;;  %v9251_v30 = vpop.f32.mrb[42].mxu0  ;;  %v9264_v54 = vpop.f32.mrb[2].mxu1 }
 0x455   :  { %10342 = vst [vmem:[#allocation18_spill] sm:$0xff] %v9251_v30  ;;  %v9255_v21 = vpop.f32.mrb[43].mxu0  ;;  %6769 = vmatmul.mubr.f32.gmra.mrb[74].mxu0 %v8627_v14  ;;  %v9269_v15 = vpop.f32.mrb[3].mxu1 }
 0x456   :  { %10343 = vst [vmem:[#allocation19_spill] sm:$0xff] %v9255_v21  ;;  %6771 = vmatprep.mubr.f32.mxu0 %v8638_v49  ;;  %v9274_v12 = vpop.f32.mrb[4].mxu1 }
 0x459   :  { %6772 = vmatmul.mubr.f32.gmra.mrb[76].mxu0 %v8699_v50 }
 0x45a   :  { %6774 = vmatprep.mubr.f32.mxu0 %v8753_v38 }
 0x45d   :  { %6775 = vmatmul.mubr.f32.gmra.mrb[78].mxu0 %v8759_v13 }
 0x45e   :  { %6779 = vmatprep.mubr.f32.mxu0 %v8923_v4  ;;  %v9283_v4 = vpop.f32.mrb[5].mxu1 }
 0x460   :  { %v9267_v30 = vpop.f32.mrb[44].mxu0 }
 0x461   :  { %10344 = vst [vmem:[#allocation22_spill] sm:$0xff] %v9267_v30  ;;  %v9271_v21 = vpop.f32.mrb[45].mxu0  ;;  %6780 = vmatmul.mubr.f32.vlgmr.msra.gmra.mrb[64].mxu0 %v8933_v44  ;;  %v9286_v30 = vpop.f32.mrb[6].mxu1 }
 0x462   :  { %10345 = vst [vmem:[#allocation23_spill] sm:$0xff] %v9271_v21  ;;  %6804 = vmatpush3.msra.mxu0 %v9161_v42  ;;  %v9277_v31 = vpop.f32.mrb[46].mxu0  ;;  %6782 = vmatprep.mubr.f32.mxu0 %v8940_v59  ;;  %v9289_v44 = vpop.f32.mrb[7].mxu1 }
 0x463   :  { %v9280_v19 = vpop.f32.mrb[47].mxu0  ;;  %6829 = vmatprep.subr.mxu0 %v9178_v58  ;;  %v9292_v21 = vpop.f32.mrb[8].mxu1 }
 0x464   :  { %v9295_v59 = vpop.f32.mrb[9].mxu1 }
 0x465   :  { %6783 = vmatmul.mubr.f32.gmra.mrb[66].mxu0 %v8948_v11  ;;  %v9304_v11 = vld [vmem:[%s10218_s10 + $0x10] sm:$0xff] }
 0x466   :  { %6785 = vmatprep.mubr.f32.mxu0 %v8957_v0  ;;  %v3635_v0 = vand.u32 4294901760, %v9304_v11 }
 0x469   :  { %6786 = vmatmul.mubr.f32.gmra.mrb[68].mxu0 %v8967_v28  ;;  %v9313_v28 = vld [vmem:[%s10218_s10] sm:$0xff] }
 0x46a   :  { %6788 = vmatprep.mubr.f32.mxu0 %v8977_v47  ;;  %v9318_v47 = vld [vmem:[%s10218_s10 + $0x8] sm:$0xff] }
 0x46d   :  { %6789 = vmatmul.mubr.f32.gmra.mrb[70].mxu0 %v8988_v26  ;;  %v3629_v26 = vand.u32 4294901760, %v9313_v28 }
 0x46e   :  { %6791 = vmatprep.mubr.f32.mxu0 %v8999_v32  ;;  %v3632_v32 = vand.u32 4294901760, %v9318_v47 }
 0x471   :  { %6792 = vmatmul.mubr.f32.gmra.mrb[72].mxu0 %v9011_v35  ;;  %v10346_v35 = vld [vmem:[#allocation5_spill] sm:$0xff] }
 0x472   :  { %6794 = vmatprep.mubr.f32.mxu0 %v9024_v27  ;;  %v10347_v27 = vand.u32 4294901760, %v10346_v35 }
 0x475   :  { %6795 = vmatmul.mubr.f32.gmra.mrb[74].mxu0 %v9037_v39  ;;  %v9327_v39 = vpack.c.bf16 %v10347_v27, %v3635_v0 }
 0x476   :  { %6797 = vmatprep.mubr.f32.mxu0 %v9049_v3  ;;  %v9333_v3 = vpack.c.bf16 %v3632_v32, %v3629_v26 }
 0x478   :  { %7266 = vmatprep.subr.bf16.mxu1 %v9333_v3 }
 0x479   :  { %6798 = vmatmul.mubr.f32.gmra.mrb[76].mxu0 %v9061_v18  ;;  %7268 = vmatpush3.bf16.msra.mxu1 %v9333_v3 }
 0x47a   :  { %6800 = vmatprep.mubr.f32.mxu0 %v9073_v9  ;;  %7270 = vmatprep.subr.bf16.mxu1 %v9327_v39 }
 0x47d   :  { %6801 = vmatmul.mubr.f32.gmra.mrb[78].mxu0 %v9085_v60  ;;  %7272 = vmatpush3.bf16.msra.mxu1 %v9327_v39 }
 0x47e   :  { %6805 = vmatprep.mubr.f32.mxu0 %v8929_v29  ;;  %v10348_v29 = vld [vmem:[#allocation10_spill] sm:$0xff] }
 0x481   :  { %6806 = vmatmul.mubr.f32.vlgmr.msra.gmra.mrb[64].mxu0 %v8944_v51  ;;  %v10349_v51 = vld [vmem:[#allocation11_spill] sm:$0xff] }
 0x482   :  { %6830 = vmatpush3.msra.mxu0 %v9178_v58  ;;  %6808 = vmatprep.mubr.f32.mxu0 %v8953_v7  ;;  %v10350_v7 = vld [vmem:[#allocation13_spill] sm:$0xff] }
 0x483   :  { %6855 = vmatprep.subr.mxu0 %v9161_v42 }
 0x485   :  { %6809 = vmatmul.mubr.f32.gmra.mrb[66].mxu0 %v8963_v25  ;;  %v10351_v25 = vld [vmem:[#allocation14_spill] sm:$0xff] }
 0x486   :  { %6811 = vmatprep.mubr.f32.mxu0 %v8973_v5 }
 0x489   :  { %6812 = vmatmul.mubr.f32.gmra.mrb[68].mxu0 %v8984_v8 }
 0x48a   :  { %6814 = vmatprep.mubr.f32.mxu0 %v8995_v43 }
 0x48d   :  { %6815 = vmatmul.mubr.f32.gmra.mrb[70].mxu0 %v9007_v34 }
 0x48e   :  { %6817 = vmatprep.mubr.f32.mxu0 %v9020_v23 }
 0x491   :  { %6818 = vmatmul.mubr.f32.gmra.mrb[72].mxu0 %v9033_v33 }
 0x492   :  { %6820 = vmatprep.mubr.f32.mxu0 %v9045_v52 }
 0x495   :  { %6821 = vmatmul.mubr.f32.gmra.mrb[74].mxu0 %v9057_v16 }
 0x496   :  { %6823 = vmatprep.mubr.f32.mxu0 %v10348_v29 }
 0x499   :  { %6824 = vmatmul.mubr.f32.gmra.mrb[76].mxu0 %v10349_v51  ;;  %v10363_v51 = vld [vmem:[#allocation7_spill] sm:$0xff] }
 0x49a   :  { %6826 = vmatprep.mubr.f32.mxu0 %v10350_v7 }
 0x49d   :  { %6827 = vmatmul.mubr.f32.gmra.mrb[78].mxu0 %v10351_v25 }
 0x49e   :  { %6831 = vmatprep.mubr.f32.mxu0 %v8731_v10 }
 0x4a1   :  { %6832 = vmatmul.mubr.f32.vlgmr.msra.gmra.mrb[64].mxu0 %v8747_v6 }
 0x4a2   :  { %6856 = vmatpush3.msra.mxu0 %v9161_v42  ;;  %6834 = vmatprep.mubr.f32.mxu0 %v8750_v61 }
 0x4a5   :  { %6835 = vmatmul.mubr.f32.gmra.mrb[66].mxu0 %v8766_v55 }
 0x4a6   :  { %6837 = vmatprep.mubr.f32.mxu0 %v8769_v57 }
 0x4a9   :  { %6838 = vmatmul.mubr.f32.gmra.mrb[68].mxu0 %v8815_v36 }
 0x4aa   :  { %6840 = vmatprep.mubr.f32.mxu0 %v8564_v41 }
 0x4ad   :  { %6841 = vmatmul.mubr.f32.gmra.mrb[70].mxu0 %v8575_v46 }
 0x4ae   :  { %6843 = vmatprep.mubr.f32.mxu0 %v10308_v56 }
 0x4b1   :  { %6844 = vmatmul.mubr.f32.gmra.mrb[72].mxu0 %v8601_v62 }
 0x4b2   :  { %6846 = vmatprep.mubr.f32.mxu0 %v8610_v48 }
 0x4b5   :  { %6847 = vmatmul.mubr.f32.gmra.mrb[74].mxu0 %v8627_v14 }
 0x4b6   :  { %6849 = vmatprep.mubr.f32.mxu0 %v8638_v49 }
 0x4b9   :  { %6850 = vmatmul.mubr.f32.gmra.mrb[76].mxu0 %v8699_v50 }
 0x4ba   :  { %6852 = vmatprep.mubr.f32.mxu0 %v8753_v38 }
 0x4bd   :  { %6853 = vmatmul.mubr.f32.gmra.mrb[78].mxu0 %v8759_v13 }
 0x4be   :  { %6857 = vmatprep.mubr.f32.mxu0 %v8731_v10 }
 0x4c1   :  { %6858 = vmatmul.mubr.f32.vlgmr.msra.gmra.mrb[64].mxu0 %v8747_v6 }
 0x4c2   :  { %6860 = vmatprep.mubr.f32.mxu0 %v8750_v61 }
 0x4c5   :  { %6861 = vmatmul.mubr.f32.gmra.mrb[66].mxu0 %v8766_v55 }
 0x4c6   :  { %6863 = vmatprep.mubr.f32.mxu0 %v8769_v57 }
 0x4c9   :  { %6864 = vmatmul.mubr.f32.gmra.mrb[68].mxu0 %v8815_v36 }
 0x4ca   :  { %6866 = vmatprep.mubr.f32.mxu0 %v8564_v41 }
 0x4cd   :  { %6867 = vmatmul.mubr.f32.gmra.mrb[70].mxu0 %v8575_v46 }
 0x4ce   :  { %6869 = vmatprep.mubr.f32.mxu0 %v10308_v56 }
 0x4d1   :  { %6870 = vmatmul.mubr.f32.gmra.mrb[72].mxu0 %v8601_v62 }
 0x4d2   :  { %6872 = vmatprep.mubr.f32.mxu0 %v8610_v48 }
 0x4d4   :  { %v6660_v10 = vpop.f32.mrb[54].mxu0 }
 0x4d5   :  { %v9387_v6 = vadd.f32 %v9253_v53, %v6660_v10  ;;  %v2042_v61 = vpop.f32.mrb[55].mxu0  ;;  %6873 = vmatmul.mubr.f32.gmra.mrb[74].mxu0 %v8627_v14 }
 0x4d6   :  { %v9391_v55 = vadd.f32 %v9261_v17, %v2042_v61  ;;  %6875 = vmatprep.mubr.f32.mxu0 %v8638_v49 }
 0x4d7   :  { %10352 = vst [vmem:[#allocation9_spill] sm:$0xff] %v9387_v6 }
 0x4d8   :  { %v6663_v41 = vpop.f32.mrb[56].mxu0 }
 0x4d9   :  { %v9395_v46 = vadd.f32 %v9264_v54, %v6663_v41  ;;  %v2058_v57 = vpop.f32.mrb[57].mxu0  ;;  %6876 = vmatmul.mubr.f32.gmra.mrb[76].mxu0 %v8699_v50 }
 0x4da   :  { %v9399_v62 = vadd.f32 %v9269_v15, %v2058_v57  ;;  %6878 = vmatprep.mubr.f32.mxu0 %v8753_v38 }
 0x4db   :  { %10353 = vst [vmem:[#allocation12_spill] sm:$0xff] %v9395_v46 }
 0x4dc   :  { %10354 = vst [vmem:[#allocation5_spill] sm:$0xff] %v9399_v62  ;;  %v6666_v48 = vpop.f32.mrb[58].mxu0 }
 0x4dd   :  { %v9403_v14 = vadd.f32 %v9274_v12, %v6666_v48  ;;  %v2074_v36 = vpop.f32.mrb[59].mxu0  ;;  %6879 = vmatmul.mubr.f32.gmra.mrb[78].mxu0 %v8759_v13 }
 0x4de   :  { %v9407_v49 = vadd.f32 %v9283_v4, %v2074_v36  ;;  %v9467_v4 = vsub.f32 %v9304_v11, %v3635_v0  ;;  %v10364_v36 = vld [vmem:[#allocation16_spill] sm:$0xff] }
 0x4df   :  { %10355 = vst [vmem:[#allocation10_spill] sm:$0xff] %v9403_v14 }
 0x4e0   :  { %10356 = vst [vmem:[#allocation11_spill] sm:$0xff] %v9407_v49  ;;  %v6669_v5 = vpop.f32.mrb[60].mxu0  ;;  %v10255_v35 = vand.u32 4294901760, %v9467_v4 }
 0x4e1   :  { %v9410_v8 = vadd.f32 %v9286_v30, %v6669_v5  ;;  %v2090_v50 = vpop.f32.mrb[61].mxu0 }
 0x4e2   :  { %v9413_v43 = vadd.f32 %v9289_v44, %v2090_v50  ;;  %v9472_v44 = vld [vmem:[%s10214_s6] ss:$0 sm:$0xff] }
 0x4e3   :  { %10357 = vst [vmem:[#allocation13_spill] sm:$0xff] %v9410_v8  ;;  %v9488_v29 = vadd.f32 %v9205_v24, %v9472_v44  ;;  %v9496_v7 = vadd.f32 %v10363_v51, %v9472_v44  ;;  %v3875_v24 = vsub.f32 %v9467_v4, %v10255_v35  ;;  %v9509_v5 = vadd.f32 %v9472_v44, %v10364_v36  ;;  %v10373_v8 = vld [vmem:[#allocation18_spill] sm:$0xff] }
 0x4e4   :  { %10358 = vst [vmem:[#allocation14_spill] sm:$0xff] %v9413_v43  ;;  %v6672_v56 = vpop.f32.mrb[62].mxu0 }
 0x4e5   :  { %v9416_v38 = vadd.f32 %v9292_v21, %v6672_v56  ;;  %v2106_v34 = vpop.f32.mrb[63].mxu0 }
 0x4e6   :  { %v9419_v23 = vadd.f32 %v9295_v59, %v2106_v34  ;;  %v9476_v59 = vadd.f32 %v9472_v44, %v9208_v37  ;;  %v10365_v34 = vld [vmem:[#allocation20_spill] sm:$0xff] }
 0x4e7   :  { %10359 = vst [vmem:[#allocation24_spill] sm:$0xff] %v9416_v38 }
 0x4e8   :  { %10360 = vst [vmem:[#allocation25_spill] sm:$0xff] %v9419_v23  ;;  %v6677_v13 = vpop.f32.mrb[48].mxu0 }
 0x4e9   :  { %v9422_v33 = vadd.f32 %v9232_v2, %v6677_v13  ;;  %v2188_v52 = vpop.f32.mrb[49].mxu0  ;;  %v9442_v2 = vsub.f32 %v9313_v28, %v3629_v26  ;;  %v10362_v28 = vld [vmem:[#allocation6_spill] sm:$0xff]  ;;  %v9481_v26 = vadd.f32 %v9472_v44, %v9203_v40  ;;  %v9517_v13 = vadd.f32 %v9472_v44, %v10365_v34 }
 0x4ea   :  { %v9425_v16 = vadd.f32 %v9235_v1, %v2188_v52  ;;  %v9447_v1 = vsub.f32 %v9318_v47, %v3632_v32  ;;  %v10254_v47 = vand.u32 4294901760, %v10362_v28 }
 0x4ec   :  { %v6680_v18 = vpop.f32.mrb[50].mxu0  ;;  %v9462_v53 = vpack.c.bf16 %v9447_v1, %v9442_v2  ;;  %v3882_v40 = vsub.f32 %v10362_v28, %v10254_v47 }
 0x4ed   :  { %v9428_v9 = vadd.f32 %v9237_v63, %v6680_v18  ;;  %v2200_v60 = vpop.f32.mrb[51].mxu0  ;;  %v10259_v63 = vand.u32 4294901760, %v9442_v2 }
 0x4ee   :  { %v9431_v42 = vadd.f32 %v9239_v22, %v2200_v60  ;;  %v10257_v22 = vand.u32 4294901760, %v9447_v1  ;;  %v3883_v60 = vand.u32 4294901760, %v3882_v40 }
 0x4f0   :  { %v6683_v58 = vpop.f32.mrb[52].mxu0  ;;  %v3868_v17 = vsub.f32 %v9447_v1, %v10257_v22  ;;  %v10369_v22 = vld [vmem:[#allocation19_spill] sm:$0xff] }
 0x4f1   :  { %v9434_v54 = vadd.f32 %v9242_v45, %v6683_v58  ;;  %v2212_v21 = vpop.f32.mrb[53].mxu0  ;;  %v3861_v45 = vsub.f32 %v9442_v2, %v10259_v63 }
 0x4f2   :  { %v9437_v12 = vadd.f32 %v9247_v20, %v2212_v21  ;;  %v3869_v15 = vand.u32 4294901760, %v3868_v17 }
 0x4f3   :  { %10361 = vst [vmem:[#allocation26_spill] sm:$0xff] %v9434_v54  ;;  %v3862_v20 = vand.u32 4294901760, %v3861_v45 }
 0x4f5   :  { %v9457_v30 = vpack.c.bf16 %v3869_v15, %v3862_v20  ;;  %v3876_v20 = vand.u32 4294901760, %v3875_v24 }
 0x4f7   :  { %7274 = vmatprep.subr.bf16.mxu1 %v9457_v30 }
 0x594   :  { %v6859_v32 = vpop.f32.mrb[64].mxu0 }
 0x595   :  { %v3557_v11 = vmul.f32 %v6859_v32, %v9476_v59  ;;  %v3442_v0 = vpop.f32.mrb[65].mxu0 }
 0x596   :  { %v3556_v27 = vmul.f32 %v3442_v0, %v9481_v26 }
 0x597   :  { %v3581_v37 = vsel %vm3576_vm3, %v3557_v11, 0 }
 0x598   :  { %v9498_v25 = vand.u32 4294901760, %v3581_v37  ;;  %v3578_v10 = vsel %vm3576_vm3, %v3556_v27, 0  ;;  %v6862_v61 = vpop.f32.mrb[66].mxu0  ;;  %v10366_v27 = vld [vmem:[#allocation15_spill] sm:$0xff] }
 0x599   :  { %v9504_v41 = vand.u32 4294901760, %v3578_v10  ;;  %v3559_v57 = vmul.f32 %v6862_v61, %v9488_v29  ;;  %v3454_v48 = vpop.f32.mrb[67].mxu0  ;;  %v10367_v61 = vld [vmem:[#allocation17_spill] sm:$0xff] }
 0x59a   :  { %v9512_v50 = vsub.f32 %v3581_v37, %v9498_v25  ;;  %v3558_v56 = vmul.f32 %v3454_v48, %v9496_v7  ;;  %v9533_v37 = vadd.f32 %v10366_v27, %v9472_v44  ;;  %v9544_v24 = vadd.f32 %v10367_v61, %v9472_v44 }
 0x59b   :  { %v9520_v52 = vsub.f32 %v3578_v10, %v9504_v41  ;;  %v3587_v18 = vsel %vm3576_vm3, %v3559_v57, 0 }
 0x59c   :  { %v10253_v58 = vand.u32 4294901760, %v9512_v50  ;;  %v9524_v21 = vand.u32 4294901760, %v3587_v18  ;;  %v3584_v45 = vsel %vm3576_vm3, %v3558_v56, 0  ;;  %v6865_v17 = vpop.f32.mrb[68].mxu0  ;;  %10368 = vst [vmem:[#allocation6_spill] sm:$0xff] %v9544_v24 }
 0x59d   :  { %v9527_v15 = vand.u32 4294901760, %v3584_v45  ;;  %v3561_v32 = vmul.f32 %v6865_v17, %v9517_v13  ;;  %v3466_v11 = vpop.f32.mrb[69].mxu0  ;;  %v10256_v0 = vand.u32 4294901760, %v9520_v52 }
 0x59e   :  { %v3710_v40 = vsub.f32 %v9512_v50, %v10253_v58  ;;  %v9539_v51 = vsub.f32 %v3587_v18, %v9524_v21  ;;  %v3560_v10 = vmul.f32 %v3466_v11, %v9509_v5  ;;  %v7277_v11 = vpack.c.bf16 %v3883_v60, %v3876_v20 }
 0x59f   :  { %v9547_v57 = vsub.f32 %v3584_v45, %v9527_v15  ;;  %v3593_v48 = vsel %vm3576_vm3, %v3561_v32, 0  ;;  %v3700_v36 = vsub.f32 %v9520_v52, %v10256_v0  ;;  %v9570_v60 = vadd.f32 %v9472_v44, %v10369_v22 }
 0x5a0   :  { %v9553_v56 = vand.u32 4294901760, %v3593_v48  ;;  %v3590_v34 = vsel %vm3576_vm3, %v3560_v10, 0  ;;  %v6868_v18 = vpop.f32.mrb[70].mxu0  ;;  %v10258_v17 = vand.u32 4294901760, %v9539_v51  ;;  %v3711_v47 = vand.u32 4294901760, %v3710_v40 }
 0x5a1   :  { %v9557_v27 = vand.u32 4294901760, %v3590_v34  ;;  %v3563_v61 = vmul.f32 %v6868_v18, %v9544_v24  ;;  %v3478_v45 = vpop.f32.mrb[71].mxu0  ;;  %v3701_v58 = vand.u32 4294901760, %v3700_v36  ;;  %v10260_v32 = vand.u32 4294901760, %v9547_v57  ;;  %10370 = vst [vmem:[#allocation7_spill] sm:$0xff] %v9570_v60 }
 0x5a2   :  { %v9562_v35 = vsub.f32 %v3593_v48, %v9553_v56  ;;  %v3562_v0 = vmul.f32 %v3478_v45, %v9533_v37  ;;  %v3730_v10 = vsub.f32 %v9539_v51, %v10258_v17  ;;  %v10371_v48 = vld [vmem:[#allocation8_spill] sm:$0xff] }
 0x5a3   :  { %v9573_v20 = vsub.f32 %v3590_v34, %v9557_v27  ;;  %v3599_v36 = vsel %vm3576_vm3, %v3563_v61, 0  ;;  %6889 = vmatprep.mubr.f32.mxu1 %v3701_v58  ;;  %v3720_v40 = vsub.f32 %v9547_v57, %v10260_v32  ;;  %v9581_v18 = vadd.f32 %v9472_v44, %v10371_v48 }
 0x5a4   :  { %v9583_v45 = vand.u32 4294901760, %v3599_v36  ;;  %v3596_v17 = vsel %vm3576_vm3, %v3562_v0, 0  ;;  %v6871_v22 = vpop.f32.mrb[72].mxu0  ;;  %6890 = vmatmul.mubr.f32.vlgmr.msra.gmra.mrb[16].mxu1 %v3711_v47  ;;  %v10261_v34 = vand.u32 4294901760, %v9562_v35  ;;  %v3731_v0 = vand.u32 4294901760, %v3730_v10  ;;  %v10375_v10 = vld [vmem:[#allocation21_spill] sm:$0xff] }
 0x5a5   :  { %10372 = vst [vmem:[#allocation16_spill] sm:$0xff] %v9581_v18  ;;  %v9587_v63 = vand.u32 4294901760, %v3596_v17  ;;  %v3565_v58 = vmul.f32 %v6871_v22, %v9570_v60  ;;  %7276 = vmatpush3.bf16.msra.mxu1 %v9457_v30  ;;  %v3490_v61 = vpop.f32.mrb[73].mxu0  ;;  %v3721_v32 = vand.u32 4294901760, %v3720_v40  ;;  %v10262_v38 = vand.u32 4294901760, %v9573_v20 }
 0x5a6   :  { %v9593_v48 = vsub.f32 %v3599_v36, %v9583_v45  ;;  %v3564_v23 = vmul.f32 %v3490_v61, %v9581_v18  ;;  %v3750_v47 = vsub.f32 %v9562_v35, %v10261_v34  ;;  %7278 = vmatprep.subr.bf16.mxu1 %v7277_v11  ;;  %v9601_v22 = vadd.f32 %v10373_v8, %v9472_v44 }
 0x5a7   :  { %v9604_v30 = vsub.f32 %v3596_v17, %v9587_v63  ;;  %v3605_v40 = vsel %vm3576_vm3, %v3565_v58, 0  ;;  %6892 = vmatprep.mubr.f32.mxu1 %v3721_v32  ;;  %v3740_v36 = vsub.f32 %v9573_v20, %v10262_v38  ;;  %v9612_v61 = vadd.f32 %v10375_v10, %v9472_v44 }
 0x5a8   :  { %10374 = vst [vmem:[#allocation20_spill] sm:$0xff] %v9601_v22  ;;  %v9614_v34 = vand.u32 4294901760, %v3605_v40  ;;  %v3602_v43 = vsel %vm3576_vm3, %v3564_v23, 0  ;;  %v6874_v8 = vpop.f32.mrb[74].mxu0  ;;  %6893 = vmatmul.mubr.f32.gmra.mrb[18].mxu1 %v3731_v0  ;;  %v10264_v17 = vand.u32 4294901760, %v9593_v48  ;;  %v3751_v60 = vand.u32 4294901760, %v3750_v47 }
 0x5a9   :  { %10376 = vst [vmem:[#allocation15_spill] sm:$0xff] %v9612_v61  ;;  %v9618_v14 = vand.u32 4294901760, %v3602_v43  ;;  %v3567_v32 = vmul.f32 %v6874_v8, %v9601_v22  ;;  %v3502_v58 = vpop.f32.mrb[75].mxu0  ;;  %v3741_v49 = vand.u32 4294901760, %v3740_v36  ;;  %v10267_v38 = vand.u32 4294901760, %v9604_v30  ;;  %7280 = vmatpush3.bf16.msra.mxu1 %v7277_v11 }
 0x5aa   :  { %v9623_v10 = vsub.f32 %v3605_v40, %v9614_v34  ;;  %v3566_v46 = vmul.f32 %v3502_v58, %v9612_v61  ;;  %v3770_v23 = vsub.f32 %v9593_v48, %v10264_v17  ;;  %7282 = vmatprep.subr.bf16.mxu1 %v9462_v53  ;;  %v9632_v0 = vadd.f32 %v9472_v44, %v9280_v19  ;;  %v10378_v40 = vld [vmem:[#allocation23_spill] sm:$0xff] }
 0x5ab   :  { %v9635_v36 = vsub.f32 %v3602_v43, %v9618_v14  ;;  %v3611_v11 = vsel %vm3576_vm3, %v3567_v32, 0  ;;  %6895 = vmatprep.mubr.f32.mxu1 %v3741_v49  ;;  %v3760_v47 = vsub.f32 %v9604_v30, %v10267_v38  ;;  %v9643_v8 = vadd.f32 %v9472_v44, %v10378_v40 }
 0x5ac   :  { %10377 = vst [vmem:[#allocation17_spill] sm:$0xff] %v9632_v0  ;;  %v9645_v58 = vand.u32 4294901760, %v3611_v11  ;;  %v3608_v17 = vsel %vm3576_vm3, %v3566_v46, 0  ;;  %v6877_v19 = vpop.f32.mrb[76].mxu0  ;;  %6896 = vmatmul.mubr.f32.gmra.mrb[20].mxu1 %v3751_v60  ;;  %v10270_v43 = vand.u32 4294901760, %v9623_v10  ;;  %v3771_v18 = vand.u32 4294901760, %v3770_v23 }
 0x5ad   :  { %10379 = vst [vmem:[#allocation19_spill] sm:$0xff] %v9643_v8  ;;  %v9649_v22 = vand.u32 4294901760, %v3608_v17  ;;  %v3569_v49 = vmul.f32 %v6877_v19, %v9632_v0  ;;  %v3514_v32 = vpop.f32.mrb[77].mxu0  ;;  %v3761_v61 = vand.u32 4294901760, %v3760_v47  ;;  %v10272_v38 = vand.u32 4294901760, %v9635_v36  ;;  %v10381_v23 = vld [vmem:[#allocation22_spill] sm:$0xff] }
 0x5ae   :  { %v9654_v62 = vsub.f32 %v3611_v11, %v9645_v58  ;;  %v3568_v40 = vmul.f32 %v3514_v32, %v9643_v8  ;;  %v3790_v46 = vsub.f32 %v9623_v10, %v10270_v43  ;;  %v9662_v60 = vadd.f32 %v9277_v31, %v9472_v44 }
 0x5af   :  { %v9665_v19 = vsub.f32 %v3608_v17, %v9649_v22  ;;  %v3617_v47 = vsel %vm3576_vm3, %v3569_v49, 0  ;;  %6898 = vmatprep.mubr.f32.mxu1 %v3761_v61  ;;  %v3780_v11 = vsub.f32 %v9635_v36, %v10272_v38  ;;  %v9673_v32 = vadd.f32 %v10381_v23, %v9472_v44 }
 0x5b0   :  { %10380 = vst [vmem:[#allocation8_spill] sm:$0xff] %v9662_v60  ;;  %v9675_v0 = vand.u32 4294901760, %v3617_v47  ;;  %v3614_v43 = vsel %vm3576_vm3, %v3568_v40, 0  ;;  %v6880_v31 = vpop.f32.mrb[78].mxu0  ;;  %6899 = vmatmul.mubr.f32.gmra.mrb[22].mxu1 %v3771_v18  ;;  %v10274_v17 = vand.u32 4294901760, %v9654_v62  ;;  %v3791_v23 = vand.u32 4294901760, %v3790_v46 }
 0x5b1   :  { %10382 = vst [vmem:[#allocation18_spill] sm:$0xff] %v9673_v32  ;;  %v9679_v8 = vand.u32 4294901760, %v3614_v43  ;;  %v3571_v61 = vmul.f32 %v6880_v31, %v9662_v60  ;;  %v3526_v49 = vpop.f32.mrb[79].mxu0  ;;  %v3781_v6 = vand.u32 4294901760, %v3780_v11  ;;  %v10276_v38 = vand.u32 4294901760, %v9665_v19 }
 0x5b2   :  { %v9684_v24 = vsub.f32 %v3617_v47, %v9675_v0  ;;  %v3570_v44 = vmul.f32 %v3526_v49, %v9673_v32  ;;  %v3810_v18 = vsub.f32 %v9654_v62, %v10274_v17 }
 0x5b3   :  { %v9691_v40 = vsub.f32 %v3614_v43, %v9679_v8  ;;  %v3623_v54 = vsel %vm3576_vm3, %v3571_v61, 0  ;;  %6901 = vmatprep.mubr.f32.mxu1 %v3781_v6  ;;  %v3800_v11 = vsub.f32 %v9665_v19, %v10276_v38 }
 0x5b4   :  { %v9697_v31 = vand.u32 4294901760, %v3623_v54  ;;  %v3620_v47 = vsel %vm3576_vm3, %v3570_v44, 0  ;;  %6902 = vmatmul.mubr.f32.gmra.mrb[24].mxu1 %v3791_v23  ;;  %v10278_v46 = vand.u32 4294901760, %v9684_v24  ;;  %v3811_v6 = vand.u32 4294901760, %v3810_v18 }
 0x5b5   :  { %v9701_v49 = vand.u32 4294901760, %v3620_v47  ;;  %v3801_v17 = vand.u32 4294901760, %v3800_v11  ;;  %v3819_v43 = vand.u32 4294901760, %v9691_v40 }
 0x5b6   :  { %v9705_v60 = vsub.f32 %v3623_v54, %v9697_v31  ;;  %v3830_v61 = vsub.f32 %v9684_v24, %v10278_v46 }
 0x5b7   :  { %v9711_v38 = vsub.f32 %v3620_v47, %v9701_v49  ;;  %6904 = vmatprep.mubr.f32.mxu1 %v3801_v17  ;;  %v3820_v44 = vsub.f32 %v9691_v40, %v3819_v43 }
 0x5b8   :  { %6905 = vmatmul.mubr.f32.gmra.mrb[26].mxu1 %v3811_v6  ;;  %v3849_v23 = vand.u32 4294901760, %v9705_v60  ;;  %v3831_v32 = vand.u32 4294901760, %v3830_v61  ;;  %v7285_v6 = vpack.c.bf16 %v10362_v28, %v9467_v4  ;;  %v10387_v61 = vand.u32 4294901760, %v10362_v28 }
 0x5b9   :  { %v3821_v11 = vand.u32 4294901760, %v3820_v44  ;;  %v3839_v54 = vand.u32 4294901760, %v9711_v38  ;;  %v10393_v28 = vand.u32 4294901760, %v9604_v30 }
 0x5ba   :  { %v3850_v18 = vsub.f32 %v9705_v60, %v3849_v23 }
 0x5bb   :  { %6907 = vmatprep.mubr.f32.mxu1 %v3821_v11  ;;  %v3840_v17 = vsub.f32 %v9711_v38, %v3839_v54  ;;  %v10388_v11 = vand.u32 4294901760, %v9512_v50 }
 0x5bc   :  { %6908 = vmatmul.mubr.f32.gmra.mrb[28].mxu1 %v3831_v32  ;;  %v3851_v46 = vand.u32 4294901760, %v3850_v18  ;;  %v10384_v32 = vand.u32 4294901760, %v9447_v1  ;;  %v10386_v1 = vand.u32 4294901760, %v9467_v4  ;;  %v10389_v18 = vand.u32 4294901760, %v9547_v57 }
 0x5bd   :  { %v3841_v47 = vand.u32 4294901760, %v3840_v17  ;;  %v10390_v17 = vand.u32 4294901760, %v9539_v51  ;;  %v10392_v4 = vand.u32 4294901760, %v9562_v35 }
 0x5be   :  { %v7301_v44 = vpack.c.bf16 %v10387_v61, %v10386_v1  ;;  %v3536_v1 = vmul.f32 %v9425_v16, %v9481_v26 }
 0x5bf   :  { %6910 = vmatprep.mubr.f32.mxu1 %v3841_v47  ;;  %v10391_v47 = vand.u32 4294901760, %v9573_v20 }
 0x5c0   :  { %6911 = vmatmul.mubr.f32.gmra.mrb[30].mxu1 %v3851_v46 }
 0x5c1   :  { %6921 = vmatprep.mubr.f32.mxu1 %v9504_v41 }
 0x5c4   :  { %6922 = vmatmul.mubr.f32.vlgmr.msra.gmra.mrb[16].mxu1 %v9498_v25 }
 0x5c5   :  { %7284 = vmatpush3.bf16.msra.mxu1 %v9462_v53  ;;  %6924 = vmatprep.mubr.f32.mxu1 %v9527_v15  ;;  %v10383_v53 = vand.u32 4294901760, %v9442_v2  ;;  %v10385_v2 = vand.u32 4294901760, %v9520_v52 }
 0x5c6   :  { %7286 = vmatprep.subr.bf16.mxu1 %v7285_v6 }
 0x5c7   :  { %v7297_v46 = vpack.c.bf16 %v10384_v32, %v10383_v53 }
 0x5c8   :  { %6925 = vmatmul.mubr.f32.gmra.mrb[18].mxu1 %v9524_v21 }
 0x5c9   :  { %6927 = vmatprep.mubr.f32.mxu1 %v9557_v27  ;;  %7288 = vmatpush3.bf16.msra.mxu1 %v7285_v6 }
 0x5ca   :  { %7290 = vmatprep.subr.bf16.mxu1 %v9333_v3 }
 0x5cc   :  { %6928 = vmatmul.mubr.f32.gmra.mrb[20].mxu1 %v9553_v56 }
 0x5cd   :  { %6930 = vmatprep.mubr.f32.mxu1 %v9587_v63 }
 0x5d0   :  { %6931 = vmatmul.mubr.f32.gmra.mrb[22].mxu1 %v9583_v45 }
 0x5d1   :  { %6933 = vmatprep.mubr.f32.mxu1 %v9618_v14 }
 0x5d4   :  { %6934 = vmatmul.mubr.f32.gmra.mrb[24].mxu1 %v9614_v34 }
 0x5d5   :  { %6936 = vmatprep.mubr.f32.mxu1 %v9649_v22 }
 0x5d8   :  { %6937 = vmatmul.mubr.f32.gmra.mrb[26].mxu1 %v9645_v58 }
 0x5d9   :  { %6939 = vmatprep.mubr.f32.mxu1 %v9679_v8 }
 0x5dc   :  { %6940 = vmatmul.mubr.f32.gmra.mrb[28].mxu1 %v9675_v0 }
 0x5dd   :  { %6942 = vmatprep.mubr.f32.mxu1 %v9701_v49 }
 0x5e0   :  { %6943 = vmatmul.mubr.f32.gmra.mrb[30].mxu1 %v9697_v31 }
 0x5e1   :  { %6953 = vmatprep.mubr.f32.mxu1 %v9520_v52  ;;  %v10395_v52 = vand.u32 4294901760, %v9635_v36 }
 0x5e4   :  { %6954 = vmatmul.mubr.f32.vlgmr.msra.gmra.mrb[16].mxu1 %v9512_v50  ;;  %v10394_v50 = vand.u32 4294901760, %v9593_v48 }
 0x5e5   :  { %7292 = vmatpush3.bf16.msra.mxu1 %v9333_v3  ;;  %6956 = vmatprep.mubr.f32.mxu1 %v9547_v57  ;;  %v10397_v57 = vand.u32 4294901760, %v9665_v19 }
 0x5e6   :  { %7294 = vmatprep.subr.bf16.mxu1 %v9327_v39 }
 0x5e8   :  { %6957 = vmatmul.mubr.f32.gmra.mrb[18].mxu1 %v9539_v51  ;;  %v10396_v51 = vand.u32 4294901760, %v9623_v10 }
 0x5e9   :  { %6959 = vmatprep.mubr.f32.mxu1 %v9573_v20  ;;  %7296 = vmatpush3.bf16.msra.mxu1 %v9327_v39  ;;  %v10398_v20 = vand.u32 4294901760, %v9654_v62 }
 0x5ea   :  { %7298 = vmatprep.subr.bf16.mxu1 %v7297_v46 }
 0x5ec   :  { %6960 = vmatmul.mubr.f32.gmra.mrb[20].mxu1 %v9562_v35  ;;  %v10399_v35 = vand.u32 4294901760, %v9684_v24 }
 0x5ed   :  { %6962 = vmatprep.mubr.f32.mxu1 %v9604_v30  ;;  %v3553_v30 = vld [vmem:[%s10217_s9 + $0x8] sm:$0xff] }
 0x5f0   :  { %6963 = vmatmul.mubr.f32.gmra.mrb[22].mxu1 %v9593_v48  ;;  %v3552_v48 = vld [vmem:[%s10217_s9] sm:$0xff] }
 0x5f1   :  { %6965 = vmatprep.mubr.f32.mxu1 %v9635_v36 }
 0x5f4   :  { %6966 = vmatmul.mubr.f32.gmra.mrb[24].mxu1 %v9623_v10  ;;  %v4813_v10 = vand.u32 4294901760, %v3553_v30 }
 0x5f5   :  { %6968 = vmatprep.mubr.f32.mxu1 %v9665_v19  ;;  %v3554_v19 = vld [vmem:[%s10217_s9 + $0x10] sm:$0xff] }
 0x5f8   :  { %6969 = vmatmul.mubr.f32.gmra.mrb[26].mxu1 %v9654_v62  ;;  %v4810_v62 = vand.u32 4294901760, %v3552_v48 }
 0x5f9   :  { %6971 = vmatprep.mubr.f32.mxu1 %v9691_v40 }
 0x5fc   :  { %6972 = vmatmul.mubr.f32.gmra.mrb[28].mxu1 %v9684_v24  ;;  %v9829_v24 = vsub.f32 %v3553_v30, %v4813_v10  ;;  %v10407_v30 = vld [vmem:[#allocation15_spill] sm:$0xff] }
 0x5fd   :  { %6974 = vmatprep.mubr.f32.mxu1 %v9711_v38  ;;  %v9815_v38 = vpack.c.bf16 %v4813_v10, %v4810_v62 }
 0x600   :  { %6975 = vmatmul.mubr.f32.gmra.mrb[30].mxu1 %v9705_v60  ;;  %v5048_v60 = vand.u32 4294901760, %v9829_v24 }
 0x601   :  { %6985 = vmatprep.mubr.f32.mxu1 %v10385_v2 }
 0x602   :  { %v5049_v6 = vsub.f32 %v9829_v24, %v5048_v60 }
 0x604   :  { %6986 = vmatmul.mubr.f32.vlgmr.msra.gmra.mrb[16].mxu1 %v10388_v11  ;;  %v10404_v11 = vld [vmem:[#allocation5_spill] sm:$0xff] }
 0x605   :  { %7300 = vmatpush3.bf16.msra.mxu1 %v7297_v46  ;;  %6988 = vmatprep.mubr.f32.mxu1 %v10389_v18  ;;  %v5050_v46 = vand.u32 4294901760, %v5049_v6 }
 0x606   :  { %7302 = vmatprep.subr.bf16.mxu1 %v7301_v44 }
 0x608   :  { %6989 = vmatmul.mubr.f32.gmra.mrb[18].mxu1 %v10390_v17 }
 0x609   :  { %6991 = vmatprep.mubr.f32.mxu1 %v10391_v47  ;;  %7304 = vmatpush3.bf16.msra.mxu1 %v7301_v44  ;;  %v10403_v44 = vld [vmem:[#allocation16_spill] sm:$0xff] }
 0x60a   :  { %7306 = vmatprep.subr.bf16.mxu1 %v9333_v3  ;;  %v3544_v18 = vmul.f32 %v10404_v11, %v10403_v44 }
 0x60c   :  { %6992 = vmatmul.mubr.f32.gmra.mrb[20].mxu1 %v10392_v4 }
 0x60d   :  { %6994 = vmatprep.mubr.f32.mxu1 %v10393_v28 }
 0x610   :  { %6995 = vmatmul.mubr.f32.gmra.mrb[22].mxu1 %v10394_v50 }
 0x611   :  { %6997 = vmatprep.mubr.f32.mxu1 %v10395_v52 }
 0x614   :  { %6998 = vmatmul.mubr.f32.gmra.mrb[24].mxu1 %v10396_v51 }
 0x615   :  { %7000 = vmatprep.mubr.f32.mxu1 %v10397_v57  ;;  %v10405_v57 = vld [vmem:[#allocation7_spill] sm:$0xff] }
 0x618   :  { %7001 = vmatmul.mubr.f32.gmra.mrb[26].mxu1 %v10398_v20  ;;  %v10406_v20 = vld [vmem:[#allocation12_spill] sm:$0xff] }
 0x619   :  { %7003 = vmatprep.mubr.f32.mxu1 %v3819_v43  ;;  %v4816_v43 = vand.u32 4294901760, %v3554_v19 }
 0x61c   :  { %7004 = vmatmul.mubr.f32.gmra.mrb[28].mxu1 %v10399_v35 }
 0x61d   :  { %7006 = vmatprep.mubr.f32.mxu1 %v3839_v54 }
 0x620   :  { %7007 = vmatmul.mubr.f32.gmra.mrb[30].mxu1 %v3849_v23 }
 0x621   :  { %7017 = vmatprep.mubr.f32.mxu1 %v9504_v41 }
 0x624   :  { %7018 = vmatmul.mubr.f32.vlgmr.msra.gmra.mrb[16].mxu1 %v9498_v25 }
 0x625   :  { %7308 = vmatpush3.bf16.msra.mxu1 %v9333_v3  ;;  %7020 = vmatprep.mubr.f32.mxu1 %v9527_v15  ;;  %v9827_v3 = vsub.f32 %v3552_v48, %v4810_v62  ;;  %v4783_v48 = vsel %vm3576_vm3, %v3544_v18, 0  ;;  %v10408_v62 = vld [vmem:[#allocation11_spill] sm:$0xff] }
 0x626   :  { %7310 = vmatprep.subr.bf16.mxu1 %v9327_v39  ;;  %v3546_v10 = vmul.f32 %v10408_v62, %v10407_v30 }
 0x627   :  { %v5041_v36 = vand.u32 4294901760, %v9827_v3 }
 0x628   :  { %7021 = vmatmul.mubr.f32.gmra.mrb[18].mxu1 %v9524_v21 }
 0x629   :  { %7023 = vmatprep.mubr.f32.mxu1 %v9557_v27  ;;  %7312 = vmatpush3.bf16.msra.mxu1 %v9327_v39  ;;  %v3555_v39 = vld [vmem:[%s10217_s9 + $0x18] sm:$0xf]  ;;  %v5042_v54 = vsub.f32 %v9827_v3, %v5041_v36  ;;  %s7923_s9 = smov [#allocation2]  }
 0x62a   :  { %7314 = vmatprep.subr.bf16.mxu1 %v9815_v38  ;;  %v4807_v40 = vsel %vm97_vm0, %v3555_v39, 0  ;;  %s5960_s5 = sshll.u32 %s7923_s9, 4  ;;  %s5961_s5 = int_to_ptr.vmem [resolvable:$true] %s5960_s5 }
 0x62b   :  { %v4819_v23 = vand.u32 4294901760, %v4807_v40  ;;  %v5043_v32 = vand.u32 4294901760, %v5042_v54  ;;  %s7899_s7 = scalar_lea.vmem %s5961_s5, 2048  ;;  %p7904_p1 = scmp.lt.s32.totalorder %s5961_s5, %s5961_s5 }
 0x62c   :  { %7024 = vmatmul.mubr.f32.gmra.mrb[20].mxu1 %v9553_v56  ;;  %p7900_p0 = scmp.ne.s32.totalorder %s5961_s5, %s7899_s7  ;;  %p7905_p2 = scmp.lt.s32.totalorder %s7899_s7, %s7899_s7 }
 0x62d   :  { %7026 = vmatprep.mubr.f32.mxu1 %v9587_v63  ;;  %v9852_v53 = vpack.c.bf16 %v4819_v23, %v4816_v43  ;;  %v9858_v2 = vpack.c.bf16 %v5050_v46, %v5043_v32 }
 0x62e   :  { %p7906_p3 = por %p7905_p2, %p7904_p1 }
 0x630   :  { %7027 = vmatmul.mubr.f32.gmra.mrb[22].mxu1 %v9583_v45  ;;  %p7907_p4 = pnand %p7906_p3, %p7900_p0 }
 0x631   :  { %7029 = vmatprep.mubr.f32.mxu1 %v9618_v14 }
 0x634   :  { %7030 = vmatmul.mubr.f32.gmra.mrb[24].mxu1 %v9614_v34 }
 0x635   :  { %7032 = vmatprep.mubr.f32.mxu1 %v9649_v22 }
 0x638   :  { %7033 = vmatmul.mubr.f32.gmra.mrb[26].mxu1 %v9645_v58 }
 0x639   :  { %7035 = vmatprep.mubr.f32.mxu1 %v9679_v8 }
 0x63c   :  { %7036 = vmatmul.mubr.f32.gmra.mrb[28].mxu1 %v9675_v0 }
 0x63d   :  { %7038 = vmatprep.mubr.f32.mxu1 %v9701_v49 }
 0x640   :  { %7039 = vmatmul.mubr.f32.gmra.mrb[30].mxu1 %v9697_v31 }
 0x641   :  { %7049 = vmatprep.mubr.f32.mxu1 %v9504_v41  ;;  %v4759_v41 = vsel %vm3576_vm3, %v3536_v1, 0  ;;  %v9957_v1 = vand.u32 4294901760, %v4783_v48 }
 0x642   :  { %v9874_v26 = vand.u32 4294901760, %v4759_v41 }
 0x644   :  { %7050 = vmatmul.mubr.f32.vlgmr.msra.gmra.mrb[16].mxu1 %v9498_v25  ;;  %v3537_v25 = vmul.f32 %v9422_v33, %v9476_v59  ;;  %v3540_v59 = vmul.f32 %v9437_v12, %v9509_v5  ;;  %v10400_v12 = vld [vmem:[#allocation26_spill] sm:$0xff] }
 0x645   :  { %7316 = vmatpush3.bf16.msra.mxu1 %v9815_v38  ;;  %7052 = vmatprep.mubr.f32.mxu1 %v9527_v15  ;;  %v3538_v15 = vmul.f32 %v9431_v42, %v9496_v7  ;;  %v3542_v42 = vmul.f32 %v9391_v55, %v9533_v37  ;;  %v3541_v5 = vmul.f32 %v10400_v12, %v9517_v13  ;;  %v10401_v37 = vld [vmem:[#allocation6_spill] sm:$0xff] }
 0x646   :  { %7318 = vmatprep.subr.bf16.mxu1 %v9852_v53  ;;  %v4762_v16 = vsel %vm3576_vm3, %v3537_v25, 0  ;;  %v4771_v55 = vsel %vm3576_vm3, %v3540_v59, 0  ;;  %v10409_v25 = vld [vmem:[#allocation20_spill] sm:$0xff] }
 0x647   :  { %v4765_v33 = vsel %vm3576_vm3, %v3538_v15, 0  ;;  %v9884_v7 = vand.u32 4294901760, %v4762_v16  ;;  %v4777_v61 = vsel %vm3576_vm3, %v3542_v42, 0  ;;  %v4774_v28 = vsel %vm3576_vm3, %v3541_v5, 0 }
 0x648   :  { %7053 = vmatmul.mubr.f32.gmra.mrb[18].mxu1 %v9524_v21  ;;  %v3539_v21 = vmul.f32 %v9428_v9, %v9488_v29  ;;  %v9892_v9 = vsub.f32 %v4759_v41, %v9874_v26  ;;  %v9918_v50 = vand.u32 4294901760, %v4771_v55  ;;  %v9921_v51 = vand.u32 4294901760, %v4777_v61  ;;  %v10410_v41 = vld [vmem:[#allocation10_spill] sm:$0xff] }
 0x649   :  { %7055 = vmatprep.mubr.f32.mxu1 %v9557_v27  ;;  %7320 = vmatpush3.bf16.msra.mxu1 %v9852_v53  ;;  %v9895_v27 = vand.u32 4294901760, %v4765_v33  ;;  %v9907_v17 = vsub.f32 %v4762_v16, %v9884_v7  ;;  %v3547_v15 = vmul.f32 %v10410_v41, %v10409_v25  ;;  %v4789_v16 = vsel %vm3576_vm3, %v3546_v10, 0 }
 0x64a   :  { %7322 = vmatprep.subr.bf16.mxu1 %v9858_v2  ;;  %v4768_v29 = vsel %vm3576_vm3, %v3539_v21, 0  ;;  %v4880_v52 = vand.u32 4294901760, %v9892_v9  ;;  %v9953_v32 = vsub.f32 %v4777_v61, %v9921_v51  ;;  %v9983_v61 = vsub.f32 %v4783_v48, %v9957_v1 }
 0x64b   :  { %v9910_v47 = vand.u32 4294901760, %v4768_v29  ;;  %v4890_v39 = vand.u32 4294901760, %v9907_v17  ;;  %v4792_v44 = vsel %vm3576_vm3, %v3547_v15, 0  ;;  %v9986_v11 = vand.u32 4294901760, %v4789_v16 }
 0x64c   :  { %7056 = vmatmul.mubr.f32.gmra.mrb[20].mxu1 %v9553_v56  ;;  %v9889_v56 = vsub.f32 %v3554_v19, %v4816_v43  ;;  %v4940_v18 = vand.u32 4294901760, %v9953_v32  ;;  %v10005_v15 = vand.u32 4294901760, %v4792_v44 }
 0x64d   :  { %7058 = vmatprep.mubr.f32.mxu1 %v9587_v63  ;;  %v9887_v63 = vsub.f32 %v4807_v40, %v4819_v23  ;;  %v9933_v19 = vsub.f32 %v4768_v29, %v9910_v47  ;;  %v9935_v40 = vand.u32 4294901760, %v4774_v28  ;;  %v9944_v23 = vsub.f32 %v4771_v55, %v9918_v50 }
 0x64e   :  { %v5055_v13 = vand.u32 4294901760, %v9889_v56  ;;  %v4891_v21 = vsub.f32 %v9907_v17, %v4890_v39 }
 0x64f   :  { %v5062_v4 = vand.u32 4294901760, %v9887_v63  ;;  %v4910_v59 = vand.u32 4294901760, %v9933_v19  ;;  %v4920_v5 = vand.u32 4294901760, %v9944_v23 }
 0x650   :  { %7059 = vmatmul.mubr.f32.gmra.mrb[22].mxu1 %v9583_v45 }
 0x651   :  { %7061 = vmatprep.mubr.f32.mxu1 %v9618_v14  ;;  %v10402_v14 = vld [vmem:[#allocation9_spill] sm:$0xff]  ;;  %v5063_v43 = vsub.f32 %v9887_v63, %v5062_v4  ;;  %v4921_v62 = vsub.f32 %v9944_v23, %v4920_v5 }
 0x652   :  { %v3543_v45 = vmul.f32 %v10402_v14, %v10401_v37  ;;  %v10412_v14 = vld [vmem:[#allocation14_spill] sm:$0xff] }
 0x654   :  { %7062 = vmatmul.mubr.f32.gmra.mrb[24].mxu1 %v9614_v34  ;;  %v9915_v34 = vsub.f32 %v4765_v33, %v9895_v27  ;;  %v4780_v35 = vsel %vm3576_vm3, %v3543_v45, 0  ;;  %v9967_v33 = vsub.f32 %v4774_v28, %v9935_v40  ;;  %v4892_v28 = vand.u32 4294901760, %v4891_v21 }
 0x655   :  { %7064 = vmatprep.mubr.f32.mxu1 %v9649_v22  ;;  %v3545_v22 = vmul.f32 %v10406_v20, %v10405_v57  ;;  %v9950_v6 = vand.u32 4294901760, %v4780_v35  ;;  %v4911_v57 = vsub.f32 %v9933_v19, %v4910_v59  ;;  %v4941_v21 = vsub.f32 %v9953_v32, %v4940_v18 }
 0x656   :  { %v4900_v54 = vand.u32 4294901760, %v9915_v34  ;;  %v4930_v20 = vand.u32 4294901760, %v9967_v33 }
 0x657   :  { %v4786_v46 = vsel %vm3576_vm3, %v3545_v22, 0  ;;  %v9975_v55 = vsub.f32 %v4780_v35, %v9950_v6  ;;  %v10413_v35 = vld [vmem:[#allocation17_spill] sm:$0xff] }
 0x658   :  { %7065 = vmatmul.mubr.f32.gmra.mrb[26].mxu1 %v9645_v58  ;;  %v5056_v58 = vsub.f32 %v9889_v56, %v5055_v13  ;;  %v4901_v12 = vsub.f32 %v9915_v34, %v4900_v54  ;;  %v9977_v37 = vand.u32 4294901760, %v4786_v46 }
 0x659   :  { %7067 = vmatprep.mubr.f32.mxu1 %v9679_v8  ;;  %v4881_v8 = vsub.f32 %v9892_v9, %v4880_v52  ;;  %v4950_v25 = vand.u32 4294901760, %v9975_v55 }
 0x65a   :  { %v5057_v42 = vand.u32 4294901760, %v5056_v58  ;;  %v4902_v48 = vand.u32 4294901760, %v4901_v12  ;;  %v10415_v58 = vld [vmem:[#allocation18_spill] sm:$0xff]  ;;  %v10003_v41 = vsub.f32 %v4786_v46, %v9977_v37  ;;  %v4931_v46 = vsub.f32 %v9967_v33, %v4930_v20 }
 0x65b   :  { %v4882_v29 = vand.u32 4294901760, %v4881_v8  ;;  %v7329_v12 = vpack.c.bf16 %v9829_v24, %v9827_v3  ;;  %v7349_v3 = vpack.c.bf16 %v5062_v4, %v5055_v13  ;;  %v10419_v24 = vand.u32 4294901760, %v9983_v61 }
 0x65c   :  { %7068 = vmatmul.mubr.f32.gmra.mrb[28].mxu1 %v9675_v0  ;;  %v5064_v0 = vand.u32 4294901760, %v5063_v43  ;;  %v10416_v43 = vld [vmem:[#allocation25_spill] sm:$0xff] }
 0x65d   :  { %7070 = vmatprep.mubr.f32.mxu1 %v9701_v49  ;;  %v10411_v49 = vld [vmem:[#allocation19_spill] sm:$0xff]  ;;  %v3550_v8 = vmul.f32 %v10416_v43, %v10415_v58  ;;  %v4932_v58 = vand.u32 4294901760, %v4931_v46  ;;  %v10279_v43 = vand.u32 4294901760, %v10003_v41 }
 0x65e   :  { %v3548_v45 = vmul.f32 %v10412_v14, %v10411_v49  ;;  %v7325_v22 = vpack.c.bf16 %v5064_v0, %v5057_v42  ;;  %v10280_v42 = vand.u32 4294901760, %v9983_v61  ;;  %v10013_v0 = vsub.f32 %v4789_v16, %v9986_v11  ;;  %v10417_v14 = vld [vmem:[#allocation8_spill] sm:$0xff] }
 0x65f   :  { %v4801_v16 = vsel %vm3576_vm3, %v3550_v8, 0 }
 0x660   :  { %7071 = vmatmul.mubr.f32.gmra.mrb[30].mxu1 %v9697_v31  ;;  %v10414_v31 = vld [vmem:[#allocation13_spill] sm:$0xff]  ;;  %v4795_v10 = vsel %vm3576_vm3, %v3548_v45, 0  ;;  %v10418_v45 = vld [vmem:[#allocation24_spill] sm:$0xff] }
 0x661   :  { %7081 = vmatprep.mubr.f32.mxu1 %v4882_v29  ;;  %v3549_v30 = vmul.f32 %v10414_v31, %v10413_v35  ;;  %v4912_v29 = vand.u32 4294901760, %v4911_v57  ;;  %v10021_v49 = vand.u32 4294901760, %v4795_v10  ;;  %v4922_v35 = vand.u32 4294901760, %v4921_v62 }
 0x662   :  { %v10027_v57 = vsub.f32 %v4792_v44, %v10005_v15  ;;  %v4942_v31 = vand.u32 4294901760, %v4941_v21  ;;  %v4961_v62 = vsub.f32 %v9983_v61, %v10280_v42  ;;  %v10042_v21 = vand.u32 4294901760, %v4801_v16 }
 0x663   :  { %v10039_v44 = vsub.f32 %v4795_v10, %v10021_v49 }
 0x664   :  { %7082 = vmatmul.mubr.f32.vlgmr.msra.gmra.mrb[16].mxu1 %v4892_v28  ;;  %v3551_v28 = vmul.f32 %v10418_v45, %v10417_v14  ;;  %v4971_v45 = vsub.f32 %v10003_v41, %v10279_v43  ;;  %v10282_v10 = vand.u32 4294901760, %v10027_v57 }
 0x665   :  { %7324 = vmatpush3.bf16.msra.mxu1 %v9858_v2  ;;  %7084 = vmatprep.mubr.f32.mxu1 %v4902_v48  ;;  %v4798_v2 = vsel %vm3576_vm3, %v3549_v30, 0  ;;  %v4951_v48 = vsub.f32 %v9975_v55, %v4950_v25 }
 0x666   :  { %7326 = vmatprep.subr.bf16.mxu1 %v7325_v22  ;;  %v10032_v30 = vand.u32 4294901760, %v4798_v2  ;;  %v4804_v8 = vsel %vm3576_vm3, %v3551_v28, 0  ;;  %v10055_v28 = vsub.f32 %v4801_v16, %v10042_v21  ;;  %v4991_v43 = vsub.f32 %v10027_v57, %v10282_v10 }
 0x667   :  { %v10048_v14 = vand.u32 4294901760, %v4804_v8 }
 0x668   :  { %7085 = vmatmul.mubr.f32.gmra.mrb[18].mxu1 %v4912_v29  ;;  %v10281_v29 = vand.u32 4294901760, %v10013_v0  ;;  %v10046_v46 = vsub.f32 %v4798_v2, %v10032_v30 }
 0x669   :  { %7087 = vmatprep.mubr.f32.mxu1 %v4922_v35  ;;  %7328 = vmatpush3.bf16.msra.mxu1 %v7325_v22  ;;  %v4952_v22 = vand.u32 4294901760, %v4951_v48  ;;  %v4962_v35 = vand.u32 4294901760, %v4961_v62  ;;  %v5000_v48 = vand.u32 4294901760, %v10039_v44  ;;  %v10062_v2 = vsub.f32 %v4804_v8, %v10048_v14 }
 0x66a   :  { %7330 = vmatprep.subr.bf16.mxu1 %v7329_v12  ;;  %v5010_v16 = vand.u32 4294901760, %v10046_v46 }
 0x66b   :  { %v5001_v62 = vsub.f32 %v10039_v44, %v5000_v48 }
 0x66c   :  { %7088 = vmatmul.mubr.f32.gmra.mrb[20].mxu1 %v4932_v58  ;;  %v4972_v58 = vand.u32 4294901760, %v4971_v45  ;;  %v5011_v8 = vsub.f32 %v10046_v46, %v5010_v16  ;;  %v5030_v45 = vand.u32 4294901760, %v10062_v2 }
 0x66d   :  { %7090 = vmatprep.mubr.f32.mxu1 %v4942_v31  ;;  %v4981_v31 = vsub.f32 %v10013_v0, %v10281_v29  ;;  %v5020_v29 = vand.u32 4294901760, %v10055_v28 }
 0x66e   :  { %v5012_v10 = vand.u32 4294901760, %v5011_v8 }
 0x66f   :  { %v4982_v42 = vand.u32 4294901760, %v4981_v31  ;;  %v5021_v31 = vsub.f32 %v10055_v28, %v5020_v29 }
 0x670   :  { %7091 = vmatmul.mubr.f32.gmra.mrb[22].mxu1 %v4952_v22  ;;  %v4992_v22 = vand.u32 4294901760, %v4991_v43 }
 0x671   :  { %7093 = vmatprep.mubr.f32.mxu1 %v4962_v35  ;;  %v5002_v35 = vand.u32 4294901760, %v5001_v62  ;;  %v7333_v62 = vpack.c.bf16 %v9887_v63, %v9889_v56  ;;  %v10422_v63 = vand.u32 4294901760, %v10027_v57 }
 0x674   :  { %7094 = vmatmul.mubr.f32.gmra.mrb[24].mxu1 %v4972_v58  ;;  %v5031_v58 = vsub.f32 %v10062_v2, %v5030_v45 }
 0x675   :  { %7096 = vmatprep.mubr.f32.mxu1 %v4982_v42  ;;  %v5022_v42 = vand.u32 4294901760, %v5021_v31 }
 0x676   :  { %v5032_v43 = vand.u32 4294901760, %v5031_v58 }
 0x678   :  { %7097 = vmatmul.mubr.f32.gmra.mrb[26].mxu1 %v4992_v22 }
 0x679   :  { %7099 = vmatprep.mubr.f32.mxu1 %v5002_v35 }
 0x67c   :  { %7100 = vmatmul.mubr.f32.gmra.mrb[28].mxu1 %v5012_v10 }
 0x67d   :  { %7102 = vmatprep.mubr.f32.mxu1 %v5022_v42 }
 0x680   :  { %7103 = vmatmul.mubr.f32.gmra.mrb[30].mxu1 %v5032_v43 }
 0x681   :  { %7113 = vmatprep.mubr.f32.mxu1 %v9874_v26 }
 0x684   :  { %7114 = vmatmul.mubr.f32.vlgmr.msra.gmra.mrb[16].mxu1 %v9884_v7 }
 0x685   :  { %7332 = vmatpush3.bf16.msra.mxu1 %v7329_v12  ;;  %7116 = vmatprep.mubr.f32.mxu1 %v9895_v27  ;;  %v7345_v12 = vpack.c.bf16 %v5048_v60, %v5041_v36  ;;  %v10420_v36 = vand.u32 4294901760, %v10003_v41  ;;  %v10421_v60 = vand.u32 4294901760, %v10013_v0 }
 0x686   :  { %7334 = vmatprep.subr.bf16.mxu1 %v7333_v62 }
 0x688   :  { %7117 = vmatmul.mubr.f32.gmra.mrb[18].mxu1 %v9910_v47 }
 0x689   :  { %7119 = vmatprep.mubr.f32.mxu1 %v9918_v50  ;;  %7336 = vmatpush3.bf16.msra.mxu1 %v7333_v62 }
 0x68a   :  { %7338 = vmatprep.subr.bf16.mxu1 %v9815_v38 }
 0x68c   :  { %7120 = vmatmul.mubr.f32.gmra.mrb[20].mxu1 %v9935_v40 }
 0x68d   :  { %7122 = vmatprep.mubr.f32.mxu1 %v9921_v51 }
 0x690   :  { %7123 = vmatmul.mubr.f32.gmra.mrb[22].mxu1 %v9950_v6 }
 0x691   :  { %7125 = vmatprep.mubr.f32.mxu1 %v9957_v1 }
 0x694   :  { %7126 = vmatmul.mubr.f32.gmra.mrb[24].mxu1 %v9977_v37 }
 0x695   :  { %7128 = vmatprep.mubr.f32.mxu1 %v9986_v11 }
 0x698   :  { %7129 = vmatmul.mubr.f32.gmra.mrb[26].mxu1 %v10005_v15 }
 0x699   :  { %7131 = vmatprep.mubr.f32.mxu1 %v10021_v49 }
 0x69c   :  { %7132 = vmatmul.mubr.f32.gmra.mrb[28].mxu1 %v10032_v30 }
 0x69d   :  { %7134 = vmatprep.mubr.f32.mxu1 %v10042_v21 }
 0x6a0   :  { %7135 = vmatmul.mubr.f32.gmra.mrb[30].mxu1 %v10048_v14 }
 0x6a1   :  { %7145 = vmatprep.mubr.f32.mxu1 %v9892_v9 }
 0x6a4   :  { %7146 = vmatmul.mubr.f32.vlgmr.msra.gmra.mrb[16].mxu1 %v9907_v17 }
 0x6a5   :  { %7340 = vmatpush3.bf16.msra.mxu1 %v9815_v38  ;;  %7148 = vmatprep.mubr.f32.mxu1 %v9915_v34 }
 0x6a6   :  { %7342 = vmatprep.subr.bf16.mxu1 %v9852_v53 }
 0x6a8   :  { %7149 = vmatmul.mubr.f32.gmra.mrb[18].mxu1 %v9933_v19 }
 0x6a9   :  { %7151 = vmatprep.mubr.f32.mxu1 %v9944_v23  ;;  %7344 = vmatpush3.bf16.msra.mxu1 %v9852_v53 }
 0x6aa   :  { %7346 = vmatprep.subr.bf16.mxu1 %v7345_v12 }
 0x6ac   :  { %7152 = vmatmul.mubr.f32.gmra.mrb[20].mxu1 %v9967_v33 }
 0x6ad   :  { %7154 = vmatprep.mubr.f32.mxu1 %v9953_v32 }
 0x6b0   :  { %7155 = vmatmul.mubr.f32.gmra.mrb[22].mxu1 %v9975_v55 }
 0x6b1   :  { %7157 = vmatprep.mubr.f32.mxu1 %v9983_v61 }
 0x6b4   :  { %7158 = vmatmul.mubr.f32.gmra.mrb[24].mxu1 %v10003_v41 }
 0x6b5   :  { %7160 = vmatprep.mubr.f32.mxu1 %v10013_v0 }
 0x6b8   :  { %7161 = vmatmul.mubr.f32.gmra.mrb[26].mxu1 %v10027_v57 }
 0x6b9   :  { %7163 = vmatprep.mubr.f32.mxu1 %v10039_v44 }
 0x6bc   :  { %7164 = vmatmul.mubr.f32.gmra.mrb[28].mxu1 %v10046_v46 }
 0x6bd   :  { %7166 = vmatprep.mubr.f32.mxu1 %v10055_v28 }
 0x6c0   :  { %7167 = vmatmul.mubr.f32.gmra.mrb[30].mxu1 %v10062_v2 }
 0x6c1   :  { %7177 = vmatprep.mubr.f32.mxu1 %v4880_v52 }
 0x6c4   :  { %7178 = vmatmul.mubr.f32.vlgmr.msra.gmra.mrb[16].mxu1 %v4890_v39 }
 0x6c5   :  { %7348 = vmatpush3.bf16.msra.mxu1 %v7345_v12  ;;  %7180 = vmatprep.mubr.f32.mxu1 %v4900_v54 }
 0x6c6   :  { %7350 = vmatprep.subr.bf16.mxu1 %v7349_v3 }
 0x6c8   :  { %7181 = vmatmul.mubr.f32.gmra.mrb[18].mxu1 %v4910_v59 }
 0x6c9   :  { %7183 = vmatprep.mubr.f32.mxu1 %v4920_v5  ;;  %7352 = vmatpush3.bf16.msra.mxu1 %v7349_v3 }
 0x6ca   :  { %7354 = vmatprep.subr.bf16.mxu1 %v9815_v38 }
 0x6cc   :  { %7184 = vmatmul.mubr.f32.gmra.mrb[20].mxu1 %v4930_v20 }
 0x6cd   :  { %7186 = vmatprep.mubr.f32.mxu1 %v4940_v18 }
 0x6d0   :  { %7187 = vmatmul.mubr.f32.gmra.mrb[22].mxu1 %v4950_v25 }
 0x6d1   :  { %7189 = vmatprep.mubr.f32.mxu1 %v10419_v24 }
 0x6d4   :  { %7190 = vmatmul.mubr.f32.gmra.mrb[24].mxu1 %v10420_v36 }
 0x6d5   :  { %7192 = vmatprep.mubr.f32.mxu1 %v10421_v60 }
 0x6d8   :  { %7193 = vmatmul.mubr.f32.gmra.mrb[26].mxu1 %v10422_v63 }
 0x6d9   :  { %7195 = vmatprep.mubr.f32.mxu1 %v5000_v48 }
 0x6dc   :  { %7196 = vmatmul.mubr.f32.gmra.mrb[28].mxu1 %v5010_v16 }
 0x6dd   :  { %7198 = vmatprep.mubr.f32.mxu1 %v5020_v29 }
 0x6e0   :  { %7199 = vmatmul.mubr.f32.gmra.mrb[30].mxu1 %v5030_v45 }
 0x6e1   :  { %7209 = vmatprep.mubr.f32.mxu1 %v9874_v26 }
 0x6e4   :  { %7210 = vmatmul.mubr.f32.vlgmr.msra.gmra.mrb[16].mxu1 %v9884_v7 }
 0x6e5   :  { %7356 = vmatpush3.bf16.msra.mxu1 %v9815_v38  ;;  %7212 = vmatprep.mubr.f32.mxu1 %v9895_v27 }
 0x6e6   :  { %7358 = vmatprep.subr.bf16.mxu1 %v9852_v53 }
 0x6e8   :  { %7213 = vmatmul.mubr.f32.gmra.mrb[18].mxu1 %v9910_v47 }
 0x6e9   :  { %7215 = vmatprep.mubr.f32.mxu1 %v9918_v50  ;;  %7360 = vmatpush3.bf16.msra.mxu1 %v9852_v53 }
 0x6ec   :  { %7216 = vmatmul.mubr.f32.gmra.mrb[20].mxu1 %v9935_v40 }
 0x6ed   :  { %7218 = vmatprep.mubr.f32.mxu1 %v9921_v51 }
 0x6f0   :  { %7219 = vmatmul.mubr.f32.gmra.mrb[22].mxu1 %v9950_v6 }
 0x6f1   :  { %7221 = vmatprep.mubr.f32.mxu1 %v9957_v1 }
 0x6f4   :  { %7222 = vmatmul.mubr.f32.gmra.mrb[24].mxu1 %v9977_v37 }
 0x6f5   :  { %7224 = vmatprep.mubr.f32.mxu1 %v9986_v11 }
 0x6f8   :  { %7225 = vmatmul.mubr.f32.gmra.mrb[26].mxu1 %v10005_v15 }
 0x6f9   :  { %7227 = vmatprep.mubr.f32.mxu1 %v10021_v49 }
 0x6fc   :  { %7228 = vmatmul.mubr.f32.gmra.mrb[28].mxu1 %v10032_v30 }
 0x6fd   :  { %7230 = vmatprep.mubr.f32.mxu1 %v10042_v21 }
 0x700   :  { %7231 = vmatmul.mubr.f32.gmra.mrb[30].mxu1 %v10048_v14 }
 0x701   :  { %7241 = vmatprep.mubr.f32.mxu1 %v9874_v26 }
 0x704   :  { %7242 = vmatmul.mubr.f32.vlgmr.msra.gmra.mrb[16].mxu1 %v9884_v7 }
 0x705   :  { %7244 = vmatprep.mubr.f32.mxu1 %v9895_v27 }
 0x708   :  { %7245 = vmatmul.mubr.f32.gmra.mrb[18].mxu1 %v9910_v47 }
 0x709   :  { %7247 = vmatprep.mubr.f32.mxu1 %v9918_v50 }
 0x70c   :  { %7248 = vmatmul.mubr.f32.gmra.mrb[20].mxu1 %v9935_v40 }
 0x70d   :  { %7250 = vmatprep.mubr.f32.mxu1 %v9921_v51 }
 0x710   :  { %7251 = vmatmul.mubr.f32.gmra.mrb[22].mxu1 %v9950_v6 }
 0x711   :  { %7253 = vmatprep.mubr.f32.mxu1 %v9957_v1 }
 0x714   :  { %7254 = vmatmul.mubr.f32.gmra.mrb[24].mxu1 %v9977_v37 }
 0x715   :  { %7256 = vmatprep.mubr.f32.mxu1 %v9986_v11 }
 0x718   :  { %7257 = vmatmul.mubr.f32.gmra.mrb[26].mxu1 %v10005_v15 }
 0x719   :  { %7259 = vmatprep.mubr.f32.mxu1 %v10021_v49 }
 0x71c   :  { %7260 = vmatmul.mubr.f32.gmra.mrb[28].mxu1 %v10032_v30 }
 0x71d   :  { %7262 = vmatprep.mubr.f32.mxu1 %v10042_v21 }
 0x720   :  { %7263 = vmatmul.mubr.f32.gmra.mrb[30].mxu1 %v10048_v14 }
 0x7d7   :  { %v7243_v38 = vpop.f32.mrb[16].mxu1 }
 0x7d8   :  { %5940 = vst [vmem:[#allocation2 + $0x8] sm:$0xff] %v7243_v38  ;;  %v5845_v53 = vpop.f32.mrb[17].mxu1 }
 0x7d9   :  { %5939 = vst [vmem:[#allocation2] sm:$0xff] %v5845_v53 }
 0x7db   :  { %v7246_v26 = vpop.f32.mrb[18].mxu1 }
 0x7dc   :  { %5942 = vst [vmem:[#allocation2 + $0x18] sm:$0xff] %v7246_v26  ;;  %v5857_v7 = vpop.f32.mrb[19].mxu1 }
 0x7dd   :  { %5941 = vst [vmem:[#allocation2 + $0x10] sm:$0xff] %v5857_v7 }
 0x7df   :  { %v7249_v56 = vpop.f32.mrb[20].mxu1 }
 0x7e0   :  { %5944 = vst [vmem:[#allocation2 + $0x28] sm:$0xff] %v7249_v56  ;;  %v5869_v9 = vpop.f32.mrb[21].mxu1 }
 0x7e1   :  { %5943 = vst [vmem:[#allocation2 + $0x20] sm:$0xff] %v5869_v9 }
 0x7e3   :  { %v7252_v27 = vpop.f32.mrb[22].mxu1 }
 0x7e4   :  { %5946 = vst [vmem:[#allocation2 + $0x38] sm:$0xff] %v7252_v27  ;;  %v5881_v17 = vpop.f32.mrb[23].mxu1 }
 0x7e5   :  { %5945 = vst [vmem:[#allocation2 + $0x30] sm:$0xff] %v5881_v17 }
 0x7e7   :  { %v7255_v47 = vpop.f32.mrb[24].mxu1 }
 0x7e8   :  { %5948 = vst [vmem:[#allocation2 + $0x48] sm:$0xff] %v7255_v47  ;;  %v5893_v13 = vpop.f32.mrb[25].mxu1 }
 0x7e9   :  { %5947 = vst [vmem:[#allocation2 + $0x40] sm:$0xff] %v5893_v13 }
 0x7eb   :  { %v7258_v4 = vpop.f32.mrb[26].mxu1 }
 0x7ec   :  { %5950 = vst [vmem:[#allocation2 + $0x58] sm:$0xff] %v7258_v4  ;;  %v5905_v34 = vpop.f32.mrb[27].mxu1 }
 0x7ed   :  { %5949 = vst [vmem:[#allocation2 + $0x50] sm:$0xff] %v5905_v34 }
 0x7ef   :  { %v7261_v50 = vpop.f32.mrb[28].mxu1 }
 0x7f0   :  { %5952 = vst [vmem:[#allocation2 + $0x68] sm:$0xff] %v7261_v50  ;;  %v5917_v52 = vpop.f32.mrb[29].mxu1 }
 0x7f1   :  { %5951 = vst [vmem:[#allocation2 + $0x60] sm:$0xff] %v5917_v52 }
 0x7f3   :  { %v7264_v51 = vpop.f32.mrb[30].mxu1 }
 0x7f4   :  { %5954 = vst [vmem:[#allocation2 + $0x78] sm:$0xff] %v7264_v51  ;;  %v5929_v39 = vpop.f32.mrb[31].mxu1 }
 0x7f5   :  { %5953 = vst [vmem:[#allocation2 + $0x70] sm:$0xff] %v5929_v39 }
 0x7f6   :  { %7910 = shalt.err (!%p7907_p4)
}
 0x7f7   :  { %s7911_s30 = scalar_lea.hbm %s10219_s11, 2048 }
 0x7f8   :  { %p7912_p5 = scmp.ne.s32.totalorder %s10219_s11, %s7911_s30  ;;  %p7915_p6 = scmp.lt.u32.totalorder %s7911_s30, %s10219_s11 }
 0x7fa   :  { %p7917_p7 = pnand %p7915_p6, %p7912_p5 }
 0x7fc   :  { %7920 = shalt.err (!%p7917_p7)
}
 0x7fd   :  { %s7924_s15 = smov 128   ;;  %s7925_s16 = smov 8  }
 0x7fe   :  { %5966 = dma.vmem_to_hbm [thread:$0]  %s5961_s5, 2048, %s10219_s11, [#allocation3], %s7924_s15, %s7924_s15, %s7925_s16  }
 0x7ff   :  { %7921 = dma.done.wait [#allocation3], 2048  }
 0x800   :  { %7922 = vsyncadd [#allocation3], 4294965248 }
 0x801   :  { %5970 = vsyncpa [#allocation3], 1 }

// kernel: tpu_custom_call.1
= control target key start
LH: loop header
LB: loop body
LE: loop exit
PB: predicated region body
PF: predicated region fallthrough
CT: control target
= control target key end

     0   :  { %vm97_vm0 = vcmask 1043456   ;;  %vm72_vm1 = vcmask 64512   ;;  %s10208_s0 = inlined_call_operand.vmem [shape: f32[128,8], index: 0, kind: input, shape index: {}]   ;;  %s10209_s1 = inlined_call_operand.vmem [shape: f32[128,8], index: 1, kind: input, shape index: {}]   ;;  %s10210_s2 = inlined_call_operand.vmem [shape: bf16[8,32], index: 2, kind: input, shape index: {}]   ;;  %s10211_s3 = inlined_call_operand.vmem [shape: bf16[32,32], index: 3, kind: input, shape index: {}]   ;;  %s10212_s4 = inlined_call_operand.vmem [shape: f32[6,32], index: 4, kind: input, shape index: {}]   ;;  %s10213_s5 = inlined_call_operand.vmem [shape: bf16[32,28], index: 5, kind: input, shape index: {}]   ;;  %s10214_s6 = inlined_call_operand.vmem [shape: f32[1,28], index: 6, kind: input, shape index: {}]   ;;  %s10215_s7 = inlined_call_operand.vmem [shape: f32[8,28], index: 7, kind: input, shape index: {}]   ;;  %s10216_s8 = inlined_call_operand.vmem [shape: f32[8,28], index: 8, kind: input, shape index: {}]   ;;  %s10217_s9 = inlined_call_operand.vmem [shape: f32[28,128], index: 9, kind: input, shape index: {}]   ;;  %s10218_s10 = inlined_call_operand.vmem [shape: f32[28,128], index: 10, kind: input, shape index: {}]   ;;  %s10219_s11 = inlined_call_operand.hbm [shape: f32[128,128], index: 11, kind: output, shape index: {}]  }
   0x1   :  { %v56_v0 = vld [vmem:[%s10210_s2] sm:$0xf]  ;;  %v3575_v1 = vld [vmem:[%s10218_s10 + $0x18] sm:$0xf]  ;;  %v41_v5 = vld [vmem:[%s10208_s0 + $0x8] sm:$0xff] }
   0x2   :  { %7699 = vmatprep.subr.msk.bf16.mxu0 %vm97_vm0, %v56_v0  ;;  %v99_v2 = vsel %vm97_vm0, %v56_v0, 0  ;;  %v7995_v3 = vsel %vm97_vm0, %v3575_v1, 0  ;;  %v40_v4 = vld [vmem:[%s10208_s0] sm:$0xff]  ;;  %v42_v8 = vld [vmem:[%s10208_s0 + $0x10] sm:$0xff]  ;;  %v43_v9 = vld [vmem:[%s10208_s0 + $0x18] sm:$0xff] }
   0x3   :  { %10283 = vst [vmem:[#allocation5_spill] sm:$0xff] %v7995_v3  ;;  %6512 = vmatpush3.bf16.msra.mxu0 %v99_v2  ;;  %v10220_v6 = vand.u32 4294901760, %v7995_v3  ;;  %v60_v7 = vpack.c.bf16 %v41_v5, %v40_v4  ;;  %v44_v10 = vld [vmem:[%s10208_s0 + $0x20] sm:$0xff]  ;;  %v61_v11 = vpack.c.bf16 %v43_v9, %v42_v8  ;;  %v45_v12 = vld [vmem:[%s10208_s0 + $0x28] sm:$0xff]  ;;  %v46_v15 = vld [vmem:[%s10208_s0 + $0x30] sm:$0xff] }
   0x4   :  { %v62_v14 = vpack.c.bf16 %v45_v12, %v44_v10  ;;  %v47_v16 = vld [vmem:[%s10208_s0 + $0x38] sm:$0xff]  ;;  %v48_v17 = vld [vmem:[%s10208_s0 + $0x40] sm:$0xff]  ;;  %v49_v18 = vld [vmem:[%s10208_s0 + $0x48] sm:$0xff] }
   0x5   :  { %v8019_v13 = vsub.f32 %v7995_v3, %v10220_v6  ;;  %6513 = vmatprep.mubr.msk.bf16.mxu0 %vm72_vm1, %v60_v7  ;;  %v63_v19 = vpack.c.bf16 %v47_v16, %v46_v15 }
   0x6   :  { %6514 = vmatmul.mubr.msk.bf16.vlgmr.msra.gmra.mrb[0].mxu0 %vm72_vm1, %v61_v11 }
   0x7   :  { %10284 = vst [vmem:[#allocation6_spill] sm:$0xff] %v8019_v13  ;;  %6517 = vmatprep.mubr.msk.bf16.mxu0 %vm72_vm1, %v62_v14 }
   0x8   :  { %16 = vsyncpa [#allocation3], 0  ;;  %v64_v20 = vpack.c.bf16 %v49_v18, %v48_v17  ;;  %v50_v21 = vld [vmem:[%s10208_s0 + $0x50] sm:$0xff]  ;;  %v51_v22 = vld [vmem:[%s10208_s0 + $0x58] sm:$0xff]  ;;  %vm198_vm2 = vcmask 261120   ;;  %vm3576_vm3 = vcmask 228352  }
   0x9   :  { %v52_v23 = vld [vmem:[%s10208_s0 + $0x60] sm:$0xff]  ;;  %v53_v24 = vld [vmem:[%s10208_s0 + $0x68] sm:$0xff]  ;;  %v65_v25 = vpack.c.bf16 %v51_v22, %v50_v21  ;;  %v54_v27 = vld [vmem:[%s10208_s0 + $0x70] sm:$0xff] }
   0xa   :  { %v66_v26 = vpack.c.bf16 %v53_v24, %v52_v23  ;;  %v55_v28 = vld [vmem:[%s10208_s0 + $0x78] sm:$0xff]  ;;  %v8062_v30 = vld [vmem:[%s10212_s4] ss:$0 sm:$0xff] }
   0xb   :  { %v67_v29 = vpack.c.bf16 %v55_v28, %v54_v27 }
   0xe   :  { %6518 = vmatmul.mubr.msk.bf16.gmra.mrb[4].mxu0 %vm72_vm1, %v63_v19 }
   0xf   :  { %6521 = vmatprep.mubr.msk.bf16.mxu0 %vm72_vm1, %v64_v20 }
  0x16   :  { %6522 = vmatmul.mubr.msk.bf16.gmra.mrb[8].mxu0 %vm72_vm1, %v65_v25 }
  0x17   :  { %6525 = vmatprep.mubr.msk.bf16.mxu0 %vm72_vm1, %v66_v26 }
  0x1e   :  { %6526 = vmatmul.mubr.msk.bf16.gmra.mrb[12].mxu0 %vm72_vm1, %v67_v29 }
  0xd9   :  { %v6515_v31 = vpop.f32.mrb[0].mxu0 }
  0xda   :  { %v8065_v32 = vadd.f32 %v6515_v31, %v8062_v30  ;;  %v135_v33 = vpop.f32.mrb[1].mxu0 }
  0xdb   :  { %v8068_v34 = vadd.f32 %v8062_v30, %v135_v33  ;;  %v6516_v35 = vpop.f32.mrb[2].mxu0 }
  0xdc   :  { %v8071_v36 = vadd.f32 %v6516_v35, %v8062_v30  ;;  %v138_v37 = vpop.f32.mrb[3].mxu0  ;;  %v205_v38 = vsel %vm198_vm2, %v8065_v32, 0.0  ;;  %v266_v40 = vmul.f32 %v8065_v32, %v8065_v32 }
  0xdd   :  { %206 = vadd.xlane.f32.xlu1 %v205_v38  ;;  %v199_v39 = vsel %vm198_vm2, %v8068_v34, 0.0  ;;  %v8080_v41 = vadd.f32 %v8062_v30, %v138_v37  ;;  %v264_v52 = vmul.f32 %v8068_v34, %v8068_v34 }
  0xde   :  { %200 = vadd.xlane.f32.xlu0 %v199_v39  ;;  %v208_v42 = vsel %vm198_vm2, %v8071_v36, 0.0  ;;  %v267_v43 = vmul.f32 %v8071_v36, %v8071_v36  ;;  %v286_v44 = vsel %vm198_vm2, %v266_v40, 0.0 }
  0xdf   :  { %v265_v50 = vmul.f32 %v8080_v41, %v8080_v41  ;;  %v202_v51 = vsel %vm198_vm2, %v8080_v41, 0.0  ;;  %v280_v56 = vsel %vm198_vm2, %v264_v52, 0.0 }
  0xe0   :  { %v289_v48 = vsel %vm198_vm2, %v267_v43, 0.0 }
  0xe1   :  { %209 = vadd.xlane.f32.xlu1 %v208_v42  ;;  %v6519_v45 = vpop.f32.mrb[4].mxu0  ;;  %v283_v54 = vsel %vm198_vm2, %v265_v50, 0.0 }
  0xe2   :  { %287 = vadd.xlane.f32.xlu0 %v286_v44  ;;  %v151_v46 = vpop.f32.mrb[5].mxu0  ;;  %v8099_v55 = vadd.f32 %v6519_v45, %v8062_v30 }
  0xe3   :  { %v6520_v47 = vpop.f32.mrb[6].mxu0  ;;  %v8108_v63 = vadd.f32 %v8062_v30, %v151_v46 }
  0xe4   :  { %v154_v49 = vpop.f32.mrb[7].mxu0  ;;  %v8095_v53 = vadd.f32 %v6520_v47, %v8062_v30  ;;  %v217_v0 = vsel %vm198_vm2, %v8099_v55, 0.0  ;;  %v270_v5 = vmul.f32 %v8099_v55, %v8099_v55 }
  0xe5   :  { %290 = vadd.xlane.f32.xlu1 %v289_v48  ;;  %v8105_v61 = vadd.f32 %v8062_v30, %v154_v49  ;;  %v211_v4 = vsel %vm198_vm2, %v8108_v63, 0.0  ;;  %v268_v15 = vmul.f32 %v8108_v63, %v8108_v63 }
  0xe6   :  { %203 = vadd.xlane.f32.xlu0 %v202_v51  ;;  %v220_v58 = vsel %vm198_vm2, %v8095_v53, 0.0  ;;  %v271_v2 = vmul.f32 %v8095_v53, %v8095_v53  ;;  %v298_v14 = vsel %vm198_vm2, %v270_v5, 0.0 }
  0xe7   :  { %v214_v1 = vsel %vm198_vm2, %v8105_v61, 0.0  ;;  %v269_v11 = vmul.f32 %v8105_v61, %v8105_v61  ;;  %v292_v19 = vsel %vm198_vm2, %v268_v15, 0.0 }
  0xe8   :  { %v301_v10 = vsel %vm198_vm2, %v271_v2, 0.0 }
  0xe9   :  { %284 = vadd.xlane.f32.xlu1 %v283_v54  ;;  %v6523_v57 = vpop.f32.mrb[8].mxu0  ;;  %v295_v17 = vsel %vm198_vm2, %v269_v11, 0.0 }
  0xea   :  { %281 = vadd.xlane.f32.xlu0 %v280_v56  ;;  %v167_v59 = vpop.f32.mrb[9].mxu0  ;;  %v8131_v18 = vadd.f32 %v6523_v57, %v8062_v30  ;;  %v7703_v56 = vld [vmem:[%s10211_s3] sm:$0xff]   ;;  %v7704_v57 = vld [vmem:[%s10211_s3 + $0x8] sm:$0xff]  }
  0xeb   :  { %v6524_v60 = vpop.f32.mrb[10].mxu0  ;;  %v8140_v22 = vadd.f32 %v8062_v30, %v167_v59  ;;  %6529 = vmatprep.subr.bf16.mxu0 %v7703_v56 }
  0xec   :  { %v170_v62 = vpop.f32.mrb[11].mxu0  ;;  %v8127_v16 = vadd.f32 %v6524_v60, %v8062_v30  ;;  %v229_v23 = vsel %vm198_vm2, %v8131_v18, 0.0  ;;  %v274_v27 = vmul.f32 %v8131_v18, %v8131_v18  ;;  %6530 = vmatpush3.bf16.msra.mxu0 %v7703_v56 }
  0xed   :  { %221 = vadd.xlane.f32.xlu1 %v220_v58  ;;  %v8137_v21 = vadd.f32 %v8062_v30, %v170_v62  ;;  %v223_v26 = vsel %vm198_vm2, %v8140_v22, 0.0  ;;  %v272_v33 = vmul.f32 %v8140_v22, %v8140_v22  ;;  %6531 = vmatprep.subr.bf16.mxu0 %v7704_v57 }
  0xee   :  { %218 = vadd.xlane.f32.xlu0 %v217_v0  ;;  %v232_v20 = vsel %vm198_vm2, %v8127_v16, 0.0  ;;  %v275_v25 = vmul.f32 %v8127_v16, %v8127_v16  ;;  %v310_v31 = vsel %vm198_vm2, %v274_v27, 0.0 }
  0xef   :  { %v226_v24 = vsel %vm198_vm2, %v8137_v21, 0.0  ;;  %v273_v29 = vmul.f32 %v8137_v21, %v8137_v21  ;;  %v304_v39 = vsel %vm198_vm2, %v272_v33, 0.0 }
  0xf0   :  { %v313_v28 = vsel %vm198_vm2, %v275_v25, 0.0  ;;  %6532 = vmatpush3.bf16.msra.mxu0 %v7704_v57 }
  0xf1   :  { %215 = vadd.xlane.f32.xlu1 %v214_v1  ;;  %v6527_v7 = vpop.f32.mrb[12].mxu0  ;;  %v307_v38 = vsel %vm198_vm2, %v273_v29, 0.0 }
  0xf2   :  { %212 = vadd.xlane.f32.xlu0 %v211_v4  ;;  %v183_v8 = vpop.f32.mrb[13].mxu0  ;;  %v8162_v37 = vadd.f32 %v6527_v7, %v8062_v30 }
  0xf3   :  { %v6528_v9 = vpop.f32.mrb[14].mxu0  ;;  %v8174_v44 = vadd.f32 %v8062_v30, %v183_v8 }
  0xf4   :  { %v186_v12 = vpop.f32.mrb[15].mxu0  ;;  %v8159_v35 = vadd.f32 %v6528_v9, %v8062_v30  ;;  %v241_v42 = vsel %vm198_vm2, %v8162_v37, 0.0  ;;  %v278_v51 = vmul.f32 %v8162_v37, %v8162_v37 }
  0xf5   :  { %302 = vadd.xlane.f32.xlu1 %v301_v10  ;;  %v8171_v43 = vadd.f32 %v8062_v30, %v186_v12  ;;  %v235_v47 = vsel %vm198_vm2, %v8174_v44, 0.0  ;;  %v276_v48 = vmul.f32 %v8174_v44, %v8174_v44 }
  0xf6   :  { %299 = vadd.xlane.f32.xlu0 %v298_v14  ;;  %v244_v40 = vsel %vm198_vm2, %v8159_v35, 0.0  ;;  %v279_v30 = vmul.f32 %v8159_v35, %v8159_v35  ;;  %v322_v54 = vsel %vm198_vm2, %v278_v51, 0.0 }
  0xf7   :  { %v238_v45 = vsel %vm198_vm2, %v8171_v43, 0.0  ;;  %v277_v46 = vmul.f32 %v8171_v43, %v8171_v43  ;;  %v316_v50 = vsel %vm198_vm2, %v276_v48, 0.0 }
  0xf8   :  { %v325_v52 = vsel %vm198_vm2, %v279_v30, 0.0  ;;  %v8220_v30 = vld [vmem:[%s10212_s4 + $0x2] ss:$0 sm:$0xff] }
  0xf9   :  { %296 = vadd.xlane.f32.xlu1 %v295_v17  ;;  %v319_v49 = vsel %vm198_vm2, %v277_v46, 0.0 }
  0xfa   :  { %293 = vadd.xlane.f32.xlu0 %v292_v19 }
  0xfd   :  { %233 = vadd.xlane.f32.xlu1 %v232_v20 }
  0xfe   :  { %230 = vadd.xlane.f32.xlu0 %v229_v23 }
 0x101   :  { %227 = vadd.xlane.f32.xlu1 %v226_v24 }
 0x102   :  { %224 = vadd.xlane.f32.xlu0 %v223_v26 }
 0x105   :  { %314 = vadd.xlane.f32.xlu1 %v313_v28 }
 0x106   :  { %311 = vadd.xlane.f32.xlu0 %v310_v31 }
 0x109   :  { %308 = vadd.xlane.f32.xlu1 %v307_v38 }
 0x10a   :  { %305 = vadd.xlane.f32.xlu0 %v304_v39  ;;  %v8209_v39 = vld [vmem:[%s10212_s4 + $0x1] ss:$0 sm:$0xff] }
 0x10d   :  { %245 = vadd.xlane.f32.xlu1 %v244_v40 }
 0x10e   :  { %242 = vadd.xlane.f32.xlu0 %v241_v42 }
 0x111   :  { %239 = vadd.xlane.f32.xlu1 %v238_v45 }
 0x112   :  { %236 = vadd.xlane.f32.xlu0 %v235_v47 }
 0x115   :  { %320 = vadd.xlane.f32.xlu1 %v319_v49 }
 0x116   :  { %317 = vadd.xlane.f32.xlu0 %v316_v50 }
 0x119   :  { %326 = vadd.xlane.f32.xlu1 %v325_v52 }
 0x11a   :  { %323 = vadd.xlane.f32.xlu0 %v322_v54 }
 0x16a   :  { %v207_v58 = vpop.xlane.xlu1 %206 }
 0x16b   :  { %v201_v59 = vpop.xlane.xlu0 %200  ;;  %v250_v60 = vmul.f32 0.03125, %v207_v58 }
 0x16c   :  { %v8198_v11 = vmul.f32 0.03125, %v201_v59 }
 0x16d   :  { %v346_v2 = vmul.f32 %v250_v60, %v250_v60  ;;  %v430_v48 = vsub.f32 %v8065_v32, %v250_v60 }
 0x16e   :  { %v210_v62 = vpop.xlane.xlu1 %209  ;;  %v344_v25 = vmul.f32 %v8198_v11, %v8198_v11 }
 0x16f   :  { %v251_v0 = vmul.f32 0.03125, %v210_v62  ;;  %v288_v1 = vpop.xlane.xlu0 %287 }
 0x170   :  { %v330_v4 = vmul.f32 0.03125, %v288_v1 }
 0x171   :  { %v347_v8 = vmul.f32 %v251_v0, %v251_v0  ;;  %v431_v32 = vsub.f32 %v8071_v36, %v251_v0 }
 0x172   :  { %v362_v5 = vsub.f32 %v330_v4, %v346_v2  ;;  %v291_v7 = vpop.xlane.xlu1 %290 }
 0x173   :  { %v331_v9 = vmul.f32 0.03125, %v291_v7  ;;  %v204_v10 = vpop.xlane.xlu0 %203 }
 0x174   :  { %v378_v12 = vadd.f32 1e-05, %v362_v5  ;;  %v8200_v14 = vmul.f32 0.03125, %v204_v10 }
 0x175   :  { %v363_v15 = vsub.f32 %v331_v9, %v347_v8 }
 0x176   :  { %7707 = vrsqrt.f32 %v378_v12  ;;  %v345_v17 = vmul.f32 %v8200_v14, %v8200_v14  ;;  %v285_v19 = vpop.xlane.xlu1 %284  ;;  %v429_v7 = vsub.f32 %v8080_v41, %v8200_v14 }
 0x177   :  { %v379_v20 = vadd.f32 1e-05, %v363_v15  ;;  %v329_v23 = vmul.f32 0.03125, %v285_v19  ;;  %v282_v24 = vpop.xlane.xlu0 %281 }
 0x178   :  { %v328_v26 = vmul.f32 0.03125, %v282_v24 }
 0x179   :  { %7709 = vrsqrt.f32 %v379_v20  ;;  %v361_v27 = vsub.f32 %v329_v23, %v345_v17 }
 0x17a   :  { %v360_v28 = vsub.f32 %v328_v26, %v344_v25  ;;  %v222_v29 = vpop.xlane.xlu1 %221  ;;  %v428_v25 = vsub.f32 %v8068_v34, %v8198_v11 }
 0x17b   :  { %v377_v31 = vadd.f32 1e-05, %v361_v27  ;;  %v219_v33 = vpop.xlane.xlu0 %218  ;;  %v8211_v42 = vmul.f32 0.03125, %v222_v29 }
 0x17c   :  { %v376_v38 = vadd.f32 1e-05, %v360_v28  ;;  %v8213_v47 = vmul.f32 0.03125, %v219_v33 }
 0x17d   :  { %7711 = vrsqrt.f32 %v377_v31  ;;  %v351_v56 = vmul.f32 %v8211_v42, %v8211_v42 }
 0x17e   :  { %7713 = vrsqrt.f32 %v376_v38  ;;  %v216_v40 = vpop.xlane.xlu1 %215  ;;  %v350_v62 = vmul.f32 %v8213_v47, %v8213_v47 }
 0x17f   :  { %v213_v45 = vpop.xlane.xlu0 %212  ;;  %v8222_v50 = vmul.f32 0.03125, %v216_v40 }
 0x180   :  { %v7708_v46 = vpop.eup %7707  ;;  %v8226_v57 = vmul.f32 0.03125, %v213_v45 }
 0x181   :  { %v414_v49 = vmul.f32 %v7708_v46, %v8209_v39  ;;  %v349_v8 = vmul.f32 %v8222_v50, %v8222_v50 }
 0x182   :  { %v303_v51 = vpop.xlane.xlu1 %302  ;;  %v348_v12 = vmul.f32 %v8226_v57, %v8226_v57 }
 0x183   :  { %v7710_v52 = vpop.eup %7709  ;;  %v446_v54 = vmul.f32 %v430_v48, %v414_v49  ;;  %v335_v58 = vmul.f32 0.03125, %v303_v51  ;;  %v300_v59 = vpop.xlane.xlu0 %299 }
 0x184   :  { %v415_v60 = vmul.f32 %v7710_v52, %v8209_v39  ;;  %v334_v1 = vmul.f32 0.03125, %v300_v59 }
 0x185   :  { %v8233_v2 = vadd.f32 %v8220_v30, %v446_v54  ;;  %v367_v4 = vsub.f32 %v335_v58, %v351_v56 }
 0x186   :  { %v447_v5 = vmul.f32 %v431_v32, %v415_v60  ;;  %v366_v9 = vsub.f32 %v334_v1, %v350_v62  ;;  %v297_v10 = vpop.xlane.xlu1 %296  ;;  %v435_v62 = vsub.f32 %v8095_v53, %v8211_v42 }
 0x187   :  { %v7712_v36 = vpop.eup %7711  ;;  %v5984_v0 = vmul.f32 -1.442695, %v8233_v2  ;;  %v383_v15 = vadd.f32 1e-05, %v367_v4  ;;  %v333_v17 = vmul.f32 0.03125, %v297_v10  ;;  %v294_v19 = vpop.xlane.xlu0 %293 }
 0x188   :  { %v7714_v20 = vpop.eup %7713  ;;  %v8243_v23 = vadd.f32 %v8220_v30, %v447_v5  ;;  %v413_v41 = vmul.f32 %v7712_v36, %v8209_v39  ;;  %v382_v14 = vadd.f32 1e-05, %v366_v9  ;;  %v332_v24 = vmul.f32 0.03125, %v294_v19 }
 0x189   :  { %7715 = vpow2.f32 %v5984_v0  ;;  %v412_v26 = vmul.f32 %v7714_v20, %v8209_v39  ;;  %v365_v27 = vsub.f32 %v333_v17, %v349_v8  ;;  %v434_v9 = vsub.f32 %v8099_v55, %v8213_v47 }
 0x18a   :  { %v5985_v28 = vmul.f32 -1.442695, %v8243_v23  ;;  %7717 = vrsqrt.f32 %v383_v15  ;;  %v364_v29 = vsub.f32 %v332_v24, %v348_v12  ;;  %v234_v31 = vpop.xlane.xlu1 %233  ;;  %v445_v33 = vmul.f32 %v429_v7, %v413_v41 }
 0x18b   :  { %7719 = vrsqrt.f32 %v382_v14  ;;  %v381_v38 = vadd.f32 1e-05, %v365_v27  ;;  %v231_v40 = vpop.xlane.xlu0 %230  ;;  %v444_v45 = vmul.f32 %v428_v25, %v412_v26  ;;  %v8257_v51 = vmul.f32 0.03125, %v234_v31 }
 0x18c   :  { %7721 = vpow2.f32 %v5985_v28  ;;  %v380_v46 = vadd.f32 1e-05, %v364_v29  ;;  %v8251_v48 = vadd.f32 %v8220_v30, %v445_v33  ;;  %v8260_v56 = vmul.f32 0.03125, %v231_v40 }
 0x18d   :  { %7723 = vrsqrt.f32 %v381_v38  ;;  %v8254_v34 = vadd.f32 %v8220_v30, %v444_v45  ;;  %v355_v1 = vmul.f32 %v8257_v51, %v8257_v51  ;;  %v433_v12 = vsub.f32 %v8105_v61, %v8222_v50 }
 0x18e   :  { %7725 = vrsqrt.f32 %v380_v46  ;;  %v228_v11 = vpop.xlane.xlu1 %227  ;;  %v5983_v49 = vmul.f32 -1.442695, %v8251_v48  ;;  %v354_v10 = vmul.f32 %v8260_v56, %v8260_v56  ;;  %v432_v45 = vsub.f32 %v8108_v63, %v8226_v57 }
 0x18f   :  { %v225_v52 = vpop.xlane.xlu0 %224  ;;  %v5982_v54 = vmul.f32 -1.442695, %v8254_v34  ;;  %v8262_v58 = vmul.f32 0.03125, %v228_v11 }
 0x190   :  { %7727 = vpow2.f32 %v5983_v49  ;;  %v8264_v59 = vmul.f32 0.03125, %v225_v52 }
 0x191   :  { %7729 = vpow2.f32 %v5982_v54  ;;  %v353_v42 = vmul.f32 %v8262_v58, %v8262_v58 }
 0x192   :  { %v315_v32 = vpop.xlane.xlu1 %314  ;;  %v352_v55 = vmul.f32 %v8264_v59, %v8264_v59 }
 0x193   :  { %v7716_v60 = vpop.eup %7715  ;;  %v339_v4 = vmul.f32 0.03125, %v315_v32  ;;  %v312_v5 = vpop.xlane.xlu0 %311 }
 0x194   :  { %v7718_v7 = vpop.eup %7717  ;;  %v530_v8 = vadd.f32 1.0, %v7716_v60  ;;  %v338_v36 = vmul.f32 0.03125, %v312_v5 }
 0x195   :  { %v7720_v0 = vpop.eup %7719  ;;  %v419_v53 = vmul.f32 %v7718_v7, %v8209_v39  ;;  %v371_v15 = vsub.f32 %v339_v4, %v355_v1 }
 0x196   :  { %v7722_v17 = vpop.eup %7721  ;;  %7731 = vrcp.f32 %v530_v8  ;;  %v418_v19 = vmul.f32 %v7720_v0, %v8209_v39  ;;  %v370_v47 = vsub.f32 %v338_v36, %v354_v10  ;;  %v309_v20 = vpop.xlane.xlu1 %308 }
 0x197   :  { %v7724_v41 = vpop.eup %7723  ;;  %v531_v14 = vadd.f32 1.0, %v7722_v17  ;;  %v387_v24 = vadd.f32 1e-05, %v371_v15  ;;  %v337_v25 = vmul.f32 0.03125, %v309_v20  ;;  %v306_v61 = vpop.xlane.xlu0 %305  ;;  %v451_v50 = vmul.f32 %v435_v62, %v419_v53 }
 0x198   :  { %v7726_v26 = vpop.eup %7725  ;;  %v417_v27 = vmul.f32 %v7724_v41, %v8209_v39  ;;  %v386_v28 = vadd.f32 1e-05, %v370_v47  ;;  %v336_v29 = vmul.f32 0.03125, %v306_v61  ;;  %v450_v31 = vmul.f32 %v434_v9, %v418_v19 }
 0x199   :  { %7733 = vrcp.f32 %v531_v14  ;;  %v416_v33 = vmul.f32 %v7726_v26, %v8209_v39  ;;  %v369_v38 = vsub.f32 %v337_v25, %v353_v42  ;;  %v8290_v62 = vadd.f32 %v8220_v30, %v451_v50 }
 0x19a   :  { %v7728_v40 = vpop.eup %7727  ;;  %7735 = vrsqrt.f32 %v387_v24  ;;  %v368_v46 = vsub.f32 %v336_v29, %v352_v55  ;;  %v246_v11 = vpop.xlane.xlu1 %245  ;;  %v449_v49 = vmul.f32 %v433_v12, %v417_v27  ;;  %v8287_v60 = vadd.f32 %v8220_v30, %v450_v31 }
 0x19b   :  { %v7730_v52 = vpop.eup %7729  ;;  %7737 = vrsqrt.f32 %v386_v28  ;;  %v385_v54 = vadd.f32 1e-05, %v369_v38  ;;  %v243_v32 = vpop.xlane.xlu0 %242  ;;  %v529_v5 = vadd.f32 1.0, %v7728_v40  ;;  %v448_v7 = vmul.f32 %v432_v45, %v416_v33 }
 0x19c   :  { %v384_v1 = vadd.f32 1e-05, %v368_v46  ;;  %v528_v4 = vadd.f32 1.0, %v7730_v52  ;;  %v8293_v63 = vadd.f32 %v8220_v30, %v449_v49  ;;  %v5988_v0 = vmul.f32 -1.442695, %v8287_v60 }
 0x19d   :  { %7739 = vrsqrt.f32 %v385_v54  ;;  %v8296_v8 = vadd.f32 %v8220_v30, %v448_v7  ;;  %v5989_v15 = vmul.f32 -1.442695, %v8290_v62  ;;  %v8306_v17 = vmul.f32 0.03125, %v246_v11 }
 0x19e   :  { %7741 = vrsqrt.f32 %v384_v1  ;;  %v240_v57 = vpop.xlane.xlu1 %239  ;;  %v5987_v36 = vmul.f32 -1.442695, %v8293_v63  ;;  %v8308_v47 = vmul.f32 0.03125, %v243_v32  ;;  %v439_v25 = vsub.f32 %v8127_v16, %v8257_v51 }
 0x19f   :  { %v8298_v9 = vmul.f32 0.03125, %v240_v57  ;;  %v237_v10 = vpop.xlane.xlu0 %236  ;;  %7743 = vrcp.f32 %v528_v4  ;;  %v5986_v42 = vmul.f32 -1.442695, %v8296_v8  ;;  %v438_v27 = vsub.f32 %v8131_v18, %v8260_v56 }
 0x1a0   :  { %v7732_v12 = vpop.eup %7731  ;;  %v8302_v53 = vmul.f32 0.03125, %v237_v10  ;;  %7745 = vrcp.f32 %v529_v5  ;;  %v437_v28 = vsub.f32 %v8137_v21, %v8262_v58  ;;  %v436_v33 = vsub.f32 %v8140_v22, %v8264_v59 }
 0x1a1   :  { %7747 = vpow2.f32 %v5987_v36  ;;  %v357_v20 = vmul.f32 %v8298_v9, %v8298_v9  ;;  %v359_v51 = vmul.f32 %v8306_v17, %v8306_v17  ;;  %v358_v18 = vmul.f32 %v8308_v47, %v8308_v47 }
 0x1a2   :  { %v321_v19 = vpop.xlane.xlu1 %320  ;;  %7749 = vpow2.f32 %v5986_v42  ;;  %v356_v61 = vmul.f32 %v8302_v53, %v8302_v53  ;;  %v578_v42 = vmul.f32 %v7732_v12, %v8233_v2 }
 0x1a3   :  { %v7734_v55 = vpop.eup %7733  ;;  %v341_v41 = vmul.f32 0.03125, %v321_v19  ;;  %v318_v14 = vpop.xlane.xlu0 %317  ;;  %7751 = vpow2.f32 %v5988_v0 }
 0x1a4   :  { %v7736_v24 = vpop.eup %7735  ;;  %v340_v50 = vmul.f32 0.03125, %v318_v14  ;;  %7753 = vpow2.f32 %v5989_v15  ;;  %v579_v58 = vmul.f32 %v7734_v55, %v8243_v23 }
 0x1a5   :  { %v7738_v26 = vpop.eup %7737  ;;  %v423_v29 = vmul.f32 %v7736_v24, %v8209_v39  ;;  %v373_v31 = vsub.f32 %v341_v41, %v357_v20 }
 0x1a6   :  { %v422_v16 = vmul.f32 %v7738_v26, %v8209_v39  ;;  %v372_v38 = vsub.f32 %v340_v50, %v356_v61  ;;  %v327_v40 = vpop.xlane.xlu1 %326  ;;  %v600_v2 = vpack.c.bf16 %v579_v58, %v578_v42  ;;  %v443_v58 = vsub.f32 %v8159_v35, %v8306_v17 }
 0x1a7   :  { %v7740_v45 = vpop.eup %7739  ;;  %v389_v56 = vadd.f32 1e-05, %v373_v31  ;;  %v343_v46 = vmul.f32 0.03125, %v327_v40  ;;  %v324_v21 = vpop.xlane.xlu0 %323  ;;  %v455_v4 = vmul.f32 %v439_v25, %v423_v29  ;;  %v440_v40 = vsub.f32 %v8174_v44, %v8302_v53 }
 0x1a8   :  { %v7742_v11 = vpop.eup %7741  ;;  %v421_v49 = vmul.f32 %v7740_v45, %v8209_v39  ;;  %v388_v22 = vadd.f32 1e-05, %v372_v38  ;;  %v342_v59 = vmul.f32 0.03125, %v324_v21  ;;  %v454_v52 = vmul.f32 %v438_v27, %v422_v16 }
 0x1a9   :  { %v7744_v54 = vpop.eup %7743  ;;  %v420_v32 = vmul.f32 %v7742_v11, %v8209_v39  ;;  %7755 = vrsqrt.f32 %v389_v56  ;;  %v375_v1 = vsub.f32 %v343_v46, %v359_v51  ;;  %v8344_v50 = vadd.f32 %v8220_v30, %v455_v4 }
 0x1aa   :  { %v7746_v5 = vpop.eup %7745  ;;  %7757 = vrsqrt.f32 %v388_v22  ;;  %v374_v7 = vsub.f32 %v342_v59, %v358_v18  ;;  %v576_v57 = vmul.f32 %v7744_v54, %v8254_v34  ;;  %v453_v10 = vmul.f32 %v437_v28, %v421_v49 }
 0x1ab   :  { %v7748_v36 = vpop.eup %7747  ;;  %v391_v23 = vadd.f32 1e-05, %v375_v1  ;;  %v577_v0 = vmul.f32 %v7746_v5, %v8251_v48  ;;  %v452_v15 = vmul.f32 %v436_v33, %v420_v32  ;;  %v8338_v14 = vadd.f32 %v8220_v30, %v454_v52 }
 0x1ac   :  { %v7750_v19 = vpop.eup %7749  ;;  %v390_v55 = vadd.f32 1e-05, %v374_v7  ;;  %v533_v20 = vadd.f32 1.0, %v7748_v36  ;;  %v8335_v41 = vadd.f32 %v8220_v30, %v453_v10  ;;  %v5993_v31 = vmul.f32 -1.442695, %v8344_v50 }
 0x1ad   :  { %v7752_v24 = vpop.eup %7751  ;;  %7759 = vrsqrt.f32 %v391_v23  ;;  %v599_v34 = vpack.c.bf16 %v577_v0, %v576_v57  ;;  %v532_v25 = vadd.f32 1.0, %v7750_v19  ;;  %v8341_v61 = vadd.f32 %v8220_v30, %v452_v15 }
 0x1ae   :  { %v7754_v48 = vpop.eup %7753  ;;  %7761 = vrsqrt.f32 %v390_v55  ;;  %v534_v12 = vadd.f32 1.0, %v7752_v24  ;;  %v5991_v28 = vmul.f32 -1.442695, %v8335_v41  ;;  %v5992_v29 = vmul.f32 -1.442695, %v8338_v14 }
 0x1af   :  { %6533 = vmatprep.mubr.msk.bf16.mxu0 %vm198_vm2, %v599_v34  ;;  %7763 = vrcp.f32 %v532_v25  ;;  %v535_v26 = vadd.f32 1.0, %v7754_v48  ;;  %v5990_v27 = vmul.f32 -1.442695, %v8341_v61  ;;  %v441_v51 = vsub.f32 %v8171_v43, %v8298_v9 }
 0x1b0   :  { %6534 = vmatmul.mubr.msk.bf16.vlgmr.msra.gmra.mrb[16].mxu0 %vm198_vm2, %v600_v2  ;;  %7765 = vrcp.f32 %v533_v20  ;;  %v442_v44 = vsub.f32 %v8162_v37, %v8308_v47 }
 0x1b1   :  { %7767 = vrcp.f32 %v534_v12 }
 0x1b2   :  { %7769 = vrcp.f32 %v535_v26 }
 0x1b3   :  { %v7756_v33 = vpop.eup %7755  ;;  %7771 = vpow2.f32 %v5990_v27 }
 0x1b4   :  { %v7758_v16 = vpop.eup %7757  ;;  %v425_v38 = vmul.f32 %v7756_v33, %v8209_v39  ;;  %7773 = vpow2.f32 %v5991_v28 }
 0x1b5   :  { %v424_v45 = vmul.f32 %v7758_v16, %v8209_v39  ;;  %7775 = vpow2.f32 %v5992_v29 }
 0x1b6   :  { %7777 = vpow2.f32 %v5993_v31  ;;  %v457_v18 = vmul.f32 %v441_v51, %v425_v38 }
 0x1b7   :  { %v7760_v56 = vpop.eup %7759  ;;  %v456_v46 = vmul.f32 %v440_v40, %v424_v45 }
 0x1b8   :  { %v7762_v21 = vpop.eup %7761  ;;  %v427_v11 = vmul.f32 %v7760_v56, %v8209_v39  ;;  %v8362_v43 = vadd.f32 %v8220_v30, %v457_v18 }
 0x1b9   :  { %v7764_v9 = vpop.eup %7763  ;;  %v426_v53 = vmul.f32 %v7762_v21, %v8209_v39  ;;  %v8368_v49 = vadd.f32 %v8220_v30, %v456_v46  ;;  %v8393_v21 = vld [vmem:[%s10212_s4 + $0x3] ss:$0 sm:$0xff] }
 0x1ba   :  { %v7766_v22 = vpop.eup %7765  ;;  %v580_v59 = vmul.f32 %v7764_v9, %v8296_v8  ;;  %v5995_v52 = vmul.f32 -1.442695, %v8362_v43  ;;  %v459_v35 = vmul.f32 %v443_v58, %v427_v11 }
 0x1bb   :  { %v7768_v17 = vpop.eup %7767  ;;  %v581_v54 = vmul.f32 %v7766_v22, %v8293_v63  ;;  %v5994_v32 = vmul.f32 -1.442695, %v8368_v49  ;;  %v458_v1 = vmul.f32 %v442_v44, %v426_v53 }
 0x1bc   :  { %v7770_v4 = vpop.eup %7769  ;;  %v582_v37 = vmul.f32 %v7768_v17, %v8287_v60  ;;  %7779 = vpow2.f32 %v5995_v52  ;;  %v479_v39 = vadd.f32 %v8220_v30, %v459_v35 }
 0x1bd   :  { %v7772_v47 = vpop.eup %7771  ;;  %v601_v5 = vpack.c.bf16 %v581_v54, %v580_v59  ;;  %v583_v7 = vmul.f32 %v7770_v4, %v8290_v62  ;;  %7781 = vpow2.f32 %v5994_v32  ;;  %v478_v8 = vadd.f32 %v8220_v30, %v458_v1 }
 0x1be   :  { %v7774_v57 = vpop.eup %7773  ;;  %v536_v10 = vadd.f32 1.0, %v7772_v47  ;;  %v5997_v19 = vmul.f32 -1.442695, %v479_v39 }
 0x1bf   :  { %v7776_v36 = vpop.eup %7775  ;;  %6537 = vmatprep.mubr.msk.bf16.mxu0 %vm198_vm2, %v601_v5  ;;  %v602_v63 = vpack.c.bf16 %v583_v7, %v582_v37  ;;  %v537_v23 = vadd.f32 1.0, %v7774_v57  ;;  %v5996_v42 = vmul.f32 -1.442695, %v478_v8 }
 0x1c0   :  { %v7778_v0 = vpop.eup %7777  ;;  %7783 = vrcp.f32 %v536_v10  ;;  %v538_v60 = vadd.f32 1.0, %v7776_v36 }
 0x1c1   :  { %6538 = vmatmul.mubr.msk.bf16.gmra.mrb[20].mxu0 %vm198_vm2, %v602_v63  ;;  %7785 = vrcp.f32 %v537_v23  ;;  %v539_v15 = vadd.f32 1.0, %v7778_v0 }
 0x1c2   :  { %7787 = vrcp.f32 %v538_v60 }
 0x1c3   :  { %7789 = vrcp.f32 %v539_v15 }
 0x1c4   :  { %7791 = vpow2.f32 %v5996_v42 }
 0x1c5   :  { %7793 = vpow2.f32 %v5997_v19 }
 0x1c6   :  { %v7780_v30 = vpop.eup %7779 }
 0x1c7   :  { %v7782_v62 = vpop.eup %7781  ;;  %v541_v55 = vadd.f32 1.0, %v7780_v30 }
 0x1c8   :  { %v540_v20 = vadd.f32 1.0, %v7782_v62 }
 0x1c9   :  { %7795 = vrcp.f32 %v541_v55 }
 0x1ca   :  { %v7784_v24 = vpop.eup %7783  ;;  %7797 = vrcp.f32 %v540_v20 }
 0x1cb   :  { %v7786_v34 = vpop.eup %7785  ;;  %v584_v25 = vmul.f32 %v7784_v24, %v8341_v61 }
 0x1cc   :  { %v7788_v48 = vpop.eup %7787  ;;  %v585_v2 = vmul.f32 %v7786_v34, %v8335_v41 }
 0x1cd   :  { %v7790_v12 = vpop.eup %7789  ;;  %v586_v26 = vmul.f32 %v7788_v48, %v8338_v14 }
 0x1ce   :  { %v7792_v27 = vpop.eup %7791  ;;  %v603_v28 = vpack.c.bf16 %v585_v2, %v584_v25  ;;  %v587_v29 = vmul.f32 %v7790_v12, %v8344_v50 }
 0x1cf   :  { %v7794_v31 = vpop.eup %7793  ;;  %v542_v33 = vadd.f32 1.0, %v7792_v27 }
 0x1d0   :  { %6541 = vmatprep.mubr.msk.bf16.mxu0 %vm198_vm2, %v603_v28  ;;  %v604_v16 = vpack.c.bf16 %v587_v29, %v586_v26  ;;  %v543_v51 = vadd.f32 1.0, %v7794_v31 }
 0x1d1   :  { %7799 = vrcp.f32 %v542_v33 }
 0x1d2   :  { %6542 = vmatmul.mubr.msk.bf16.gmra.mrb[24].mxu0 %vm198_vm2, %v604_v16  ;;  %7801 = vrcp.f32 %v543_v51 }
 0x1d3   :  { %v7796_v61 = vpop.eup %7795 }
 0x1d4   :  { %v7798_v38 = vpop.eup %7797  ;;  %v589_v41 = vmul.f32 %v7796_v61, %v8362_v43 }
 0x1d5   :  { %v588_v14 = vmul.f32 %v7798_v38, %v8368_v49 }
 0x1d7   :  { %v605_v40 = vpack.c.bf16 %v589_v41, %v588_v14 }
 0x1d9   :  { %6545 = vmatprep.mubr.msk.bf16.mxu0 %vm198_vm2, %v605_v40 }
 0x1db   :  { %v7800_v50 = vpop.eup %7799 }
 0x1dc   :  { %v7802_v45 = vpop.eup %7801  ;;  %v590_v18 = vmul.f32 %v7800_v50, %v478_v8 }
 0x1dd   :  { %v591_v56 = vmul.f32 %v7802_v45, %v479_v39 }
 0x1df   :  { %v606_v46 = vpack.c.bf16 %v591_v56, %v590_v18 }
 0x1e1   :  { %6546 = vmatmul.mubr.msk.bf16.gmra.mrb[28].mxu0 %vm198_vm2, %v606_v46 }
 0x283   :  { %v6535_v58 = vpop.f32.mrb[16].mxu0 }
 0x284   :  { %v8396_v11 = vadd.f32 %v6535_v58, %v8393_v21  ;;  %v681_v43 = vpop.f32.mrb[17].mxu0 }
 0x285   :  { %v6536_v9 = vpop.f32.mrb[18].mxu0  ;;  %v8399_v44 = vadd.f32 %v8393_v21, %v681_v43 }
 0x286   :  { %v8402_v53 = vadd.f32 %v6536_v9, %v8393_v21  ;;  %v684_v49 = vpop.f32.mrb[19].mxu0  ;;  %v750_v22 = vsel %vm198_vm2, %v8396_v11, 0.0  ;;  %v810_v17 = vmul.f32 %v8396_v11, %v8396_v11 }
 0x287   :  { %751 = vadd.xlane.f32.xlu0 %v750_v22  ;;  %v8407_v59 = vadd.f32 %v8393_v21, %v684_v49  ;;  %v744_v35 = vsel %vm198_vm2, %v8399_v44, 0.0  ;;  %v808_v4 = vmul.f32 %v8399_v44, %v8399_v44 }
 0x288   :  { %v753_v52 = vsel %vm198_vm2, %v8402_v53, 0.0  ;;  %v811_v32 = vmul.f32 %v8402_v53, %v8402_v53  ;;  %v830_v1 = vsel %vm198_vm2, %v810_v17, 0.0 }
 0x289   :  { %754 = vadd.xlane.f32.xlu1 %v753_v52  ;;  %v747_v54 = vsel %vm198_vm2, %v8407_v59, 0.0  ;;  %v809_v39 = vmul.f32 %v8407_v59, %v8407_v59  ;;  %v824_v47 = vsel %vm198_vm2, %v808_v4, 0.0 }
 0x28a   :  { %v833_v37 = vsel %vm198_vm2, %v811_v32, 0.0 }
 0x28b   :  { %745 = vadd.xlane.f32.xlu0 %v744_v35  ;;  %v827_v7 = vsel %vm198_vm2, %v809_v39, 0.0 }
 0x28d   :  { %748 = vadd.xlane.f32.xlu1 %v747_v54 }
 0x28f   :  { %831 = vadd.xlane.f32.xlu0 %v830_v1 }
 0x291   :  { %834 = vadd.xlane.f32.xlu1 %v833_v37 }
 0x293   :  { %825 = vadd.xlane.f32.xlu0 %v824_v47 }
 0x294   :  { %v6539_v5 = vpop.f32.mrb[20].mxu0 }
 0x295   :  { %v8428_v8 = vadd.f32 %v6539_v5, %v8393_v21  ;;  %v697_v57 = vpop.f32.mrb[21].mxu0  ;;  %828 = vadd.xlane.f32.xlu1 %v827_v7 }
 0x296   :  { %v6540_v10 = vpop.f32.mrb[22].mxu0  ;;  %v8431_v36 = vadd.f32 %v8393_v21, %v697_v57 }
 0x297   :  { %v8434_v63 = vadd.f32 %v6540_v10, %v8393_v21  ;;  %v700_v23 = vpop.f32.mrb[23].mxu0  ;;  %v762_v0 = vsel %vm198_vm2, %v8428_v8, 0.0  ;;  %v814_v19 = vmul.f32 %v8428_v8, %v8428_v8 }
 0x298   :  { %763 = vadd.xlane.f32.xlu0 %v762_v0  ;;  %v8439_v60 = vadd.f32 %v8393_v21, %v700_v23  ;;  %v756_v15 = vsel %vm198_vm2, %v8431_v36, 0.0  ;;  %v812_v20 = vmul.f32 %v8431_v36, %v8431_v36  ;;  %v7705_v23 = vld [vmem:[%s10213_s5] sm:$0xff]   ;;  %v7706_v0 = vld [vmem:[%s10213_s5 + $0x8] sm:$0xff]  }
 0x299   :  { %v765_v42 = vsel %vm198_vm2, %v8434_v63, 0.0  ;;  %v815_v62 = vmul.f32 %v8434_v63, %v8434_v63  ;;  %v842_v55 = vsel %vm198_vm2, %v814_v19, 0.0  ;;  %6549 = vmatprep.subr.bf16.mxu0 %v7705_v23 }
 0x29a   :  { %766 = vadd.xlane.f32.xlu1 %v765_v42  ;;  %v759_v30 = vsel %vm198_vm2, %v8439_v60, 0.0  ;;  %v813_v34 = vmul.f32 %v8439_v60, %v8439_v60  ;;  %v836_v25 = vsel %vm198_vm2, %v812_v20, 0.0  ;;  %6550 = vmatpush3.bf16.msra.mxu0 %v7705_v23  ;;  %v1304_v42 = vld [vmem:[%s10215_s7] sm:$0xff] }
 0x29b   :  { %v845_v24 = vsel %vm198_vm2, %v815_v62, 0.0  ;;  %6551 = vmatprep.subr.bf16.mxu0 %v7706_v0 }
 0x29c   :  { %757 = vadd.xlane.f32.xlu0 %v756_v15  ;;  %v839_v2 = vsel %vm198_vm2, %v813_v34, 0.0  ;;  %v8532_v15 = vand.u32 4294901760, %v1304_v42 }
 0x29e   :  { %760 = vadd.xlane.f32.xlu1 %v759_v30  ;;  %6552 = vmatpush3.bf16.msra.mxu0 %v7706_v0  ;;  %v8536_v19 = vsub.f32 %v1304_v42, %v8532_v15 }
 0x29f   :  { %6569 = vmatprep.subr.mxu0 %v8532_v15 }
 0x2a0   :  { %843 = vadd.xlane.f32.xlu0 %v842_v55  ;;  %10285 = vst [vmem:[#allocation7_spill] sm:$0xff] %v8536_v19  ;;  %v8539_v30 = vand.u32 4294901760, %v8536_v19 }
 0x2a2   :  { %846 = vadd.xlane.f32.xlu1 %v845_v24  ;;  %10286 = vst [vmem:[#allocation8_spill] sm:$0xff] %v8539_v30  ;;  %7361 = vmatprep.subr.mxu1 %v8539_v30 }
 0x2a3   :  { %7362 = vmatpush3.msra.mxu1 %v8539_v30 }
 0x2a4   :  { %837 = vadd.xlane.f32.xlu0 %v836_v25  ;;  %6699 = vmatprep.subr.mxu1 %v8532_v15 }
 0x2a5   :  { %v6543_v48 = vpop.f32.mrb[24].mxu0 }
 0x2a6   :  { %v8460_v12 = vadd.f32 %v6543_v48, %v8393_v21  ;;  %v713_v26 = vpop.f32.mrb[25].mxu0  ;;  %840 = vadd.xlane.f32.xlu1 %v839_v2  ;;  %v1294_v48 = vld [vmem:[%s10209_s1 + $0x30] sm:$0xff] }
 0x2a7   :  { %v6544_v27 = vpop.f32.mrb[26].mxu0  ;;  %v8463_v28 = vadd.f32 %v8393_v21, %v713_v26  ;;  %v8552_v26 = vsel %vm72_vm1, %v1294_v48, 0 }
 0x2a8   :  { %v8466_v29 = vadd.f32 %v6544_v27, %v8393_v21  ;;  %v716_v31 = vpop.f32.mrb[27].mxu0  ;;  %v774_v33 = vsel %vm198_vm2, %v8460_v12, 0.0  ;;  %v818_v38 = vmul.f32 %v8460_v12, %v8460_v12  ;;  %10287 = vst [vmem:[#allocation9_spill] sm:$0xff] %v8552_v26  ;;  %v1295_v27 = vld [vmem:[%s10209_s1 + $0x38] sm:$0xff] }
 0x2a9   :  { %775 = vadd.xlane.f32.xlu0 %v774_v33  ;;  %v8471_v16 = vadd.f32 %v8393_v21, %v716_v31  ;;  %v768_v61 = vsel %vm198_vm2, %v8463_v28, 0.0  ;;  %v816_v50 = vmul.f32 %v8463_v28, %v8463_v28 }
 0x2aa   :  { %v777_v51 = vsel %vm198_vm2, %v8466_v29, 0.0  ;;  %v819_v14 = vmul.f32 %v8466_v29, %v8466_v29  ;;  %v854_v40 = vsel %vm198_vm2, %v818_v38, 0.0 }
 0x2ab   :  { %778 = vadd.xlane.f32.xlu1 %v777_v51  ;;  %v771_v41 = vsel %vm198_vm2, %v8471_v16, 0.0  ;;  %v817_v18 = vmul.f32 %v8471_v16, %v8471_v16  ;;  %v848_v46 = vsel %vm198_vm2, %v816_v50, 0.0 }
 0x2ac   :  { %v857_v45 = vsel %vm198_vm2, %v819_v14, 0.0 }
 0x2ad   :  { %769 = vadd.xlane.f32.xlu0 %v768_v61  ;;  %v851_v49 = vsel %vm198_vm2, %v817_v18, 0.0  ;;  %v1296_v18 = vld [vmem:[%s10209_s1 + $0x40] sm:$0xff] }
 0x2af   :  { %772 = vadd.xlane.f32.xlu1 %v771_v41  ;;  %v8564_v41 = vand.u32 4294901760, %v8552_v26 }
 0x2b1   :  { %855 = vadd.xlane.f32.xlu0 %v854_v40  ;;  %6684 = vmatprep.mubr.f32.mxu1 %v8564_v41 }
 0x2b3   :  { %858 = vadd.xlane.f32.xlu1 %v857_v45  ;;  %v8569_v45 = vsel %vm72_vm1, %v1295_v27, 0 }
 0x2b4   :  { %v6547_v56 = vpop.f32.mrb[28].mxu0  ;;  %10288 = vst [vmem:[#allocation10_spill] sm:$0xff] %v8569_v45 }
 0x2b5   :  { %v8491_v58 = vadd.f32 %v6547_v56, %v8393_v21  ;;  %849 = vadd.xlane.f32.xlu0 %v848_v46  ;;  %v729_v43 = vpop.f32.mrb[29].mxu0  ;;  %v8575_v46 = vand.u32 4294901760, %v8569_v45 }
 0x2b6   :  { %v6548_v9 = vpop.f32.mrb[30].mxu0  ;;  %v8500_v17 = vadd.f32 %v8393_v21, %v729_v43  ;;  %v8578_v43 = vsel %vm72_vm1, %v1296_v18, 0 }
 0x2b7   :  { %v8495_v22 = vadd.f32 %v6548_v9, %v8393_v21  ;;  %852 = vadd.xlane.f32.xlu1 %v851_v49  ;;  %v732_v52 = vpop.f32.mrb[31].mxu0  ;;  %v786_v35 = vsel %vm198_vm2, %v8491_v58, 0.0  ;;  %10289 = vst [vmem:[#allocation11_spill] sm:$0xff] %v8578_v43  ;;  %6685 = vmatmul.mubr.f32.vlgmr.msra.gmra.mrb[0].mxu1 %v8575_v46 }
 0x2b8   :  { %v8505_v32 = vadd.f32 %v8393_v21, %v732_v52  ;;  %v780_v1 = vsel %vm198_vm2, %v8500_v17, 0.0  ;;  %v820_v4 = vmul.f32 %v8500_v17, %v8500_v17  ;;  %v822_v21 = vmul.f32 %v8491_v58, %v8491_v58  ;;  %6700 = vmatpush3.msra.mxu1 %v8532_v15 }
 0x2b9   :  { %787 = vadd.xlane.f32.xlu0 %v786_v35  ;;  %v789_v54 = vsel %vm198_vm2, %v8495_v22, 0.0  ;;  %v823_v7 = vmul.f32 %v8495_v22, %v8495_v22 }
 0x2ba   :  { %v783_v37 = vsel %vm198_vm2, %v8505_v32, 0.0  ;;  %v821_v39 = vmul.f32 %v8505_v32, %v8505_v32  ;;  %v860_v47 = vsel %vm198_vm2, %v820_v4, 0.0  ;;  %v866_v57 = vsel %vm198_vm2, %v822_v21, 0.0 }
 0x2bb   :  { %790 = vadd.xlane.f32.xlu1 %v789_v54  ;;  %v869_v10 = vsel %vm198_vm2, %v823_v7, 0.0  ;;  %v8586_v4 = vand.u32 4294901760, %v8578_v43 }
 0x2bc   :  { %v863_v5 = vsel %vm198_vm2, %v821_v39, 0.0 }
 0x2bd   :  { %781 = vadd.xlane.f32.xlu0 %v780_v1  ;;  %10290 = vst [vmem:[#allocation12_spill] sm:$0xff] %v8586_v4  ;;  %6687 = vmatprep.mubr.f32.mxu1 %v8586_v4 }
 0x2bf   :  { %784 = vadd.xlane.f32.xlu1 %v783_v37  ;;  %v1297_v37 = vld [vmem:[%s10209_s1 + $0x48] sm:$0xff] }
 0x2c0   :  { %v8598_v23 = vsel %vm72_vm1, %v1297_v37, 0 }
 0x2c1   :  { %861 = vadd.xlane.f32.xlu0 %v860_v47  ;;  %10291 = vst [vmem:[#allocation13_spill] sm:$0xff] %v8598_v23 }
 0x2c3   :  { %864 = vadd.xlane.f32.xlu1 %v863_v5  ;;  %v1298_v5 = vld [vmem:[%s10209_s1 + $0x50] sm:$0xff] }
 0x2c5   :  { %867 = vadd.xlane.f32.xlu0 %v866_v57 }
 0x2c7   :  { %870 = vadd.xlane.f32.xlu1 %v869_v10 }
 0x314   :  { %v752_v62 = vpop.xlane.xlu0 %751 }
 0x315   :  { %v8544_v24 = vmul.f32 0.03125, %v752_v62  ;;  %v8601_v62 = vand.u32 4294901760, %v8598_v23 }
 0x316   :  { %v755_v55 = vpop.xlane.xlu1 %754 }
 0x317   :  { %v8546_v25 = vmul.f32 0.03125, %v755_v55  ;;  %v890_v31 = vmul.f32 %v8544_v24, %v8544_v24  ;;  %v8604_v55 = vsel %vm72_vm1, %v1298_v5, 0  ;;  %6688 = vmatmul.mubr.f32.gmra.mrb[2].mxu1 %v8601_v62 }
 0x318   :  { %v746_v20 = vpop.xlane.xlu0 %745  ;;  %10292 = vst [vmem:[#allocation14_spill] sm:$0xff] %v8604_v55  ;;  %v8610_v48 = vand.u32 4294901760, %v8604_v55 }
 0x319   :  { %v8559_v33 = vmul.f32 0.03125, %v746_v20  ;;  %v891_v14 = vmul.f32 %v8546_v25, %v8546_v25  ;;  %v1299_v20 = vld [vmem:[%s10209_s1 + $0x58] sm:$0xff] }
 0x31a   :  { %v749_v34 = vpop.xlane.xlu1 %748  ;;  %6690 = vmatprep.mubr.f32.mxu1 %v8610_v48 }
 0x31b   :  { %v8561_v61 = vmul.f32 0.03125, %v749_v34  ;;  %v888_v9 = vmul.f32 %v8559_v33, %v8559_v33 }
 0x31c   :  { %v832_v2 = vpop.xlane.xlu0 %831 }
 0x31d   :  { %v874_v51 = vmul.f32 0.03125, %v832_v2  ;;  %v889_v54 = vmul.f32 %v8561_v61, %v8561_v61  ;;  %v1300_v2 = vld [vmem:[%s10209_s1 + $0x60] sm:$0xff] }
 0x31e   :  { %v835_v38 = vpop.xlane.xlu1 %834 }
 0x31f   :  { %v906_v40 = vsub.f32 %v874_v51, %v890_v31  ;;  %v875_v50 = vmul.f32 0.03125, %v835_v38  ;;  %v8619_v31 = vsel %vm72_vm1, %v1299_v20, 0  ;;  %v8624_v51 = vld [vmem:[%s10212_s4 + $0x4] ss:$0 sm:$0xff] }
 0x320   :  { %v826_v56 = vpop.xlane.xlu0 %825  ;;  %10293 = vst [vmem:[#allocation15_spill] sm:$0xff] %v8619_v31 }
 0x321   :  { %v922_v49 = vadd.f32 1e-05, %v906_v40  ;;  %v907_v52 = vsub.f32 %v875_v50, %v891_v14  ;;  %v872_v35 = vmul.f32 0.03125, %v826_v56  ;;  %v8627_v14 = vand.u32 4294901760, %v8619_v31 }
 0x322   :  { %v829_v1 = vpop.xlane.xlu1 %828  ;;  %v8631_v40 = vsel %vm72_vm1, %v1300_v2, 0 }
 0x323   :  { %7803 = vrsqrt.f32 %v922_v49  ;;  %v923_v39 = vadd.f32 1e-05, %v907_v52  ;;  %v904_v47 = vsub.f32 %v872_v35, %v888_v9  ;;  %v873_v21 = vmul.f32 0.03125, %v829_v1  ;;  %10294 = vst [vmem:[#allocation16_spill] sm:$0xff] %v8631_v40  ;;  %6691 = vmatmul.mubr.f32.gmra.mrb[4].mxu1 %v8627_v14 }
 0x324   :  { %v8638_v49 = vand.u32 4294901760, %v8631_v40  ;;  %v974_v52 = vsub.f32 %v8396_v11, %v8544_v24 }
 0x325   :  { %7805 = vrsqrt.f32 %v923_v39  ;;  %v920_v7 = vadd.f32 1e-05, %v904_v47  ;;  %v905_v57 = vsub.f32 %v873_v21, %v889_v54  ;;  %v764_v10 = vpop.xlane.xlu0 %763  ;;  %v975_v39 = vsub.f32 %v8402_v53, %v8546_v25  ;;  %v8651_v47 = vld [vmem:[%s10212_s4 + $0x5] ss:$0 sm:$0xff] }
 0x326   :  { %v8616_v27 = vmul.f32 0.03125, %v764_v10  ;;  %6693 = vmatprep.mubr.f32.mxu1 %v8638_v49  ;;  %v1301_v10 = vld [vmem:[%s10209_s1 + $0x68] sm:$0xff]  ;;  %v972_v25 = vsub.f32 %v8399_v44, %v8559_v33 }
 0x327   :  { %7807 = vrsqrt.f32 %v920_v7  ;;  %v921_v0 = vadd.f32 1e-05, %v905_v57  ;;  %v767_v42 = vpop.xlane.xlu1 %766 }
 0x328   :  { %v8633_v18 = vmul.f32 0.03125, %v767_v42  ;;  %v894_v54 = vmul.f32 %v8616_v27, %v8616_v27 }
 0x329   :  { %7809 = vrsqrt.f32 %v921_v0  ;;  %v758_v34 = vpop.xlane.xlu0 %757  ;;  %v973_v0 = vsub.f32 %v8407_v59, %v8561_v61 }
 0x32a   :  { %v8635_v56 = vmul.f32 0.03125, %v758_v34  ;;  %v895_v42 = vmul.f32 %v8633_v18, %v8633_v18 }
 0x32b   :  { %v761_v38 = vpop.xlane.xlu1 %760 }
 0x32c   :  { %v8653_v21 = vmul.f32 0.03125, %v761_v38  ;;  %v892_v20 = vmul.f32 %v8635_v56, %v8635_v56 }
 0x32d   :  { %v7804_v50 = vpop.eup %7803  ;;  %v844_v9 = vpop.xlane.xlu0 %843 }
 0x32e   :  { %v958_v35 = vmul.f32 %v7804_v50, %v8624_v51  ;;  %v878_v1 = vmul.f32 0.03125, %v844_v9  ;;  %v893_v44 = vmul.f32 %v8653_v21, %v8653_v21  ;;  %v977_v43 = vsub.f32 %v8439_v60, %v8653_v21 }
 0x32f   :  { %v7806_v37 = vpop.eup %7805  ;;  %v847_v5 = vpop.xlane.xlu1 %846 }
 0x330   :  { %v990_v11 = vmul.f32 %v974_v52, %v958_v35  ;;  %v959_v24 = vmul.f32 %v7806_v37, %v8624_v51  ;;  %v910_v7 = vsub.f32 %v878_v1, %v894_v54  ;;  %v879_v57 = vmul.f32 0.03125, %v847_v5 }
 0x331   :  { %v7808_v53 = vpop.eup %7807  ;;  %v838_v34 = vpop.xlane.xlu0 %837  ;;  %v8675_v35 = vsel %vm72_vm1, %v1301_v10, 0  ;;  %v1288_v10 = vld [vmem:[%s10209_s1] sm:$0xff] }
 0x332   :  { %v8669_v2 = vadd.f32 %v8651_v47, %v990_v11  ;;  %v991_v38 = vmul.f32 %v975_v39, %v959_v24  ;;  %v956_v50 = vmul.f32 %v7808_v53, %v8624_v51  ;;  %v926_v9 = vadd.f32 1e-05, %v910_v7  ;;  %10295 = vst [vmem:[#allocation17_spill] sm:$0xff] %v8675_v35 }
 0x333   :  { %v7810_v52 = vpop.eup %7809  ;;  %v911_v33 = vsub.f32 %v879_v57, %v895_v42  ;;  %v876_v59 = vmul.f32 0.03125, %v838_v34  ;;  %v841_v61 = vpop.xlane.xlu1 %840 }
 0x334   :  { %v6013_v54 = vmul.f32 -1.442695, %v8669_v2  ;;  %v8679_v1 = vadd.f32 %v8651_v47, %v991_v38  ;;  %v957_v37 = vmul.f32 %v7810_v52, %v8624_v51  ;;  %7811 = vrsqrt.f32 %v926_v9  ;;  %v1302_v52 = vld [vmem:[%s10209_s1 + $0x70] sm:$0xff] }
 0x335   :  { %v927_v39 = vadd.f32 1e-05, %v911_v33  ;;  %v908_v5 = vsub.f32 %v876_v59, %v892_v20  ;;  %v877_v11 = vmul.f32 0.03125, %v841_v61  ;;  %v988_v24 = vmul.f32 %v972_v25, %v956_v50  ;;  %v1289_v25 = vld [vmem:[%s10209_s1 + $0x8] sm:$0xff]  ;;  %v1291_v59 = vld [vmem:[%s10209_s1 + $0x18] sm:$0xff] }
 0x336   :  { %7813 = vpow2.f32 %v6013_v54  ;;  %v6014_v7 = vmul.f32 -1.442695, %v8679_v1  ;;  %v776_v57 = vpop.xlane.xlu0 %775  ;;  %v989_v53 = vmul.f32 %v973_v0, %v957_v37  ;;  %v1290_v0 = vld [vmem:[%s10209_s1 + $0x10] sm:$0xff]  ;;  %v8699_v50 = vand.u32 4294901760, %v8675_v35  ;;  %v1303_v61 = vld [vmem:[%s10209_s1 + $0x78] sm:$0xff] }
 0x337   :  { %7815 = vrsqrt.f32 %v927_v39  ;;  %v924_v42 = vadd.f32 1e-05, %v908_v5  ;;  %v909_v34 = vsub.f32 %v877_v11, %v893_v44  ;;  %v8687_v9 = vadd.f32 %v8651_v47, %v988_v24  ;;  %v1292_v11 = vld [vmem:[%s10209_s1 + $0x20] sm:$0xff] }
 0x338   :  { %7817 = vpow2.f32 %v6014_v7  ;;  %v779_v38 = vpop.xlane.xlu1 %778  ;;  %v8690_v20 = vadd.f32 %v8651_v47, %v989_v53  ;;  %v8705_v33 = vsel %vm72_vm1, %v1288_v10, 0  ;;  %v8713_v54 = vmul.f32 0.03125, %v776_v57  ;;  %6694 = vmatmul.mubr.f32.gmra.mrb[6].mxu1 %v8699_v50 }
 0x339   :  { %7819 = vrsqrt.f32 %v924_v42  ;;  %v925_v44 = vadd.f32 1e-05, %v909_v34  ;;  %v6011_v39 = vmul.f32 -1.442695, %v8687_v9  ;;  %v8722_v24 = vsel %vm72_vm1, %v1289_v25, 0 }
 0x33a   :  { %v770_v37 = vpop.xlane.xlu0 %769  ;;  %v6012_v5 = vmul.f32 -1.442695, %v8690_v20  ;;  %10296 = vst [vmem:[#allocation18_spill] sm:$0xff] %v8722_v24  ;;  %v8725_v7 = vsel %vm72_vm1, %v1290_v0, 0  ;;  %v8728_v57 = vsel %vm72_vm1, %v1302_v52, 0  ;;  %v8731_v10 = vand.u32 4294901760, %v8705_v33 }
 0x33b   :  { %7821 = vrsqrt.f32 %v925_v44  ;;  %10297 = vst [vmem:[#allocation19_spill] sm:$0xff] %v8725_v7  ;;  %10298 = vst [vmem:[#allocation20_spill] sm:$0xff] %v8728_v57  ;;  %v8734_v42 = vsel %vm72_vm1, %v1303_v61, 0  ;;  %v8736_v34 = vmul.f32 0.03125, %v779_v38  ;;  %v8739_v25 = vsel %vm72_vm1, %v1291_v59, 0 }
 0x33c   :  { %v773_v53 = vpop.xlane.xlu1 %772  ;;  %7823 = vpow2.f32 %v6011_v39  ;;  %10299 = vst [vmem:[#allocation21_spill] sm:$0xff] %v8734_v42  ;;  %10300 = vst [vmem:[#allocation22_spill] sm:$0xff] %v8739_v25  ;;  %v8742_v0 = vsel %vm72_vm1, %v1292_v11, 0  ;;  %v898_v52 = vmul.f32 %v8713_v54, %v8713_v54  ;;  %v8747_v6 = vand.u32 4294901760, %v8722_v24 }
 0x33d   :  { %7825 = vpow2.f32 %v6012_v5  ;;  %10301 = vst [vmem:[#allocation23_spill] sm:$0xff] %v8742_v0  ;;  %v8750_v61 = vand.u32 4294901760, %v8725_v7  ;;  %v8753_v38 = vand.u32 4294901760, %v8728_v57  ;;  %v8756_v5 = vmul.f32 0.03125, %v770_v37 }
 0x33e   :  { %v7812_v44 = vpop.eup %7811  ;;  %v856_v39 = vpop.xlane.xlu0 %855  ;;  %v8759_v13 = vand.u32 4294901760, %v8734_v42  ;;  %v978_v35 = vsub.f32 %v8428_v8, %v8616_v27  ;;  %v8763_v40 = vmul.f32 0.03125, %v773_v53  ;;  %v8766_v55 = vand.u32 4294901760, %v8739_v25 }
 0x33f   :  { %v962_v59 = vmul.f32 %v7812_v44, %v8624_v51  ;;  %v882_v11 = vmul.f32 0.03125, %v856_v39  ;;  %v8769_v57 = vand.u32 4294901760, %v8742_v0  ;;  %6696 = vmatprep.mubr.f32.mxu1 %v8753_v38  ;;  %v899_v39 = vmul.f32 %v8736_v34, %v8736_v34 }
 0x340   :  { %v7814_v3 = vpop.eup %7813  ;;  %v859_v31 = vpop.xlane.xlu1 %858  ;;  %6697 = vmatmul.mubr.f32.gmra.mrb[8].mxu1 %v8759_v13  ;;  %v979_v27 = vsub.f32 %v8434_v63, %v8633_v18  ;;  %v976_v53 = vsub.f32 %v8431_v36, %v8635_v56  ;;  %v897_v36 = vmul.f32 %v8763_v40, %v8763_v40  ;;  %v1293_v56 = vld [vmem:[%s10209_s1 + $0x28] sm:$0xff] }
 0x341   :  { %v7816_v37 = vpop.eup %7815  ;;  %v1074_v44 = vadd.f32 1.0, %v7814_v3  ;;  %v914_v42 = vsub.f32 %v882_v11, %v898_v52  ;;  %v883_v23 = vmul.f32 0.03125, %v859_v31  ;;  %6701 = vmatprep.mubr.f32.mxu1 %v8731_v10  ;;  %v896_v31 = vmul.f32 %v8756_v5, %v8756_v5 }
 0x342   :  { %v7818_v8 = vpop.eup %7817  ;;  %v963_v45 = vmul.f32 %v7816_v37, %v8624_v51  ;;  %v850_v3 = vpop.xlane.xlu0 %849  ;;  %v994_v0 = vmul.f32 %v978_v35, %v962_v59 }
 0x343   :  { %v7820_v26 = vpop.eup %7819  ;;  %v930_v52 = vadd.f32 1e-05, %v914_v42  ;;  %v915_v11 = vsub.f32 %v883_v23, %v899_v39  ;;  %7827 = vrcp.f32 %v1074_v44  ;;  %v880_v18 = vmul.f32 0.03125, %v850_v3 }
 0x344   :  { %v960_v63 = vmul.f32 %v7820_v26, %v8624_v51  ;;  %v853_v60 = vpop.xlane.xlu1 %852  ;;  %v1075_v37 = vadd.f32 1.0, %v7818_v8  ;;  %v995_v24 = vmul.f32 %v979_v27, %v963_v45  ;;  %6702 = vmatmul.mubr.f32.vlgmr.msra.gmra.mrb[10].mxu1 %v8747_v6  ;;  %v8795_v3 = vadd.f32 %v8651_v47, %v994_v0 }
 0x345   :  { %v7822_v21 = vpop.eup %7821  ;;  %v931_v25 = vadd.f32 1e-05, %v915_v11  ;;  %v881_v7 = vmul.f32 0.03125, %v853_v60  ;;  %7829 = vrsqrt.f32 %v930_v52  ;;  %v912_v26 = vsub.f32 %v880_v18, %v896_v31  ;;  %6704 = vmatprep.mubr.f32.mxu1 %v8750_v61 }
 0x346   :  { %v7824_v23 = vpop.eup %7823  ;;  %v961_v35 = vmul.f32 %v7822_v21, %v8624_v51  ;;  %v788_v42 = vpop.xlane.xlu0 %787  ;;  %v992_v59 = vmul.f32 %v976_v53, %v960_v63  ;;  %v8798_v8 = vsel %vm72_vm1, %v1293_v56, 0  ;;  %v8809_v63 = vadd.f32 %v8651_v47, %v995_v24 }
 0x347   :  { %v7826_v44 = vpop.eup %7825  ;;  %7831 = vrsqrt.f32 %v931_v25  ;;  %v913_v39 = vsub.f32 %v881_v7, %v897_v36  ;;  %v928_v45 = vadd.f32 1e-05, %v912_v26  ;;  %v1072_v11 = vadd.f32 1.0, %v7824_v23 }
 0x348   :  { %v791_v27 = vpop.xlane.xlu1 %790  ;;  %v993_v60 = vmul.f32 %v977_v43, %v961_v35  ;;  %v8801_v52 = vadd.f32 %v8651_v47, %v992_v59  ;;  %7833 = vrcp.f32 %v1075_v37  ;;  %v1073_v31 = vadd.f32 1.0, %v7826_v44  ;;  %6705 = vmatmul.mubr.f32.gmra.mrb[12].mxu1 %v8766_v55 }
 0x349   :  { %v929_v53 = vadd.f32 1e-05, %v913_v39  ;;  %7835 = vrsqrt.f32 %v928_v45  ;;  %6707 = vmatprep.mubr.f32.mxu1 %v8769_v57  ;;  %v8815_v36 = vand.u32 4294901760, %v8798_v8  ;;  %v6017_v21 = vmul.f32 -1.442695, %v8795_v3 }
 0x34a   :  { %v782_v7 = vpop.xlane.xlu0 %781  ;;  %v8805_v25 = vadd.f32 %v8651_v47, %v993_v60  ;;  %v6015_v0 = vmul.f32 -1.442695, %v8801_v52  ;;  %v6018_v24 = vmul.f32 -1.442695, %v8809_v63  ;;  %v8823_v35 = vmul.f32 0.03125, %v788_v42 }
 0x34b   :  { %7837 = vrsqrt.f32 %v929_v53  ;;  %v8812_v43 = vmul.f32 0.03125, %v782_v7  ;;  %v1583_v59 = vsub.f32 %v8536_v19, %v8539_v30 }
 0x34c   :  { %v785_v18 = vpop.xlane.xlu1 %784  ;;  %7839 = vrcp.f32 %v1072_v11  ;;  %v6016_v56 = vmul.f32 -1.442695, %v8805_v25  ;;  %6708 = vmatmul.mubr.f32.gmra.mrb[14].mxu1 %v8815_v36  ;;  %v8830_v11 = vmul.f32 0.03125, %v791_v27  ;;  %v983_v27 = vsub.f32 %v8466_v29, %v8736_v34 }
 0x34d   :  { %v8819_v37 = vmul.f32 0.03125, %v785_v18  ;;  %7841 = vrcp.f32 %v1073_v31  ;;  %v7828_v23 = vpop.eup %7827  ;;  %6710 = vmatprep.mubr.f32.mxu1 %v8564_v41  ;;  %v900_v44 = vmul.f32 %v8812_v43, %v8812_v43  ;;  %v982_v18 = vsub.f32 %v8460_v12, %v8713_v54 }
 0x34e   :  { %v862_v26 = vpop.xlane.xlu0 %861  ;;  %7843 = vpow2.f32 %v6015_v0  ;;  %v8842_v30 = vand.u32 4294901760, %v1583_v59  ;;  %v980_v12 = vsub.f32 %v8463_v28, %v8756_v5  ;;  %v981_v29 = vsub.f32 %v8471_v16, %v8763_v40 }
 0x34f   :  { %v884_v39 = vmul.f32 0.03125, %v862_v26  ;;  %7845 = vpow2.f32 %v6016_v56  ;;  %v7830_v45 = vpop.eup %7829  ;;  %v901_v60 = vmul.f32 %v8819_v37, %v8819_v37  ;;  %v902_v56 = vmul.f32 %v8823_v35, %v8823_v35 }
 0x350   :  { %v865_v42 = vpop.xlane.xlu1 %864  ;;  %7847 = vpow2.f32 %v6017_v21  ;;  %v966_v31 = vmul.f32 %v7830_v45, %v8624_v51  ;;  %6711 = vmatmul.mubr.f32.gmra.mrb[0].mxu1 %v8575_v46  ;;  %v903_v54 = vmul.f32 %v8830_v11, %v8830_v11  ;;  %v1122_v5 = vmul.f32 %v7828_v23, %v8669_v2 }
 0x351   :  { %v7832_v53 = vpop.eup %7831  ;;  %v916_v7 = vsub.f32 %v884_v39, %v900_v44  ;;  %v885_v0 = vmul.f32 0.03125, %v865_v42  ;;  %7849 = vpow2.f32 %v6018_v24  ;;  %6713 = vmatprep.mubr.f32.mxu1 %v8586_v4 }
 0x352   :  { %v868_v26 = vpop.xlane.xlu0 %867  ;;  %v7834_v21 = vpop.eup %7833  ;;  %v967_v44 = vmul.f32 %v7832_v53, %v8624_v51  ;;  %v998_v59 = vmul.f32 %v982_v18, %v966_v31 }
 0x353   :  { %v932_v24 = vadd.f32 1e-05, %v916_v7  ;;  %v917_v39 = vsub.f32 %v885_v0, %v901_v60  ;;  %v886_v45 = vmul.f32 0.03125, %v868_v26  ;;  %v7836_v42 = vpop.eup %7835  ;;  %v1123_v16 = vmul.f32 %v7834_v21, %v8679_v1 }
 0x354   :  { %v871_v34 = vpop.xlane.xlu1 %870  ;;  %v964_v4 = vmul.f32 %v7836_v42, %v8624_v51  ;;  %6714 = vmatmul.mubr.f32.gmra.mrb[2].mxu1 %v8601_v62  ;;  %v999_v26 = vmul.f32 %v983_v27, %v967_v44  ;;  %v8864_v1 = vadd.f32 %v8651_v47, %v998_v59 }
 0x355   :  { %v7838_v19 = vpop.eup %7837  ;;  %7851 = vrsqrt.f32 %v932_v24  ;;  %v933_v53 = vadd.f32 1e-05, %v917_v39  ;;  %v918_v7 = vsub.f32 %v886_v45, %v902_v56  ;;  %v887_v28 = vmul.f32 0.03125, %v871_v34  ;;  %6716 = vmatprep.mubr.f32.mxu1 %v8610_v48 }
 0x356   :  { %v7840_v60 = vpop.eup %7839  ;;  %v965_v0 = vmul.f32 %v7838_v19, %v8624_v51  ;;  %v996_v18 = vmul.f32 %v980_v12, %v964_v4  ;;  %v1137_v44 = vpack.c.bf16 %v1123_v16, %v1122_v5 }
 0x357   :  { %v7842_v40 = vpop.eup %7841  ;;  %7853 = vrsqrt.f32 %v933_v53  ;;  %v934_v31 = vadd.f32 1e-05, %v918_v7  ;;  %v919_v39 = vsub.f32 %v887_v28, %v903_v54  ;;  %v1120_v56 = vmul.f32 %v7840_v60, %v8687_v9 }
 0x358   :  { %v7844_v24 = vpop.eup %7843  ;;  %v1121_v45 = vmul.f32 %v7842_v40, %v8690_v20  ;;  %v997_v42 = vmul.f32 %v981_v29, %v965_v0  ;;  %v8861_v2 = vadd.f32 %v8651_v47, %v996_v18  ;;  %6717 = vmatmul.mubr.f32.gmra.mrb[4].mxu1 %v8627_v14  ;;  %v8872_v29 = vadd.f32 %v8651_v47, %v999_v26 }
 0x359   :  { %v7846_v19 = vpop.eup %7845  ;;  %7855 = vrsqrt.f32 %v934_v31  ;;  %v1076_v34 = vadd.f32 1.0, %v7844_v24  ;;  %v935_v23 = vadd.f32 1e-05, %v919_v39  ;;  %6719 = vmatprep.mubr.f32.mxu1 %v8638_v49  ;;  %v6021_v7 = vmul.f32 -1.442695, %v8864_v1 }
 0x35a   :  { %v7848_v4 = vpop.eup %7847  ;;  %v1136_v27 = vpack.c.bf16 %v1121_v45, %v1120_v56  ;;  %v1077_v21 = vadd.f32 1.0, %v7846_v19  ;;  %v8868_v9 = vadd.f32 %v8651_v47, %v997_v42  ;;  %v6019_v59 = vmul.f32 -1.442695, %v8861_v2 }
 0x35b   :  { %v7850_v20 = vpop.eup %7849  ;;  %7857 = vrcp.f32 %v1076_v34  ;;  %v1078_v12 = vadd.f32 1.0, %v7848_v4  ;;  %v6022_v0 = vmul.f32 -1.442695, %v8872_v29  ;;  %v984_v28 = vsub.f32 %v8500_v17, %v8812_v43 }
 0x35c   :  { %7859 = vrsqrt.f32 %v935_v23  ;;  %6553 = vmatprep.mubr.msk.bf16.mxu0 %vm198_vm2, %v1136_v27  ;;  %v1079_v54 = vadd.f32 1.0, %v7850_v20  ;;  %v6020_v53 = vmul.f32 -1.442695, %v8868_v9  ;;  %6720 = vmatmul.mubr.f32.gmra.mrb[6].mxu1 %v8699_v50  ;;  %v985_v40 = vsub.f32 %v8505_v32, %v8819_v37 }
 0x35d   :  { %6554 = vmatmul.mubr.msk.bf16.vlgmr.msra.gmra.mrb[32].mxu0 %vm198_vm2, %v1137_v44  ;;  %7861 = vrcp.f32 %v1077_v21  ;;  %6722 = vmatprep.mubr.f32.mxu1 %v8753_v38  ;;  %v986_v24 = vsub.f32 %v8491_v58, %v8823_v35  ;;  %v987_v34 = vsub.f32 %v8495_v22, %v8830_v11 }
 0x35e   :  { %7863 = vrcp.f32 %v1078_v12  ;;  %6570 = vmatpush3.msra.mxu0 %v8532_v15 }
 0x35f   :  { %v7852_v60 = vpop.eup %7851  ;;  %7865 = vrcp.f32 %v1079_v54  ;;  %6595 = vmatprep.subr.mxu0 %v8842_v30 }
 0x360   :  { %v968_v5 = vmul.f32 %v7852_v60, %v8624_v51  ;;  %7867 = vpow2.f32 %v6019_v59  ;;  %6723 = vmatmul.mubr.f32.gmra.mrb[8].mxu1 %v8759_v13 }
 0x361   :  { %v7854_v16 = vpop.eup %7853  ;;  %7869 = vpow2.f32 %v6020_v53 }
 0x362   :  { %v969_v31 = vmul.f32 %v7854_v16, %v8624_v51  ;;  %7871 = vpow2.f32 %v6021_v7  ;;  %v1000_v18 = vmul.f32 %v984_v28, %v968_v5 }
 0x363   :  { %v7856_v26 = vpop.eup %7855  ;;  %7873 = vpow2.f32 %v6022_v0 }
 0x364   :  { %v970_v17 = vmul.f32 %v7856_v26, %v8624_v51  ;;  %v1001_v43 = vmul.f32 %v985_v40, %v969_v31  ;;  %v8895_v39 = vadd.f32 %v8651_v47, %v1000_v18 }
 0x365   :  { %v7858_v56 = vpop.eup %7857 }
 0x366   :  { %v7860_v45 = vpop.eup %7859  ;;  %v8898_v42 = vadd.f32 %v8651_v47, %v1001_v43  ;;  %v6023_v32 = vmul.f32 -1.442695, %v8895_v39  ;;  %v1002_v37 = vmul.f32 %v986_v24, %v970_v17  ;;  %v1124_v35 = vmul.f32 %v7858_v56, %v8801_v52 }
 0x367   :  { %v7862_v19 = vpop.eup %7861  ;;  %v971_v58 = vmul.f32 %v7860_v45, %v8624_v51 }
 0x368   :  { %v7864_v4 = vpop.eup %7863  ;;  %v1125_v23 = vmul.f32 %v7862_v19, %v8805_v25  ;;  %7875 = vpow2.f32 %v6023_v32  ;;  %v6024_v27 = vmul.f32 -1.442695, %v8898_v42  ;;  %v8908_v21 = vadd.f32 %v8651_v47, %v1002_v37 }
 0x369   :  { %v7866_v20 = vpop.eup %7865  ;;  %v1126_v44 = vmul.f32 %v7864_v4, %v8795_v3  ;;  %v1003_v12 = vmul.f32 %v987_v34, %v971_v58  ;;  %v8923_v4 = vsub.f32 %v8705_v33, %v8731_v10 }
 0x36a   :  { %v7868_v54 = vpop.eup %7867  ;;  %v1138_v59 = vpack.c.bf16 %v1125_v23, %v1124_v35  ;;  %v1127_v22 = vmul.f32 %v7866_v20, %v8809_v63  ;;  %7877 = vpow2.f32 %v6024_v27  ;;  %v6025_v51 = vmul.f32 -1.442695, %v8908_v21  ;;  %v10302_v20 = vld [vmem:[#allocation18_spill] sm:$0xff] }
 0x36b   :  { %v7870_v52 = vpop.eup %7869  ;;  %v1080_v11 = vadd.f32 1.0, %v7868_v54  ;;  %v1023_v25 = vadd.f32 %v8651_v47, %v1003_v12  ;;  %v10303_v54 = vld [vmem:[#allocation19_spill] sm:$0xff] }
 0x36c   :  { %v7872_v53 = vpop.eup %7871  ;;  %6557 = vmatprep.mubr.msk.bf16.mxu0 %vm198_vm2, %v1138_v59  ;;  %v1139_v7 = vpack.c.bf16 %v1127_v22, %v1126_v44  ;;  %v1081_v60 = vadd.f32 1.0, %v7870_v52  ;;  %7879 = vpow2.f32 %v6025_v51  ;;  %v8933_v44 = vsub.f32 %v10302_v20, %v8747_v6  ;;  %v10304_v52 = vld [vmem:[#allocation22_spill] sm:$0xff]  ;;  %v10313_v20 = vld [vmem:[#allocation7_spill] sm:$0xff] }
 0x36d   :  { %v7874_v0 = vpop.eup %7873  ;;  %7881 = vrcp.f32 %v1080_v11  ;;  %v1082_v3 = vadd.f32 1.0, %v7872_v53  ;;  %v6026_v28 = vmul.f32 -1.442695, %v1023_v25  ;;  %v8940_v59 = vsub.f32 %v10303_v54, %v8750_v61  ;;  %v10315_v54 = vld [vmem:[#allocation15_spill] sm:$0xff] }
 0x36e   :  { %6558 = vmatmul.mubr.msk.bf16.gmra.mrb[36].mxu0 %vm198_vm2, %v1139_v7  ;;  %7883 = vrcp.f32 %v1081_v60  ;;  %v1083_v63 = vadd.f32 1.0, %v7874_v0  ;;  %v8944_v51 = vand.u32 4294901760, %v8933_v44  ;;  %v8948_v11 = vsub.f32 %v10304_v52, %v8766_v55  ;;  %v10305_v60 = vld [vmem:[#allocation23_spill] sm:$0xff] }
 0x36f   :  { %7885 = vrcp.f32 %v1082_v3  ;;  %v8953_v7 = vand.u32 4294901760, %v8940_v59  ;;  %v8957_v0 = vsub.f32 %v10305_v60, %v8769_v57  ;;  %v10317_v60 = vld [vmem:[#allocation16_spill] sm:$0xff] }
 0x370   :  { %7887 = vrcp.f32 %v1083_v63 }
 0x371   :  { %7889 = vpow2.f32 %v6026_v28  ;;  %v8967_v28 = vsub.f32 %v8798_v8, %v8815_v36  ;;  %v1442_v63 = vsub.f32 %v8940_v59, %v8953_v7 }
 0x372   :  { %v7876_v5 = vpop.eup %7875 }
 0x373   :  { %v1084_v16 = vadd.f32 1.0, %v7876_v5  ;;  %v8973_v5 = vand.u32 4294901760, %v8957_v0  ;;  %v8984_v8 = vand.u32 4294901760, %v8967_v28 }
 0x374   :  { %v7878_v47 = vpop.eup %7877 }
 0x375   :  { %v1085_v40 = vadd.f32 1.0, %v7878_v47  ;;  %7891 = vrcp.f32 %v1084_v16  ;;  %v10306_v16 = vld [vmem:[#allocation9_spill] sm:$0xff] }
 0x376   :  { %v7880_v31 = vpop.eup %7879  ;;  %v8977_v47 = vsub.f32 %v10306_v16, %v8564_v41 }
 0x377   :  { %v7882_v18 = vpop.eup %7881  ;;  %7893 = vrcp.f32 %v1085_v40  ;;  %v1086_v24 = vadd.f32 1.0, %v7880_v31 }
 0x378   :  { %v7884_v26 = vpop.eup %7883  ;;  %v1128_v43 = vmul.f32 %v7882_v18, %v8861_v2  ;;  %v10307_v18 = vld [vmem:[#allocation10_spill] sm:$0xff] }
 0x379   :  { %v7886_v17 = vpop.eup %7885  ;;  %v1129_v56 = vmul.f32 %v7884_v26, %v8868_v9  ;;  %7895 = vrcp.f32 %v1086_v24  ;;  %v8988_v26 = vsub.f32 %v10307_v18, %v8575_v46  ;;  %v8990_v24 = vand.u32 4294901760, %v1442_v63 }
 0x37a   :  { %v7888_v45 = vpop.eup %7887  ;;  %v1130_v19 = vmul.f32 %v7886_v17, %v8864_v1  ;;  %v1462_v17 = vsub.f32 %v8957_v0, %v8973_v5 }
 0x37b   :  { %v7890_v32 = vpop.eup %7889  ;;  %v1140_v37 = vpack.c.bf16 %v1129_v56, %v1128_v43  ;;  %v1131_v34 = vmul.f32 %v7888_v45, %v8872_v29  ;;  %v8929_v29 = vand.u32 4294901760, %v8923_v4  ;;  %v8995_v43 = vand.u32 4294901760, %v8977_v47  ;;  %v10308_v56 = vld [vmem:[#allocation12_spill] sm:$0xff]  ;;  %v10309_v45 = vld [vmem:[#allocation11_spill] sm:$0xff] }
 0x37c   :  { %v1087_v58 = vadd.f32 1.0, %v7890_v32  ;;  %v8999_v32 = vsub.f32 %v10309_v45, %v10308_v56 }
 0x37d   :  { %6561 = vmatprep.mubr.msk.bf16.mxu0 %vm198_vm2, %v1140_v37  ;;  %v1141_v35 = vpack.c.bf16 %v1131_v34, %v1130_v19  ;;  %v1422_v33 = vsub.f32 %v8923_v4, %v8929_v29  ;;  %v1472_v19 = vsub.f32 %v8967_v28, %v8984_v8  ;;  %v9007_v34 = vand.u32 4294901760, %v8988_v26 }
 0x37e   :  { %7897 = vrcp.f32 %v1087_v58  ;;  %v10310_v58 = vld [vmem:[#allocation13_spill] sm:$0xff] }
 0x37f   :  { %v7892_v2 = vpop.eup %7891  ;;  %6562 = vmatmul.mubr.msk.bf16.gmra.mrb[40].mxu0 %vm198_vm2, %v1141_v35  ;;  %v8950_v53 = vand.u32 4294901760, %v1422_v33  ;;  %v9011_v35 = vsub.f32 %v10310_v58, %v8601_v62  ;;  %v10322_v58 = vld [vmem:[#allocation20_spill] sm:$0xff] }
 0x380   :  { %v1132_v23 = vmul.f32 %v7892_v2, %v8895_v39  ;;  %v9015_v2 = vand.u32 4294901760, %v1462_v17 }
 0x381   :  { %v7894_v9 = vpop.eup %7893  ;;  %v9033_v33 = vand.u32 4294901760, %v9011_v35 }
 0x382   :  { %v1133_v1 = vmul.f32 %v7894_v9, %v8898_v42  ;;  %10311 = vst [vmem:[#allocation18_spill] sm:$0xff] %v9015_v2  ;;  %v1482_v9 = vsub.f32 %v8977_v47, %v8995_v43 }
 0x383   :  { %v7896_v12 = vpop.eup %7895  ;;  %v1512_v63 = vsub.f32 %v9011_v35, %v9033_v33 }
 0x384   :  { %v1142_v27 = vpack.c.bf16 %v1133_v1, %v1132_v23  ;;  %v1134_v42 = vmul.f32 %v7896_v12, %v8908_v21  ;;  %v1432_v21 = vsub.f32 %v8933_v44, %v8944_v51  ;;  %v9020_v23 = vand.u32 4294901760, %v8999_v32  ;;  %v10312_v1 = vld [vmem:[#allocation14_spill] sm:$0xff] }
 0x385   :  { %v9028_v12 = vand.u32 4294901760, %v1472_v19 }
 0x386   :  { %6565 = vmatprep.mubr.msk.bf16.mxu0 %vm198_vm2, %v1142_v27  ;;  %v8979_v40 = vand.u32 4294901760, %v1432_v21  ;;  %v9024_v27 = vsub.f32 %v10312_v1, %v8610_v48  ;;  %v9076_v1 = vand.u32 4294901760, %v1512_v63 }
 0x387   :  { %10314 = vst [vmem:[#allocation19_spill] sm:$0xff] %v9028_v12 }
 0x388   :  { %v7898_v39 = vpop.eup %7897  ;;  %v9045_v52 = vand.u32 4294901760, %v9024_v27  ;;  %10323 = vst [vmem:[#allocation12_spill] sm:$0xff] %v9076_v1 }
 0x389   :  { %v1135_v22 = vmul.f32 %v7898_v39, %v1023_v25  ;;  %v8963_v25 = vand.u32 4294901760, %v8948_v11  ;;  %v9037_v39 = vsub.f32 %v10315_v54, %v8627_v14 }
 0x38a   :  { %v1522_v45 = vsub.f32 %v9024_v27, %v9045_v52 }
 0x38b   :  { %v1143_v3 = vpack.c.bf16 %v1135_v22, %v1134_v42  ;;  %v1452_v31 = vsub.f32 %v8948_v11, %v8963_v25  ;;  %v9040_v42 = vand.u32 4294901760, %v1482_v9  ;;  %v1502_v22 = vsub.f32 %v8999_v32, %v9020_v23 }
 0x38c   :  { %v9057_v16 = vand.u32 4294901760, %v9037_v39  ;;  %v9073_v9 = vsub.f32 %v10322_v58, %v8753_v38 }
 0x38d   :  { %6566 = vmatmul.mubr.msk.bf16.gmra.mrb[44].mxu0 %vm198_vm2, %v1143_v3  ;;  %v9002_v37 = vand.u32 4294901760, %v1452_v31  ;;  %10316 = vst [vmem:[#allocation22_spill] sm:$0xff] %v9040_v42  ;;  %v9049_v3 = vsub.f32 %v10317_v60, %v8638_v49  ;;  %v10319_v31 = vld [vmem:[#allocation17_spill] sm:$0xff]  ;;  %v9064_v17 = vand.u32 4294901760, %v1502_v22 }
 0x38e   :  { %6571 = vmatprep.mubr.f32.mxu0 %v8950_v53  ;;  %v9061_v18 = vsub.f32 %v10319_v31, %v8699_v50  ;;  %v10325_v22 = vld [vmem:[#allocation21_spill] sm:$0xff]  ;;  %v9088_v31 = vand.u32 4294901760, %v1522_v45  ;;  %v9093_v63 = vand.u32 4294901760, %v9073_v9 }
 0x38f   :  { %10320 = vst [vmem:[#allocation9_spill] sm:$0xff] %v9064_v17  ;;  %v9069_v19 = vand.u32 4294901760, %v9049_v3  ;;  %v9085_v60 = vsub.f32 %v10325_v22, %v8759_v13 }
 0x390   :  { %v9081_v54 = vand.u32 4294901760, %v9061_v18  ;;  %10326 = vst [vmem:[#allocation13_spill] sm:$0xff] %v9093_v63 }
 0x391   :  { %10321 = vst [vmem:[#allocation10_spill] sm:$0xff] %v9069_v19  ;;  %v1542_v58 = vsub.f32 %v9049_v3, %v9069_v19  ;;  %v9101_v22 = vand.u32 4294901760, %v9085_v60 }
 0x392   :  { %10324 = vst [vmem:[#allocation11_spill] sm:$0xff] %v9081_v54 }
 0x393   :  { %10327 = vst [vmem:[#allocation14_spill] sm:$0xff] %v9101_v22  ;;  %v9104_v45 = vand.u32 4294901760, %v1542_v58 }
 0x395   :  { %6572 = vmatmul.mubr.f32.vlgmr.msra.gmra.mrb[48].mxu0 %v8979_v40 }
 0x396   :  { %6596 = vmatpush3.msra.mxu0 %v8842_v30  ;;  %6574 = vmatprep.mubr.f32.mxu0 %v8990_v24  ;;  %v1492_v30 = vsub.f32 %v8988_v26, %v9007_v34 }
 0x397   :  { %6621 = vmatprep.subr.mxu0 %v10313_v20 }
 0x398   :  { %v9052_v21 = vand.u32 4294901760, %v1492_v30  ;;  %v1532_v30 = vsub.f32 %v9037_v39, %v9057_v16 }
 0x399   :  { %6575 = vmatmul.mubr.f32.gmra.mrb[50].mxu0 %v9002_v37 }
 0x39a   :  { %6577 = vmatprep.mubr.f32.mxu0 %v9015_v2  ;;  %10318 = vst [vmem:[#allocation23_spill] sm:$0xff] %v9052_v21 }
 0x39d   :  { %6578 = vmatmul.mubr.f32.gmra.mrb[52].mxu0 %v9028_v12 }
 0x39e   :  { %6580 = vmatprep.mubr.f32.mxu0 %v9040_v42  ;;  %v1552_v42 = vsub.f32 %v9061_v18, %v9081_v54 }
 0x3a0   :  { %v9109_v12 = vand.u32 4294901760, %v1552_v42 }
 0x3a1   :  { %6581 = vmatmul.mubr.f32.gmra.mrb[54].mxu0 %v9052_v21  ;;  %v9096_v21 = vand.u32 4294901760, %v1532_v30  ;;  %v1572_v30 = vsub.f32 %v9085_v60, %v9101_v22 }
 0x3a2   :  { %6583 = vmatprep.mubr.f32.mxu0 %v9064_v17  ;;  %v1562_v17 = vsub.f32 %v9073_v9, %v9093_v63 }
 0x3a3   :  { %v9117_v2 = vand.u32 4294901760, %v1572_v30 }
 0x3a5   :  { %6584 = vmatmul.mubr.f32.gmra.mrb[56].mxu0 %v9076_v1  ;;  %v9114_v1 = vand.u32 4294901760, %v1562_v17 }
 0x3a6   :  { %6586 = vmatprep.mubr.f32.mxu0 %v9088_v31 }
 0x3a9   :  { %6587 = vmatmul.mubr.f32.gmra.mrb[58].mxu0 %v9096_v21 }
 0x3aa   :  { %6589 = vmatprep.mubr.f32.mxu0 %v9104_v45 }
 0x3ad   :  { %6590 = vmatmul.mubr.f32.gmra.mrb[60].mxu0 %v9109_v12 }
 0x3ae   :  { %6592 = vmatprep.mubr.f32.mxu0 %v9114_v1 }
 0x3b1   :  { %6593 = vmatmul.mubr.f32.gmra.mrb[62].mxu0 %v9117_v2 }
 0x3b2   :  { %6597 = vmatprep.mubr.f32.mxu0 %v8731_v10 }
 0x3b5   :  { %6598 = vmatmul.mubr.f32.vlgmr.msra.gmra.mrb[48].mxu0 %v8747_v6 }
 0x3b6   :  { %6622 = vmatpush3.msra.mxu0 %v10313_v20  ;;  %6600 = vmatprep.mubr.f32.mxu0 %v8750_v61  ;;  %v10328_v20 = vld [vmem:[#allocation8_spill] sm:$0xff] }
 0x3b7   :  { %6647 = vmatprep.subr.mxu0 %v8532_v15 }
 0x3b9   :  { %6601 = vmatmul.mubr.f32.gmra.mrb[50].mxu0 %v8766_v55 }
 0x3ba   :  { %6603 = vmatprep.mubr.f32.mxu0 %v8769_v57 }
 0x3bd   :  { %6604 = vmatmul.mubr.f32.gmra.mrb[52].mxu0 %v8815_v36 }
 0x3be   :  { %6606 = vmatprep.mubr.f32.mxu0 %v8564_v41 }
 0x3c1   :  { %6607 = vmatmul.mubr.f32.gmra.mrb[54].mxu0 %v8575_v46 }
 0x3c2   :  { %6609 = vmatprep.mubr.f32.mxu0 %v10308_v56 }
 0x3c5   :  { %6610 = vmatmul.mubr.f32.gmra.mrb[56].mxu0 %v8601_v62 }
 0x3c6   :  { %6612 = vmatprep.mubr.f32.mxu0 %v8610_v48 }
 0x3c9   :  { %6613 = vmatmul.mubr.f32.gmra.mrb[58].mxu0 %v8627_v14 }
 0x3ca   :  { %6615 = vmatprep.mubr.f32.mxu0 %v8638_v49 }
 0x3cd   :  { %6616 = vmatmul.mubr.f32.gmra.mrb[60].mxu0 %v8699_v50 }
 0x3ce   :  { %6618 = vmatprep.mubr.f32.mxu0 %v8753_v38 }
 0x3d1   :  { %6619 = vmatmul.mubr.f32.gmra.mrb[62].mxu0 %v8759_v13 }
 0x3d2   :  { %6623 = vmatprep.mubr.f32.mxu0 %v8923_v4 }
 0x3d5   :  { %6624 = vmatmul.mubr.f32.vlgmr.msra.gmra.mrb[48].mxu0 %v8933_v44 }
 0x3d6   :  { %6648 = vmatpush3.msra.mxu0 %v8532_v15  ;;  %6626 = vmatprep.mubr.f32.mxu0 %v8940_v59  ;;  %v2444_v15 = vld [vmem:[%s10216_s8] sm:$0xff] }
 0x3d7   :  { %6673 = vmatprep.subr.mxu0 %v10328_v20  ;;  %v9161_v42 = vand.u32 4294901760, %v2444_v15 }
 0x3d9   :  { %6627 = vmatmul.mubr.f32.gmra.mrb[50].mxu0 %v8948_v11  ;;  %v2673_v17 = vsub.f32 %v2444_v15, %v9161_v42  ;;  %v10329_v15 = vld [vmem:[#allocation18_spill] sm:$0xff] }
 0x3da   :  { %6629 = vmatprep.mubr.f32.mxu0 %v8957_v0 }
 0x3db   :  { %v9178_v58 = vand.u32 4294901760, %v2673_v17 }
 0x3dd   :  { %6630 = vmatmul.mubr.f32.gmra.mrb[52].mxu0 %v8967_v28  ;;  %v2675_v30 = vsub.f32 %v2673_v17, %v9178_v58 }
 0x3de   :  { %6632 = vmatprep.mubr.f32.mxu0 %v8977_v47 }
 0x3e1   :  { %6633 = vmatmul.mubr.f32.gmra.mrb[54].mxu0 %v8988_v26 }
 0x3e2   :  { %6635 = vmatprep.mubr.f32.mxu0 %v8999_v32 }
 0x3e5   :  { %6636 = vmatmul.mubr.f32.gmra.mrb[56].mxu0 %v9011_v35 }
 0x3e6   :  { %6638 = vmatprep.mubr.f32.mxu0 %v9024_v27 }
 0x3e9   :  { %6639 = vmatmul.mubr.f32.gmra.mrb[58].mxu0 %v9037_v39 }
 0x3ea   :  { %6641 = vmatprep.mubr.f32.mxu0 %v9049_v3 }
 0x3ed   :  { %6642 = vmatmul.mubr.f32.gmra.mrb[60].mxu0 %v9061_v18 }
 0x3ee   :  { %6644 = vmatprep.mubr.f32.mxu0 %v9073_v9 }
 0x3f1   :  { %6645 = vmatmul.mubr.f32.gmra.mrb[62].mxu0 %v9085_v60 }
 0x3f2   :  { %6649 = vmatprep.mubr.f32.mxu0 %v8929_v29 }
 0x3f5   :  { %6650 = vmatmul.mubr.f32.vlgmr.msra.gmra.mrb[48].mxu0 %v8944_v51 }
 0x3f6   :  { %6674 = vmatpush3.msra.mxu0 %v10328_v20  ;;  %6652 = vmatprep.mubr.f32.mxu0 %v8953_v7  ;;  %v2676_v20 = vand.u32 4294901760, %v2675_v30  ;;  %v10330_v30 = vld [vmem:[#allocation19_spill] sm:$0xff] }
 0x3f7   :  { %6725 = vmatprep.subr.mxu0 %v9161_v42 }
 0x3f9   :  { %6653 = vmatmul.mubr.f32.gmra.mrb[50].mxu0 %v8963_v25 }
 0x3fa   :  { %6655 = vmatprep.mubr.f32.mxu0 %v8973_v5 }
 0x3fd   :  { %6656 = vmatmul.mubr.f32.gmra.mrb[52].mxu0 %v8984_v8 }
 0x3fe   :  { %6658 = vmatprep.mubr.f32.mxu0 %v8995_v43 }
 0x401   :  { %6659 = vmatmul.mubr.f32.gmra.mrb[54].mxu0 %v9007_v34 }
 0x402   :  { %6661 = vmatprep.mubr.f32.mxu0 %v9020_v23 }
 0x405   :  { %6662 = vmatmul.mubr.f32.gmra.mrb[56].mxu0 %v9033_v33 }
 0x406   :  { %6664 = vmatprep.mubr.f32.mxu0 %v9045_v52 }
 0x409   :  { %6665 = vmatmul.mubr.f32.gmra.mrb[58].mxu0 %v9057_v16 }
 0x40a   :  { %6667 = vmatprep.mubr.f32.mxu0 %v9069_v19 }
 0x40d   :  { %6668 = vmatmul.mubr.f32.gmra.mrb[60].mxu0 %v9081_v54  ;;  %v10333_v54 = vld [vmem:[#allocation9_spill] sm:$0xff] }
 0x40e   :  { %6670 = vmatprep.mubr.f32.mxu0 %v9093_v63  ;;  %v10332_v63 = vld [vmem:[#allocation23_spill] sm:$0xff] }
 0x411   :  { %6671 = vmatmul.mubr.f32.gmra.mrb[62].mxu0 %v9101_v22  ;;  %v10331_v22 = vld [vmem:[#allocation22_spill] sm:$0xff] }
 0x412   :  { %6675 = vmatprep.mubr.f32.mxu0 %v8731_v10 }
 0x415   :  { %6676 = vmatmul.mubr.f32.vlgmr.msra.gmra.mrb[48].mxu0 %v8747_v6 }
 0x416   :  { %6726 = vmatpush3.msra.mxu0 %v9161_v42  ;;  %6678 = vmatprep.mubr.f32.mxu0 %v8750_v61 }
 0x417   :  { %6751 = vmatprep.subr.mxu0 %v2676_v20 }
 0x419   :  { %6679 = vmatmul.mubr.f32.gmra.mrb[50].mxu0 %v8766_v55 }
 0x41a   :  { %6681 = vmatprep.mubr.f32.mxu0 %v8769_v57 }
 0x41d   :  { %6682 = vmatmul.mubr.f32.gmra.mrb[52].mxu0 %v8815_v36 }
 0x41e   :  { %6727 = vmatprep.mubr.f32.mxu0 %v8950_v53  ;;  %v10335_v53 = vld [vmem:[#allocation12_spill] sm:$0xff] }
 0x421   :  { %6728 = vmatmul.mubr.f32.vlgmr.msra.gmra.mrb[64].mxu0 %v8979_v40 }
 0x422   :  { %6752 = vmatpush3.msra.mxu0 %v2676_v20  ;;  %6730 = vmatprep.mubr.f32.mxu0 %v8990_v24 }
 0x423   :  { %6777 = vmatprep.subr.mxu0 %v2673_v17 }
 0x425   :  { %6731 = vmatmul.mubr.f32.gmra.mrb[66].mxu0 %v9002_v37 }
 0x426   :  { %6733 = vmatprep.mubr.f32.mxu0 %v10329_v15 }
 0x429   :  { %6734 = vmatmul.mubr.f32.gmra.mrb[68].mxu0 %v10330_v30 }
 0x42a   :  { %6736 = vmatprep.mubr.f32.mxu0 %v10331_v22 }
 0x42d   :  { %6737 = vmatmul.mubr.f32.gmra.mrb[70].mxu0 %v10332_v63 }
 0x42e   :  { %6739 = vmatprep.mubr.f32.mxu0 %v10333_v54 }
 0x430   :  { %v9200_v19 = vpop.f32.mrb[32].mxu0 }
 0x431   :  { %10334 = vst [vmem:[#allocation7_spill] sm:$0xff] %v9200_v19  ;;  %6740 = vmatmul.mubr.f32.gmra.mrb[72].mxu0 %v10335_v53  ;;  %v9203_v40 = vpop.f32.mrb[33].mxu0 }
 0x432   :  { %v9205_v24 = vpop.f32.mrb[34].mxu0  ;;  %6742 = vmatprep.mubr.f32.mxu0 %v9088_v31 }
 0x433   :  { %v9208_v37 = vpop.f32.mrb[35].mxu0 }
 0x435   :  { %6743 = vmatmul.mubr.f32.gmra.mrb[74].mxu0 %v9096_v21 }
 0x436   :  { %6745 = vmatprep.mubr.f32.mxu0 %v9104_v45 }
 0x439   :  { %6746 = vmatmul.mubr.f32.gmra.mrb[76].mxu0 %v9109_v12 }
 0x43a   :  { %6748 = vmatprep.mubr.f32.mxu0 %v9114_v1 }
 0x43d   :  { %6749 = vmatmul.mubr.f32.gmra.mrb[78].mxu0 %v9117_v2  ;;  %v9232_v2 = vpop.f32.mrb[10].mxu1 }
 0x43e   :  { %6753 = vmatprep.mubr.f32.mxu0 %v8731_v10  ;;  %v9235_v1 = vpop.f32.mrb[11].mxu1 }
 0x43f   :  { %v9237_v63 = vpop.f32.mrb[12].mxu1 }
 0x440   :  { %v9239_v22 = vpop.f32.mrb[13].mxu1 }
 0x441   :  { %v9216_v54 = vpop.f32.mrb[36].mxu0  ;;  %6754 = vmatmul.mubr.f32.vlgmr.msra.gmra.mrb[64].mxu0 %v8747_v6  ;;  %v9242_v45 = vpop.f32.mrb[14].mxu1 }
 0x442   :  { %10336 = vst [vmem:[#allocation15_spill] sm:$0xff] %v9216_v54  ;;  %6778 = vmatpush3.msra.mxu0 %v2673_v17  ;;  %v9219_v31 = vpop.f32.mrb[37].mxu0  ;;  %6756 = vmatprep.mubr.f32.mxu0 %v8750_v61  ;;  %v9247_v20 = vpop.f32.mrb[15].mxu1 }
 0x443   :  { %10337 = vst [vmem:[#allocation16_spill] sm:$0xff] %v9219_v31  ;;  %v9222_v21 = vpop.f32.mrb[38].mxu0  ;;  %6803 = vmatprep.subr.mxu0 %v9161_v42  ;;  %v9253_v53 = vpop.f32.mrb[0].mxu1 }
 0x444   :  { %10338 = vst [vmem:[#allocation17_spill] sm:$0xff] %v9222_v21  ;;  %v9225_v12 = vpop.f32.mrb[39].mxu0 }
 0x445   :  { %10339 = vst [vmem:[#allocation20_spill] sm:$0xff] %v9225_v12  ;;  %6757 = vmatmul.mubr.f32.gmra.mrb[66].mxu0 %v8766_v55 }
 0x446   :  { %6759 = vmatprep.mubr.f32.mxu0 %v8769_v57 }
 0x449   :  { %6760 = vmatmul.mubr.f32.gmra.mrb[68].mxu0 %v8815_v36 }
 0x44a   :  { %6762 = vmatprep.mubr.f32.mxu0 %v8564_v41 }
 0x44d   :  { %6763 = vmatmul.mubr.f32.gmra.mrb[70].mxu0 %v8575_v46 }
 0x44e   :  { %6765 = vmatprep.mubr.f32.mxu0 %v10308_v56 }
 0x451   :  { %6766 = vmatmul.mubr.f32.gmra.mrb[72].mxu0 %v8601_v62 }
 0x452   :  { %v9244_v17 = vpop.f32.mrb[40].mxu0  ;;  %6768 = vmatprep.mubr.f32.mxu0 %v8610_v48 }
 0x453   :  { %10340 = vst [vmem:[#allocation21_spill] sm:$0xff] %v9244_v17  ;;  %v9249_v15 = vpop.f32.mrb[41].mxu0  ;;  %v9261_v17 = vpop.f32.mrb[1].mxu1 }
 0x454   :  { %10341 = vst [vmem:[#allocation8_spill] sm:$0xff] %v9249_v15  ;;  %v9251_v30 = vpop.f32.mrb[42].mxu0  ;;  %v9264_v54 = vpop.f32.mrb[2].mxu1 }
 0x455   :  { %10342 = vst [vmem:[#allocation18_spill] sm:$0xff] %v9251_v30  ;;  %v9255_v21 = vpop.f32.mrb[43].mxu0  ;;  %6769 = vmatmul.mubr.f32.gmra.mrb[74].mxu0 %v8627_v14  ;;  %v9269_v15 = vpop.f32.mrb[3].mxu1 }
 0x456   :  { %10343 = vst [vmem:[#allocation19_spill] sm:$0xff] %v9255_v21  ;;  %6771 = vmatprep.mubr.f32.mxu0 %v8638_v49  ;;  %v9274_v12 = vpop.f32.mrb[4].mxu1 }
 0x459   :  { %6772 = vmatmul.mubr.f32.gmra.mrb[76].mxu0 %v8699_v50 }
 0x45a   :  { %6774 = vmatprep.mubr.f32.mxu0 %v8753_v38 }
 0x45d   :  { %6775 = vmatmul.mubr.f32.gmra.mrb[78].mxu0 %v8759_v13 }
 0x45e   :  { %6779 = vmatprep.mubr.f32.mxu0 %v8923_v4  ;;  %v9283_v4 = vpop.f32.mrb[5].mxu1 }
 0x460   :  { %v9267_v30 = vpop.f32.mrb[44].mxu0 }
 0x461   :  { %10344 = vst [vmem:[#allocation22_spill] sm:$0xff] %v9267_v30  ;;  %v9271_v21 = vpop.f32.mrb[45].mxu0  ;;  %6780 = vmatmul.mubr.f32.vlgmr.msra.gmra.mrb[64].mxu0 %v8933_v44  ;;  %v9286_v30 = vpop.f32.mrb[6].mxu1 }
 0x462   :  { %10345 = vst [vmem:[#allocation23_spill] sm:$0xff] %v9271_v21  ;;  %6804 = vmatpush3.msra.mxu0 %v9161_v42  ;;  %v9277_v31 = vpop.f32.mrb[46].mxu0  ;;  %6782 = vmatprep.mubr.f32.mxu0 %v8940_v59  ;;  %v9289_v44 = vpop.f32.mrb[7].mxu1 }
 0x463   :  { %v9280_v19 = vpop.f32.mrb[47].mxu0  ;;  %6829 = vmatprep.subr.mxu0 %v9178_v58  ;;  %v9292_v21 = vpop.f32.mrb[8].mxu1 }
 0x464   :  { %v9295_v59 = vpop.f32.mrb[9].mxu1 }
 0x465   :  { %6783 = vmatmul.mubr.f32.gmra.mrb[66].mxu0 %v8948_v11  ;;  %v9304_v11 = vld [vmem:[%s10218_s10 + $0x10] sm:$0xff] }
 0x466   :  { %6785 = vmatprep.mubr.f32.mxu0 %v8957_v0  ;;  %v3635_v0 = vand.u32 4294901760, %v9304_v11 }
 0x469   :  { %6786 = vmatmul.mubr.f32.gmra.mrb[68].mxu0 %v8967_v28  ;;  %v9313_v28 = vld [vmem:[%s10218_s10] sm:$0xff] }
 0x46a   :  { %6788 = vmatprep.mubr.f32.mxu0 %v8977_v47  ;;  %v9318_v47 = vld [vmem:[%s10218_s10 + $0x8] sm:$0xff] }
 0x46d   :  { %6789 = vmatmul.mubr.f32.gmra.mrb[70].mxu0 %v8988_v26  ;;  %v3629_v26 = vand.u32 4294901760, %v9313_v28 }
 0x46e   :  { %6791 = vmatprep.mubr.f32.mxu0 %v8999_v32  ;;  %v3632_v32 = vand.u32 4294901760, %v9318_v47 }
 0x471   :  { %6792 = vmatmul.mubr.f32.gmra.mrb[72].mxu0 %v9011_v35  ;;  %v10346_v35 = vld [vmem:[#allocation5_spill] sm:$0xff] }
 0x472   :  { %6794 = vmatprep.mubr.f32.mxu0 %v9024_v27  ;;  %v10347_v27 = vand.u32 4294901760, %v10346_v35 }
 0x475   :  { %6795 = vmatmul.mubr.f32.gmra.mrb[74].mxu0 %v9037_v39  ;;  %v9327_v39 = vpack.c.bf16 %v10347_v27, %v3635_v0 }
 0x476   :  { %6797 = vmatprep.mubr.f32.mxu0 %v9049_v3  ;;  %v9333_v3 = vpack.c.bf16 %v3632_v32, %v3629_v26 }
 0x478   :  { %7266 = vmatprep.subr.bf16.mxu1 %v9333_v3 }
 0x479   :  { %6798 = vmatmul.mubr.f32.gmra.mrb[76].mxu0 %v9061_v18  ;;  %7268 = vmatpush3.bf16.msra.mxu1 %v9333_v3 }
 0x47a   :  { %6800 = vmatprep.mubr.f32.mxu0 %v9073_v9  ;;  %7270 = vmatprep.subr.bf16.mxu1 %v9327_v39 }
 0x47d   :  { %6801 = vmatmul.mubr.f32.gmra.mrb[78].mxu0 %v9085_v60  ;;  %7272 = vmatpush3.bf16.msra.mxu1 %v9327_v39 }
 0x47e   :  { %6805 = vmatprep.mubr.f32.mxu0 %v8929_v29  ;;  %v10348_v29 = vld [vmem:[#allocation10_spill] sm:$0xff] }
 0x481   :  { %6806 = vmatmul.mubr.f32.vlgmr.msra.gmra.mrb[64].mxu0 %v8944_v51  ;;  %v10349_v51 = vld [vmem:[#allocation11_spill] sm:$0xff] }
 0x482   :  { %6830 = vmatpush3.msra.mxu0 %v9178_v58  ;;  %6808 = vmatprep.mubr.f32.mxu0 %v8953_v7  ;;  %v10350_v7 = vld [vmem:[#allocation13_spill] sm:$0xff] }
 0x483   :  { %6855 = vmatprep.subr.mxu0 %v9161_v42 }
 0x485   :  { %6809 = vmatmul.mubr.f32.gmra.mrb[66].mxu0 %v8963_v25  ;;  %v10351_v25 = vld [vmem:[#allocation14_spill] sm:$0xff] }
 0x486   :  { %6811 = vmatprep.mubr.f32.mxu0 %v8973_v5 }
 0x489   :  { %6812 = vmatmul.mubr.f32.gmra.mrb[68].mxu0 %v8984_v8 }
 0x48a   :  { %6814 = vmatprep.mubr.f32.mxu0 %v8995_v43 }
 0x48d   :  { %6815 = vmatmul.mubr.f32.gmra.mrb[70].mxu0 %v9007_v34 }
 0x48e   :  { %6817 = vmatprep.mubr.f32.mxu0 %v9020_v23 }
 0x491   :  { %6818 = vmatmul.mubr.f32.gmra.mrb[72].mxu0 %v9033_v33 }
 0x492   :  { %6820 = vmatprep.mubr.f32.mxu0 %v9045_v52 }
 0x495   :  { %6821 = vmatmul.mubr.f32.gmra.mrb[74].mxu0 %v9057_v16 }
 0x496   :  { %6823 = vmatprep.mubr.f32.mxu0 %v10348_v29 }
 0x499   :  { %6824 = vmatmul.mubr.f32.gmra.mrb[76].mxu0 %v10349_v51  ;;  %v10363_v51 = vld [vmem:[#allocation7_spill] sm:$0xff] }
 0x49a   :  { %6826 = vmatprep.mubr.f32.mxu0 %v10350_v7 }
 0x49d   :  { %6827 = vmatmul.mubr.f32.gmra.mrb[78].mxu0 %v10351_v25 }
 0x49e   :  { %6831 = vmatprep.mubr.f32.mxu0 %v8731_v10 }
 0x4a1   :  { %6832 = vmatmul.mubr.f32.vlgmr.msra.gmra.mrb[64].mxu0 %v8747_v6 }
 0x4a2   :  { %6856 = vmatpush3.msra.mxu0 %v9161_v42  ;;  %6834 = vmatprep.mubr.f32.mxu0 %v8750_v61 }
 0x4a5   :  { %6835 = vmatmul.mubr.f32.gmra.mrb[66].mxu0 %v8766_v55 }
 0x4a6   :  { %6837 = vmatprep.mubr.f32.mxu0 %v8769_v57 }
 0x4a9   :  { %6838 = vmatmul.mubr.f32.gmra.mrb[68].mxu0 %v8815_v36 }
 0x4aa   :  { %6840 = vmatprep.mubr.f32.mxu0 %v8564_v41 }
 0x4ad   :  { %6841 = vmatmul.mubr.f32.gmra.mrb[70].mxu0 %v8575_v46 }
 0x4ae   :  { %6843 = vmatprep.mubr.f32.mxu0 %v10308_v56 }
 0x4b1   :  { %6844 = vmatmul.mubr.f32.gmra.mrb[72].mxu0 %v8601_v62 }
 0x4b2   :  { %6846 = vmatprep.mubr.f32.mxu0 %v8610_v48 }
 0x4b5   :  { %6847 = vmatmul.mubr.f32.gmra.mrb[74].mxu0 %v8627_v14 }
 0x4b6   :  { %6849 = vmatprep.mubr.f32.mxu0 %v8638_v49 }
 0x4b9   :  { %6850 = vmatmul.mubr.f32.gmra.mrb[76].mxu0 %v8699_v50 }
 0x4ba   :  { %6852 = vmatprep.mubr.f32.mxu0 %v8753_v38 }
 0x4bd   :  { %6853 = vmatmul.mubr.f32.gmra.mrb[78].mxu0 %v8759_v13 }
 0x4be   :  { %6857 = vmatprep.mubr.f32.mxu0 %v8731_v10 }
 0x4c1   :  { %6858 = vmatmul.mubr.f32.vlgmr.msra.gmra.mrb[64].mxu0 %v8747_v6 }
 0x4c2   :  { %6860 = vmatprep.mubr.f32.mxu0 %v8750_v61 }
 0x4c5   :  { %6861 = vmatmul.mubr.f32.gmra.mrb[66].mxu0 %v8766_v55 }
 0x4c6   :  { %6863 = vmatprep.mubr.f32.mxu0 %v8769_v57 }
 0x4c9   :  { %6864 = vmatmul.mubr.f32.gmra.mrb[68].mxu0 %v8815_v36 }
 0x4ca   :  { %6866 = vmatprep.mubr.f32.mxu0 %v8564_v41 }
 0x4cd   :  { %6867 = vmatmul.mubr.f32.gmra.mrb[70].mxu0 %v8575_v46 }
 0x4ce   :  { %6869 = vmatprep.mubr.f32.mxu0 %v10308_v56 }
 0x4d1   :  { %6870 = vmatmul.mubr.f32.gmra.mrb[72].mxu0 %v8601_v62 }
 0x4d2   :  { %6872 = vmatprep.mubr.f32.mxu0 %v8610_v48 }
 0x4d4   :  { %v6660_v10 = vpop.f32.mrb[54].mxu0 }
 0x4d5   :  { %v9387_v6 = vadd.f32 %v9253_v53, %v6660_v10  ;;  %v2042_v61 = vpop.f32.mrb[55].mxu0  ;;  %6873 = vmatmul.mubr.f32.gmra.mrb[74].mxu0 %v8627_v14 }
 0x4d6   :  { %v9391_v55 = vadd.f32 %v9261_v17, %v2042_v61  ;;  %6875 = vmatprep.mubr.f32.mxu0 %v8638_v49 }
 0x4d7   :  { %10352 = vst [vmem:[#allocation9_spill] sm:$0xff] %v9387_v6 }
 0x4d8   :  { %v6663_v41 = vpop.f32.mrb[56].mxu0 }
 0x4d9   :  { %v9395_v46 = vadd.f32 %v9264_v54, %v6663_v41  ;;  %v2058_v57 = vpop.f32.mrb[57].mxu0  ;;  %6876 = vmatmul.mubr.f32.gmra.mrb[76].mxu0 %v8699_v50 }
 0x4da   :  { %v9399_v62 = vadd.f32 %v9269_v15, %v2058_v57  ;;  %6878 = vmatprep.mubr.f32.mxu0 %v8753_v38 }
 0x4db   :  { %10353 = vst [vmem:[#allocation12_spill] sm:$0xff] %v9395_v46 }
 0x4dc   :  { %10354 = vst [vmem:[#allocation5_spill] sm:$0xff] %v9399_v62  ;;  %v6666_v48 = vpop.f32.mrb[58].mxu0 }
 0x4dd   :  { %v9403_v14 = vadd.f32 %v9274_v12, %v6666_v48  ;;  %v2074_v36 = vpop.f32.mrb[59].mxu0  ;;  %6879 = vmatmul.mubr.f32.gmra.mrb[78].mxu0 %v8759_v13 }
 0x4de   :  { %v9407_v49 = vadd.f32 %v9283_v4, %v2074_v36  ;;  %v9467_v4 = vsub.f32 %v9304_v11, %v3635_v0  ;;  %v10364_v36 = vld [vmem:[#allocation16_spill] sm:$0xff] }
 0x4df   :  { %10355 = vst [vmem:[#allocation10_spill] sm:$0xff] %v9403_v14 }
 0x4e0   :  { %10356 = vst [vmem:[#allocation11_spill] sm:$0xff] %v9407_v49  ;;  %v6669_v5 = vpop.f32.mrb[60].mxu0  ;;  %v10255_v35 = vand.u32 4294901760, %v9467_v4 }
 0x4e1   :  { %v9410_v8 = vadd.f32 %v9286_v30, %v6669_v5  ;;  %v2090_v50 = vpop.f32.mrb[61].mxu0 }
 0x4e2   :  { %v9413_v43 = vadd.f32 %v9289_v44, %v2090_v50  ;;  %v9472_v44 = vld [vmem:[%s10214_s6] ss:$0 sm:$0xff] }
 0x4e3   :  { %10357 = vst [vmem:[#allocation13_spill] sm:$0xff] %v9410_v8  ;;  %v9488_v29 = vadd.f32 %v9205_v24, %v9472_v44  ;;  %v9496_v7 = vadd.f32 %v10363_v51, %v9472_v44  ;;  %v3875_v24 = vsub.f32 %v9467_v4, %v10255_v35  ;;  %v9509_v5 = vadd.f32 %v9472_v44, %v10364_v36  ;;  %v10373_v8 = vld [vmem:[#allocation18_spill] sm:$0xff] }
 0x4e4   :  { %10358 = vst [vmem:[#allocation14_spill] sm:$0xff] %v9413_v43  ;;  %v6672_v56 = vpop.f32.mrb[62].mxu0 }
 0x4e5   :  { %v9416_v38 = vadd.f32 %v9292_v21, %v6672_v56  ;;  %v2106_v34 = vpop.f32.mrb[63].mxu0 }
 0x4e6   :  { %v9419_v23 = vadd.f32 %v9295_v59, %v2106_v34  ;;  %v9476_v59 = vadd.f32 %v9472_v44, %v9208_v37  ;;  %v10365_v34 = vld [vmem:[#allocation20_spill] sm:$0xff] }
 0x4e7   :  { %10359 = vst [vmem:[#allocation24_spill] sm:$0xff] %v9416_v38 }
 0x4e8   :  { %10360 = vst [vmem:[#allocation25_spill] sm:$0xff] %v9419_v23  ;;  %v6677_v13 = vpop.f32.mrb[48].mxu0 }
 0x4e9   :  { %v9422_v33 = vadd.f32 %v9232_v2, %v6677_v13  ;;  %v2188_v52 = vpop.f32.mrb[49].mxu0  ;;  %v9442_v2 = vsub.f32 %v9313_v28, %v3629_v26  ;;  %v10362_v28 = vld [vmem:[#allocation6_spill] sm:$0xff]  ;;  %v9481_v26 = vadd.f32 %v9472_v44, %v9203_v40  ;;  %v9517_v13 = vadd.f32 %v9472_v44, %v10365_v34 }
 0x4ea   :  { %v9425_v16 = vadd.f32 %v9235_v1, %v2188_v52  ;;  %v9447_v1 = vsub.f32 %v9318_v47, %v3632_v32  ;;  %v10254_v47 = vand.u32 4294901760, %v10362_v28 }
 0x4ec   :  { %v6680_v18 = vpop.f32.mrb[50].mxu0  ;;  %v9462_v53 = vpack.c.bf16 %v9447_v1, %v9442_v2  ;;  %v3882_v40 = vsub.f32 %v10362_v28, %v10254_v47 }
 0x4ed   :  { %v9428_v9 = vadd.f32 %v9237_v63, %v6680_v18  ;;  %v2200_v60 = vpop.f32.mrb[51].mxu0  ;;  %v10259_v63 = vand.u32 4294901760, %v9442_v2 }
 0x4ee   :  { %v9431_v42 = vadd.f32 %v9239_v22, %v2200_v60  ;;  %v10257_v22 = vand.u32 4294901760, %v9447_v1  ;;  %v3883_v60 = vand.u32 4294901760, %v3882_v40 }
 0x4f0   :  { %v6683_v58 = vpop.f32.mrb[52].mxu0  ;;  %v3868_v17 = vsub.f32 %v9447_v1, %v10257_v22  ;;  %v10369_v22 = vld [vmem:[#allocation19_spill] sm:$0xff] }
 0x4f1   :  { %v9434_v54 = vadd.f32 %v9242_v45, %v6683_v58  ;;  %v2212_v21 = vpop.f32.mrb[53].mxu0  ;;  %v3861_v45 = vsub.f32 %v9442_v2, %v10259_v63 }
 0x4f2   :  { %v9437_v12 = vadd.f32 %v9247_v20, %v2212_v21  ;;  %v3869_v15 = vand.u32 4294901760, %v3868_v17 }
 0x4f3   :  { %10361 = vst [vmem:[#allocation26_spill] sm:$0xff] %v9434_v54  ;;  %v3862_v20 = vand.u32 4294901760, %v3861_v45 }
 0x4f5   :  { %v9457_v30 = vpack.c.bf16 %v3869_v15, %v3862_v20  ;;  %v3876_v20 = vand.u32 4294901760, %v3875_v24 }
 0x4f7   :  { %7274 = vmatprep.subr.bf16.mxu1 %v9457_v30 }
 0x594   :  { %v6859_v32 = vpop.f32.mrb[64].mxu0 }
 0x595   :  { %v3557_v11 = vmul.f32 %v6859_v32, %v9476_v59  ;;  %v3442_v0 = vpop.f32.mrb[65].mxu0 }
 0x596   :  { %v3556_v27 = vmul.f32 %v3442_v0, %v9481_v26 }
 0x597   :  { %v3581_v37 = vsel %vm3576_vm3, %v3557_v11, 0 }
 0x598   :  { %v9498_v25 = vand.u32 4294901760, %v3581_v37  ;;  %v3578_v10 = vsel %vm3576_vm3, %v3556_v27, 0  ;;  %v6862_v61 = vpop.f32.mrb[66].mxu0  ;;  %v10366_v27 = vld [vmem:[#allocation15_spill] sm:$0xff] }
 0x599   :  { %v9504_v41 = vand.u32 4294901760, %v3578_v10  ;;  %v3559_v57 = vmul.f32 %v6862_v61, %v9488_v29  ;;  %v3454_v48 = vpop.f32.mrb[67].mxu0  ;;  %v10367_v61 = vld [vmem:[#allocation17_spill] sm:$0xff] }
 0x59a   :  { %v9512_v50 = vsub.f32 %v3581_v37, %v9498_v25  ;;  %v3558_v56 = vmul.f32 %v3454_v48, %v9496_v7  ;;  %v9533_v37 = vadd.f32 %v10366_v27, %v9472_v44  ;;  %v9544_v24 = vadd.f32 %v10367_v61, %v9472_v44 }
 0x59b   :  { %v9520_v52 = vsub.f32 %v3578_v10, %v9504_v41  ;;  %v3587_v18 = vsel %vm3576_vm3, %v3559_v57, 0 }
 0x59c   :  { %v10253_v58 = vand.u32 4294901760, %v9512_v50  ;;  %v9524_v21 = vand.u32 4294901760, %v3587_v18  ;;  %v3584_v45 = vsel %vm3576_vm3, %v3558_v56, 0  ;;  %v6865_v17 = vpop.f32.mrb[68].mxu0  ;;  %10368 = vst [vmem:[#allocation6_spill] sm:$0xff] %v9544_v24 }
 0x59d   :  { %v9527_v15 = vand.u32 4294901760, %v3584_v45  ;;  %v3561_v32 = vmul.f32 %v6865_v17, %v9517_v13  ;;  %v3466_v11 = vpop.f32.mrb[69].mxu0  ;;  %v10256_v0 = vand.u32 4294901760, %v9520_v52 }
 0x59e   :  { %v3710_v40 = vsub.f32 %v9512_v50, %v10253_v58  ;;  %v9539_v51 = vsub.f32 %v3587_v18, %v9524_v21  ;;  %v3560_v10 = vmul.f32 %v3466_v11, %v9509_v5  ;;  %v7277_v11 = vpack.c.bf16 %v3883_v60, %v3876_v20 }
 0x59f   :  { %v9547_v57 = vsub.f32 %v3584_v45, %v9527_v15  ;;  %v3593_v48 = vsel %vm3576_vm3, %v3561_v32, 0  ;;  %v3700_v36 = vsub.f32 %v9520_v52, %v10256_v0  ;;  %v9570_v60 = vadd.f32 %v9472_v44, %v10369_v22 }
 0x5a0   :  { %v9553_v56 = vand.u32 4294901760, %v3593_v48  ;;  %v3590_v34 = vsel %vm3576_vm3, %v3560_v10, 0  ;;  %v6868_v18 = vpop.f32.mrb[70].mxu0  ;;  %v10258_v17 = vand.u32 4294901760, %v9539_v51  ;;  %v3711_v47 = vand.u32 4294901760, %v3710_v40 }
 0x5a1   :  { %v9557_v27 = vand.u32 4294901760, %v3590_v34  ;;  %v3563_v61 = vmul.f32 %v6868_v18, %v9544_v24  ;;  %v3478_v45 = vpop.f32.mrb[71].mxu0  ;;  %v3701_v58 = vand.u32 4294901760, %v3700_v36  ;;  %v10260_v32 = vand.u32 4294901760, %v9547_v57  ;;  %10370 = vst [vmem:[#allocation7_spill] sm:$0xff] %v9570_v60 }
 0x5a2   :  { %v9562_v35 = vsub.f32 %v3593_v48, %v9553_v56  ;;  %v3562_v0 = vmul.f32 %v3478_v45, %v9533_v37  ;;  %v3730_v10 = vsub.f32 %v9539_v51, %v10258_v17  ;;  %v10371_v48 = vld [vmem:[#allocation8_spill] sm:$0xff] }
 0x5a3   :  { %v9573_v20 = vsub.f32 %v3590_v34, %v9557_v27  ;;  %v3599_v36 = vsel %vm3576_vm3, %v3563_v61, 0  ;;  %6889 = vmatprep.mubr.f32.mxu1 %v3701_v58  ;;  %v3720_v40 = vsub.f32 %v9547_v57, %v10260_v32  ;;  %v9581_v18 = vadd.f32 %v9472_v44, %v10371_v48 }
 0x5a4   :  { %v9583_v45 = vand.u32 4294901760, %v3599_v36  ;;  %v3596_v17 = vsel %vm3576_vm3, %v3562_v0, 0  ;;  %v6871_v22 = vpop.f32.mrb[72].mxu0  ;;  %6890 = vmatmul.mubr.f32.vlgmr.msra.gmra.mrb[16].mxu1 %v3711_v47  ;;  %v10261_v34 = vand.u32 4294901760, %v9562_v35  ;;  %v3731_v0 = vand.u32 4294901760, %v3730_v10  ;;  %v10375_v10 = vld [vmem:[#allocation21_spill] sm:$0xff] }
 0x5a5   :  { %10372 = vst [vmem:[#allocation16_spill] sm:$0xff] %v9581_v18  ;;  %v9587_v63 = vand.u32 4294901760, %v3596_v17  ;;  %v3565_v58 = vmul.f32 %v6871_v22, %v9570_v60  ;;  %7276 = vmatpush3.bf16.msra.mxu1 %v9457_v30  ;;  %v3490_v61 = vpop.f32.mrb[73].mxu0  ;;  %v3721_v32 = vand.u32 4294901760, %v3720_v40  ;;  %v10262_v38 = vand.u32 4294901760, %v9573_v20 }
 0x5a6   :  { %v9593_v48 = vsub.f32 %v3599_v36, %v9583_v45  ;;  %v3564_v23 = vmul.f32 %v3490_v61, %v9581_v18  ;;  %v3750_v47 = vsub.f32 %v9562_v35, %v10261_v34  ;;  %7278 = vmatprep.subr.bf16.mxu1 %v7277_v11  ;;  %v9601_v22 = vadd.f32 %v10373_v8, %v9472_v44 }
 0x5a7   :  { %v9604_v30 = vsub.f32 %v3596_v17, %v9587_v63  ;;  %v3605_v40 = vsel %vm3576_vm3, %v3565_v58, 0  ;;  %6892 = vmatprep.mubr.f32.mxu1 %v3721_v32  ;;  %v3740_v36 = vsub.f32 %v9573_v20, %v10262_v38  ;;  %v9612_v61 = vadd.f32 %v10375_v10, %v9472_v44 }
 0x5a8   :  { %10374 = vst [vmem:[#allocation20_spill] sm:$0xff] %v9601_v22  ;;  %v9614_v34 = vand.u32 4294901760, %v3605_v40  ;;  %v3602_v43 = vsel %vm3576_vm3, %v3564_v23, 0  ;;  %v6874_v8 = vpop.f32.mrb[74].mxu0  ;;  %6893 = vmatmul.mubr.f32.gmra.mrb[18].mxu1 %v3731_v0  ;;  %v10264_v17 = vand.u32 4294901760, %v9593_v48  ;;  %v3751_v60 = vand.u32 4294901760, %v3750_v47 }
 0x5a9   :  { %10376 = vst [vmem:[#allocation15_spill] sm:$0xff] %v9612_v61  ;;  %v9618_v14 = vand.u32 4294901760, %v3602_v43  ;;  %v3567_v32 = vmul.f32 %v6874_v8, %v9601_v22  ;;  %v3502_v58 = vpop.f32.mrb[75].mxu0  ;;  %v3741_v49 = vand.u32 4294901760, %v3740_v36  ;;  %v10267_v38 = vand.u32 4294901760, %v9604_v30  ;;  %7280 = vmatpush3.bf16.msra.mxu1 %v7277_v11 }
 0x5aa   :  { %v9623_v10 = vsub.f32 %v3605_v40, %v9614_v34  ;;  %v3566_v46 = vmul.f32 %v3502_v58, %v9612_v61  ;;  %v3770_v23 = vsub.f32 %v9593_v48, %v10264_v17  ;;  %7282 = vmatprep.subr.bf16.mxu1 %v9462_v53  ;;  %v9632_v0 = vadd.f32 %v9472_v44, %v9280_v19  ;;  %v10378_v40 = vld [vmem:[#allocation23_spill] sm:$0xff] }
 0x5ab   :  { %v9635_v36 = vsub.f32 %v3602_v43, %v9618_v14  ;;  %v3611_v11 = vsel %vm3576_vm3, %v3567_v32, 0  ;;  %6895 = vmatprep.mubr.f32.mxu1 %v3741_v49  ;;  %v3760_v47 = vsub.f32 %v9604_v30, %v10267_v38  ;;  %v9643_v8 = vadd.f32 %v9472_v44, %v10378_v40 }
 0x5ac   :  { %10377 = vst [vmem:[#allocation17_spill] sm:$0xff] %v9632_v0  ;;  %v9645_v58 = vand.u32 4294901760, %v3611_v11  ;;  %v3608_v17 = vsel %vm3576_vm3, %v3566_v46, 0  ;;  %v6877_v19 = vpop.f32.mrb[76].mxu0  ;;  %6896 = vmatmul.mubr.f32.gmra.mrb[20].mxu1 %v3751_v60  ;;  %v10270_v43 = vand.u32 4294901760, %v9623_v10  ;;  %v3771_v18 = vand.u32 4294901760, %v3770_v23 }
 0x5ad   :  { %10379 = vst [vmem:[#allocation19_spill] sm:$0xff] %v9643_v8  ;;  %v9649_v22 = vand.u32 4294901760, %v3608_v17  ;;  %v3569_v49 = vmul.f32 %v6877_v19, %v9632_v0  ;;  %v3514_v32 = vpop.f32.mrb[77].mxu0  ;;  %v3761_v61 = vand.u32 4294901760, %v3760_v47  ;;  %v10272_v38 = vand.u32 4294901760, %v9635_v36  ;;  %v10381_v23 = vld [vmem:[#allocation22_spill] sm:$0xff] }
 0x5ae   :  { %v9654_v62 = vsub.f32 %v3611_v11, %v9645_v58  ;;  %v3568_v40 = vmul.f32 %v3514_v32, %v9643_v8  ;;  %v3790_v46 = vsub.f32 %v9623_v10, %v10270_v43  ;;  %v9662_v60 = vadd.f32 %v9277_v31, %v9472_v44 }
 0x5af   :  { %v9665_v19 = vsub.f32 %v3608_v17, %v9649_v22  ;;  %v3617_v47 = vsel %vm3576_vm3, %v3569_v49, 0  ;;  %6898 = vmatprep.mubr.f32.mxu1 %v3761_v61  ;;  %v3780_v11 = vsub.f32 %v9635_v36, %v10272_v38  ;;  %v9673_v32 = vadd.f32 %v10381_v23, %v9472_v44 }
 0x5b0   :  { %10380 = vst [vmem:[#allocation8_spill] sm:$0xff] %v9662_v60  ;;  %v9675_v0 = vand.u32 4294901760, %v3617_v47  ;;  %v3614_v43 = vsel %vm3576_vm3, %v3568_v40, 0  ;;  %v6880_v31 = vpop.f32.mrb[78].mxu0  ;;  %6899 = vmatmul.mubr.f32.gmra.mrb[22].mxu1 %v3771_v18  ;;  %v10274_v17 = vand.u32 4294901760, %v9654_v62  ;;  %v3791_v23 = vand.u32 4294901760, %v3790_v46 }
 0x5b1   :  { %10382 = vst [vmem:[#allocation18_spill] sm:$0xff] %v9673_v32  ;;  %v9679_v8 = vand.u32 4294901760, %v3614_v43  ;;  %v3571_v61 = vmul.f32 %v6880_v31, %v9662_v60  ;;  %v3526_v49 = vpop.f32.mrb[79].mxu0  ;;  %v3781_v6 = vand.u32 4294901760, %v3780_v11  ;;  %v10276_v38 = vand.u32 4294901760, %v9665_v19 }
 0x5b2   :  { %v9684_v24 = vsub.f32 %v3617_v47, %v9675_v0  ;;  %v3570_v44 = vmul.f32 %v3526_v49, %v9673_v32  ;;  %v3810_v18 = vsub.f32 %v9654_v62, %v10274_v17 }
 0x5b3   :  { %v9691_v40 = vsub.f32 %v3614_v43, %v9679_v8  ;;  %v3623_v54 = vsel %vm3576_vm3, %v3571_v61, 0  ;;  %6901 = vmatprep.mubr.f32.mxu1 %v3781_v6  ;;  %v3800_v11 = vsub.f32 %v9665_v19, %v10276_v38 }
 0x5b4   :  { %v9697_v31 = vand.u32 4294901760, %v3623_v54  ;;  %v3620_v47 = vsel %vm3576_vm3, %v3570_v44, 0  ;;  %6902 = vmatmul.mubr.f32.gmra.mrb[24].mxu1 %v3791_v23  ;;  %v10278_v46 = vand.u32 4294901760, %v9684_v24  ;;  %v3811_v6 = vand.u32 4294901760, %v3810_v18 }
 0x5b5   :  { %v9701_v49 = vand.u32 4294901760, %v3620_v47  ;;  %v3801_v17 = vand.u32 4294901760, %v3800_v11  ;;  %v3819_v43 = vand.u32 4294901760, %v9691_v40 }
 0x5b6   :  { %v9705_v60 = vsub.f32 %v3623_v54, %v9697_v31  ;;  %v3830_v61 = vsub.f32 %v9684_v24, %v10278_v46 }
 0x5b7   :  { %v9711_v38 = vsub.f32 %v3620_v47, %v9701_v49  ;;  %6904 = vmatprep.mubr.f32.mxu1 %v3801_v17  ;;  %v3820_v44 = vsub.f32 %v9691_v40, %v3819_v43 }
 0x5b8   :  { %6905 = vmatmul.mubr.f32.gmra.mrb[26].mxu1 %v3811_v6  ;;  %v3849_v23 = vand.u32 4294901760, %v9705_v60  ;;  %v3831_v32 = vand.u32 4294901760, %v3830_v61  ;;  %v7285_v6 = vpack.c.bf16 %v10362_v28, %v9467_v4  ;;  %v10387_v61 = vand.u32 4294901760, %v10362_v28 }
 0x5b9   :  { %v3821_v11 = vand.u32 4294901760, %v3820_v44  ;;  %v3839_v54 = vand.u32 4294901760, %v9711_v38  ;;  %v10393_v28 = vand.u32 4294901760, %v9604_v30 }
 0x5ba   :  { %v3850_v18 = vsub.f32 %v9705_v60, %v3849_v23 }
 0x5bb   :  { %6907 = vmatprep.mubr.f32.mxu1 %v3821_v11  ;;  %v3840_v17 = vsub.f32 %v9711_v38, %v3839_v54  ;;  %v10388_v11 = vand.u32 4294901760, %v9512_v50 }
 0x5bc   :  { %6908 = vmatmul.mubr.f32.gmra.mrb[28].mxu1 %v3831_v32  ;;  %v3851_v46 = vand.u32 4294901760, %v3850_v18  ;;  %v10384_v32 = vand.u32 4294901760, %v9447_v1  ;;  %v10386_v1 = vand.u32 4294901760, %v9467_v4  ;;  %v10389_v18 = vand.u32 4294901760, %v9547_v57 }
 0x5bd   :  { %v3841_v47 = vand.u32 4294901760, %v3840_v17  ;;  %v10390_v17 = vand.u32 4294901760, %v9539_v51  ;;  %v10392_v4 = vand.u32 4294901760, %v9562_v35 }
 0x5be   :  { %v7301_v44 = vpack.c.bf16 %v10387_v61, %v10386_v1  ;;  %v3536_v1 = vmul.f32 %v9425_v16, %v9481_v26 }
 0x5bf   :  { %6910 = vmatprep.mubr.f32.mxu1 %v3841_v47  ;;  %v10391_v47 = vand.u32 4294901760, %v9573_v20 }
 0x5c0   :  { %6911 = vmatmul.mubr.f32.gmra.mrb[30].mxu1 %v3851_v46 }
 0x5c1   :  { %6921 = vmatprep.mubr.f32.mxu1 %v9504_v41 }
 0x5c4   :  { %6922 = vmatmul.mubr.f32.vlgmr.msra.gmra.mrb[16].mxu1 %v9498_v25 }
 0x5c5   :  { %7284 = vmatpush3.bf16.msra.mxu1 %v9462_v53  ;;  %6924 = vmatprep.mubr.f32.mxu1 %v9527_v15  ;;  %v10383_v53 = vand.u32 4294901760, %v9442_v2  ;;  %v10385_v2 = vand.u32 4294901760, %v9520_v52 }
 0x5c6   :  { %7286 = vmatprep.subr.bf16.mxu1 %v7285_v6 }
 0x5c7   :  { %v7297_v46 = vpack.c.bf16 %v10384_v32, %v10383_v53 }
 0x5c8   :  { %6925 = vmatmul.mubr.f32.gmra.mrb[18].mxu1 %v9524_v21 }
 0x5c9   :  { %6927 = vmatprep.mubr.f32.mxu1 %v9557_v27  ;;  %7288 = vmatpush3.bf16.msra.mxu1 %v7285_v6 }
 0x5ca   :  { %7290 = vmatprep.subr.bf16.mxu1 %v9333_v3 }
 0x5cc   :  { %6928 = vmatmul.mubr.f32.gmra.mrb[20].mxu1 %v9553_v56 }
 0x5cd   :  { %6930 = vmatprep.mubr.f32.mxu1 %v9587_v63 }
 0x5d0   :  { %6931 = vmatmul.mubr.f32.gmra.mrb[22].mxu1 %v9583_v45 }
 0x5d1   :  { %6933 = vmatprep.mubr.f32.mxu1 %v9618_v14 }
 0x5d4   :  { %6934 = vmatmul.mubr.f32.gmra.mrb[24].mxu1 %v9614_v34 }
 0x5d5   :  { %6936 = vmatprep.mubr.f32.mxu1 %v9649_v22 }
 0x5d8   :  { %6937 = vmatmul.mubr.f32.gmra.mrb[26].mxu1 %v9645_v58 }
 0x5d9   :  { %6939 = vmatprep.mubr.f32.mxu1 %v9679_v8 }
 0x5dc   :  { %6940 = vmatmul.mubr.f32.gmra.mrb[28].mxu1 %v9675_v0 }
 0x5dd   :  { %6942 = vmatprep.mubr.f32.mxu1 %v9701_v49 }
 0x5e0   :  { %6943 = vmatmul.mubr.f32.gmra.mrb[30].mxu1 %v9697_v31 }
 0x5e1   :  { %6953 = vmatprep.mubr.f32.mxu1 %v9520_v52  ;;  %v10395_v52 = vand.u32 4294901760, %v9635_v36 }
 0x5e4   :  { %6954 = vmatmul.mubr.f32.vlgmr.msra.gmra.mrb[16].mxu1 %v9512_v50  ;;  %v10394_v50 = vand.u32 4294901760, %v9593_v48 }
 0x5e5   :  { %7292 = vmatpush3.bf16.msra.mxu1 %v9333_v3  ;;  %6956 = vmatprep.mubr.f32.mxu1 %v9547_v57  ;;  %v10397_v57 = vand.u32 4294901760, %v9665_v19 }
 0x5e6   :  { %7294 = vmatprep.subr.bf16.mxu1 %v9327_v39 }
 0x5e8   :  { %6957 = vmatmul.mubr.f32.gmra.mrb[18].mxu1 %v9539_v51  ;;  %v10396_v51 = vand.u32 4294901760, %v9623_v10 }
 0x5e9   :  { %6959 = vmatprep.mubr.f32.mxu1 %v9573_v20  ;;  %7296 = vmatpush3.bf16.msra.mxu1 %v9327_v39  ;;  %v10398_v20 = vand.u32 4294901760, %v9654_v62 }
 0x5ea   :  { %7298 = vmatprep.subr.bf16.mxu1 %v7297_v46 }
 0x5ec   :  { %6960 = vmatmul.mubr.f32.gmra.mrb[20].mxu1 %v9562_v35  ;;  %v10399_v35 = vand.u32 4294901760, %v9684_v24 }
 0x5ed   :  { %6962 = vmatprep.mubr.f32.mxu1 %v9604_v30  ;;  %v3553_v30 = vld [vmem:[%s10217_s9 + $0x8] sm:$0xff] }
 0x5f0   :  { %6963 = vmatmul.mubr.f32.gmra.mrb[22].mxu1 %v9593_v48  ;;  %v3552_v48 = vld [vmem:[%s10217_s9] sm:$0xff] }
 0x5f1   :  { %6965 = vmatprep.mubr.f32.mxu1 %v9635_v36 }
 0x5f4   :  { %6966 = vmatmul.mubr.f32.gmra.mrb[24].mxu1 %v9623_v10  ;;  %v4813_v10 = vand.u32 4294901760, %v3553_v30 }
 0x5f5   :  { %6968 = vmatprep.mubr.f32.mxu1 %v9665_v19  ;;  %v3554_v19 = vld [vmem:[%s10217_s9 + $0x10] sm:$0xff] }
 0x5f8   :  { %6969 = vmatmul.mubr.f32.gmra.mrb[26].mxu1 %v9654_v62  ;;  %v4810_v62 = vand.u32 4294901760, %v3552_v48 }
 0x5f9   :  { %6971 = vmatprep.mubr.f32.mxu1 %v9691_v40 }
 0x5fc   :  { %6972 = vmatmul.mubr.f32.gmra.mrb[28].mxu1 %v9684_v24  ;;  %v9829_v24 = vsub.f32 %v3553_v30, %v4813_v10  ;;  %v10407_v30 = vld [vmem:[#allocation15_spill] sm:$0xff] }
 0x5fd   :  { %6974 = vmatprep.mubr.f32.mxu1 %v9711_v38  ;;  %v9815_v38 = vpack.c.bf16 %v4813_v10, %v4810_v62 }
 0x600   :  { %6975 = vmatmul.mubr.f32.gmra.mrb[30].mxu1 %v9705_v60  ;;  %v5048_v60 = vand.u32 4294901760, %v9829_v24 }
 0x601   :  { %6985 = vmatprep.mubr.f32.mxu1 %v10385_v2 }
 0x602   :  { %v5049_v6 = vsub.f32 %v9829_v24, %v5048_v60 }
 0x604   :  { %6986 = vmatmul.mubr.f32.vlgmr.msra.gmra.mrb[16].mxu1 %v10388_v11  ;;  %v10404_v11 = vld [vmem:[#allocation5_spill] sm:$0xff] }
 0x605   :  { %7300 = vmatpush3.bf16.msra.mxu1 %v7297_v46  ;;  %6988 = vmatprep.mubr.f32.mxu1 %v10389_v18  ;;  %v5050_v46 = vand.u32 4294901760, %v5049_v6 }
 0x606   :  { %7302 = vmatprep.subr.bf16.mxu1 %v7301_v44 }
 0x608   :  { %6989 = vmatmul.mubr.f32.gmra.mrb[18].mxu1 %v10390_v17 }
 0x609   :  { %6991 = vmatprep.mubr.f32.mxu1 %v10391_v47  ;;  %7304 = vmatpush3.bf16.msra.mxu1 %v7301_v44  ;;  %v10403_v44 = vld [vmem:[#allocation16_spill] sm:$0xff] }
 0x60a   :  { %7306 = vmatprep.subr.bf16.mxu1 %v9333_v3  ;;  %v3544_v18 = vmul.f32 %v10404_v11, %v10403_v44 }
 0x60c   :  { %6992 = vmatmul.mubr.f32.gmra.mrb[20].mxu1 %v10392_v4 }
 0x60d   :  { %6994 = vmatprep.mubr.f32.mxu1 %v10393_v28 }
 0x610   :  { %6995 = vmatmul.mubr.f32.gmra.mrb[22].mxu1 %v10394_v50 }
 0x611   :  { %6997 = vmatprep.mubr.f32.mxu1 %v10395_v52 }
 0x614   :  { %6998 = vmatmul.mubr.f32.gmra.mrb[24].mxu1 %v10396_v51 }
 0x615   :  { %7000 = vmatprep.mubr.f32.mxu1 %v10397_v57  ;;  %v10405_v57 = vld [vmem:[#allocation7_spill] sm:$0xff] }
 0x618   :  { %7001 = vmatmul.mubr.f32.gmra.mrb[26].mxu1 %v10398_v20  ;;  %v10406_v20 = vld [vmem:[#allocation12_spill] sm:$0xff] }
 0x619   :  { %7003 = vmatprep.mubr.f32.mxu1 %v3819_v43  ;;  %v4816_v43 = vand.u32 4294901760, %v3554_v19 }
 0x61c   :  { %7004 = vmatmul.mubr.f32.gmra.mrb[28].mxu1 %v10399_v35 }
 0x61d   :  { %7006 = vmatprep.mubr.f32.mxu1 %v3839_v54 }
 0x620   :  { %7007 = vmatmul.mubr.f32.gmra.mrb[30].mxu1 %v3849_v23 }
 0x621   :  { %7017 = vmatprep.mubr.f32.mxu1 %v9504_v41 }
 0x624   :  { %7018 = vmatmul.mubr.f32.vlgmr.msra.gmra.mrb[16].mxu1 %v9498_v25 }
 0x625   :  { %7308 = vmatpush3.bf16.msra.mxu1 %v9333_v3  ;;  %7020 = vmatprep.mubr.f32.mxu1 %v9527_v15  ;;  %v9827_v3 = vsub.f32 %v3552_v48, %v4810_v62  ;;  %v4783_v48 = vsel %vm3576_vm3, %v3544_v18, 0  ;;  %v10408_v62 = vld [vmem:[#allocation11_spill] sm:$0xff] }
 0x626   :  { %7310 = vmatprep.subr.bf16.mxu1 %v9327_v39  ;;  %v3546_v10 = vmul.f32 %v10408_v62, %v10407_v30 }
 0x627   :  { %v5041_v36 = vand.u32 4294901760, %v9827_v3 }
 0x628   :  { %7021 = vmatmul.mubr.f32.gmra.mrb[18].mxu1 %v9524_v21 }
 0x629   :  { %7023 = vmatprep.mubr.f32.mxu1 %v9557_v27  ;;  %7312 = vmatpush3.bf16.msra.mxu1 %v9327_v39  ;;  %v3555_v39 = vld [vmem:[%s10217_s9 + $0x18] sm:$0xf]  ;;  %v5042_v54 = vsub.f32 %v9827_v3, %v5041_v36  ;;  %s7923_s9 = smov [#allocation2]  }
 0x62a   :  { %7314 = vmatprep.subr.bf16.mxu1 %v9815_v38  ;;  %v4807_v40 = vsel %vm97_vm0, %v3555_v39, 0  ;;  %s5960_s5 = sshll.u32 %s7923_s9, 4  ;;  %s5961_s5 = int_to_ptr.vmem [resolvable:$true] %s5960_s5 }
 0x62b   :  { %v4819_v23 = vand.u32 4294901760, %v4807_v40  ;;  %v5043_v32 = vand.u32 4294901760, %v5042_v54  ;;  %s7899_s7 = scalar_lea.vmem %s5961_s5, 2048  ;;  %p7904_p1 = scmp.lt.s32.totalorder %s5961_s5, %s5961_s5 }
 0x62c   :  { %7024 = vmatmul.mubr.f32.gmra.mrb[20].mxu1 %v9553_v56  ;;  %p7900_p0 = scmp.ne.s32.totalorder %s5961_s5, %s7899_s7  ;;  %p7905_p2 = scmp.lt.s32.totalorder %s7899_s7, %s7899_s7 }
 0x62d   :  { %7026 = vmatprep.mubr.f32.mxu1 %v9587_v63  ;;  %v9852_v53 = vpack.c.bf16 %v4819_v23, %v4816_v43  ;;  %v9858_v2 = vpack.c.bf16 %v5050_v46, %v5043_v32 }
 0x62e   :  { %p7906_p3 = por %p7905_p2, %p7904_p1 }
 0x630   :  { %7027 = vmatmul.mubr.f32.gmra.mrb[22].mxu1 %v9583_v45  ;;  %p7907_p4 = pnand %p7906_p3, %p7900_p0 }
 0x631   :  { %7029 = vmatprep.mubr.f32.mxu1 %v9618_v14 }
 0x634   :  { %7030 = vmatmul.mubr.f32.gmra.mrb[24].mxu1 %v9614_v34 }
 0x635   :  { %7032 = vmatprep.mubr.f32.mxu1 %v9649_v22 }
 0x638   :  { %7033 = vmatmul.mubr.f32.gmra.mrb[26].mxu1 %v9645_v58 }
 0x639   :  { %7035 = vmatprep.mubr.f32.mxu1 %v9679_v8 }
 0x63c   :  { %7036 = vmatmul.mubr.f32.gmra.mrb[28].mxu1 %v9675_v0 }
 0x63d   :  { %7038 = vmatprep.mubr.f32.mxu1 %v9701_v49 }
 0x640   :  { %7039 = vmatmul.mubr.f32.gmra.mrb[30].mxu1 %v9697_v31 }
 0x641   :  { %7049 = vmatprep.mubr.f32.mxu1 %v9504_v41  ;;  %v4759_v41 = vsel %vm3576_vm3, %v3536_v1, 0  ;;  %v9957_v1 = vand.u32 4294901760, %v4783_v48 }
 0x642   :  { %v9874_v26 = vand.u32 4294901760, %v4759_v41 }
 0x644   :  { %7050 = vmatmul.mubr.f32.vlgmr.msra.gmra.mrb[16].mxu1 %v9498_v25  ;;  %v3537_v25 = vmul.f32 %v9422_v33, %v9476_v59  ;;  %v3540_v59 = vmul.f32 %v9437_v12, %v9509_v5  ;;  %v10400_v12 = vld [vmem:[#allocation26_spill] sm:$0xff] }
 0x645   :  { %7316 = vmatpush3.bf16.msra.mxu1 %v9815_v38  ;;  %7052 = vmatprep.mubr.f32.mxu1 %v9527_v15  ;;  %v3538_v15 = vmul.f32 %v9431_v42, %v9496_v7  ;;  %v3542_v42 = vmul.f32 %v9391_v55, %v9533_v37  ;;  %v3541_v5 = vmul.f32 %v10400_v12, %v9517_v13  ;;  %v10401_v37 = vld [vmem:[#allocation6_spill] sm:$0xff] }
 0x646   :  { %7318 = vmatprep.subr.bf16.mxu1 %v9852_v53  ;;  %v4762_v16 = vsel %vm3576_vm3, %v3537_v25, 0  ;;  %v4771_v55 = vsel %vm3576_vm3, %v3540_v59, 0  ;;  %v10409_v25 = vld [vmem:[#allocation20_spill] sm:$0xff] }
 0x647   :  { %v4765_v33 = vsel %vm3576_vm3, %v3538_v15, 0  ;;  %v9884_v7 = vand.u32 4294901760, %v4762_v16  ;;  %v4777_v61 = vsel %vm3576_vm3, %v3542_v42, 0  ;;  %v4774_v28 = vsel %vm3576_vm3, %v3541_v5, 0 }
 0x648   :  { %7053 = vmatmul.mubr.f32.gmra.mrb[18].mxu1 %v9524_v21  ;;  %v3539_v21 = vmul.f32 %v9428_v9, %v9488_v29  ;;  %v9892_v9 = vsub.f32 %v4759_v41, %v9874_v26  ;;  %v9918_v50 = vand.u32 4294901760, %v4771_v55  ;;  %v9921_v51 = vand.u32 4294901760, %v4777_v61  ;;  %v10410_v41 = vld [vmem:[#allocation10_spill] sm:$0xff] }
 0x649   :  { %7055 = vmatprep.mubr.f32.mxu1 %v9557_v27  ;;  %7320 = vmatpush3.bf16.msra.mxu1 %v9852_v53  ;;  %v9895_v27 = vand.u32 4294901760, %v4765_v33  ;;  %v9907_v17 = vsub.f32 %v4762_v16, %v9884_v7  ;;  %v3547_v15 = vmul.f32 %v10410_v41, %v10409_v25  ;;  %v4789_v16 = vsel %vm3576_vm3, %v3546_v10, 0 }
 0x64a   :  { %7322 = vmatprep.subr.bf16.mxu1 %v9858_v2  ;;  %v4768_v29 = vsel %vm3576_vm3, %v3539_v21, 0  ;;  %v4880_v52 = vand.u32 4294901760, %v9892_v9  ;;  %v9953_v32 = vsub.f32 %v4777_v61, %v9921_v51  ;;  %v9983_v61 = vsub.f32 %v4783_v48, %v9957_v1 }
 0x64b   :  { %v9910_v47 = vand.u32 4294901760, %v4768_v29  ;;  %v4890_v39 = vand.u32 4294901760, %v9907_v17  ;;  %v4792_v44 = vsel %vm3576_vm3, %v3547_v15, 0  ;;  %v9986_v11 = vand.u32 4294901760, %v4789_v16 }
 0x64c   :  { %7056 = vmatmul.mubr.f32.gmra.mrb[20].mxu1 %v9553_v56  ;;  %v9889_v56 = vsub.f32 %v3554_v19, %v4816_v43  ;;  %v4940_v18 = vand.u32 4294901760, %v9953_v32  ;;  %v10005_v15 = vand.u32 4294901760, %v4792_v44 }
 0x64d   :  { %7058 = vmatprep.mubr.f32.mxu1 %v9587_v63  ;;  %v9887_v63 = vsub.f32 %v4807_v40, %v4819_v23  ;;  %v9933_v19 = vsub.f32 %v4768_v29, %v9910_v47  ;;  %v9935_v40 = vand.u32 4294901760, %v4774_v28  ;;  %v9944_v23 = vsub.f32 %v4771_v55, %v9918_v50 }
 0x64e   :  { %v5055_v13 = vand.u32 4294901760, %v9889_v56  ;;  %v4891_v21 = vsub.f32 %v9907_v17, %v4890_v39 }
 0x64f   :  { %v5062_v4 = vand.u32 4294901760, %v9887_v63  ;;  %v4910_v59 = vand.u32 4294901760, %v9933_v19  ;;  %v4920_v5 = vand.u32 4294901760, %v9944_v23 }
 0x650   :  { %7059 = vmatmul.mubr.f32.gmra.mrb[22].mxu1 %v9583_v45 }
 0x651   :  { %7061 = vmatprep.mubr.f32.mxu1 %v9618_v14  ;;  %v10402_v14 = vld [vmem:[#allocation9_spill] sm:$0xff]  ;;  %v5063_v43 = vsub.f32 %v9887_v63, %v5062_v4  ;;  %v4921_v62 = vsub.f32 %v9944_v23, %v4920_v5 }
 0x652   :  { %v3543_v45 = vmul.f32 %v10402_v14, %v10401_v37  ;;  %v10412_v14 = vld [vmem:[#allocation14_spill] sm:$0xff] }
 0x654   :  { %7062 = vmatmul.mubr.f32.gmra.mrb[24].mxu1 %v9614_v34  ;;  %v9915_v34 = vsub.f32 %v4765_v33, %v9895_v27  ;;  %v4780_v35 = vsel %vm3576_vm3, %v3543_v45, 0  ;;  %v9967_v33 = vsub.f32 %v4774_v28, %v9935_v40  ;;  %v4892_v28 = vand.u32 4294901760, %v4891_v21 }
 0x655   :  { %7064 = vmatprep.mubr.f32.mxu1 %v9649_v22  ;;  %v3545_v22 = vmul.f32 %v10406_v20, %v10405_v57  ;;  %v9950_v6 = vand.u32 4294901760, %v4780_v35  ;;  %v4911_v57 = vsub.f32 %v9933_v19, %v4910_v59  ;;  %v4941_v21 = vsub.f32 %v9953_v32, %v4940_v18 }
 0x656   :  { %v4900_v54 = vand.u32 4294901760, %v9915_v34  ;;  %v4930_v20 = vand.u32 4294901760, %v9967_v33 }
 0x657   :  { %v4786_v46 = vsel %vm3576_vm3, %v3545_v22, 0  ;;  %v9975_v55 = vsub.f32 %v4780_v35, %v9950_v6  ;;  %v10413_v35 = vld [vmem:[#allocation17_spill] sm:$0xff] }
 0x658   :  { %7065 = vmatmul.mubr.f32.gmra.mrb[26].mxu1 %v9645_v58  ;;  %v5056_v58 = vsub.f32 %v9889_v56, %v5055_v13  ;;  %v4901_v12 = vsub.f32 %v9915_v34, %v4900_v54  ;;  %v9977_v37 = vand.u32 4294901760, %v4786_v46 }
 0x659   :  { %7067 = vmatprep.mubr.f32.mxu1 %v9679_v8  ;;  %v4881_v8 = vsub.f32 %v9892_v9, %v4880_v52  ;;  %v4950_v25 = vand.u32 4294901760, %v9975_v55 }
 0x65a   :  { %v5057_v42 = vand.u32 4294901760, %v5056_v58  ;;  %v4902_v48 = vand.u32 4294901760, %v4901_v12  ;;  %v10415_v58 = vld [vmem:[#allocation18_spill] sm:$0xff]  ;;  %v10003_v41 = vsub.f32 %v4786_v46, %v9977_v37  ;;  %v4931_v46 = vsub.f32 %v9967_v33, %v4930_v20 }
 0x65b   :  { %v4882_v29 = vand.u32 4294901760, %v4881_v8  ;;  %v7329_v12 = vpack.c.bf16 %v9829_v24, %v9827_v3  ;;  %v7349_v3 = vpack.c.bf16 %v5062_v4, %v5055_v13  ;;  %v10419_v24 = vand.u32 4294901760, %v9983_v61 }
 0x65c   :  { %7068 = vmatmul.mubr.f32.gmra.mrb[28].mxu1 %v9675_v0  ;;  %v5064_v0 = vand.u32 4294901760, %v5063_v43  ;;  %v10416_v43 = vld [vmem:[#allocation25_spill] sm:$0xff] }
 0x65d   :  { %7070 = vmatprep.mubr.f32.mxu1 %v9701_v49  ;;  %v10411_v49 = vld [vmem:[#allocation19_spill] sm:$0xff]  ;;  %v3550_v8 = vmul.f32 %v10416_v43, %v10415_v58  ;;  %v4932_v58 = vand.u32 4294901760, %v4931_v46  ;;  %v10279_v43 = vand.u32 4294901760, %v10003_v41 }
 0x65e   :  { %v3548_v45 = vmul.f32 %v10412_v14, %v10411_v49  ;;  %v7325_v22 = vpack.c.bf16 %v5064_v0, %v5057_v42  ;;  %v10280_v42 = vand.u32 4294901760, %v9983_v61  ;;  %v10013_v0 = vsub.f32 %v4789_v16, %v9986_v11  ;;  %v10417_v14 = vld [vmem:[#allocation8_spill] sm:$0xff] }
 0x65f   :  { %v4801_v16 = vsel %vm3576_vm3, %v3550_v8, 0 }
 0x660   :  { %7071 = vmatmul.mubr.f32.gmra.mrb[30].mxu1 %v9697_v31  ;;  %v10414_v31 = vld [vmem:[#allocation13_spill] sm:$0xff]  ;;  %v4795_v10 = vsel %vm3576_vm3, %v3548_v45, 0  ;;  %v10418_v45 = vld [vmem:[#allocation24_spill] sm:$0xff] }
 0x661   :  { %7081 = vmatprep.mubr.f32.mxu1 %v4882_v29  ;;  %v3549_v30 = vmul.f32 %v10414_v31, %v10413_v35  ;;  %v4912_v29 = vand.u32 4294901760, %v4911_v57  ;;  %v10021_v49 = vand.u32 4294901760, %v4795_v10  ;;  %v4922_v35 = vand.u32 4294901760, %v4921_v62 }
 0x662   :  { %v10027_v57 = vsub.f32 %v4792_v44, %v10005_v15  ;;  %v4942_v31 = vand.u32 4294901760, %v4941_v21  ;;  %v4961_v62 = vsub.f32 %v9983_v61, %v10280_v42  ;;  %v10042_v21 = vand.u32 4294901760, %v4801_v16 }
 0x663   :  { %v10039_v44 = vsub.f32 %v4795_v10, %v10021_v49 }
 0x664   :  { %7082 = vmatmul.mubr.f32.vlgmr.msra.gmra.mrb[16].mxu1 %v4892_v28  ;;  %v3551_v28 = vmul.f32 %v10418_v45, %v10417_v14  ;;  %v4971_v45 = vsub.f32 %v10003_v41, %v10279_v43  ;;  %v10282_v10 = vand.u32 4294901760, %v10027_v57 }
 0x665   :  { %7324 = vmatpush3.bf16.msra.mxu1 %v9858_v2  ;;  %7084 = vmatprep.mubr.f32.mxu1 %v4902_v48  ;;  %v4798_v2 = vsel %vm3576_vm3, %v3549_v30, 0  ;;  %v4951_v48 = vsub.f32 %v9975_v55, %v4950_v25 }
 0x666   :  { %7326 = vmatprep.subr.bf16.mxu1 %v7325_v22  ;;  %v10032_v30 = vand.u32 4294901760, %v4798_v2  ;;  %v4804_v8 = vsel %vm3576_vm3, %v3551_v28, 0  ;;  %v10055_v28 = vsub.f32 %v4801_v16, %v10042_v21  ;;  %v4991_v43 = vsub.f32 %v10027_v57, %v10282_v10 }
 0x667   :  { %v10048_v14 = vand.u32 4294901760, %v4804_v8 }
 0x668   :  { %7085 = vmatmul.mubr.f32.gmra.mrb[18].mxu1 %v4912_v29  ;;  %v10281_v29 = vand.u32 4294901760, %v10013_v0  ;;  %v10046_v46 = vsub.f32 %v4798_v2, %v10032_v30 }
 0x669   :  { %7087 = vmatprep.mubr.f32.mxu1 %v4922_v35  ;;  %7328 = vmatpush3.bf16.msra.mxu1 %v7325_v22  ;;  %v4952_v22 = vand.u32 4294901760, %v4951_v48  ;;  %v4962_v35 = vand.u32 4294901760, %v4961_v62  ;;  %v5000_v48 = vand.u32 4294901760, %v10039_v44  ;;  %v10062_v2 = vsub.f32 %v4804_v8, %v10048_v14 }
 0x66a   :  { %7330 = vmatprep.subr.bf16.mxu1 %v7329_v12  ;;  %v5010_v16 = vand.u32 4294901760, %v10046_v46 }
 0x66b   :  { %v5001_v62 = vsub.f32 %v10039_v44, %v5000_v48 }
 0x66c   :  { %7088 = vmatmul.mubr.f32.gmra.mrb[20].mxu1 %v4932_v58  ;;  %v4972_v58 = vand.u32 4294901760, %v4971_v45  ;;  %v5011_v8 = vsub.f32 %v10046_v46, %v5010_v16  ;;  %v5030_v45 = vand.u32 4294901760, %v10062_v2 }
 0x66d   :  { %7090 = vmatprep.mubr.f32.mxu1 %v4942_v31  ;;  %v4981_v31 = vsub.f32 %v10013_v0, %v10281_v29  ;;  %v5020_v29 = vand.u32 4294901760, %v10055_v28 }
 0x66e   :  { %v5012_v10 = vand.u32 4294901760, %v5011_v8 }
 0x66f   :  { %v4982_v42 = vand.u32 4294901760, %v4981_v31  ;;  %v5021_v31 = vsub.f32 %v10055_v28, %v5020_v29 }
 0x670   :  { %7091 = vmatmul.mubr.f32.gmra.mrb[22].mxu1 %v4952_v22  ;;  %v4992_v22 = vand.u32 4294901760, %v4991_v43 }
 0x671   :  { %7093 = vmatprep.mubr.f32.mxu1 %v4962_v35  ;;  %v5002_v35 = vand.u32 4294901760, %v5001_v62  ;;  %v7333_v62 = vpack.c.bf16 %v9887_v63, %v9889_v56  ;;  %v10422_v63 = vand.u32 4294901760, %v10027_v57 }
 0x674   :  { %7094 = vmatmul.mubr.f32.gmra.mrb[24].mxu1 %v4972_v58  ;;  %v5031_v58 = vsub.f32 %v10062_v2, %v5030_v45 }
 0x675   :  { %7096 = vmatprep.mubr.f32.mxu1 %v4982_v42  ;;  %v5022_v42 = vand.u32 4294901760, %v5021_v31 }
 0x676   :  { %v5032_v43 = vand.u32 4294901760, %v5031_v58 }
 0x678   :  { %7097 = vmatmul.mubr.f32.gmra.mrb[26].mxu1 %v4992_v22 }
 0x679   :  { %7099 = vmatprep.mubr.f32.mxu1 %v5002_v35 }
 0x67c   :  { %7100 = vmatmul.mubr.f32.gmra.mrb[28].mxu1 %v5012_v10 }
 0x67d   :  { %7102 = vmatprep.mubr.f32.mxu1 %v5022_v42 }
 0x680   :  { %7103 = vmatmul.mubr.f32.gmra.mrb[30].mxu1 %v5032_v43 }
 0x681   :  { %7113 = vmatprep.mubr.f32.mxu1 %v9874_v26 }
 0x684   :  { %7114 = vmatmul.mubr.f32.vlgmr.msra.gmra.mrb[16].mxu1 %v9884_v7 }
 0x685   :  { %7332 = vmatpush3.bf16.msra.mxu1 %v7329_v12  ;;  %7116 = vmatprep.mubr.f32.mxu1 %v9895_v27  ;;  %v7345_v12 = vpack.c.bf16 %v5048_v60, %v5041_v36  ;;  %v10420_v36 = vand.u32 4294901760, %v10003_v41  ;;  %v10421_v60 = vand.u32 4294901760, %v10013_v0 }
 0x686   :  { %7334 = vmatprep.subr.bf16.mxu1 %v7333_v62 }
 0x688   :  { %7117 = vmatmul.mubr.f32.gmra.mrb[18].mxu1 %v9910_v47 }
 0x689   :  { %7119 = vmatprep.mubr.f32.mxu1 %v9918_v50  ;;  %7336 = vmatpush3.bf16.msra.mxu1 %v7333_v62 }
 0x68a   :  { %7338 = vmatprep.subr.bf16.mxu1 %v9815_v38 }
 0x68c   :  { %7120 = vmatmul.mubr.f32.gmra.mrb[20].mxu1 %v9935_v40 }
 0x68d   :  { %7122 = vmatprep.mubr.f32.mxu1 %v9921_v51 }
 0x690   :  { %7123 = vmatmul.mubr.f32.gmra.mrb[22].mxu1 %v9950_v6 }
 0x691   :  { %7125 = vmatprep.mubr.f32.mxu1 %v9957_v1 }
 0x694   :  { %7126 = vmatmul.mubr.f32.gmra.mrb[24].mxu1 %v9977_v37 }
 0x695   :  { %7128 = vmatprep.mubr.f32.mxu1 %v9986_v11 }
 0x698   :  { %7129 = vmatmul.mubr.f32.gmra.mrb[26].mxu1 %v10005_v15 }
 0x699   :  { %7131 = vmatprep.mubr.f32.mxu1 %v10021_v49 }
 0x69c   :  { %7132 = vmatmul.mubr.f32.gmra.mrb[28].mxu1 %v10032_v30 }
 0x69d   :  { %7134 = vmatprep.mubr.f32.mxu1 %v10042_v21 }
 0x6a0   :  { %7135 = vmatmul.mubr.f32.gmra.mrb[30].mxu1 %v10048_v14 }
 0x6a1   :  { %7145 = vmatprep.mubr.f32.mxu1 %v9892_v9 }
 0x6a4   :  { %7146 = vmatmul.mubr.f32.vlgmr.msra.gmra.mrb[16].mxu1 %v9907_v17 }
 0x6a5   :  { %7340 = vmatpush3.bf16.msra.mxu1 %v9815_v38  ;;  %7148 = vmatprep.mubr.f32.mxu1 %v9915_v34 }
 0x6a6   :  { %7342 = vmatprep.subr.bf16.mxu1 %v9852_v53 }
 0x6a8   :  { %7149 = vmatmul.mubr.f32.gmra.mrb[18].mxu1 %v9933_v19 }
 0x6a9   :  { %7151 = vmatprep.mubr.f32.mxu1 %v9944_v23  ;;  %7344 = vmatpush3.bf16.msra.mxu1 %v9852_v53 }
 0x6aa   :  { %7346 = vmatprep.subr.bf16.mxu1 %v7345_v12 }
 0x6ac   :  { %7152 = vmatmul.mubr.f32.gmra.mrb[20].mxu1 %v9967_v33 }
 0x6ad   :  { %7154 = vmatprep.mubr.f32.mxu1 %v9953_v32 }
 0x6b0   :  { %7155 = vmatmul.mubr.f32.gmra.mrb[22].mxu1 %v9975_v55 }
 0x6b1   :  { %7157 = vmatprep.mubr.f32.mxu1 %v9983_v61 }
 0x6b4   :  { %7158 = vmatmul.mubr.f32.gmra.mrb[24].mxu1 %v10003_v41 }
 0x6b5   :  { %7160 = vmatprep.mubr.f32.mxu1 %v10013_v0 }
 0x6b8   :  { %7161 = vmatmul.mubr.f32.gmra.mrb[26].mxu1 %v10027_v57 }
 0x6b9   :  { %7163 = vmatprep.mubr.f32.mxu1 %v10039_v44 }
 0x6bc   :  { %7164 = vmatmul.mubr.f32.gmra.mrb[28].mxu1 %v10046_v46 }
 0x6bd   :  { %7166 = vmatprep.mubr.f32.mxu1 %v10055_v28 }
 0x6c0   :  { %7167 = vmatmul.mubr.f32.gmra.mrb[30].mxu1 %v10062_v2 }
 0x6c1   :  { %7177 = vmatprep.mubr.f32.mxu1 %v4880_v52 }
 0x6c4   :  { %7178 = vmatmul.mubr.f32.vlgmr.msra.gmra.mrb[16].mxu1 %v4890_v39 }
 0x6c5   :  { %7348 = vmatpush3.bf16.msra.mxu1 %v7345_v12  ;;  %7180 = vmatprep.mubr.f32.mxu1 %v4900_v54 }
 0x6c6   :  { %7350 = vmatprep.subr.bf16.mxu1 %v7349_v3 }
 0x6c8   :  { %7181 = vmatmul.mubr.f32.gmra.mrb[18].mxu1 %v4910_v59 }
 0x6c9   :  { %7183 = vmatprep.mubr.f32.mxu1 %v4920_v5  ;;  %7352 = vmatpush3.bf16.msra.mxu1 %v7349_v3 }
 0x6ca   :  { %7354 = vmatprep.subr.bf16.mxu1 %v9815_v38 }
 0x6cc   :  { %7184 = vmatmul.mubr.f32.gmra.mrb[20].mxu1 %v4930_v20 }
 0x6cd   :  { %7186 = vmatprep.mubr.f32.mxu1 %v4940_v18 }
 0x6d0   :  { %7187 = vmatmul.mubr.f32.gmra.mrb[22].mxu1 %v4950_v25 }
 0x6d1   :  { %7189 = vmatprep.mubr.f32.mxu1 %v10419_v24 }
 0x6d4   :  { %7190 = vmatmul.mubr.f32.gmra.mrb[24].mxu1 %v10420_v36 }
 0x6d5   :  { %7192 = vmatprep.mubr.f32.mxu1 %v10421_v60 }
 0x6d8   :  { %7193 = vmatmul.mubr.f32.gmra.mrb[26].mxu1 %v10422_v63 }
 0x6d9   :  { %7195 = vmatprep.mubr.f32.mxu1 %v5000_v48 }
 0x6dc   :  { %7196 = vmatmul.mubr.f32.gmra.mrb[28].mxu1 %v5010_v16 }
 0x6dd   :  { %7198 = vmatprep.mubr.f32.mxu1 %v5020_v29 }
 0x6e0   :  { %7199 = vmatmul.mubr.f32.gmra.mrb[30].mxu1 %v5030_v45 }
 0x6e1   :  { %7209 = vmatprep.mubr.f32.mxu1 %v9874_v26 }
 0x6e4   :  { %7210 = vmatmul.mubr.f32.vlgmr.msra.gmra.mrb[16].mxu1 %v9884_v7 }
 0x6e5   :  { %7356 = vmatpush3.bf16.msra.mxu1 %v9815_v38  ;;  %7212 = vmatprep.mubr.f32.mxu1 %v9895_v27 }
 0x6e6   :  { %7358 = vmatprep.subr.bf16.mxu1 %v9852_v53 }
 0x6e8   :  { %7213 = vmatmul.mubr.f32.gmra.mrb[18].mxu1 %v9910_v47 }
 0x6e9   :  { %7215 = vmatprep.mubr.f32.mxu1 %v9918_v50  ;;  %7360 = vmatpush3.bf16.msra.mxu1 %v9852_v53 }
 0x6ec   :  { %7216 = vmatmul.mubr.f32.gmra.mrb[20].mxu1 %v9935_v40 }
 0x6ed   :  { %7218 = vmatprep.mubr.f32.mxu1 %v9921_v51 }
 0x6f0   :  { %7219 = vmatmul.mubr.f32.gmra.mrb[22].mxu1 %v9950_v6 }
 0x6f1   :  { %7221 = vmatprep.mubr.f32.mxu1 %v9957_v1 }
 0x6f4   :  { %7222 = vmatmul.mubr.f32.gmra.mrb[24].mxu1 %v9977_v37 }
 0x6f5   :  { %7224 = vmatprep.mubr.f32.mxu1 %v9986_v11 }
 0x6f8   :  { %7225 = vmatmul.mubr.f32.gmra.mrb[26].mxu1 %v10005_v15 }
 0x6f9   :  { %7227 = vmatprep.mubr.f32.mxu1 %v10021_v49 }
 0x6fc   :  { %7228 = vmatmul.mubr.f32.gmra.mrb[28].mxu1 %v10032_v30 }
 0x6fd   :  { %7230 = vmatprep.mubr.f32.mxu1 %v10042_v21 }
 0x700   :  { %7231 = vmatmul.mubr.f32.gmra.mrb[30].mxu1 %v10048_v14 }
 0x701   :  { %7241 = vmatprep.mubr.f32.mxu1 %v9874_v26 }
 0x704   :  { %7242 = vmatmul.mubr.f32.vlgmr.msra.gmra.mrb[16].mxu1 %v9884_v7 }
 0x705   :  { %7244 = vmatprep.mubr.f32.mxu1 %v9895_v27 }
 0x708   :  { %7245 = vmatmul.mubr.f32.gmra.mrb[18].mxu1 %v9910_v47 }
 0x709   :  { %7247 = vmatprep.mubr.f32.mxu1 %v9918_v50 }
 0x70c   :  { %7248 = vmatmul.mubr.f32.gmra.mrb[20].mxu1 %v9935_v40 }
 0x70d   :  { %7250 = vmatprep.mubr.f32.mxu1 %v9921_v51 }
 0x710   :  { %7251 = vmatmul.mubr.f32.gmra.mrb[22].mxu1 %v9950_v6 }
 0x711   :  { %7253 = vmatprep.mubr.f32.mxu1 %v9957_v1 }
 0x714   :  { %7254 = vmatmul.mubr.f32.gmra.mrb[24].mxu1 %v9977_v37 }
 0x715   :  { %7256 = vmatprep.mubr.f32.mxu1 %v9986_v11 }
 0x718   :  { %7257 = vmatmul.mubr.f32.gmra.mrb[26].mxu1 %v10005_v15 }
 0x719   :  { %7259 = vmatprep.mubr.f32.mxu1 %v10021_v49 }
 0x71c   :  { %7260 = vmatmul.mubr.f32.gmra.mrb[28].mxu1 %v10032_v30 }
 0x71d   :  { %7262 = vmatprep.mubr.f32.mxu1 %v10042_v21 }
 0x720   :  { %7263 = vmatmul.mubr.f32.gmra.mrb[30].mxu1 %v10048_v14 }
 0x7d7   :  { %v7243_v38 = vpop.f32.mrb[16].mxu1 }
 0x7d8   :  { %5940 = vst [vmem:[#allocation2 + $0x8] sm:$0xff] %v7243_v38  ;;  %v5845_v53 = vpop.f32.mrb[17].mxu1 }
 0x7d9   :  { %5939 = vst [vmem:[#allocation2] sm:$0xff] %v5845_v53 }
 0x7db   :  { %v7246_v26 = vpop.f32.mrb[18].mxu1 }
 0x7dc   :  { %5942 = vst [vmem:[#allocation2 + $0x18] sm:$0xff] %v7246_v26  ;;  %v5857_v7 = vpop.f32.mrb[19].mxu1 }
 0x7dd   :  { %5941 = vst [vmem:[#allocation2 + $0x10] sm:$0xff] %v5857_v7 }
 0x7df   :  { %v7249_v56 = vpop.f32.mrb[20].mxu1 }
 0x7e0   :  { %5944 = vst [vmem:[#allocation2 + $0x28] sm:$0xff] %v7249_v56  ;;  %v5869_v9 = vpop.f32.mrb[21].mxu1 }
 0x7e1   :  { %5943 = vst [vmem:[#allocation2 + $0x20] sm:$0xff] %v5869_v9 }
 0x7e3   :  { %v7252_v27 = vpop.f32.mrb[22].mxu1 }
 0x7e4   :  { %5946 = vst [vmem:[#allocation2 + $0x38] sm:$0xff] %v7252_v27  ;;  %v5881_v17 = vpop.f32.mrb[23].mxu1 }
 0x7e5   :  { %5945 = vst [vmem:[#allocation2 + $0x30] sm:$0xff] %v5881_v17 }
 0x7e7   :  { %v7255_v47 = vpop.f32.mrb[24].mxu1 }
 0x7e8   :  { %5948 = vst [vmem:[#allocation2 + $0x48] sm:$0xff] %v7255_v47  ;;  %v5893_v13 = vpop.f32.mrb[25].mxu1 }
 0x7e9   :  { %5947 = vst [vmem:[#allocation2 + $0x40] sm:$0xff] %v5893_v13 }
 0x7eb   :  { %v7258_v4 = vpop.f32.mrb[26].mxu1 }
 0x7ec   :  { %5950 = vst [vmem:[#allocation2 + $0x58] sm:$0xff] %v7258_v4  ;;  %v5905_v34 = vpop.f32.mrb[27].mxu1 }
 0x7ed   :  { %5949 = vst [vmem:[#allocation2 + $0x50] sm:$0xff] %v5905_v34 }
 0x7ef   :  { %v7261_v50 = vpop.f32.mrb[28].mxu1 }
 0x7f0   :  { %5952 = vst [vmem:[#allocation2 + $0x68] sm:$0xff] %v7261_v50  ;;  %v5917_v52 = vpop.f32.mrb[29].mxu1 }
 0x7f1   :  { %5951 = vst [vmem:[#allocation2 + $0x60] sm:$0xff] %v5917_v52 }
 0x7f3   :  { %v7264_v51 = vpop.f32.mrb[30].mxu1 }
 0x7f4   :  { %5954 = vst [vmem:[#allocation2 + $0x78] sm:$0xff] %v7264_v51  ;;  %v5929_v39 = vpop.f32.mrb[31].mxu1 }
 0x7f5   :  { %5953 = vst [vmem:[#allocation2 + $0x70] sm:$0xff] %v5929_v39 }
 0x7f6   :  { %7910 = shalt.err (!%p7907_p4)
}
 0x7f7   :  { %s7911_s30 = scalar_lea.hbm %s10219_s11, 2048 }
 0x7f8   :  { %p7912_p5 = scmp.ne.s32.totalorder %s10219_s11, %s7911_s30  ;;  %p7915_p6 = scmp.lt.u32.totalorder %s7911_s30, %s10219_s11 }
 0x7fa   :  { %p7917_p7 = pnand %p7915_p6, %p7912_p5 }
 0x7fc   :  { %7920 = shalt.err (!%p7917_p7)
}
 0x7fd   :  { %s7924_s15 = smov 128   ;;  %s7925_s16 = smov 8  }
 0x7fe   :  { %5966 = dma.vmem_to_hbm [thread:$0]  %s5961_s5, 2048, %s10219_s11, [#allocation3], %s7924_s15, %s7924_s15, %s7925_s16  }
 0x7ff   :  { %7921 = dma.done.wait [#allocation3], 2048  }
 0x800   :  { %7922 = vsyncadd [#allocation3], 4294965248 }
 0x801   :  { %5970 = vsyncpa [#allocation3], 1 }

</bundles_post_ra>
